<compile_context>
chip_gen: v6e
topology: v6e:2x2x1
jax: 0.10.0
libtpu: 0.0.40
codegen_flags: <defaults>
</compile_context>

<pallas_src>
import functools

import jax
import jax.numpy as jnp
import numpy as np
from jax.experimental import pallas as pl
from jax.experimental.pallas import tpu as pltpu

_BN_EPS = 1e-5
# (Cin, Cout, stride) for the 5 conv blocks of CNN_cifar10
_LAYERS = [(3, 8, 1), (8, 16, 2), (16, 32, 1), (32, 64, 2), (64, 128, 1)]

# Padded-activation scratch layout: (NB, H+4, W+10, Cin).  The unpadded
# interior is stored at rows [2, 2+H) and cols [_PAD_L, _PAD_L+W) so the big
# interior store starts on a sublane boundary.  Padded-image column p lives at
# scratch column p + _COL0; scratch cols [0, _COL0) are never read/written.
_PAD_L = 8
_COL0 = _PAD_L - 2   # = 6


# ---------------------------------------------------------------------------
# In-kernel building blocks
# ---------------------------------------------------------------------------
def _write_padded_input(pad_ref, y):
    """Zero ONLY the 2-wide halo the conv reads, then store the interior."""
    NB, H, W, Cin = y.shape
    Wp = W + 10
    zrow = jnp.zeros((NB, 2, Wp, Cin), jnp.float32)
    zcol = jnp.zeros((NB, H, 2, Cin), jnp.float32)
    pad_ref[:, 0:2, :, :] = zrow                                  # top halo rows
    pad_ref[:, H + 2:H + 4, :, :] = zrow                          # bottom halo rows
    pad_ref[:, 2:2 + H, _COL0:_COL0 + 2, :] = zcol                # left halo cols
    pad_ref[:, 2:2 + H, _PAD_L + W:_PAD_L + W + 2, :] = zcol      # right halo cols
    pad_ref[:, 2:2 + H, _PAD_L:_PAD_L + W, :] = y                 # interior


def _conv_block(pad_ref, y, w_ref, b_ref, stride, fat_k):
    """Conv2d(5x5, pad=2, `stride`) + folded-BN bias + ReLU, fully in VMEM.

    y:        (NB, H, W, Cin) layer input value.
    pad_ref:  (NB, H+4, W+10, Cin) VMEM padding scratch.
    w_ref:    (25*Cin, Cout) im2col weight with BN scale folded in,
              rows ordered (ky, kx, cin).
    b_ref:    (1, Cout) folded bias (conv bias + BN shift).
    returns:  (NB, H//stride, W//stride, Cout) f32.
    """
    NB, H, W, Cin = y.shape
    Cout = w_ref.shape[-1]
    Ho, Wo = H // stride, W // stride
    M = NB * Ho * Wo

    _write_padded_input(pad_ref, y)

    # ---- gather the 25 taps, each (NB, Ho, Wo, Cin) --------------------------
    taps = [[None] * 5 for _ in range(5)]
    if stride == 1:
        # Per-ky contiguous row slab; the 5 kx taps are offset slices of it.
        for ky in range(5):
            slab = pad_ref[:, ky:ky + H, _COL0:_COL0 + W + 4, :]   # (NB,H,W+4,Cin)
            for kx in range(5):
                taps[ky][kx] = slab[:, :, kx:kx + W, :]
    else:
        # One-time row/column parity split (2 strided sublane reads + cheap
        # leading-dim regroups); every tap is then a contiguous slice.
        planes = [[None, None], [None, None]]                      # [row_par][col_par]
        for cp in (0, 1):
            cols = pad_ref[:, :, pl.ds(_COL0 + cp, Wo + 2, 2), :]  # (NB,H+4,Wo+2,Cin)
            for rp in (0, 1):
                nrows = Ho + 2 - rp
                v = cols[:, rp:rp + 2 * nrows, :, :]
                v = v.reshape(NB, nrows, 2, Wo + 2, Cin)[:, :, 0]  # rows rp, rp+2, ...
                planes[rp][cp] = v
        for ky in range(5):
            for kx in range(5):
                p = planes[ky % 2][kx % 2]
                taps[ky][kx] = p[:, ky // 2:ky // 2 + Ho, kx // 2:kx // 2 + Wo, :]

    # ---- MXU matmul(s) + bias + ReLU -----------------------------------------
    if fat_k:
        # Single fat-K matmul (layer 5: Cin=64 -> K=1600).
        patches = jnp.concatenate(
            [taps[ky][kx] for ky in range(5) for kx in range(5)],
            axis=-1).reshape(M, 25 * Cin)
        acc = jnp.dot(patches, w_ref[...], preferred_element_type=jnp.float32)
    else:
        # 5 matmuls of K=5*Cin accumulated in f32 (no 25-way lane concat).
        kblk = 5 * Cin
        acc = jnp.zeros((M, Cout), jnp.float32)
        for ky in range(5):
            blk = jnp.concatenate(taps[ky], axis=-1).reshape(M, kblk)
            acc = acc + jnp.dot(blk, w_ref[ky * kblk:(ky + 1) * kblk, :],
                                preferred_element_type=jnp.float32)

    z = jnp.maximum(acc + b_ref[...], 0.0)                         # bias + ReLU
    return z.reshape(NB, Ho, Wo, Cout)


def _fused_kernel(p_ref,
                  w1, b1, w2, b2, w3, b3, w4, b4, w5, b5,
                  lw_ref, lb_ref,
                  logits_ref, feat_ref,
                  pad2, pad3, pad4, pad5,
                  *, H1, W1):
    # p_ref: (NB, H1*W1, 75) pre-gathered layer-1 im2col patches.
    NB, HW, K1 = p_ref.shape

    # Layer 1 (stride 1, Cin=3): starts directly at the MXU matmul.
    pat = p_ref[...].reshape(NB * HW, K1)
    y = jnp.maximum(jnp.dot(pat, w1[...], preferred_element_type=jnp.float32)
                    + b1[...], 0.0)
    y = y.reshape(NB, H1, W1, w1.shape[-1])
    # TODO(synk): nn.Dropout2d(p=0.1) after each block is identity here
    # (eval-mode forward); training-mode channel dropout is not implemented.

    y = _conv_block(pad2, y, w2, b2, stride=2, fat_k=False)   # 16x16x8  -> 8x8x16
    y = _conv_block(pad3, y, w3, b3, stride=1, fat_k=False)   # 8x8x16   -> 8x8x32
    y = _conv_block(pad4, y, w4, b4, stride=2, fat_k=False)   # 8x8x32   -> 4x4x64
    y = _conv_block(pad5, y, w5, b5, stride=1, fat_k=True)    # 4x4x64   -> 4x4x128

    # Fused head: global average pool + Linear(128 -> 10).  The Linear weight
    # is zero-padded to 128 output lanes so the logits store is unmasked.
    NBy, Hf, Wf, C = y.shape
    feat = jnp.mean(y.reshape(NBy, Hf * Wf, C), axis=1)        # (NB, 128)
    feat_ref[0] = feat
    logits_ref[0] = (jnp.dot(feat, lw_ref[...], preferred_element_type=jnp.float32)
                     + lb_ref[...])


# ---------------------------------------------------------------------------
# Wrapper: one pallas_call for the whole network
# ---------------------------------------------------------------------------
def _pick_nb(batch):
    for nb in (8, 4, 2, 1):
        if batch % nb == 0:
            return nb
    return 1


@jax.jit
def cnn_cifar10_forward(x_nchw, conv_params, linear_params):
    x = jnp.transpose(x_nchw, (0, 2, 3, 1))                    # NCHW -> NHWC
    B, H, W, Cin0 = x.shape
    NB = _pick_nb(B)                                           # images per grid step
    G = B // NB

    # Layer-1 im2col in XLA (Cin=3 would waste ~42x of every in-kernel vreg):
    # (B, H*W, 25*Cin0), inner order (ky, kx, cin) to match the weight layout.
    xp = jnp.pad(x, ((0, 0), (2, 2), (2, 2), (0, 0)))
    patches = jnp.concatenate(
        [xp[:, ky:ky + H, kx:kx + W, :] for ky in range(5) for kx in range(5)],
        axis=-1).reshape(B, H * W, 25 * Cin0)

    args = [patches]
    in_specs = [pl.BlockSpec((NB, H * W, 25 * Cin0), lambda g: (g, 0, 0))]
    for p, (cin, cout, _stride) in zip(conv_params, _LAYERS):
        # OIHW -> HWIO -> (25*Cin, Cout) im2col matrix (rows (ky,kx,ci));
        # fold BN scale into the weights, BN shift + conv bias into one bias.
        scale = p["gamma"] / jnp.sqrt(p["rvar"] + _BN_EPS)
        w = (jnp.transpose(p["w"], (2, 3, 1, 0)).reshape(25 * cin, cout)
             * scale[None, :])
        bias = p["beta"] + (p["cb"] - p["rmean"]) * scale
        args += [w, bias.reshape(1, cout)]
        in_specs += [pl.BlockSpec((25 * cin, cout), lambda g: (0, 0)),
                     pl.BlockSpec((1, cout), lambda g: (0, 0))]

    # Linear head, output lanes zero-padded 10 -> 128 for a lane-dense store.
    lw, lb = linear_params                                     # torch Linear: (10,128),(10,)
    nout, nfeat = lw.shape
    npad = 128
    lw_pad = jnp.zeros((nfeat, npad), jnp.float32).at[:, :nout].set(jnp.transpose(lw))
    lb_pad = jnp.zeros((1, npad), jnp.float32).at[0, :nout].set(lb)
    args += [lw_pad, lb_pad]
    in_specs += [pl.BlockSpec((nfeat, npad), lambda g: (0, 0)),
                 pl.BlockSpec((1, npad), lambda g: (0, 0))]

    # One padded-input VMEM scratch per in-kernel conv layer (layers 2..5);
    # spatial pyramid 16 -> 16 -> 8 -> 8 -> 4.
    scratch = []
    h, w_sp = H, W
    for idx, (cin, _cout, stride) in enumerate(_LAYERS):
        if idx > 0:
            scratch.append(pltpu.VMEM((NB, h + 4, w_sp + 10, cin), jnp.float32))
        h, w_sp = h // stride, w_sp // stride

    # Advisory cost estimate (lets XLA schedule the surrounding prep ops).
    macs = 0
    h, w_sp = H, W
    for (cin, cout, stride) in _LAYERS:
        h, w_sp = h // stride, w_sp // stride
        macs += h * w_sp * 25 * cin * cout
    macs += nfeat * nout
    param_elems = sum(int(np.prod(a.shape)) for a in args[1:])
    cost = pl.CostEstimate(
        flops=2 * B * macs,
        transcendentals=0,
        bytes_accessed=4 * (param_elems + B * (H * W * 25 * Cin0 + 2 * npad)))

    kernel = functools.partial(_fused_kernel, H1=H, W1=W)
    logits3, feat3 = pl.pallas_call(
        kernel,
        grid=(G,),
        in_specs=in_specs,
        out_specs=[pl.BlockSpec((1, NB, npad), lambda g: (g, 0, 0)),
                   pl.BlockSpec((1, NB, nfeat), lambda g: (g, 0, 0))],
        out_shape=(jax.ShapeDtypeStruct((G, NB, npad), jnp.float32),
                   jax.ShapeDtypeStruct((G, NB, nfeat), jnp.float32)),
        scratch_shapes=scratch,
        compiler_params=pltpu.CompilerParams(
            dimension_semantics=("parallel",)),
        cost_estimate=cost,
    )(*args)

    logits = logits3.reshape(B, npad)[:, :nout]
    feat = feat3.reshape(B, nfeat)
    return logits, feat


# ---------------------------------------------------------------------------
# Params + pure-JAX reference
# ---------------------------------------------------------------------------
def init_params(key):
    conv_params = []
    for (cin, cout, _stride) in _LAYERS:
        key, k1, k2, k3, k4, k5, k6 = jax.random.split(key, 7)
        conv_params.append(dict(
            w=0.1 * jax.random.normal(k1, (cout, cin, 5, 5), jnp.float32),   # OIHW
            cb=0.1 * jax.random.normal(k2, (cout,), jnp.float32),
            gamma=1.0 + 0.1 * jax.random.normal(k3, (cout,), jnp.float32),
            beta=0.1 * jax.random.normal(k4, (cout,), jnp.float32),
            rmean=0.1 * jax.random.normal(k5, (cout,), jnp.float32),
            rvar=0.5 + 0.5 * jnp.abs(jax.random.normal(k6, (cout,), jnp.float32)),
        ))
    key, k1, k2 = jax.random.split(key, 3)
    lw = 0.1 * jax.random.normal(k1, (10, 128), jnp.float32)   # torch Linear (out, in)
    lb = 0.1 * jax.random.normal(k2, (10,), jnp.float32)
    return conv_params, (lw, lb)


def _reference_forward(x_nchw, conv_params, linear_params):
    x = jnp.transpose(x_nchw, (0, 2, 3, 1))
    for p, (_cin, _cout, stride) in zip(conv_params, _LAYERS):
        w_hwio = jnp.transpose(p["w"], (2, 3, 1, 0))
        y = jax.lax.conv_general_dilated(
            x, w_hwio, window_strides=(stride, stride),
            padding=((2, 2), (2, 2)),
            dimension_numbers=("NHWC", "HWIO", "NHWC"))
        y = y + p["cb"]
        scale = p["gamma"] / jnp.sqrt(p["rvar"] + _BN_EPS)
        y = (y - p["rmean"]) * scale + p["beta"]
        x = jnp.maximum(y, 0.0)
    feat = jnp.mean(x.reshape(x.shape[0], -1, x.shape[-1]), axis=1)
    lw, lb = linear_params
    logits = feat @ lw.T + lb
    return logits, feat


if __name__ == "__main__":
    key = jax.random.PRNGKey(0)
    kp, kx = jax.random.split(key)
    conv_params, linear_params = init_params(kp)

    # small input consistent with the module: batch=2, 3 channels, 16x16 spatial
    x = jax.random.normal(kx, (2, 3, 16, 16), jnp.float32)

    logits, feat = cnn_cifar10_forward(x, conv_params, linear_params)
    logits, feat = jax.block_until_ready((logits, feat))

    ref_logits, ref_feat = _reference_forward(x, conv_params, linear_params)
    np.testing.assert_allclose(np.asarray(feat), np.asarray(ref_feat),
                               rtol=1e-3, atol=1e-3)
    np.testing.assert_allclose(np.asarray(logits), np.asarray(ref_logits),
                               rtol=1e-3, atol=1e-3)

    assert logits.shape == (2, 10) and feat.shape == (2, 128)
    print("KERNEL_OK")
</pallas_src>

<mosaic_0001>
module attributes {stable_mosaic.version = 11 : i64} {
  func.func @_fused_kernel(%arg0: i32, %arg1: memref<2x256x75xf32, #tpu.memory_space<vmem>>, %arg2: memref<75x8xf32, #tpu.memory_space<vmem>>, %arg3: memref<1x8xf32, #tpu.memory_space<vmem>>, %arg4: memref<200x16xf32, #tpu.memory_space<vmem>>, %arg5: memref<1x16xf32, #tpu.memory_space<vmem>>, %arg6: memref<400x32xf32, #tpu.memory_space<vmem>>, %arg7: memref<1x32xf32, #tpu.memory_space<vmem>>, %arg8: memref<800x64xf32, #tpu.memory_space<vmem>>, %arg9: memref<1x64xf32, #tpu.memory_space<vmem>>, %arg10: memref<1600x128xf32, #tpu.memory_space<vmem>>, %arg11: memref<1x128xf32, #tpu.memory_space<vmem>>, %arg12: memref<128x128xf32, #tpu.memory_space<vmem>>, %arg13: memref<1x128xf32, #tpu.memory_space<vmem>>, %arg14: memref<1x2x128xf32, #tpu.memory_space<vmem>>, %arg15: memref<1x2x128xf32, #tpu.memory_space<vmem>>, %arg16: memref<2x20x26x8xf32, #tpu.memory_space<vmem>>, %arg17: memref<2x12x18x16xf32, #tpu.memory_space<vmem>>, %arg18: memref<2x12x18x32xf32, #tpu.memory_space<vmem>>, %arg19: memref<2x8x14x64xf32, #tpu.memory_space<vmem>>) attributes {dimension_semantics = [#tpu.dimension_semantics<parallel>], iteration_bounds = array<i64: 1>, scalar_prefetch = 0 : i64, scratch_operands = 4 : i64, tpu.core_type = #tpu.core_type<tc>, window_params = [{transform_indices = @transform_0, window_bounds = array<i64: 2, 256, 75>}, {pipeline_mode = #tpu.pipeline_mode<synchronous>, transform_indices = @transform_1, window_bounds = array<i64: 75, 8>}, {pipeline_mode = #tpu.pipeline_mode<synchronous>, transform_indices = @transform_2, window_bounds = array<i64: 1, 8>}, {pipeline_mode = #tpu.pipeline_mode<synchronous>, transform_indices = @transform_3, window_bounds = array<i64: 200, 16>}, {pipeline_mode = #tpu.pipeline_mode<synchronous>, transform_indices = @transform_4, window_bounds = array<i64: 1, 16>}, {pipeline_mode = #tpu.pipeline_mode<synchronous>, transform_indices = @transform_5, window_bounds = array<i64: 400, 32>}, {pipeline_mode = #tpu.pipeline_mode<synchronous>, transform_indices = @transform_6, window_bounds = array<i64: 1, 32>}, {pipeline_mode = #tpu.pipeline_mode<synchronous>, transform_indices = @transform_7, window_bounds = array<i64: 800, 64>}, {pipeline_mode = #tpu.pipeline_mode<synchronous>, transform_indices = @transform_8, window_bounds = array<i64: 1, 64>}, {pipeline_mode = #tpu.pipeline_mode<synchronous>, transform_indices = @transform_9, window_bounds = array<i64: 1600, 128>}, {pipeline_mode = #tpu.pipeline_mode<synchronous>, transform_indices = @transform_10, window_bounds = array<i64: 1, 128>}, {pipeline_mode = #tpu.pipeline_mode<synchronous>, transform_indices = @transform_11, window_bounds = array<i64: 128, 128>}, {pipeline_mode = #tpu.pipeline_mode<synchronous>, transform_indices = @transform_12, window_bounds = array<i64: 1, 128>}, {transform_indices = @transform_13, window_bounds = array<i64: 1, 2, 128>}, {transform_indices = @transform_14, window_bounds = array<i64: 1, 2, 128>}]} {
    %c0 = arith.constant 0 : index
    %c0_0 = arith.constant 0 : index
    %c0_1 = arith.constant 0 : index
    %0 = vector.load %arg1[%c0, %c0_0, %c0_1] : memref<2x256x75xf32, #tpu.memory_space<vmem>>, vector<2x256x75xf32>
    %1 = vector.shape_cast %0 : vector<2x256x75xf32> to vector<512x75xf32>
    %c0_2 = arith.constant 0 : index
    %c0_3 = arith.constant 0 : index
    %2 = vector.load %arg2[%c0_2, %c0_3] : memref<75x8xf32, #tpu.memory_space<vmem>>, vector<75x8xf32>
    %cst = arith.constant dense<0.000000e+00> : vector<512x8xf32>
    %3 = tpu.matmul %1, %2, %cst {dimension_numbers = #tpu.dot_dimension_numbers<[1], [0], [0], [1], [0, 0, 1, 1], [], []>} : vector<512x75xf32>, vector<75x8xf32>, vector<512x8xf32> -> vector<512x8xf32>
    %c0_4 = arith.constant 0 : index
    %c0_5 = arith.constant 0 : index
    %4 = vector.load %arg3[%c0_4, %c0_5] : memref<1x8xf32, #tpu.memory_space<vmem>>, vector<1x8xf32>
    %5 = vector.broadcast %4 : vector<1x8xf32> to vector<512x8xf32>
    %6 = arith.addf %3, %5 : vector<512x8xf32>
    %cst_6 = arith.constant 0.000000e+00 : f32
    %7 = vector.broadcast %cst_6 : f32 to vector<512x8xf32>
    %8 = arith.maximumf %6, %7 : vector<512x8xf32>
    %9 = vector.shape_cast %8 : vector<512x8xf32> to vector<2x16x16x8xf32>
    %cst_7 = arith.constant 0.000000e+00 : f32
    %10 = vector.broadcast %cst_7 : f32 to vector<2x2x26x8xf32>
    %cst_8 = arith.constant 0.000000e+00 : f32
    %11 = vector.broadcast %cst_8 : f32 to vector<2x16x2x8xf32>
    %c0_9 = arith.constant 0 : index
    %c0_10 = arith.constant 0 : index
    %c0_11 = arith.constant 0 : index
    %c0_12 = arith.constant 0 : index
    %12 = vector.load %arg16[%c0_9, %c0_10, %c0_11, %c0_12] : memref<2x20x26x8xf32, #tpu.memory_space<vmem>>, vector<2x2x26x8xf32>
    tpu.vector_store %arg16[%c0_9, %c0_10, %c0_11, %c0_12], %10 {strides = array<i32>} : memref<2x20x26x8xf32, #tpu.memory_space<vmem>>, vector<2x2x26x8xf32>,
    %c0_13 = arith.constant 0 : index
    %c18 = arith.constant 18 : index
    %c0_14 = arith.constant 0 : index
    %c0_15 = arith.constant 0 : index
    %13 = vector.load %arg16[%c0_13, %c18, %c0_14, %c0_15] : memref<2x20x26x8xf32, #tpu.memory_space<vmem>>, vector<2x2x26x8xf32>
    tpu.vector_store %arg16[%c0_13, %c18, %c0_14, %c0_15], %10 {strides = array<i32>} : memref<2x20x26x8xf32, #tpu.memory_space<vmem>>, vector<2x2x26x8xf32>,
    %c0_16 = arith.constant 0 : index
    %c2 = arith.constant 2 : index
    %c6 = arith.constant 6 : index
    %c0_17 = arith.constant 0 : index
    %14 = vector.load %arg16[%c0_16, %c2, %c6, %c0_17] : memref<2x20x26x8xf32, #tpu.memory_space<vmem>>, vector<2x16x2x8xf32>
    tpu.vector_store %arg16[%c0_16, %c2, %c6, %c0_17], %11 {strides = array<i32>} : memref<2x20x26x8xf32, #tpu.memory_space<vmem>>, vector<2x16x2x8xf32>,
    %c0_18 = arith.constant 0 : index
    %c2_19 = arith.constant 2 : index
    %c24 = arith.constant 24 : index
    %c0_20 = arith.constant 0 : index
    %15 = vector.load %arg16[%c0_18, %c2_19, %c24, %c0_20] : memref<2x20x26x8xf32, #tpu.memory_space<vmem>>, vector<2x16x2x8xf32>
    tpu.vector_store %arg16[%c0_18, %c2_19, %c24, %c0_20], %11 {strides = array<i32>} : memref<2x20x26x8xf32, #tpu.memory_space<vmem>>, vector<2x16x2x8xf32>,
    %c0_21 = arith.constant 0 : index
    %c2_22 = arith.constant 2 : index
    %c8 = arith.constant 8 : index
    %c0_23 = arith.constant 0 : index
    %16 = vector.load %arg16[%c0_21, %c2_22, %c8, %c0_23] : memref<2x20x26x8xf32, #tpu.memory_space<vmem>>, vector<2x16x16x8xf32>
    tpu.vector_store %arg16[%c0_21, %c2_22, %c8, %c0_23], %9 {strides = array<i32>} : memref<2x20x26x8xf32, #tpu.memory_space<vmem>>, vector<2x16x16x8xf32>,
    %c0_24 = arith.constant 0 : index
    %c0_25 = arith.constant 0 : index
    %c6_26 = arith.constant 6 : index
    %c0_27 = arith.constant 0 : index
    %17 = tpu.strided_load %arg16[%c0_24, %c0_25, %c6_26, %c0_27] {strides = array<i32: 1, 1, 2, 1>} : memref<2x20x26x8xf32, #tpu.memory_space<vmem>>, vector<2x20x10x8xf32>
    %18 = vector.shape_cast %17 : vector<2x20x10x8xf32> to vector<2x10x2x10x8xf32>
    %19 = vector.extract_strided_slice %18 {offsets = [0, 0, 0, 0, 0], sizes = [2, 10, 1, 10, 8], strides = [1, 1, 1, 1, 1]} : vector<2x10x2x10x8xf32> to vector<2x10x1x10x8xf32>
    %20 = vector.shape_cast %19 : vector<2x10x1x10x8xf32> to vector<2x10x10x8xf32>
    %21 = vector.extract_strided_slice %17 {offsets = [0, 1, 0, 0], sizes = [2, 18, 10, 8], strides = [1, 1, 1, 1]} : vector<2x20x10x8xf32> to vector<2x18x10x8xf32>
    %22 = vector.shape_cast %21 : vector<2x18x10x8xf32> to vector<2x9x2x10x8xf32>
    %23 = vector.extract_strided_slice %22 {offsets = [0, 0, 0, 0, 0], sizes = [2, 9, 1, 10, 8], strides = [1, 1, 1, 1, 1]} : vector<2x9x2x10x8xf32> to vector<2x9x1x10x8xf32>
    %24 = vector.shape_cast %23 : vector<2x9x1x10x8xf32> to vector<2x9x10x8xf32>
    %c0_28 = arith.constant 0 : index
    %c0_29 = arith.constant 0 : index
    %c7 = arith.constant 7 : index
    %c0_30 = arith.constant 0 : index
    %25 = tpu.strided_load %arg16[%c0_28, %c0_29, %c7, %c0_30] {strides = array<i32: 1, 1, 2, 1>} : memref<2x20x26x8xf32, #tpu.memory_space<vmem>>, vector<2x20x10x8xf32>
    %26 = vector.shape_cast %25 : vector<2x20x10x8xf32> to vector<2x10x2x10x8xf32>
    %27 = vector.extract_strided_slice %26 {offsets = [0, 0, 0, 0, 0], sizes = [2, 10, 1, 10, 8], strides = [1, 1, 1, 1, 1]} : vector<2x10x2x10x8xf32> to vector<2x10x1x10x8xf32>
    %28 = vector.shape_cast %27 : vector<2x10x1x10x8xf32> to vector<2x10x10x8xf32>
    %29 = vector.extract_strided_slice %25 {offsets = [0, 1, 0, 0], sizes = [2, 18, 10, 8], strides = [1, 1, 1, 1]} : vector<2x20x10x8xf32> to vector<2x18x10x8xf32>
    %30 = vector.shape_cast %29 : vector<2x18x10x8xf32> to vector<2x9x2x10x8xf32>
    %31 = vector.extract_strided_slice %30 {offsets = [0, 0, 0, 0, 0], sizes = [2, 9, 1, 10, 8], strides = [1, 1, 1, 1, 1]} : vector<2x9x2x10x8xf32> to vector<2x9x1x10x8xf32>
    %32 = vector.shape_cast %31 : vector<2x9x1x10x8xf32> to vector<2x9x10x8xf32>
    %33 = vector.extract_strided_slice %20 {offsets = [0, 0, 0, 0], sizes = [2, 8, 8, 8], strides = [1, 1, 1, 1]} : vector<2x10x10x8xf32> to vector<2x8x8x8xf32>
    %34 = vector.extract_strided_slice %28 {offsets = [0, 0, 0, 0], sizes = [2, 8, 8, 8], strides = [1, 1, 1, 1]} : vector<2x10x10x8xf32> to vector<2x8x8x8xf32>
    %35 = vector.extract_strided_slice %20 {offsets = [0, 0, 1, 0], sizes = [2, 8, 8, 8], strides = [1, 1, 1, 1]} : vector<2x10x10x8xf32> to vector<2x8x8x8xf32>
    %36 = vector.extract_strided_slice %28 {offsets = [0, 0, 1, 0], sizes = [2, 8, 8, 8], strides = [1, 1, 1, 1]} : vector<2x10x10x8xf32> to vector<2x8x8x8xf32>
    %37 = vector.extract_strided_slice %20 {offsets = [0, 0, 2, 0], sizes = [2, 8, 8, 8], strides = [1, 1, 1, 1]} : vector<2x10x10x8xf32> to vector<2x8x8x8xf32>
    %38 = vector.extract_strided_slice %24 {offsets = [0, 0, 0, 0], sizes = [2, 8, 8, 8], strides = [1, 1, 1, 1]} : vector<2x9x10x8xf32> to vector<2x8x8x8xf32>
    %39 = vector.extract_strided_slice %32 {offsets = [0, 0, 0, 0], sizes = [2, 8, 8, 8], strides = [1, 1, 1, 1]} : vector<2x9x10x8xf32> to vector<2x8x8x8xf32>
    %40 = vector.extract_strided_slice %24 {offsets = [0, 0, 1, 0], sizes = [2, 8, 8, 8], strides = [1, 1, 1, 1]} : vector<2x9x10x8xf32> to vector<2x8x8x8xf32>
    %41 = vector.extract_strided_slice %32 {offsets = [0, 0, 1, 0], sizes = [2, 8, 8, 8], strides = [1, 1, 1, 1]} : vector<2x9x10x8xf32> to vector<2x8x8x8xf32>
    %42 = vector.extract_strided_slice %24 {offsets = [0, 0, 2, 0], sizes = [2, 8, 8, 8], strides = [1, 1, 1, 1]} : vector<2x9x10x8xf32> to vector<2x8x8x8xf32>
    %43 = vector.extract_strided_slice %20 {offsets = [0, 1, 0, 0], sizes = [2, 8, 8, 8], strides = [1, 1, 1, 1]} : vector<2x10x10x8xf32> to vector<2x8x8x8xf32>
    %44 = vector.extract_strided_slice %28 {offsets = [0, 1, 0, 0], sizes = [2, 8, 8, 8], strides = [1, 1, 1, 1]} : vector<2x10x10x8xf32> to vector<2x8x8x8xf32>
    %45 = vector.extract_strided_slice %20 {offsets = [0, 1, 1, 0], sizes = [2, 8, 8, 8], strides = [1, 1, 1, 1]} : vector<2x10x10x8xf32> to vector<2x8x8x8xf32>
    %46 = vector.extract_strided_slice %28 {offsets = [0, 1, 1, 0], sizes = [2, 8, 8, 8], strides = [1, 1, 1, 1]} : vector<2x10x10x8xf32> to vector<2x8x8x8xf32>
    %47 = vector.extract_strided_slice %20 {offsets = [0, 1, 2, 0], sizes = [2, 8, 8, 8], strides = [1, 1, 1, 1]} : vector<2x10x10x8xf32> to vector<2x8x8x8xf32>
    %48 = vector.extract_strided_slice %24 {offsets = [0, 1, 0, 0], sizes = [2, 8, 8, 8], strides = [1, 1, 1, 1]} : vector<2x9x10x8xf32> to vector<2x8x8x8xf32>
    %49 = vector.extract_strided_slice %32 {offsets = [0, 1, 0, 0], sizes = [2, 8, 8, 8], strides = [1, 1, 1, 1]} : vector<2x9x10x8xf32> to vector<2x8x8x8xf32>
    %50 = vector.extract_strided_slice %24 {offsets = [0, 1, 1, 0], sizes = [2, 8, 8, 8], strides = [1, 1, 1, 1]} : vector<2x9x10x8xf32> to vector<2x8x8x8xf32>
    %51 = vector.extract_strided_slice %32 {offsets = [0, 1, 1, 0], sizes = [2, 8, 8, 8], strides = [1, 1, 1, 1]} : vector<2x9x10x8xf32> to vector<2x8x8x8xf32>
    %52 = vector.extract_strided_slice %24 {offsets = [0, 1, 2, 0], sizes = [2, 8, 8, 8], strides = [1, 1, 1, 1]} : vector<2x9x10x8xf32> to vector<2x8x8x8xf32>
    %53 = vector.extract_strided_slice %20 {offsets = [0, 2, 0, 0], sizes = [2, 8, 8, 8], strides = [1, 1, 1, 1]} : vector<2x10x10x8xf32> to vector<2x8x8x8xf32>
    %54 = vector.extract_strided_slice %28 {offsets = [0, 2, 0, 0], sizes = [2, 8, 8, 8], strides = [1, 1, 1, 1]} : vector<2x10x10x8xf32> to vector<2x8x8x8xf32>
    %55 = vector.extract_strided_slice %20 {offsets = [0, 2, 1, 0], sizes = [2, 8, 8, 8], strides = [1, 1, 1, 1]} : vector<2x10x10x8xf32> to vector<2x8x8x8xf32>
    %56 = vector.extract_strided_slice %28 {offsets = [0, 2, 1, 0], sizes = [2, 8, 8, 8], strides = [1, 1, 1, 1]} : vector<2x10x10x8xf32> to vector<2x8x8x8xf32>
    %57 = vector.extract_strided_slice %20 {offsets = [0, 2, 2, 0], sizes = [2, 8, 8, 8], strides = [1, 1, 1, 1]} : vector<2x10x10x8xf32> to vector<2x8x8x8xf32>
    %cst_31 = arith.constant 0.000000e+00 : f32
    %58 = vector.broadcast %cst_31 : f32 to vector<128x16xf32>
    %59 = tpu.concatenate %33, %34, %35, %36, %37 in 3 : vector<2x8x8x8xf32>, vector<2x8x8x8xf32>, vector<2x8x8x8xf32>, vector<2x8x8x8xf32>, vector<2x8x8x8xf32> -> vector<2x8x8x40xf32>
    %60 = vector.shape_cast %59 : vector<2x8x8x40xf32> to vector<128x40xf32>
    %c0_32 = arith.constant 0 : index
    %c0_33 = arith.constant 0 : index
    %61 = vector.load %arg4[%c0_32, %c0_33] : memref<200x16xf32, #tpu.memory_space<vmem>>, vector<40x16xf32>
    %cst_34 = arith.constant dense<0.000000e+00> : vector<128x16xf32>
    %62 = tpu.matmul %60, %61, %cst_34 {dimension_numbers = #tpu.dot_dimension_numbers<[1], [0], [0], [1], [0, 0, 1, 1], [], []>} : vector<128x40xf32>, vector<40x16xf32>, vector<128x16xf32> -> vector<128x16xf32>
    %63 = arith.addf %58, %62 : vector<128x16xf32>
    %64 = tpu.concatenate %38, %39, %40, %41, %42 in 3 : vector<2x8x8x8xf32>, vector<2x8x8x8xf32>, vector<2x8x8x8xf32>, vector<2x8x8x8xf32>, vector<2x8x8x8xf32> -> vector<2x8x8x40xf32>
    %65 = vector.shape_cast %64 : vector<2x8x8x40xf32> to vector<128x40xf32>
    %c40 = arith.constant 40 : index
    %c0_35 = arith.constant 0 : index
    %66 = vector.load %arg4[%c40, %c0_35] : memref<200x16xf32, #tpu.memory_space<vmem>>, vector<40x16xf32>
    %cst_36 = arith.constant dense<0.000000e+00> : vector<128x16xf32>
    %67 = tpu.matmul %65, %66, %cst_36 {dimension_numbers = #tpu.dot_dimension_numbers<[1], [0], [0], [1], [0, 0, 1, 1], [], []>} : vector<128x40xf32>, vector<40x16xf32>, vector<128x16xf32> -> vector<128x16xf32>
    %68 = arith.addf %63, %67 : vector<128x16xf32>
    %69 = tpu.concatenate %43, %44, %45, %46, %47 in 3 : vector<2x8x8x8xf32>, vector<2x8x8x8xf32>, vector<2x8x8x8xf32>, vector<2x8x8x8xf32>, vector<2x8x8x8xf32> -> vector<2x8x8x40xf32>
    %70 = vector.shape_cast %69 : vector<2x8x8x40xf32> to vector<128x40xf32>
    %c80 = arith.constant 80 : index
    %c0_37 = arith.constant 0 : index
    %71 = vector.load %arg4[%c80, %c0_37] : memref<200x16xf32, #tpu.memory_space<vmem>>, vector<40x16xf32>
    %cst_38 = arith.constant dense<0.000000e+00> : vector<128x16xf32>
    %72 = tpu.matmul %70, %71, %cst_38 {dimension_numbers = #tpu.dot_dimension_numbers<[1], [0], [0], [1], [0, 0, 1, 1], [], []>} : vector<128x40xf32>, vector<40x16xf32>, vector<128x16xf32> -> vector<128x16xf32>
    %73 = arith.addf %68, %72 : vector<128x16xf32>
    %74 = tpu.concatenate %48, %49, %50, %51, %52 in 3 : vector<2x8x8x8xf32>, vector<2x8x8x8xf32>, vector<2x8x8x8xf32>, vector<2x8x8x8xf32>, vector<2x8x8x8xf32> -> vector<2x8x8x40xf32>
    %75 = vector.shape_cast %74 : vector<2x8x8x40xf32> to vector<128x40xf32>
    %c120 = arith.constant 120 : index
    %c0_39 = arith.constant 0 : index
    %76 = vector.load %arg4[%c120, %c0_39] : memref<200x16xf32, #tpu.memory_space<vmem>>, vector<40x16xf32>
    %cst_40 = arith.constant dense<0.000000e+00> : vector<128x16xf32>
    %77 = tpu.matmul %75, %76, %cst_40 {dimension_numbers = #tpu.dot_dimension_numbers<[1], [0], [0], [1], [0, 0, 1, 1], [], []>} : vector<128x40xf32>, vector<40x16xf32>, vector<128x16xf32> -> vector<128x16xf32>
    %78 = arith.addf %73, %77 : vector<128x16xf32>
    %79 = tpu.concatenate %53, %54, %55, %56, %57 in 3 : vector<2x8x8x8xf32>, vector<2x8x8x8xf32>, vector<2x8x8x8xf32>, vector<2x8x8x8xf32>, vector<2x8x8x8xf32> -> vector<2x8x8x40xf32>
    %80 = vector.shape_cast %79 : vector<2x8x8x40xf32> to vector<128x40xf32>
    %c160 = arith.constant 160 : index
    %c0_41 = arith.constant 0 : index
    %81 = vector.load %arg4[%c160, %c0_41] : memref<200x16xf32, #tpu.memory_space<vmem>>, vector<40x16xf32>
    %cst_42 = arith.constant dense<0.000000e+00> : vector<128x16xf32>
    %82 = tpu.matmul %80, %81, %cst_42 {dimension_numbers = #tpu.dot_dimension_numbers<[1], [0], [0], [1], [0, 0, 1, 1], [], []>} : vector<128x40xf32>, vector<40x16xf32>, vector<128x16xf32> -> vector<128x16xf32>
    %83 = arith.addf %78, %82 : vector<128x16xf32>
    %c0_43 = arith.constant 0 : index
    %c0_44 = arith.constant 0 : index
    %84 = vector.load %arg5[%c0_43, %c0_44] : memref<1x16xf32, #tpu.memory_space<vmem>>, vector<1x16xf32>
    %85 = vector.broadcast %84 : vector<1x16xf32> to vector<128x16xf32>
    %86 = arith.addf %83, %85 : vector<128x16xf32>
    %cst_45 = arith.constant 0.000000e+00 : f32
    %87 = vector.broadcast %cst_45 : f32 to vector<128x16xf32>
    %88 = arith.maximumf %86, %87 : vector<128x16xf32>
    %89 = vector.shape_cast %88 : vector<128x16xf32> to vector<2x8x8x16xf32>
    %cst_46 = arith.constant 0.000000e+00 : f32
    %90 = vector.broadcast %cst_46 : f32 to vector<2x2x18x16xf32>
    %cst_47 = arith.constant 0.000000e+00 : f32
    %91 = vector.broadcast %cst_47 : f32 to vector<2x8x2x16xf32>
    %c0_48 = arith.constant 0 : index
    %c0_49 = arith.constant 0 : index
    %c0_50 = arith.constant 0 : index
    %c0_51 = arith.constant 0 : index
    %92 = vector.load %arg17[%c0_48, %c0_49, %c0_50, %c0_51] : memref<2x12x18x16xf32, #tpu.memory_space<vmem>>, vector<2x2x18x16xf32>
    tpu.vector_store %arg17[%c0_48, %c0_49, %c0_50, %c0_51], %90 {strides = array<i32>} : memref<2x12x18x16xf32, #tpu.memory_space<vmem>>, vector<2x2x18x16xf32>,
    %c0_52 = arith.constant 0 : index
    %c10 = arith.constant 10 : index
    %c0_53 = arith.constant 0 : index
    %c0_54 = arith.constant 0 : index
    %93 = vector.load %arg17[%c0_52, %c10, %c0_53, %c0_54] : memref<2x12x18x16xf32, #tpu.memory_space<vmem>>, vector<2x2x18x16xf32>
    tpu.vector_store %arg17[%c0_52, %c10, %c0_53, %c0_54], %90 {strides = array<i32>} : memref<2x12x18x16xf32, #tpu.memory_space<vmem>>, vector<2x2x18x16xf32>,
    %c0_55 = arith.constant 0 : index
    %c2_56 = arith.constant 2 : index
    %c6_57 = arith.constant 6 : index
    %c0_58 = arith.constant 0 : index
    %94 = vector.load %arg17[%c0_55, %c2_56, %c6_57, %c0_58] : memref<2x12x18x16xf32, #tpu.memory_space<vmem>>, vector<2x8x2x16xf32>
    tpu.vector_store %arg17[%c0_55, %c2_56, %c6_57, %c0_58], %91 {strides = array<i32>} : memref<2x12x18x16xf32, #tpu.memory_space<vmem>>, vector<2x8x2x16xf32>,
    %c0_59 = arith.constant 0 : index
    %c2_60 = arith.constant 2 : index
    %c16 = arith.constant 16 : index
    %c0_61 = arith.constant 0 : index
    %95 = vector.load %arg17[%c0_59, %c2_60, %c16, %c0_61] : memref<2x12x18x16xf32, #tpu.memory_space<vmem>>, vector<2x8x2x16xf32>
    tpu.vector_store %arg17[%c0_59, %c2_60, %c16, %c0_61], %91 {strides = array<i32>} : memref<2x12x18x16xf32, #tpu.memory_space<vmem>>, vector<2x8x2x16xf32>,
    %c0_62 = arith.constant 0 : index
    %c2_63 = arith.constant 2 : index
    %c8_64 = arith.constant 8 : index
    %c0_65 = arith.constant 0 : index
    %96 = vector.load %arg17[%c0_62, %c2_63, %c8_64, %c0_65] : memref<2x12x18x16xf32, #tpu.memory_space<vmem>>, vector<2x8x8x16xf32>
    tpu.vector_store %arg17[%c0_62, %c2_63, %c8_64, %c0_65], %89 {strides = array<i32>} : memref<2x12x18x16xf32, #tpu.memory_space<vmem>>, vector<2x8x8x16xf32>,
    %c0_66 = arith.constant 0 : index
    %c0_67 = arith.constant 0 : index
    %c6_68 = arith.constant 6 : index
    %c0_69 = arith.constant 0 : index
    %97 = vector.load %arg17[%c0_66, %c0_67, %c6_68, %c0_69] : memref<2x12x18x16xf32, #tpu.memory_space<vmem>>, vector<2x8x12x16xf32>
    %98 = vector.extract_strided_slice %97 {offsets = [0, 0, 0, 0], sizes = [2, 8, 8, 16], strides = [1, 1, 1, 1]} : vector<2x8x12x16xf32> to vector<2x8x8x16xf32>
    %99 = vector.extract_strided_slice %97 {offsets = [0, 0, 1, 0], sizes = [2, 8, 8, 16], strides = [1, 1, 1, 1]} : vector<2x8x12x16xf32> to vector<2x8x8x16xf32>
    %100 = vector.extract_strided_slice %97 {offsets = [0, 0, 2, 0], sizes = [2, 8, 8, 16], strides = [1, 1, 1, 1]} : vector<2x8x12x16xf32> to vector<2x8x8x16xf32>
    %101 = vector.extract_strided_slice %97 {offsets = [0, 0, 3, 0], sizes = [2, 8, 8, 16], strides = [1, 1, 1, 1]} : vector<2x8x12x16xf32> to vector<2x8x8x16xf32>
    %102 = vector.extract_strided_slice %97 {offsets = [0, 0, 4, 0], sizes = [2, 8, 8, 16], strides = [1, 1, 1, 1]} : vector<2x8x12x16xf32> to vector<2x8x8x16xf32>
    %c0_70 = arith.constant 0 : index
    %c1 = arith.constant 1 : index
    %c6_71 = arith.constant 6 : index
    %c0_72 = arith.constant 0 : index
    %103 = vector.load %arg17[%c0_70, %c1, %c6_71, %c0_72] : memref<2x12x18x16xf32, #tpu.memory_space<vmem>>, vector<2x8x12x16xf32>
    %104 = vector.extract_strided_slice %103 {offsets = [0, 0, 0, 0], sizes = [2, 8, 8, 16], strides = [1, 1, 1, 1]} : vector<2x8x12x16xf32> to vector<2x8x8x16xf32>
    %105 = vector.extract_strided_slice %103 {offsets = [0, 0, 1, 0], sizes = [2, 8, 8, 16], strides = [1, 1, 1, 1]} : vector<2x8x12x16xf32> to vector<2x8x8x16xf32>
    %106 = vector.extract_strided_slice %103 {offsets = [0, 0, 2, 0], sizes = [2, 8, 8, 16], strides = [1, 1, 1, 1]} : vector<2x8x12x16xf32> to vector<2x8x8x16xf32>
    %107 = vector.extract_strided_slice %103 {offsets = [0, 0, 3, 0], sizes = [2, 8, 8, 16], strides = [1, 1, 1, 1]} : vector<2x8x12x16xf32> to vector<2x8x8x16xf32>
    %108 = vector.extract_strided_slice %103 {offsets = [0, 0, 4, 0], sizes = [2, 8, 8, 16], strides = [1, 1, 1, 1]} : vector<2x8x12x16xf32> to vector<2x8x8x16xf32>
    %c0_73 = arith.constant 0 : index
    %c2_74 = arith.constant 2 : index
    %c6_75 = arith.constant 6 : index
    %c0_76 = arith.constant 0 : index
    %109 = vector.load %arg17[%c0_73, %c2_74, %c6_75, %c0_76] : memref<2x12x18x16xf32, #tpu.memory_space<vmem>>, vector<2x8x12x16xf32>
    %110 = vector.extract_strided_slice %109 {offsets = [0, 0, 0, 0], sizes = [2, 8, 8, 16], strides = [1, 1, 1, 1]} : vector<2x8x12x16xf32> to vector<2x8x8x16xf32>
    %111 = vector.extract_strided_slice %109 {offsets = [0, 0, 1, 0], sizes = [2, 8, 8, 16], strides = [1, 1, 1, 1]} : vector<2x8x12x16xf32> to vector<2x8x8x16xf32>
    %112 = vector.extract_strided_slice %109 {offsets = [0, 0, 2, 0], sizes = [2, 8, 8, 16], strides = [1, 1, 1, 1]} : vector<2x8x12x16xf32> to vector<2x8x8x16xf32>
    %113 = vector.extract_strided_slice %109 {offsets = [0, 0, 3, 0], sizes = [2, 8, 8, 16], strides = [1, 1, 1, 1]} : vector<2x8x12x16xf32> to vector<2x8x8x16xf32>
    %114 = vector.extract_strided_slice %109 {offsets = [0, 0, 4, 0], sizes = [2, 8, 8, 16], strides = [1, 1, 1, 1]} : vector<2x8x12x16xf32> to vector<2x8x8x16xf32>
    %c0_77 = arith.constant 0 : index
    %c3 = arith.constant 3 : index
    %c6_78 = arith.constant 6 : index
    %c0_79 = arith.constant 0 : index
    %115 = vector.load %arg17[%c0_77, %c3, %c6_78, %c0_79] : memref<2x12x18x16xf32, #tpu.memory_space<vmem>>, vector<2x8x12x16xf32>
    %116 = vector.extract_strided_slice %115 {offsets = [0, 0, 0, 0], sizes = [2, 8, 8, 16], strides = [1, 1, 1, 1]} : vector<2x8x12x16xf32> to vector<2x8x8x16xf32>
    %117 = vector.extract_strided_slice %115 {offsets = [0, 0, 1, 0], sizes = [2, 8, 8, 16], strides = [1, 1, 1, 1]} : vector<2x8x12x16xf32> to vector<2x8x8x16xf32>
    %118 = vector.extract_strided_slice %115 {offsets = [0, 0, 2, 0], sizes = [2, 8, 8, 16], strides = [1, 1, 1, 1]} : vector<2x8x12x16xf32> to vector<2x8x8x16xf32>
    %119 = vector.extract_strided_slice %115 {offsets = [0, 0, 3, 0], sizes = [2, 8, 8, 16], strides = [1, 1, 1, 1]} : vector<2x8x12x16xf32> to vector<2x8x8x16xf32>
    %120 = vector.extract_strided_slice %115 {offsets = [0, 0, 4, 0], sizes = [2, 8, 8, 16], strides = [1, 1, 1, 1]} : vector<2x8x12x16xf32> to vector<2x8x8x16xf32>
    %c0_80 = arith.constant 0 : index
    %c4 = arith.constant 4 : index
    %c6_81 = arith.constant 6 : index
    %c0_82 = arith.constant 0 : index
    %121 = vector.load %arg17[%c0_80, %c4, %c6_81, %c0_82] : memref<2x12x18x16xf32, #tpu.memory_space<vmem>>, vector<2x8x12x16xf32>
    %122 = vector.extract_strided_slice %121 {offsets = [0, 0, 0, 0], sizes = [2, 8, 8, 16], strides = [1, 1, 1, 1]} : vector<2x8x12x16xf32> to vector<2x8x8x16xf32>
    %123 = vector.extract_strided_slice %121 {offsets = [0, 0, 1, 0], sizes = [2, 8, 8, 16], strides = [1, 1, 1, 1]} : vector<2x8x12x16xf32> to vector<2x8x8x16xf32>
    %124 = vector.extract_strided_slice %121 {offsets = [0, 0, 2, 0], sizes = [2, 8, 8, 16], strides = [1, 1, 1, 1]} : vector<2x8x12x16xf32> to vector<2x8x8x16xf32>
    %125 = vector.extract_strided_slice %121 {offsets = [0, 0, 3, 0], sizes = [2, 8, 8, 16], strides = [1, 1, 1, 1]} : vector<2x8x12x16xf32> to vector<2x8x8x16xf32>
    %126 = vector.extract_strided_slice %121 {offsets = [0, 0, 4, 0], sizes = [2, 8, 8, 16], strides = [1, 1, 1, 1]} : vector<2x8x12x16xf32> to vector<2x8x8x16xf32>
    %cst_83 = arith.constant 0.000000e+00 : f32
    %127 = vector.broadcast %cst_83 : f32 to vector<128x32xf32>
    %128 = tpu.concatenate %98, %99, %100, %101, %102 in 3 : vector<2x8x8x16xf32>, vector<2x8x8x16xf32>, vector<2x8x8x16xf32>, vector<2x8x8x16xf32>, vector<2x8x8x16xf32> -> vector<2x8x8x80xf32>
    %129 = vector.shape_cast %128 : vector<2x8x8x80xf32> to vector<128x80xf32>
    %c0_84 = arith.constant 0 : index
    %c0_85 = arith.constant 0 : index
    %130 = vector.load %arg6[%c0_84, %c0_85] : memref<400x32xf32, #tpu.memory_space<vmem>>, vector<80x32xf32>
    %cst_86 = arith.constant dense<0.000000e+00> : vector<128x32xf32>
    %131 = tpu.matmul %129, %130, %cst_86 {dimension_numbers = #tpu.dot_dimension_numbers<[1], [0], [0], [1], [0, 0, 1, 1], [], []>} : vector<128x80xf32>, vector<80x32xf32>, vector<128x32xf32> -> vector<128x32xf32>
    %132 = arith.addf %127, %131 : vector<128x32xf32>
    %133 = tpu.concatenate %104, %105, %106, %107, %108 in 3 : vector<2x8x8x16xf32>, vector<2x8x8x16xf32>, vector<2x8x8x16xf32>, vector<2x8x8x16xf32>, vector<2x8x8x16xf32> -> vector<2x8x8x80xf32>
    %134 = vector.shape_cast %133 : vector<2x8x8x80xf32> to vector<128x80xf32>
    %c80_87 = arith.constant 80 : index
    %c0_88 = arith.constant 0 : index
    %135 = vector.load %arg6[%c80_87, %c0_88] : memref<400x32xf32, #tpu.memory_space<vmem>>, vector<80x32xf32>
    %cst_89 = arith.constant dense<0.000000e+00> : vector<128x32xf32>
    %136 = tpu.matmul %134, %135, %cst_89 {dimension_numbers = #tpu.dot_dimension_numbers<[1], [0], [0], [1], [0, 0, 1, 1], [], []>} : vector<128x80xf32>, vector<80x32xf32>, vector<128x32xf32> -> vector<128x32xf32>
    %137 = arith.addf %132, %136 : vector<128x32xf32>
    %138 = tpu.concatenate %110, %111, %112, %113, %114 in 3 : vector<2x8x8x16xf32>, vector<2x8x8x16xf32>, vector<2x8x8x16xf32>, vector<2x8x8x16xf32>, vector<2x8x8x16xf32> -> vector<2x8x8x80xf32>
    %139 = vector.shape_cast %138 : vector<2x8x8x80xf32> to vector<128x80xf32>
    %c160_90 = arith.constant 160 : index
    %c0_91 = arith.constant 0 : index
    %140 = vector.load %arg6[%c160_90, %c0_91] : memref<400x32xf32, #tpu.memory_space<vmem>>, vector<80x32xf32>
    %cst_92 = arith.constant dense<0.000000e+00> : vector<128x32xf32>
    %141 = tpu.matmul %139, %140, %cst_92 {dimension_numbers = #tpu.dot_dimension_numbers<[1], [0], [0], [1], [0, 0, 1, 1], [], []>} : vector<128x80xf32>, vector<80x32xf32>, vector<128x32xf32> -> vector<128x32xf32>
    %142 = arith.addf %137, %141 : vector<128x32xf32>
    %143 = tpu.concatenate %116, %117, %118, %119, %120 in 3 : vector<2x8x8x16xf32>, vector<2x8x8x16xf32>, vector<2x8x8x16xf32>, vector<2x8x8x16xf32>, vector<2x8x8x16xf32> -> vector<2x8x8x80xf32>
    %144 = vector.shape_cast %143 : vector<2x8x8x80xf32> to vector<128x80xf32>
    %c240 = arith.constant 240 : index
    %c0_93 = arith.constant 0 : index
    %145 = vector.load %arg6[%c240, %c0_93] : memref<400x32xf32, #tpu.memory_space<vmem>>, vector<80x32xf32>
    %cst_94 = arith.constant dense<0.000000e+00> : vector<128x32xf32>
    %146 = tpu.matmul %144, %145, %cst_94 {dimension_numbers = #tpu.dot_dimension_numbers<[1], [0], [0], [1], [0, 0, 1, 1], [], []>} : vector<128x80xf32>, vector<80x32xf32>, vector<128x32xf32> -> vector<128x32xf32>
    %147 = arith.addf %142, %146 : vector<128x32xf32>
    %148 = tpu.concatenate %122, %123, %124, %125, %126 in 3 : vector<2x8x8x16xf32>, vector<2x8x8x16xf32>, vector<2x8x8x16xf32>, vector<2x8x8x16xf32>, vector<2x8x8x16xf32> -> vector<2x8x8x80xf32>
    %149 = vector.shape_cast %148 : vector<2x8x8x80xf32> to vector<128x80xf32>
    %c320 = arith.constant 320 : index
    %c0_95 = arith.constant 0 : index
    %150 = vector.load %arg6[%c320, %c0_95] : memref<400x32xf32, #tpu.memory_space<vmem>>, vector<80x32xf32>
    %cst_96 = arith.constant dense<0.000000e+00> : vector<128x32xf32>
    %151 = tpu.matmul %149, %150, %cst_96 {dimension_numbers = #tpu.dot_dimension_numbers<[1], [0], [0], [1], [0, 0, 1, 1], [], []>} : vector<128x80xf32>, vector<80x32xf32>, vector<128x32xf32> -> vector<128x32xf32>
    %152 = arith.addf %147, %151 : vector<128x32xf32>
    %c0_97 = arith.constant 0 : index
    %c0_98 = arith.constant 0 : index
    %153 = vector.load %arg7[%c0_97, %c0_98] : memref<1x32xf32, #tpu.memory_space<vmem>>, vector<1x32xf32>
    %154 = vector.broadcast %153 : vector<1x32xf32> to vector<128x32xf32>
    %155 = arith.addf %152, %154 : vector<128x32xf32>
    %cst_99 = arith.constant 0.000000e+00 : f32
    %156 = vector.broadcast %cst_99 : f32 to vector<128x32xf32>
    %157 = arith.maximumf %155, %156 : vector<128x32xf32>
    %158 = vector.shape_cast %157 : vector<128x32xf32> to vector<2x8x8x32xf32>
    %cst_100 = arith.constant 0.000000e+00 : f32
    %159 = vector.broadcast %cst_100 : f32 to vector<2x2x18x32xf32>
    %cst_101 = arith.constant 0.000000e+00 : f32
    %160 = vector.broadcast %cst_101 : f32 to vector<2x8x2x32xf32>
    %c0_102 = arith.constant 0 : index
    %c0_103 = arith.constant 0 : index
    %c0_104 = arith.constant 0 : index
    %c0_105 = arith.constant 0 : index
    %161 = vector.load %arg18[%c0_102, %c0_103, %c0_104, %c0_105] : memref<2x12x18x32xf32, #tpu.memory_space<vmem>>, vector<2x2x18x32xf32>
    tpu.vector_store %arg18[%c0_102, %c0_103, %c0_104, %c0_105], %159 {strides = array<i32>} : memref<2x12x18x32xf32, #tpu.memory_space<vmem>>, vector<2x2x18x32xf32>,
    %c0_106 = arith.constant 0 : index
    %c10_107 = arith.constant 10 : index
    %c0_108 = arith.constant 0 : index
    %c0_109 = arith.constant 0 : index
    %162 = vector.load %arg18[%c0_106, %c10_107, %c0_108, %c0_109] : memref<2x12x18x32xf32, #tpu.memory_space<vmem>>, vector<2x2x18x32xf32>
    tpu.vector_store %arg18[%c0_106, %c10_107, %c0_108, %c0_109], %159 {strides = array<i32>} : memref<2x12x18x32xf32, #tpu.memory_space<vmem>>, vector<2x2x18x32xf32>,
    %c0_110 = arith.constant 0 : index
    %c2_111 = arith.constant 2 : index
    %c6_112 = arith.constant 6 : index
    %c0_113 = arith.constant 0 : index
    %163 = vector.load %arg18[%c0_110, %c2_111, %c6_112, %c0_113] : memref<2x12x18x32xf32, #tpu.memory_space<vmem>>, vector<2x8x2x32xf32>
    tpu.vector_store %arg18[%c0_110, %c2_111, %c6_112, %c0_113], %160 {strides = array<i32>} : memref<2x12x18x32xf32, #tpu.memory_space<vmem>>, vector<2x8x2x32xf32>,
    %c0_114 = arith.constant 0 : index
    %c2_115 = arith.constant 2 : index
    %c16_116 = arith.constant 16 : index
    %c0_117 = arith.constant 0 : index
    %164 = vector.load %arg18[%c0_114, %c2_115, %c16_116, %c0_117] : memref<2x12x18x32xf32, #tpu.memory_space<vmem>>, vector<2x8x2x32xf32>
    tpu.vector_store %arg18[%c0_114, %c2_115, %c16_116, %c0_117], %160 {strides = array<i32>} : memref<2x12x18x32xf32, #tpu.memory_space<vmem>>, vector<2x8x2x32xf32>,
    %c0_118 = arith.constant 0 : index
    %c2_119 = arith.constant 2 : index
    %c8_120 = arith.constant 8 : index
    %c0_121 = arith.constant 0 : index
    %165 = vector.load %arg18[%c0_118, %c2_119, %c8_120, %c0_121] : memref<2x12x18x32xf32, #tpu.memory_space<vmem>>, vector<2x8x8x32xf32>
    tpu.vector_store %arg18[%c0_118, %c2_119, %c8_120, %c0_121], %158 {strides = array<i32>} : memref<2x12x18x32xf32, #tpu.memory_space<vmem>>, vector<2x8x8x32xf32>,
    %c0_122 = arith.constant 0 : index
    %c0_123 = arith.constant 0 : index
    %c6_124 = arith.constant 6 : index
    %c0_125 = arith.constant 0 : index
    %166 = tpu.strided_load %arg18[%c0_122, %c0_123, %c6_124, %c0_125] {strides = array<i32: 1, 1, 2, 1>} : memref<2x12x18x32xf32, #tpu.memory_space<vmem>>, vector<2x12x6x32xf32>
    %167 = vector.shape_cast %166 : vector<2x12x6x32xf32> to vector<2x6x2x6x32xf32>
    %168 = vector.extract_strided_slice %167 {offsets = [0, 0, 0, 0, 0], sizes = [2, 6, 1, 6, 32], strides = [1, 1, 1, 1, 1]} : vector<2x6x2x6x32xf32> to vector<2x6x1x6x32xf32>
    %169 = vector.shape_cast %168 : vector<2x6x1x6x32xf32> to vector<2x6x6x32xf32>
    %170 = vector.extract_strided_slice %166 {offsets = [0, 1, 0, 0], sizes = [2, 10, 6, 32], strides = [1, 1, 1, 1]} : vector<2x12x6x32xf32> to vector<2x10x6x32xf32>
    %171 = vector.shape_cast %170 : vector<2x10x6x32xf32> to vector<2x5x2x6x32xf32>
    %172 = vector.extract_strided_slice %171 {offsets = [0, 0, 0, 0, 0], sizes = [2, 5, 1, 6, 32], strides = [1, 1, 1, 1, 1]} : vector<2x5x2x6x32xf32> to vector<2x5x1x6x32xf32>
    %173 = vector.shape_cast %172 : vector<2x5x1x6x32xf32> to vector<2x5x6x32xf32>
    %c0_126 = arith.constant 0 : index
    %c0_127 = arith.constant 0 : index
    %c7_128 = arith.constant 7 : index
    %c0_129 = arith.constant 0 : index
    %174 = tpu.strided_load %arg18[%c0_126, %c0_127, %c7_128, %c0_129] {strides = array<i32: 1, 1, 2, 1>} : memref<2x12x18x32xf32, #tpu.memory_space<vmem>>, vector<2x12x6x32xf32>
    %175 = vector.shape_cast %174 : vector<2x12x6x32xf32> to vector<2x6x2x6x32xf32>
    %176 = vector.extract_strided_slice %175 {offsets = [0, 0, 0, 0, 0], sizes = [2, 6, 1, 6, 32], strides = [1, 1, 1, 1, 1]} : vector<2x6x2x6x32xf32> to vector<2x6x1x6x32xf32>
    %177 = vector.shape_cast %176 : vector<2x6x1x6x32xf32> to vector<2x6x6x32xf32>
    %178 = vector.extract_strided_slice %174 {offsets = [0, 1, 0, 0], sizes = [2, 10, 6, 32], strides = [1, 1, 1, 1]} : vector<2x12x6x32xf32> to vector<2x10x6x32xf32>
    %179 = vector.shape_cast %178 : vector<2x10x6x32xf32> to vector<2x5x2x6x32xf32>
    %180 = vector.extract_strided_slice %179 {offsets = [0, 0, 0, 0, 0], sizes = [2, 5, 1, 6, 32], strides = [1, 1, 1, 1, 1]} : vector<2x5x2x6x32xf32> to vector<2x5x1x6x32xf32>
    %181 = vector.shape_cast %180 : vector<2x5x1x6x32xf32> to vector<2x5x6x32xf32>
    %182 = vector.extract_strided_slice %169 {offsets = [0, 0, 0, 0], sizes = [2, 4, 4, 32], strides = [1, 1, 1, 1]} : vector<2x6x6x32xf32> to vector<2x4x4x32xf32>
    %183 = vector.extract_strided_slice %177 {offsets = [0, 0, 0, 0], sizes = [2, 4, 4, 32], strides = [1, 1, 1, 1]} : vector<2x6x6x32xf32> to vector<2x4x4x32xf32>
    %184 = vector.extract_strided_slice %169 {offsets = [0, 0, 1, 0], sizes = [2, 4, 4, 32], strides = [1, 1, 1, 1]} : vector<2x6x6x32xf32> to vector<2x4x4x32xf32>
    %185 = vector.extract_strided_slice %177 {offsets = [0, 0, 1, 0], sizes = [2, 4, 4, 32], strides = [1, 1, 1, 1]} : vector<2x6x6x32xf32> to vector<2x4x4x32xf32>
    %186 = vector.extract_strided_slice %169 {offsets = [0, 0, 2, 0], sizes = [2, 4, 4, 32], strides = [1, 1, 1, 1]} : vector<2x6x6x32xf32> to vector<2x4x4x32xf32>
    %187 = vector.extract_strided_slice %173 {offsets = [0, 0, 0, 0], sizes = [2, 4, 4, 32], strides = [1, 1, 1, 1]} : vector<2x5x6x32xf32> to vector<2x4x4x32xf32>
    %188 = vector.extract_strided_slice %181 {offsets = [0, 0, 0, 0], sizes = [2, 4, 4, 32], strides = [1, 1, 1, 1]} : vector<2x5x6x32xf32> to vector<2x4x4x32xf32>
    %189 = vector.extract_strided_slice %173 {offsets = [0, 0, 1, 0], sizes = [2, 4, 4, 32], strides = [1, 1, 1, 1]} : vector<2x5x6x32xf32> to vector<2x4x4x32xf32>
    %190 = vector.extract_strided_slice %181 {offsets = [0, 0, 1, 0], sizes = [2, 4, 4, 32], strides = [1, 1, 1, 1]} : vector<2x5x6x32xf32> to vector<2x4x4x32xf32>
    %191 = vector.extract_strided_slice %173 {offsets = [0, 0, 2, 0], sizes = [2, 4, 4, 32], strides = [1, 1, 1, 1]} : vector<2x5x6x32xf32> to vector<2x4x4x32xf32>
    %192 = vector.extract_strided_slice %169 {offsets = [0, 1, 0, 0], sizes = [2, 4, 4, 32], strides = [1, 1, 1, 1]} : vector<2x6x6x32xf32> to vector<2x4x4x32xf32>
    %193 = vector.extract_strided_slice %177 {offsets = [0, 1, 0, 0], sizes = [2, 4, 4, 32], strides = [1, 1, 1, 1]} : vector<2x6x6x32xf32> to vector<2x4x4x32xf32>
    %194 = vector.extract_strided_slice %169 {offsets = [0, 1, 1, 0], sizes = [2, 4, 4, 32], strides = [1, 1, 1, 1]} : vector<2x6x6x32xf32> to vector<2x4x4x32xf32>
    %195 = vector.extract_strided_slice %177 {offsets = [0, 1, 1, 0], sizes = [2, 4, 4, 32], strides = [1, 1, 1, 1]} : vector<2x6x6x32xf32> to vector<2x4x4x32xf32>
    %196 = vector.extract_strided_slice %169 {offsets = [0, 1, 2, 0], sizes = [2, 4, 4, 32], strides = [1, 1, 1, 1]} : vector<2x6x6x32xf32> to vector<2x4x4x32xf32>
    %197 = vector.extract_strided_slice %173 {offsets = [0, 1, 0, 0], sizes = [2, 4, 4, 32], strides = [1, 1, 1, 1]} : vector<2x5x6x32xf32> to vector<2x4x4x32xf32>
    %198 = vector.extract_strided_slice %181 {offsets = [0, 1, 0, 0], sizes = [2, 4, 4, 32], strides = [1, 1, 1, 1]} : vector<2x5x6x32xf32> to vector<2x4x4x32xf32>
    %199 = vector.extract_strided_slice %173 {offsets = [0, 1, 1, 0], sizes = [2, 4, 4, 32], strides = [1, 1, 1, 1]} : vector<2x5x6x32xf32> to vector<2x4x4x32xf32>
    %200 = vector.extract_strided_slice %181 {offsets = [0, 1, 1, 0], sizes = [2, 4, 4, 32], strides = [1, 1, 1, 1]} : vector<2x5x6x32xf32> to vector<2x4x4x32xf32>
    %201 = vector.extract_strided_slice %173 {offsets = [0, 1, 2, 0], sizes = [2, 4, 4, 32], strides = [1, 1, 1, 1]} : vector<2x5x6x32xf32> to vector<2x4x4x32xf32>
    %202 = vector.extract_strided_slice %169 {offsets = [0, 2, 0, 0], sizes = [2, 4, 4, 32], strides = [1, 1, 1, 1]} : vector<2x6x6x32xf32> to vector<2x4x4x32xf32>
    %203 = vector.extract_strided_slice %177 {offsets = [0, 2, 0, 0], sizes = [2, 4, 4, 32], strides = [1, 1, 1, 1]} : vector<2x6x6x32xf32> to vector<2x4x4x32xf32>
    %204 = vector.extract_strided_slice %169 {offsets = [0, 2, 1, 0], sizes = [2, 4, 4, 32], strides = [1, 1, 1, 1]} : vector<2x6x6x32xf32> to vector<2x4x4x32xf32>
    %205 = vector.extract_strided_slice %177 {offsets = [0, 2, 1, 0], sizes = [2, 4, 4, 32], strides = [1, 1, 1, 1]} : vector<2x6x6x32xf32> to vector<2x4x4x32xf32>
    %206 = vector.extract_strided_slice %169 {offsets = [0, 2, 2, 0], sizes = [2, 4, 4, 32], strides = [1, 1, 1, 1]} : vector<2x6x6x32xf32> to vector<2x4x4x32xf32>
    %cst_130 = arith.constant 0.000000e+00 : f32
    %207 = vector.broadcast %cst_130 : f32 to vector<32x64xf32>
    %208 = tpu.concatenate %182, %183, %184, %185, %186 in 3 : vector<2x4x4x32xf32>, vector<2x4x4x32xf32>, vector<2x4x4x32xf32>, vector<2x4x4x32xf32>, vector<2x4x4x32xf32> -> vector<2x4x4x160xf32>
    %209 = vector.shape_cast %208 : vector<2x4x4x160xf32> to vector<32x160xf32>
    %c0_131 = arith.constant 0 : index
    %c0_132 = arith.constant 0 : index
    %210 = vector.load %arg8[%c0_131, %c0_132] : memref<800x64xf32, #tpu.memory_space<vmem>>, vector<160x64xf32>
    %cst_133 = arith.constant dense<0.000000e+00> : vector<32x64xf32>
    %211 = tpu.matmul %209, %210, %cst_133 {dimension_numbers = #tpu.dot_dimension_numbers<[1], [0], [0], [1], [0, 0, 1, 1], [], []>} : vector<32x160xf32>, vector<160x64xf32>, vector<32x64xf32> -> vector<32x64xf32>
    %212 = arith.addf %207, %211 : vector<32x64xf32>
    %213 = tpu.concatenate %187, %188, %189, %190, %191 in 3 : vector<2x4x4x32xf32>, vector<2x4x4x32xf32>, vector<2x4x4x32xf32>, vector<2x4x4x32xf32>, vector<2x4x4x32xf32> -> vector<2x4x4x160xf32>
    %214 = vector.shape_cast %213 : vector<2x4x4x160xf32> to vector<32x160xf32>
    %c160_134 = arith.constant 160 : index
    %c0_135 = arith.constant 0 : index
    %215 = vector.load %arg8[%c160_134, %c0_135] : memref<800x64xf32, #tpu.memory_space<vmem>>, vector<160x64xf32>
    %cst_136 = arith.constant dense<0.000000e+00> : vector<32x64xf32>
    %216 = tpu.matmul %214, %215, %cst_136 {dimension_numbers = #tpu.dot_dimension_numbers<[1], [0], [0], [1], [0, 0, 1, 1], [], []>} : vector<32x160xf32>, vector<160x64xf32>, vector<32x64xf32> -> vector<32x64xf32>
    %217 = arith.addf %212, %216 : vector<32x64xf32>
    %218 = tpu.concatenate %192, %193, %194, %195, %196 in 3 : vector<2x4x4x32xf32>, vector<2x4x4x32xf32>, vector<2x4x4x32xf32>, vector<2x4x4x32xf32>, vector<2x4x4x32xf32> -> vector<2x4x4x160xf32>
    %219 = vector.shape_cast %218 : vector<2x4x4x160xf32> to vector<32x160xf32>
    %c320_137 = arith.constant 320 : index
    %c0_138 = arith.constant 0 : index
    %220 = vector.load %arg8[%c320_137, %c0_138] : memref<800x64xf32, #tpu.memory_space<vmem>>, vector<160x64xf32>
    %cst_139 = arith.constant dense<0.000000e+00> : vector<32x64xf32>
    %221 = tpu.matmul %219, %220, %cst_139 {dimension_numbers = #tpu.dot_dimension_numbers<[1], [0], [0], [1], [0, 0, 1, 1], [], []>} : vector<32x160xf32>, vector<160x64xf32>, vector<32x64xf32> -> vector<32x64xf32>
    %222 = arith.addf %217, %221 : vector<32x64xf32>
    %223 = tpu.concatenate %197, %198, %199, %200, %201 in 3 : vector<2x4x4x32xf32>, vector<2x4x4x32xf32>, vector<2x4x4x32xf32>, vector<2x4x4x32xf32>, vector<2x4x4x32xf32> -> vector<2x4x4x160xf32>
    %224 = vector.shape_cast %223 : vector<2x4x4x160xf32> to vector<32x160xf32>
    %c480 = arith.constant 480 : index
    %c0_140 = arith.constant 0 : index
    %225 = vector.load %arg8[%c480, %c0_140] : memref<800x64xf32, #tpu.memory_space<vmem>>, vector<160x64xf32>
    %cst_141 = arith.constant dense<0.000000e+00> : vector<32x64xf32>
    %226 = tpu.matmul %224, %225, %cst_141 {dimension_numbers = #tpu.dot_dimension_numbers<[1], [0], [0], [1], [0, 0, 1, 1], [], []>} : vector<32x160xf32>, vector<160x64xf32>, vector<32x64xf32> -> vector<32x64xf32>
    %227 = arith.addf %222, %226 : vector<32x64xf32>
    %228 = tpu.concatenate %202, %203, %204, %205, %206 in 3 : vector<2x4x4x32xf32>, vector<2x4x4x32xf32>, vector<2x4x4x32xf32>, vector<2x4x4x32xf32>, vector<2x4x4x32xf32> -> vector<2x4x4x160xf32>
    %229 = vector.shape_cast %228 : vector<2x4x4x160xf32> to vector<32x160xf32>
    %c640 = arith.constant 640 : index
    %c0_142 = arith.constant 0 : index
    %230 = vector.load %arg8[%c640, %c0_142] : memref<800x64xf32, #tpu.memory_space<vmem>>, vector<160x64xf32>
    %cst_143 = arith.constant dense<0.000000e+00> : vector<32x64xf32>
    %231 = tpu.matmul %229, %230, %cst_143 {dimension_numbers = #tpu.dot_dimension_numbers<[1], [0], [0], [1], [0, 0, 1, 1], [], []>} : vector<32x160xf32>, vector<160x64xf32>, vector<32x64xf32> -> vector<32x64xf32>
    %232 = arith.addf %227, %231 : vector<32x64xf32>
    %c0_144 = arith.constant 0 : index
    %c0_145 = arith.constant 0 : index
    %233 = vector.load %arg9[%c0_144, %c0_145] : memref<1x64xf32, #tpu.memory_space<vmem>>, vector<1x64xf32>
    %234 = vector.broadcast %233 : vector<1x64xf32> to vector<32x64xf32>
    %235 = arith.addf %232, %234 : vector<32x64xf32>
    %cst_146 = arith.constant 0.000000e+00 : f32
    %236 = vector.broadcast %cst_146 : f32 to vector<32x64xf32>
    %237 = arith.maximumf %235, %236 : vector<32x64xf32>
    %238 = vector.shape_cast %237 : vector<32x64xf32> to vector<2x4x4x64xf32>
    %cst_147 = arith.constant 0.000000e+00 : f32
    %239 = vector.broadcast %cst_147 : f32 to vector<2x2x14x64xf32>
    %cst_148 = arith.constant 0.000000e+00 : f32
    %240 = vector.broadcast %cst_148 : f32 to vector<2x4x2x64xf32>
    %c0_149 = arith.constant 0 : index
    %c0_150 = arith.constant 0 : index
    %c0_151 = arith.constant 0 : index
    %c0_152 = arith.constant 0 : index
    %241 = vector.load %arg19[%c0_149, %c0_150, %c0_151, %c0_152] : memref<2x8x14x64xf32, #tpu.memory_space<vmem>>, vector<2x2x14x64xf32>
    tpu.vector_store %arg19[%c0_149, %c0_150, %c0_151, %c0_152], %239 {strides = array<i32>} : memref<2x8x14x64xf32, #tpu.memory_space<vmem>>, vector<2x2x14x64xf32>,
    %c0_153 = arith.constant 0 : index
    %c6_154 = arith.constant 6 : index
    %c0_155 = arith.constant 0 : index
    %c0_156 = arith.constant 0 : index
    %242 = vector.load %arg19[%c0_153, %c6_154, %c0_155, %c0_156] : memref<2x8x14x64xf32, #tpu.memory_space<vmem>>, vector<2x2x14x64xf32>
    tpu.vector_store %arg19[%c0_153, %c6_154, %c0_155, %c0_156], %239 {strides = array<i32>} : memref<2x8x14x64xf32, #tpu.memory_space<vmem>>, vector<2x2x14x64xf32>,
    %c0_157 = arith.constant 0 : index
    %c2_158 = arith.constant 2 : index
    %c6_159 = arith.constant 6 : index
    %c0_160 = arith.constant 0 : index
    %243 = vector.load %arg19[%c0_157, %c2_158, %c6_159, %c0_160] : memref<2x8x14x64xf32, #tpu.memory_space<vmem>>, vector<2x4x2x64xf32>
    tpu.vector_store %arg19[%c0_157, %c2_158, %c6_159, %c0_160], %240 {strides = array<i32>} : memref<2x8x14x64xf32, #tpu.memory_space<vmem>>, vector<2x4x2x64xf32>,
    %c0_161 = arith.constant 0 : index
    %c2_162 = arith.constant 2 : index
    %c12 = arith.constant 12 : index
    %c0_163 = arith.constant 0 : index
    %244 = vector.load %arg19[%c0_161, %c2_162, %c12, %c0_163] : memref<2x8x14x64xf32, #tpu.memory_space<vmem>>, vector<2x4x2x64xf32>
    tpu.vector_store %arg19[%c0_161, %c2_162, %c12, %c0_163], %240 {strides = array<i32>} : memref<2x8x14x64xf32, #tpu.memory_space<vmem>>, vector<2x4x2x64xf32>,
    %c0_164 = arith.constant 0 : index
    %c2_165 = arith.constant 2 : index
    %c8_166 = arith.constant 8 : index
    %c0_167 = arith.constant 0 : index
    %245 = vector.load %arg19[%c0_164, %c2_165, %c8_166, %c0_167] : memref<2x8x14x64xf32, #tpu.memory_space<vmem>>, vector<2x4x4x64xf32>
    tpu.vector_store %arg19[%c0_164, %c2_165, %c8_166, %c0_167], %238 {strides = array<i32>} : memref<2x8x14x64xf32, #tpu.memory_space<vmem>>, vector<2x4x4x64xf32>,
    %c0_168 = arith.constant 0 : index
    %c0_169 = arith.constant 0 : index
    %c6_170 = arith.constant 6 : index
    %c0_171 = arith.constant 0 : index
    %246 = vector.load %arg19[%c0_168, %c0_169, %c6_170, %c0_171] : memref<2x8x14x64xf32, #tpu.memory_space<vmem>>, vector<2x4x8x64xf32>
    %247 = vector.extract_strided_slice %246 {offsets = [0, 0, 0, 0], sizes = [2, 4, 4, 64], strides = [1, 1, 1, 1]} : vector<2x4x8x64xf32> to vector<2x4x4x64xf32>
    %248 = vector.extract_strided_slice %246 {offsets = [0, 0, 1, 0], sizes = [2, 4, 4, 64], strides = [1, 1, 1, 1]} : vector<2x4x8x64xf32> to vector<2x4x4x64xf32>
    %249 = vector.extract_strided_slice %246 {offsets = [0, 0, 2, 0], sizes = [2, 4, 4, 64], strides = [1, 1, 1, 1]} : vector<2x4x8x64xf32> to vector<2x4x4x64xf32>
    %250 = vector.extract_strided_slice %246 {offsets = [0, 0, 3, 0], sizes = [2, 4, 4, 64], strides = [1, 1, 1, 1]} : vector<2x4x8x64xf32> to vector<2x4x4x64xf32>
    %251 = vector.extract_strided_slice %246 {offsets = [0, 0, 4, 0], sizes = [2, 4, 4, 64], strides = [1, 1, 1, 1]} : vector<2x4x8x64xf32> to vector<2x4x4x64xf32>
    %c0_172 = arith.constant 0 : index
    %c1_173 = arith.constant 1 : index
    %c6_174 = arith.constant 6 : index
    %c0_175 = arith.constant 0 : index
    %252 = vector.load %arg19[%c0_172, %c1_173, %c6_174, %c0_175] : memref<2x8x14x64xf32, #tpu.memory_space<vmem>>, vector<2x4x8x64xf32>
    %253 = vector.extract_strided_slice %252 {offsets = [0, 0, 0, 0], sizes = [2, 4, 4, 64], strides = [1, 1, 1, 1]} : vector<2x4x8x64xf32> to vector<2x4x4x64xf32>
    %254 = vector.extract_strided_slice %252 {offsets = [0, 0, 1, 0], sizes = [2, 4, 4, 64], strides = [1, 1, 1, 1]} : vector<2x4x8x64xf32> to vector<2x4x4x64xf32>
    %255 = vector.extract_strided_slice %252 {offsets = [0, 0, 2, 0], sizes = [2, 4, 4, 64], strides = [1, 1, 1, 1]} : vector<2x4x8x64xf32> to vector<2x4x4x64xf32>
    %256 = vector.extract_strided_slice %252 {offsets = [0, 0, 3, 0], sizes = [2, 4, 4, 64], strides = [1, 1, 1, 1]} : vector<2x4x8x64xf32> to vector<2x4x4x64xf32>
    %257 = vector.extract_strided_slice %252 {offsets = [0, 0, 4, 0], sizes = [2, 4, 4, 64], strides = [1, 1, 1, 1]} : vector<2x4x8x64xf32> to vector<2x4x4x64xf32>
    %c0_176 = arith.constant 0 : index
    %c2_177 = arith.constant 2 : index
    %c6_178 = arith.constant 6 : index
    %c0_179 = arith.constant 0 : index
    %258 = vector.load %arg19[%c0_176, %c2_177, %c6_178, %c0_179] : memref<2x8x14x64xf32, #tpu.memory_space<vmem>>, vector<2x4x8x64xf32>
    %259 = vector.extract_strided_slice %258 {offsets = [0, 0, 0, 0], sizes = [2, 4, 4, 64], strides = [1, 1, 1, 1]} : vector<2x4x8x64xf32> to vector<2x4x4x64xf32>
    %260 = vector.extract_strided_slice %258 {offsets = [0, 0, 1, 0], sizes = [2, 4, 4, 64], strides = [1, 1, 1, 1]} : vector<2x4x8x64xf32> to vector<2x4x4x64xf32>
    %261 = vector.extract_strided_slice %258 {offsets = [0, 0, 2, 0], sizes = [2, 4, 4, 64], strides = [1, 1, 1, 1]} : vector<2x4x8x64xf32> to vector<2x4x4x64xf32>
    %262 = vector.extract_strided_slice %258 {offsets = [0, 0, 3, 0], sizes = [2, 4, 4, 64], strides = [1, 1, 1, 1]} : vector<2x4x8x64xf32> to vector<2x4x4x64xf32>
    %263 = vector.extract_strided_slice %258 {offsets = [0, 0, 4, 0], sizes = [2, 4, 4, 64], strides = [1, 1, 1, 1]} : vector<2x4x8x64xf32> to vector<2x4x4x64xf32>
    %c0_180 = arith.constant 0 : index
    %c3_181 = arith.constant 3 : index
    %c6_182 = arith.constant 6 : index
    %c0_183 = arith.constant 0 : index
    %264 = vector.load %arg19[%c0_180, %c3_181, %c6_182, %c0_183] : memref<2x8x14x64xf32, #tpu.memory_space<vmem>>, vector<2x4x8x64xf32>
    %265 = vector.extract_strided_slice %264 {offsets = [0, 0, 0, 0], sizes = [2, 4, 4, 64], strides = [1, 1, 1, 1]} : vector<2x4x8x64xf32> to vector<2x4x4x64xf32>
    %266 = vector.extract_strided_slice %264 {offsets = [0, 0, 1, 0], sizes = [2, 4, 4, 64], strides = [1, 1, 1, 1]} : vector<2x4x8x64xf32> to vector<2x4x4x64xf32>
    %267 = vector.extract_strided_slice %264 {offsets = [0, 0, 2, 0], sizes = [2, 4, 4, 64], strides = [1, 1, 1, 1]} : vector<2x4x8x64xf32> to vector<2x4x4x64xf32>
    %268 = vector.extract_strided_slice %264 {offsets = [0, 0, 3, 0], sizes = [2, 4, 4, 64], strides = [1, 1, 1, 1]} : vector<2x4x8x64xf32> to vector<2x4x4x64xf32>
    %269 = vector.extract_strided_slice %264 {offsets = [0, 0, 4, 0], sizes = [2, 4, 4, 64], strides = [1, 1, 1, 1]} : vector<2x4x8x64xf32> to vector<2x4x4x64xf32>
    %c0_184 = arith.constant 0 : index
    %c4_185 = arith.constant 4 : index
    %c6_186 = arith.constant 6 : index
    %c0_187 = arith.constant 0 : index
    %270 = vector.load %arg19[%c0_184, %c4_185, %c6_186, %c0_187] : memref<2x8x14x64xf32, #tpu.memory_space<vmem>>, vector<2x4x8x64xf32>
    %271 = vector.extract_strided_slice %270 {offsets = [0, 0, 0, 0], sizes = [2, 4, 4, 64], strides = [1, 1, 1, 1]} : vector<2x4x8x64xf32> to vector<2x4x4x64xf32>
    %272 = vector.extract_strided_slice %270 {offsets = [0, 0, 1, 0], sizes = [2, 4, 4, 64], strides = [1, 1, 1, 1]} : vector<2x4x8x64xf32> to vector<2x4x4x64xf32>
    %273 = vector.extract_strided_slice %270 {offsets = [0, 0, 2, 0], sizes = [2, 4, 4, 64], strides = [1, 1, 1, 1]} : vector<2x4x8x64xf32> to vector<2x4x4x64xf32>
    %274 = vector.extract_strided_slice %270 {offsets = [0, 0, 3, 0], sizes = [2, 4, 4, 64], strides = [1, 1, 1, 1]} : vector<2x4x8x64xf32> to vector<2x4x4x64xf32>
    %275 = vector.extract_strided_slice %270 {offsets = [0, 0, 4, 0], sizes = [2, 4, 4, 64], strides = [1, 1, 1, 1]} : vector<2x4x8x64xf32> to vector<2x4x4x64xf32>
    %276 = tpu.concatenate %247, %248, %249, %250, %251, %253, %254, %255, %256, %257, %259, %260, %261, %262, %263, %265 in 3 : vector<2x4x4x64xf32>, vector<2x4x4x64xf32>, vector<2x4x4x64xf32>, vector<2x4x4x64xf32>, vector<2x4x4x64xf32>, vector<2x4x4x64xf32>, vector<2x4x4x64xf32>, vector<2x4x4x64xf32>, vector<2x4x4x64xf32>, vector<2x4x4x64xf32>, vector<2x4x4x64xf32>, vector<2x4x4x64xf32>, vector<2x4x4x64xf32>, vector<2x4x4x64xf32>, vector<2x4x4x64xf32>, vector<2x4x4x64xf32> -> vector<2x4x4x1024xf32>
    %277 = tpu.concatenate %266, %267, %268, %269, %271, %272, %273, %274, %275 in 3 : vector<2x4x4x64xf32>, vector<2x4x4x64xf32>, vector<2x4x4x64xf32>, vector<2x4x4x64xf32>, vector<2x4x4x64xf32>, vector<2x4x4x64xf32>, vector<2x4x4x64xf32>, vector<2x4x4x64xf32>, vector<2x4x4x64xf32> -> vector<2x4x4x576xf32>
    %278 = tpu.concatenate %276, %277 in 3 : vector<2x4x4x1024xf32>, vector<2x4x4x576xf32> -> vector<2x4x4x1600xf32>
    %279 = vector.shape_cast %278 : vector<2x4x4x1600xf32> to vector<32x1600xf32>
    %c0_188 = arith.constant 0 : index
    %c0_189 = arith.constant 0 : index
    %280 = vector.load %arg10[%c0_188, %c0_189] : memref<1600x128xf32, #tpu.memory_space<vmem>>, vector<1600x128xf32>
    %cst_190 = arith.constant dense<0.000000e+00> : vector<32x128xf32>
    %281 = tpu.matmul %279, %280, %cst_190 {dimension_numbers = #tpu.dot_dimension_numbers<[1], [0], [0], [1], [0, 0, 1, 1], [], []>} : vector<32x1600xf32>, vector<1600x128xf32>, vector<32x128xf32> -> vector<32x128xf32>
    %c0_191 = arith.constant 0 : index
    %c0_192 = arith.constant 0 : index
    %282 = vector.load %arg11[%c0_191, %c0_192] : memref<1x128xf32, #tpu.memory_space<vmem>>, vector<1x128xf32>
    %283 = vector.broadcast %282 : vector<1x128xf32> to vector<32x128xf32>
    %284 = arith.addf %281, %283 : vector<32x128xf32>
    %cst_193 = arith.constant 0.000000e+00 : f32
    %285 = vector.broadcast %cst_193 : f32 to vector<32x128xf32>
    %286 = arith.maximumf %284, %285 : vector<32x128xf32>
    %287 = vector.shape_cast %286 : vector<32x128xf32> to vector<2x4x4x128xf32>
    %288 = vector.shape_cast %287 : vector<2x4x4x128xf32> to vector<2x16x128xf32>
    %cst_194 = arith.constant dense<0.000000e+00> : vector<2x128xf32>
    %289 = vector.multi_reduction <add>, %288, %cst_194 [1] : vector<2x16x128xf32> to vector<2x128xf32>
    %cst_195 = arith.constant 1.600000e+01 : f32
    %290 = vector.broadcast %cst_195 : f32 to vector<2x128xf32>
    %291 = arith.divf %289, %290 : vector<2x128xf32>
    %c0_196 = arith.constant 0 : index
    %c0_197 = arith.constant 0 : index
    %c0_198 = arith.constant 0 : index
    %292 = vector.load %arg15[%c0_196, %c0_197, %c0_198] : memref<1x2x128xf32, #tpu.memory_space<vmem>>, vector<1x2x128xf32>
    %293 = vector.shape_cast %292 : vector<1x2x128xf32> to vector<2x128xf32>
    %294 = vector.shape_cast %291 : vector<2x128xf32> to vector<1x2x128xf32>
    tpu.vector_store %arg15[%c0_196, %c0_197, %c0_198], %294 {strides = array<i32>} : memref<1x2x128xf32, #tpu.memory_space<vmem>>, vector<1x2x128xf32>,
    %c0_199 = arith.constant 0 : index
    %c0_200 = arith.constant 0 : index
    %295 = vector.load %arg12[%c0_199, %c0_200] : memref<128x128xf32, #tpu.memory_space<vmem>>, vector<128x128xf32>
    %cst_201 = arith.constant dense<0.000000e+00> : vector<2x128xf32>
    %296 = tpu.matmul %291, %295, %cst_201 {dimension_numbers = #tpu.dot_dimension_numbers<[1], [0], [0], [1], [0, 0, 1, 1], [], []>} : vector<2x128xf32>, vector<128x128xf32>, vector<2x128xf32> -> vector<2x128xf32>
    %c0_202 = arith.constant 0 : index
    %c0_203 = arith.constant 0 : index
    %297 = vector.load %arg13[%c0_202, %c0_203] : memref<1x128xf32, #tpu.memory_space<vmem>>, vector<1x128xf32>
    %298 = vector.broadcast %297 : vector<1x128xf32> to vector<2x128xf32>
    %299 = arith.addf %296, %298 : vector<2x128xf32>
    %c0_204 = arith.constant 0 : index
    %c0_205 = arith.constant 0 : index
    %c0_206 = arith.constant 0 : index
    %300 = vector.load %arg14[%c0_204, %c0_205, %c0_206] : memref<1x2x128xf32, #tpu.memory_space<vmem>>, vector<1x2x128xf32>
    %301 = vector.shape_cast %300 : vector<1x2x128xf32> to vector<2x128xf32>
    %302 = vector.shape_cast %299 : vector<2x128xf32> to vector<1x2x128xf32>
    tpu.vector_store %arg14[%c0_204, %c0_205, %c0_206], %302 {strides = array<i32>} : memref<1x2x128xf32, #tpu.memory_space<vmem>>, vector<1x2x128xf32>,
    return
  }
  func.func @transform_0(%arg0: i32) -> (i32, i32, i32) {
    %c0_i32 = arith.constant 0 : i32
    %c0_i32_0 = arith.constant 0 : i32
    %c0_i32_1 = arith.constant 0 : i32
    return %arg0, %c0_i32, %c0_i32_0 : i32, i32, i32
  }
  func.func @transform_1(%arg0: i32) -> (i32, i32) {
    %c0_i32 = arith.constant 0 : i32
    %c0_i32_0 = arith.constant 0 : i32
    %c0_i32_1 = arith.constant 0 : i32
    return %c0_i32, %c0_i32_0 : i32, i32
  }
  func.func @transform_2(%arg0: i32) -> (i32, i32) {
    %c0_i32 = arith.constant 0 : i32
    %c0_i32_0 = arith.constant 0 : i32
    %c0_i32_1 = arith.constant 0 : i32
    return %c0_i32, %c0_i32_0 : i32, i32
  }
  func.func @transform_3(%arg0: i32) -> (i32, i32) {
    %c0_i32 = arith.constant 0 : i32
    %c0_i32_0 = arith.constant 0 : i32
    %c0_i32_1 = arith.constant 0 : i32
    return %c0_i32, %c0_i32_0 : i32, i32
  }
  func.func @transform_4(%arg0: i32) -> (i32, i32) {
    %c0_i32 = arith.constant 0 : i32
    %c0_i32_0 = arith.constant 0 : i32
    %c0_i32_1 = arith.constant 0 : i32
    return %c0_i32, %c0_i32_0 : i32, i32
  }
  func.func @transform_5(%arg0: i32) -> (i32, i32) {
    %c0_i32 = arith.constant 0 : i32
    %c0_i32_0 = arith.constant 0 : i32
    %c0_i32_1 = arith.constant 0 : i32
    return %c0_i32, %c0_i32_0 : i32, i32
  }
  func.func @transform_6(%arg0: i32) -> (i32, i32) {
    %c0_i32 = arith.constant 0 : i32
    %c0_i32_0 = arith.constant 0 : i32
    %c0_i32_1 = arith.constant 0 : i32
    return %c0_i32, %c0_i32_0 : i32, i32
  }
  func.func @transform_7(%arg0: i32) -> (i32, i32) {
    %c0_i32 = arith.constant 0 : i32
    %c0_i32_0 = arith.constant 0 : i32
    %c0_i32_1 = arith.constant 0 : i32
    return %c0_i32, %c0_i32_0 : i32, i32
  }
  func.func @transform_8(%arg0: i32) -> (i32, i32) {
    %c0_i32 = arith.constant 0 : i32
    %c0_i32_0 = arith.constant 0 : i32
    %c0_i32_1 = arith.constant 0 : i32
    return %c0_i32, %c0_i32_0 : i32, i32
  }
  func.func @transform_9(%arg0: i32) -> (i32, i32) {
    %c0_i32 = arith.constant 0 : i32
    %c0_i32_0 = arith.constant 0 : i32
    %c0_i32_1 = arith.constant 0 : i32
    return %c0_i32, %c0_i32_0 : i32, i32
  }
  func.func @transform_10(%arg0: i32) -> (i32, i32) {
    %c0_i32 = arith.constant 0 : i32
    %c0_i32_0 = arith.constant 0 : i32
    %c0_i32_1 = arith.constant 0 : i32
    return %c0_i32, %c0_i32_0 : i32, i32
  }
  func.func @transform_11(%arg0: i32) -> (i32, i32) {
    %c0_i32 = arith.constant 0 : i32
    %c0_i32_0 = arith.constant 0 : i32
    %c0_i32_1 = arith.constant 0 : i32
    return %c0_i32, %c0_i32_0 : i32, i32
  }
  func.func @transform_12(%arg0: i32) -> (i32, i32) {
    %c0_i32 = arith.constant 0 : i32
    %c0_i32_0 = arith.constant 0 : i32
    %c0_i32_1 = arith.constant 0 : i32
    return %c0_i32, %c0_i32_0 : i32, i32
  }
  func.func @transform_13(%arg0: i32) -> (i32, i32, i32) {
    %c0_i32 = arith.constant 0 : i32
    %c0_i32_0 = arith.constant 0 : i32
    %c0_i32_1 = arith.constant 0 : i32
    return %arg0, %c0_i32, %c0_i32_0 : i32, i32, i32
  }
  func.func @transform_14(%arg0: i32) -> (i32, i32, i32) {
    %c0_i32 = arith.constant 0 : i32
    %c0_i32_0 = arith.constant 0 : i32
    %c0_i32_1 = arith.constant 0 : i32
    return %arg0, %c0_i32, %c0_i32_0 : i32, i32, i32
  }
}

</mosaic_0001>

<bundles_post_ra>
// kernel: cnn_cifar10_forward.1
= control target key start
LH: loop header
LB: loop body
LE: loop exit
PB: predicated region body
PF: predicated region fallthrough
CT: control target
= control target key end

     0   :  { %20 = vsyncpa [#allocation7], 0  ;;  %vm322_vm0 = vcmask 1042432   ;;  %vm129_vm1 = vcmask 613376   ;;  %vm775_vm2 = vcmask 64512   ;;  %v19379_v3 = vmov 0.0   ;;  %s19364_s0 = inlined_call_operand.vmem [shape: f32[2,256,75], index: 0, kind: input, shape index: {}]   ;;  %s19365_s1 = inlined_call_operand.vmem [shape: f32[75,8], index: 1, kind: input, shape index: {}]   ;;  %s19366_s2 = inlined_call_operand.vmem [shape: f32[1,8], index: 2, kind: input, shape index: {}]   ;;  %s19367_s3 = inlined_call_operand.vmem [shape: f32[200,16], index: 3, kind: input, shape index: {}]   ;;  %s19368_s4 = inlined_call_operand.vmem [shape: f32[1,16], index: 4, kind: input, shape index: {}]   ;;  %s19369_s5 = inlined_call_operand.vmem [shape: f32[400,32], index: 5, kind: input, shape index: {}]   ;;  %s19370_s6 = inlined_call_operand.vmem [shape: f32[1,32], index: 6, kind: input, shape index: {}]   ;;  %s19371_s7 = inlined_call_operand.vmem [shape: f32[800,64], index: 7, kind: input, shape index: {}]   ;;  %s19372_s8 = inlined_call_operand.vmem [shape: f32[1,64], index: 8, kind: input, shape index: {}]   ;;  %s19373_s9 = inlined_call_operand.vmem [shape: f32[1600,128], index: 9, kind: input, shape index: {}]   ;;  %s19374_s10 = inlined_call_operand.vmem [shape: f32[1,128], index: 10, kind: input, shape index: {}]   ;;  %s19375_s11 = inlined_call_operand.vmem [shape: f32[128,128], index: 11, kind: input, shape index: {}]   ;;  %s19376_s12 = inlined_call_operand.vmem [shape: f32[1,128], index: 12, kind: input, shape index: {}]   ;;  %s19377_s13 = inlined_call_operand.hbm [shape: f32[1,2,128], index: 13, kind: output, shape index: {0}]   ;;  %s19378_s14 = inlined_call_operand.hbm [shape: f32[1,2,128], index: 14, kind: output, shape index: {1}]  }
   0x1   :  { %v121_v0 = vld [vmem:[%s19365_s1 + $0x48] sm:$0x7]  ;;  %v11984_v1 = vld [vmem:[%s19365_s1 + $0x40] sm:$0xff]  ;;  %v11989_v2 = vld [vmem:[%s19365_s1 + $0x38] sm:$0xff]  ;;  %781 = vst.msk [vmem:[#allocation2 + $0x20] sm:$0xff] %vm775_vm2, %v19379_v3  ;;  %vm779_vm3 = vcmask 58368  }
   0x2   :  { %11211 = vmatprep.subr.msk.mxu0 %vm322_vm0, %v121_v0  ;;  %782 = vst.msk [vmem:[#allocation2 + $0x28] sm:$0xff] %vm775_vm2, %v19379_v3  ;;  %783 = vst.msk [vmem:[#allocation2 + $0x30] sm:$0xff] %vm775_vm2, %v19379_v3  ;;  %v12031_v4 = vld [vmem:[%s19364_s0] sm:$0xff]  ;;  %v12177_v5 = vld [vmem:[%s19365_s1 + $0x30] sm:$0xff]  ;;  %vm1661_vm4 = vcmask 130048   ;;  %vm3304_vm5 = vcmask 123904  }
   0x3   :  { %11212 = vmatpush3.msk.msra.mxu0 %vm322_vm0, %v121_v0  ;;  %776 = vst.msk [vmem:[#allocation2] sm:$0xff] %vm775_vm2, %v19379_v3  ;;  %777 = vst.msk [vmem:[#allocation2 + $0x8] sm:$0xff] %vm775_vm2, %v19379_v3  ;;  %11231 = vmatprep.mubr.msk.f32.mxu0 %vm129_vm1, %v12031_v4  ;;  %v117_v6 = vld [vmem:[%s19365_s1 + $0x28] sm:$0xff]  ;;  %v116_v7 = vld [vmem:[%s19365_s1 + $0x20] sm:$0xff]  ;;  %s11893_s15 = smov 8   ;;  %vm1339_vm6 = vcmask 1046528  }
   0x4   :  { %778 = vst.msk [vmem:[#allocation2 + $0x10] sm:$0xff] %vm775_vm2, %v19379_v3  ;;  %785 = vst.msk [vmem:[#allocation2 + $0x280] sm:$0xff] %vm775_vm2, %v19379_v3  ;;  %11213 = vmatprep.subr.mxu0 %v11984_v1  ;;  %v115_v8 = vld [vmem:[%s19365_s1 + $0x18] sm:$0xff]  ;;  %v114_v9 = vld [vmem:[%s19365_s1 + $0x10] sm:$0xff]  ;;  %vm1548_vm7 = vcmask 1045504   ;;  %s11894_s20 = smov 24  }
   0x5   :  { %786 = vst.msk [vmem:[#allocation2 + $0x288] sm:$0xff] %vm775_vm2, %v19379_v3  ;;  %787 = vst.msk [vmem:[#allocation2 + $0x290] sm:$0xff] %vm775_vm2, %v19379_v3  ;;  %11214 = vmatpush3.msra.mxu0 %v11984_v1  ;;  %v113_v16 = vld [vmem:[%s19365_s1 + $0x8] sm:$0xff]  ;;  %v112_v22 = vld [vmem:[%s19365_s1] sm:$0xff]  ;;  %s11895_s24 = smov 32   ;;  %s11896_s29 = smov 16  }
   0x6   :  { %789 = vst.msk [vmem:[#allocation2 + $0x2a0] sm:$0xff] %vm775_vm2, %v19379_v3  ;;  %790 = vst.msk [vmem:[#allocation2 + $0x2a8] sm:$0xff] %vm775_vm2, %v19379_v3  ;;  %11215 = vmatprep.subr.mxu0 %v11989_v2  ;;  %v49_v27 = vld [vmem:[%s19364_s0 + $0x8] sm:$0xff]  ;;  %v50_v29 = vld [vmem:[%s19364_s0 + $0x10] sm:$0xff] }
   0x7   :  { %791 = vst.msk [vmem:[#allocation2 + $0x2b0] sm:$0xff] %vm775_vm2, %v19379_v3  ;;  %794 = vst.msk [vmem:[#allocation2 + $0x240] sm:$0xff] %vm775_vm2, %v19379_v3  ;;  %11216 = vmatpush3.msra.mxu0 %v11989_v2  ;;  %v51_v35 = vld [vmem:[%s19364_s0 + $0x18] sm:$0xff]  ;;  %v52_v36 = vld [vmem:[%s19364_s0 + $0x20] sm:$0xff] }
   0x8   :  { %795 = vst.msk [vmem:[#allocation2 + $0x248] sm:$0xff] %vm775_vm2, %v19379_v3  ;;  %796 = vst.msk [vmem:[#allocation2 + $0x250] sm:$0xff] %vm775_vm2, %v19379_v3  ;;  %11217 = vmatprep.subr.mxu0 %v12177_v5  ;;  %v53_v42 = vld [vmem:[%s19364_s0 + $0x28] sm:$0xff]  ;;  %v54_v45 = vld [vmem:[%s19364_s0 + $0x30] sm:$0xff] }
   0x9   :  { %802 = vst.msk [vmem:[#allocation2 + $0x4c0] sm:$0xff] %vm775_vm2, %v19379_v3  ;;  %803 = vst.msk [vmem:[#allocation2 + $0x4c8] sm:$0xff] %vm775_vm2, %v19379_v3  ;;  %11218 = vmatpush3.msra.mxu0 %v12177_v5  ;;  %v1096_v10 = vld [vmem:[#allocation2 + $0x27] ss:$2 sm:$0xff]  ;;  %v12310_v14 = vld [vmem:[#allocation2 + $0x26] ss:$2 sm:$0xff] }
   0xa   :  { %804 = vst.msk [vmem:[#allocation2 + $0x4d0] sm:$0xff] %vm775_vm2, %v19379_v3  ;;  %11219 = vmatprep.subr.mxu0 %v117_v6  ;;  %1733 = vrot.lane.b32.xlu0 %v1096_v10, %s11893_s15  ;;  %v1925_v11 = vrot.slane %v1096_v10, 1  ;;  %v2021_v17 = vrot.slane %v12310_v14, 2  ;;  %v1813_v30 = vrot.slane %v12310_v14, 1  ;;  %v55_v54 = vld [vmem:[%s19364_s0 + $0x38] sm:$0xff]  ;;  %v56_v55 = vld [vmem:[%s19364_s0 + $0x40] sm:$0xff] }
   0xb   :  { %784 = vst.msk [vmem:[#allocation2 + $0x38] sm:$0x3] %vm779_vm3, %v19379_v3  ;;  %780 = vst.msk [vmem:[#allocation2 + $0x18] sm:$0x3] %vm779_vm3, %v19379_v3  ;;  %11220 = vmatpush3.msra.mxu0 %v117_v6  ;;  %v940_v41 = vld [vmem:[#allocation2 + $0x6] ss:$2 sm:$0xff] }
   0xc   :  { %788 = vst.msk [vmem:[#allocation2 + $0x298] sm:$0x3] %vm779_vm3, %v19379_v3  ;;  %792 = vst.msk [vmem:[#allocation2 + $0x2b8] sm:$0x3] %vm779_vm3, %v19379_v3  ;;  %11221 = vmatprep.subr.mxu0 %v116_v7  ;;  %v1092_v46 = vld [vmem:[#allocation2 + $0x7] ss:$2 sm:$0xff] }
   0xd   :  { %797 = vst.msk [vmem:[#allocation2 + $0x258] sm:$0x3] %vm779_vm3, %v19379_v3  ;;  %805 = vst.msk [vmem:[#allocation2 + $0x4d8] sm:$0x3] %vm779_vm3, %v19379_v3  ;;  %11222 = vmatpush3.msra.mxu0 %v116_v7  ;;  %v1340_v48 = vrot.slane %v940_v41, 1  ;;  %v1452_v57 = vrot.slane %v1092_v46, 1 }
   0xe   :  { %811 = vst.msk [vmem:[#allocation2 + $0x46] sm:$0x3] %vm779_vm3, %v19379_v3  ;;  %812 = vst.msk [vmem:[#allocation2 + $0x66] sm:$0x3] %vm779_vm3, %v19379_v3  ;;  %11223 = vmatprep.subr.mxu0 %v115_v8  ;;  %v1020_v19 = vld [vmem:[#allocation2 + $0x2a6] ss:$2 sm:$0xff] }
   0xf   :  { %813 = vst.msk [vmem:[#allocation2 + $0x86] sm:$0x3] %vm779_vm3, %v19379_v3  ;;  %814 = vst.msk [vmem:[#allocation2 + $0xa6] sm:$0x3] %vm779_vm3, %v19379_v3  ;;  %11224 = vmatpush3.msra.mxu0 %v115_v8  ;;  %v1172_v23 = vld [vmem:[#allocation2 + $0x2a7] ss:$2 sm:$0xff] }
  0x10   :  { %815 = vst.msk [vmem:[#allocation2 + $0xc6] sm:$0x3] %vm779_vm3, %v19379_v3  ;;  %816 = vst.msk [vmem:[#allocation2 + $0xe6] sm:$0x3] %vm779_vm3, %v19379_v3  ;;  %11225 = vmatprep.subr.mxu0 %v114_v9  ;;  %v1837_v25 = vrot.slane %v1020_v19, 1  ;;  %1749 = vrot.lane.b32.xlu1 %v1172_v23, %s11893_s15  ;;  %v1949_v32 = vrot.slane %v1172_v23, 1 }
  0x11   :  { %817 = vst.msk [vmem:[#allocation2 + $0x106] sm:$0x3] %vm779_vm3, %v19379_v3  ;;  %818 = vst.msk [vmem:[#allocation2 + $0x126] sm:$0x3] %vm779_vm3, %v19379_v3  ;;  %11226 = vmatpush3.msra.mxu0 %v114_v9  ;;  %v2045_v39 = vrot.slane %v1020_v19, 2  ;;  %v57_v63 = vld [vmem:[%s19364_s0 + $0x48] sm:$0xff] }
  0x12   :  { %819 = vst.msk [vmem:[#allocation2 + $0x146] sm:$0x3] %vm779_vm3, %v19379_v3  ;;  %820 = vst.msk [vmem:[#allocation2 + $0x166] sm:$0x3] %vm779_vm3, %v19379_v3  ;;  %11227 = vmatprep.subr.mxu0 %v113_v16  ;;  %v1012_v44 = vld [vmem:[#allocation2 + $0x246] ss:$2 sm:$0xff] }
  0x13   :  { %821 = vst.msk [vmem:[#allocation2 + $0x186] sm:$0x3] %vm779_vm3, %v19379_v3  ;;  %822 = vst.msk [vmem:[#allocation2 + $0x1a6] sm:$0x3] %vm779_vm3, %v19379_v3  ;;  %11228 = vmatpush3.msra.mxu0 %v113_v16  ;;  %v3045_v52 = vrot.slane %v1012_v44, 1  ;;  %v3071_v61 = vrot.slane %v1012_v44, 2 }
  0x14   :  { %823 = vst.msk [vmem:[#allocation2 + $0x1c6] sm:$0x3] %vm779_vm3, %v19379_v3  ;;  %824 = vst.msk [vmem:[#allocation2 + $0x1e6] sm:$0x3] %vm779_vm3, %v19379_v3  ;;  %11229 = vmatprep.subr.mxu0 %v112_v22  ;;  %v12363_v56 = vld [vmem:[#allocation2 + $0x287] ss:$2 sm:$0xff] }
  0x15   :  { %825 = vst.msk [vmem:[#allocation2 + $0x206] sm:$0x3] %vm779_vm3, %v19379_v3  ;;  %826 = vst.msk [vmem:[#allocation2 + $0x226] sm:$0x3] %vm779_vm3, %v19379_v3  ;;  %11230 = vmatpush3.msra.mxu0 %v112_v22  ;;  %v1088_v0 = vld [vmem:[#allocation2 + $0x4c6] ss:$2 sm:$0xff] }
  0x16   :  { %827 = vst.msk [vmem:[#allocation2 + $0x2c6] sm:$0x3] %vm779_vm3, %v19379_v3  ;;  %828 = vst.msk [vmem:[#allocation2 + $0x2e6] sm:$0x3] %vm779_vm3, %v19379_v3  ;;  %11232 = vmatmul.mubr.msk.f32.vlgmr.msra.gmra.mxu0 %vm129_vm1, %v49_v27  ;;  %v58_v2 = vld [vmem:[%s19364_s0 + $0x50] sm:$0xff]  ;;  %v1549_v4 = vrot.slane %v940_v41, 2 }
  0x17   :  { %829 = vst.msk [vmem:[#allocation2 + $0x306] sm:$0x3] %vm779_vm3, %v19379_v3  ;;  %830 = vst.msk [vmem:[#allocation2 + $0x326] sm:$0x3] %vm779_vm3, %v19379_v3  ;;  %11234 = vmatprep.mubr.msk.f32.mxu0 %vm129_vm1, %v50_v29  ;;  %v1016_v6 = vld [vmem:[#allocation2 + $0x286] ss:$2 sm:$0xff] }
  0x18   :  { %831 = vst.msk [vmem:[#allocation2 + $0x346] sm:$0x3] %vm779_vm3, %v19379_v3  ;;  %832 = vst.msk [vmem:[#allocation2 + $0x366] sm:$0x3] %vm779_vm3, %v19379_v3 }
  0x19   :  { %833 = vst.msk [vmem:[#allocation2 + $0x386] sm:$0x3] %vm779_vm3, %v19379_v3  ;;  %834 = vst.msk [vmem:[#allocation2 + $0x3a6] sm:$0x3] %vm779_vm3, %v19379_v3 }
  0x1a   :  { %835 = vst.msk [vmem:[#allocation2 + $0x3c6] sm:$0x3] %vm779_vm3, %v19379_v3  ;;  %836 = vst.msk [vmem:[#allocation2 + $0x3e6] sm:$0x3] %vm779_vm3, %v19379_v3  ;;  %11235 = vmatmul.mubr.msk.f32.gmra.mxu0 %vm129_vm1, %v51_v35 }
  0x1b   :  { %837 = vst.msk [vmem:[#allocation2 + $0x406] sm:$0x3] %vm779_vm3, %v19379_v3  ;;  %838 = vst.msk [vmem:[#allocation2 + $0x426] sm:$0x3] %vm779_vm3, %v19379_v3  ;;  %11237 = vmatprep.mubr.msk.f32.mxu0 %vm129_vm1, %v52_v36 }
  0x1c   :  { %839 = vst.msk [vmem:[#allocation2 + $0x446] sm:$0x3] %vm779_vm3, %v19379_v3  ;;  %840 = vst.msk [vmem:[#allocation2 + $0x466] sm:$0x3] %vm779_vm3, %v19379_v3 }
  0x1d   :  { %841 = vst.msk [vmem:[#allocation2 + $0x486] sm:$0x3] %vm779_vm3, %v19379_v3  ;;  %842 = vst.msk [vmem:[#allocation2 + $0x4a6] sm:$0x3] %vm779_vm3, %v19379_v3 }
  0x1e   :  { %843 = vst.msk [vmem:[#allocation2 + $0x58] sm:$0x3] %vm779_vm3, %v19379_v3  ;;  %844 = vst.msk [vmem:[#allocation2 + $0x78] sm:$0x3] %vm779_vm3, %v19379_v3  ;;  %11238 = vmatmul.mubr.msk.f32.gmra.mxu0 %vm129_vm1, %v53_v42 }
  0x1f   :  { %845 = vst.msk [vmem:[#allocation2 + $0x98] sm:$0x3] %vm779_vm3, %v19379_v3  ;;  %846 = vst.msk [vmem:[#allocation2 + $0xb8] sm:$0x3] %vm779_vm3, %v19379_v3  ;;  %11240 = vmatprep.mubr.msk.f32.mxu0 %vm129_vm1, %v54_v45 }
  0x20   :  { %847 = vst.msk [vmem:[#allocation2 + $0xd8] sm:$0x3] %vm779_vm3, %v19379_v3  ;;  %848 = vst.msk [vmem:[#allocation2 + $0xf8] sm:$0x3] %vm779_vm3, %v19379_v3 }
  0x21   :  { %849 = vst.msk [vmem:[#allocation2 + $0x118] sm:$0x3] %vm779_vm3, %v19379_v3  ;;  %850 = vst.msk [vmem:[#allocation2 + $0x138] sm:$0x3] %vm779_vm3, %v19379_v3 }
  0x22   :  { %851 = vst.msk [vmem:[#allocation2 + $0x158] sm:$0x3] %vm779_vm3, %v19379_v3  ;;  %852 = vst.msk [vmem:[#allocation2 + $0x178] sm:$0x3] %vm779_vm3, %v19379_v3  ;;  %11241 = vmatmul.mubr.msk.f32.gmra.mxu0 %vm129_vm1, %v55_v54 }
  0x23   :  { %853 = vst.msk [vmem:[#allocation2 + $0x198] sm:$0x3] %vm779_vm3, %v19379_v3  ;;  %854 = vst.msk [vmem:[#allocation2 + $0x1b8] sm:$0x3] %vm779_vm3, %v19379_v3  ;;  %11243 = vmatprep.mubr.msk.f32.mxu0 %vm129_vm1, %v56_v55 }
  0x24   :  { %855 = vst.msk [vmem:[#allocation2 + $0x1d8] sm:$0x3] %vm779_vm3, %v19379_v3  ;;  %856 = vst.msk [vmem:[#allocation2 + $0x1f8] sm:$0x3] %vm779_vm3, %v19379_v3 }
  0x25   :  { %857 = vst.msk [vmem:[#allocation2 + $0x218] sm:$0x3] %vm779_vm3, %v19379_v3  ;;  %858 = vst.msk [vmem:[#allocation2 + $0x238] sm:$0x3] %vm779_vm3, %v19379_v3 }
  0x26   :  { %859 = vst.msk [vmem:[#allocation2 + $0x2d8] sm:$0x3] %vm779_vm3, %v19379_v3  ;;  %860 = vst.msk [vmem:[#allocation2 + $0x2f8] sm:$0x3] %vm779_vm3, %v19379_v3 }
  0x27   :  { %861 = vst.msk [vmem:[#allocation2 + $0x318] sm:$0x3] %vm779_vm3, %v19379_v3  ;;  %862 = vst.msk [vmem:[#allocation2 + $0x338] sm:$0x3] %vm779_vm3, %v19379_v3 }
  0x28   :  { %863 = vst.msk [vmem:[#allocation2 + $0x358] sm:$0x3] %vm779_vm3, %v19379_v3  ;;  %864 = vst.msk [vmem:[#allocation2 + $0x378] sm:$0x3] %vm779_vm3, %v19379_v3 }
  0x29   :  { %865 = vst.msk [vmem:[#allocation2 + $0x398] sm:$0x3] %vm779_vm3, %v19379_v3  ;;  %866 = vst.msk [vmem:[#allocation2 + $0x3b8] sm:$0x3] %vm779_vm3, %v19379_v3 }
  0x2a   :  { %867 = vst.msk [vmem:[#allocation2 + $0x3d8] sm:$0x3] %vm779_vm3, %v19379_v3  ;;  %868 = vst.msk [vmem:[#allocation2 + $0x3f8] sm:$0x3] %vm779_vm3, %v19379_v3 }
  0x2b   :  { %869 = vst.msk [vmem:[#allocation2 + $0x418] sm:$0x3] %vm779_vm3, %v19379_v3  ;;  %870 = vst.msk [vmem:[#allocation2 + $0x438] sm:$0x3] %vm779_vm3, %v19379_v3 }
  0x2c   :  { %871 = vst.msk [vmem:[#allocation2 + $0x458] sm:$0x3] %vm779_vm3, %v19379_v3  ;;  %872 = vst.msk [vmem:[#allocation2 + $0x478] sm:$0x3] %vm779_vm3, %v19379_v3 }
  0x2d   :  { %873 = vst.msk [vmem:[#allocation2 + $0x498] sm:$0x3] %vm779_vm3, %v19379_v3  ;;  %874 = vst.msk [vmem:[#allocation2 + $0x4b8] sm:$0x3] %vm779_vm3, %v19379_v3 }
  0x2e   :  { %3306 = vst.msk [vmem:[#allocation3 + $0x18] sm:$0xff] %vm1661_vm4, %v19379_v3  ;;  %3307 = vst.msk [vmem:[#allocation3 + $0x20] sm:$0xff] %vm1661_vm4, %v19379_v3  ;;  %v1098_v12 = vld [vmem:[#allocation2 + $0x37] ss:$2 sm:$0x3] }
  0x2f   :  { %3308 = vst.msk [vmem:[#allocation3 + $0x28] sm:$0x3] %vm3304_vm5, %v19379_v3  ;;  %3305 = vst.msk [vmem:[#allocation3 + $0x10] sm:$0x3] %vm3304_vm5, %v19379_v3  ;;  %v1926_v13 = vrot.slane %v1098_v12, 1 }
  0x30   :  { %3302 = vst.msk [vmem:[#allocation3] sm:$0xff] %vm1661_vm4, %v19379_v3  ;;  %3303 = vst.msk [vmem:[#allocation3 + $0x8] sm:$0xff] %vm1661_vm4, %v19379_v3  ;;  %v946_v15 = vld [vmem:[#allocation2 + $0x36] ss:$2 sm:$0x3] }
  0x31   :  { %3309 = vst.msk [vmem:[#allocation3 + $0x120] sm:$0xff] %vm1661_vm4, %v19379_v3  ;;  %3310 = vst.msk [vmem:[#allocation3 + $0x128] sm:$0xff] %vm1661_vm4, %v19379_v3  ;;  %v2022_v18 = vrot.slane %v946_v15, 2  ;;  %v1927_v20 = vsel %vm1339_vm6, %v1925_v11, %v1926_v13  ;;  %v1022_v21 = vld [vmem:[#allocation2 + $0x2b6] ss:$2 sm:$0x3] }
  0x32   :  { %3311 = vst.msk [vmem:[#allocation3 + $0x130] sm:$0x3] %vm3304_vm5, %v19379_v3  ;;  %3314 = vst.msk [vmem:[#allocation3 + $0x148] sm:$0x3] %vm3304_vm5, %v19379_v3  ;;  %1973 = vrot.lane.b32.xlu0 %v1927_v20, %s11894_s20  ;;  %v1838_v26 = vrot.slane %v1022_v21, 1  ;;  %v1814_v34 = vrot.slane %v946_v15, 1 }
  0x33   :  { %3312 = vst.msk [vmem:[#allocation3 + $0x138] sm:$0xff] %vm1661_vm4, %v19379_v3  ;;  %3313 = vst.msk [vmem:[#allocation3 + $0x140] sm:$0xff] %vm1661_vm4, %v19379_v3  ;;  %v2023_v24 = vsel %vm1548_vm7, %v2021_v17, %v2022_v18  ;;  %v1174_v28 = vld [vmem:[#allocation2 + $0x2b7] ss:$2 sm:$0x3]  ;;  %v2046_v40 = vrot.slane %v1022_v21, 2 }
  0x34   :  { %3316 = vst.msk [vmem:[#allocation3 + $0xf0] sm:$0xff] %vm1661_vm4, %v19379_v3  ;;  %3317 = vst.msk [vmem:[#allocation3 + $0xf8] sm:$0xff] %vm1661_vm4, %v19379_v3  ;;  %v1839_v31 = vsel %vm1339_vm6, %v1837_v25, %v1838_v26  ;;  %v1950_v33 = vrot.slane %v1174_v28, 1  ;;  %v1815_v37 = vsel %vm1339_vm6, %v1813_v30, %v1814_v34  ;;  %v942_v43 = vld [vmem:[#allocation2 + $0x16] ss:$2 sm:$0x3] }
  0x35   :  { %3318 = vst.msk [vmem:[#allocation3 + $0x100] sm:$0x3] %vm3304_vm5, %v19379_v3  ;;  %3321 = vst.msk [vmem:[#allocation3 + $0x118] sm:$0x3] %vm3304_vm5, %v19379_v3  ;;  %1861 = vrot.lane.b32.xlu1 %v1815_v37, %s11896_s29  ;;  %v2047_v49 = vsel %vm1548_vm7, %v2045_v39, %v2046_v40  ;;  %v1341_v50 = vrot.slane %v942_v43, 1  ;;  %v1550_v5 = vrot.slane %v942_v43, 2 }
  0x36   :  { %3319 = vst.msk [vmem:[#allocation3 + $0x108] sm:$0xff] %vm1661_vm4, %v19379_v3  ;;  %3320 = vst.msk [vmem:[#allocation3 + $0x110] sm:$0xff] %vm1661_vm4, %v19379_v3  ;;  %2069 = vrot.lane.b32.xlu0 %v2023_v24, %s11895_s24  ;;  %v1951_v38 = vsel %vm1339_vm6, %v1949_v32, %v1950_v33  ;;  %v1014_v47 = vld [vmem:[#allocation2 + $0x256] ss:$2 sm:$0x3] }
  0x37   :  { %3322 = vst.msk [vmem:[#allocation3 + $0x210] sm:$0xff] %vm1661_vm4, %v19379_v3  ;;  %3323 = vst.msk [vmem:[#allocation3 + $0x218] sm:$0xff] %vm1661_vm4, %v19379_v3  ;;  %v1094_v51 = vld [vmem:[#allocation2 + $0x17] ss:$2 sm:$0x3]  ;;  %v3046_v53 = vrot.slane %v1014_v47, 1  ;;  %v1342_v59 = vsel %vm1339_vm6, %v1340_v48, %v1341_v50 }
  0x38   :  { %3324 = vst.msk [vmem:[#allocation3 + $0x220] sm:$0x3] %vm3304_vm5, %v19379_v3  ;;  %3327 = vst.msk [vmem:[#allocation3 + $0x238] sm:$0x3] %vm3304_vm5, %v19379_v3  ;;  %v1453_v58 = vrot.slane %v1094_v51, 1  ;;  %v3072_v62 = vrot.slane %v1014_v47, 2 }
  0x39   :  { %3325 = vst.msk [vmem:[#allocation3 + $0x228] sm:$0xff] %vm1661_vm4, %v19379_v3  ;;  %3326 = vst.msk [vmem:[#allocation3 + $0x230] sm:$0xff] %vm1661_vm4, %v19379_v3  ;;  %1259 = vrot.lane.b32.xlu1 %v1092_v46, %s11893_s15  ;;  %v3047_v60 = vsel %vm1339_vm6, %v3045_v52, %v3046_v53  ;;  %v1090_v1 = vld [vmem:[#allocation2 + $0x4d6] ss:$2 sm:$0x3] }
  0x3a   :  { %3329 = vst.msk [vmem:[#allocation3 + $0x36] sm:$0x3] %vm3304_vm5, %v19379_v3  ;;  %3330 = vst.msk [vmem:[#allocation3 + $0x4e] sm:$0x3] %vm3304_vm5, %v19379_v3  ;;  %1877 = vrot.lane.b32.xlu0 %v1839_v31, %s11896_s29 }
  0x3b   :  { %3331 = vst.msk [vmem:[#allocation3 + $0x66] sm:$0x3] %vm3304_vm5, %v19379_v3  ;;  %3332 = vst.msk [vmem:[#allocation3 + $0x7e] sm:$0x3] %vm3304_vm5, %v19379_v3 }
  0x3c   :  { %3333 = vst.msk [vmem:[#allocation3 + $0x96] sm:$0x3] %vm3304_vm5, %v19379_v3  ;;  %3334 = vst.msk [vmem:[#allocation3 + $0xae] sm:$0x3] %vm3304_vm5, %v19379_v3 }
  0x3d   :  { %3335 = vst.msk [vmem:[#allocation3 + $0xc6] sm:$0x3] %vm3304_vm5, %v19379_v3  ;;  %3336 = vst.msk [vmem:[#allocation3 + $0xde] sm:$0x3] %vm3304_vm5, %v19379_v3  ;;  %1275 = vrot.lane.b32.xlu1 %v12363_v56, %s11893_s15 }
  0x3e   :  { %3337 = vst.msk [vmem:[#allocation3 + $0x156] sm:$0x3] %vm3304_vm5, %v19379_v3  ;;  %3338 = vst.msk [vmem:[#allocation3 + $0x16e] sm:$0x3] %vm3304_vm5, %v19379_v3  ;;  %1989 = vrot.lane.b32.xlu0 %v1951_v38, %s11894_s20 }
  0x3f   :  { %3339 = vst.msk [vmem:[#allocation3 + $0x186] sm:$0x3] %vm3304_vm5, %v19379_v3  ;;  %3340 = vst.msk [vmem:[#allocation3 + $0x19e] sm:$0x3] %vm3304_vm5, %v19379_v3 }
  0x40   :  { %3341 = vst.msk [vmem:[#allocation3 + $0x1b6] sm:$0x3] %vm3304_vm5, %v19379_v3  ;;  %3342 = vst.msk [vmem:[#allocation3 + $0x1ce] sm:$0x3] %vm3304_vm5, %v19379_v3 }
  0x41   :  { %3343 = vst.msk [vmem:[#allocation3 + $0x1e6] sm:$0x3] %vm3304_vm5, %v19379_v3  ;;  %3344 = vst.msk [vmem:[#allocation3 + $0x1fe] sm:$0x3] %vm3304_vm5, %v19379_v3  ;;  %3051 = vrot.lane.b32.xlu1 %v3047_v60, %s11896_s29 }
  0x42   :  { %3345 = vst.msk [vmem:[#allocation3 + $0x40] sm:$0x3] %vm3304_vm5, %v19379_v3  ;;  %3346 = vst.msk [vmem:[#allocation3 + $0x58] sm:$0x3] %vm3304_vm5, %v19379_v3  ;;  %2085 = vrot.lane.b32.xlu0 %v2047_v49, %s11895_s24 }
  0x43   :  { %3347 = vst.msk [vmem:[#allocation3 + $0x70] sm:$0x3] %vm3304_vm5, %v19379_v3  ;;  %3348 = vst.msk [vmem:[#allocation3 + $0x88] sm:$0x3] %vm3304_vm5, %v19379_v3 }
  0x44   :  { %3349 = vst.msk [vmem:[#allocation3 + $0xa0] sm:$0x3] %vm3304_vm5, %v19379_v3  ;;  %3350 = vst.msk [vmem:[#allocation3 + $0xb8] sm:$0x3] %vm3304_vm5, %v19379_v3 }
  0x45   :  { %3351 = vst.msk [vmem:[#allocation3 + $0xd0] sm:$0x3] %vm3304_vm5, %v19379_v3  ;;  %3352 = vst.msk [vmem:[#allocation3 + $0xe8] sm:$0x3] %vm3304_vm5, %v19379_v3 }
  0x46   :  { %3353 = vst.msk [vmem:[#allocation3 + $0x160] sm:$0x3] %vm3304_vm5, %v19379_v3  ;;  %3354 = vst.msk [vmem:[#allocation3 + $0x178] sm:$0x3] %vm3304_vm5, %v19379_v3  ;;  %1388 = vrot.lane.b32.xlu0 %v1342_v59, %s11896_s29 }
  0x47   :  { %3355 = vst.msk [vmem:[#allocation3 + $0x190] sm:$0x3] %vm3304_vm5, %v19379_v3  ;;  %3356 = vst.msk [vmem:[#allocation3 + $0x1a8] sm:$0x3] %vm3304_vm5, %v19379_v3 }
  0x48   :  { %3357 = vst.msk [vmem:[#allocation3 + $0x1c0] sm:$0x3] %vm3304_vm5, %v19379_v3  ;;  %3358 = vst.msk [vmem:[#allocation3 + $0x1d8] sm:$0x3] %vm3304_vm5, %v19379_v3 }
  0x49   :  { %3359 = vst.msk [vmem:[#allocation3 + $0x1f0] sm:$0x3] %vm3304_vm5, %v19379_v3  ;;  %3360 = vst.msk [vmem:[#allocation3 + $0x208] sm:$0x3] %vm3304_vm5, %v19379_v3 }
  0x4a   :  { %21 = vsyncpa [#allocation9], 0  ;;  %11244 = vmatmul.mubr.msk.f32.gmra.mxu0 %vm129_vm1, %v57_v63  ;;  %v1454_v7 = vsel %vm1339_vm6, %v1452_v57, %v1453_v58  ;;  %v1018_v8 = vld [vmem:[#allocation2 + $0x296] ss:$2 sm:$0x3]  ;;  %v3073_v9 = vsel %vm1548_vm7, %v3071_v61, %v3072_v62  ;;  %v3048_v10 = vrot.slane %v1088_v0, 1  ;;  %v1551_v18 = vsel %vm1548_vm7, %v1549_v4, %v1550_v5 }
  0x4b   :  { %v3049_v11 = vrot.slane %v1090_v1, 1  ;;  %11246 = vmatprep.mubr.msk.f32.mxu0 %vm129_vm1, %v58_v2  ;;  %v59_v12 = vld [vmem:[%s19364_s0 + $0x58] sm:$0xff]  ;;  %v60_v13 = vld [vmem:[%s19364_s0 + $0x60] sm:$0xff]  ;;  %1500 = vrot.lane.b32.xlu0 %v1454_v7, %s11894_s20  ;;  %v1364_v15 = vrot.slane %v1016_v6, 1  ;;  %v1365_v16 = vrot.slane %v1018_v8, 1  ;;  %v61_v17 = vld [vmem:[%s19364_s0 + $0x68] sm:$0xff] }
  0x4c   :  { %3077 = vrot.lane.b32.xlu1 %v3073_v9, %s11895_s24  ;;  %v3074_v20 = vrot.slane %v1088_v0, 2  ;;  %v3075_v21 = vrot.slane %v1090_v1, 2  ;;  %v1170_v22 = vld [vmem:[#allocation2 + $0x297] ss:$2 sm:$0x3]  ;;  %v12399_v23 = vld [vmem:[#allocation3 + $0x13e] sm:$0xff] }
  0x4d   :  { %v3050_v19 = vsel %vm1339_vm6, %v3048_v10, %v3049_v11  ;;  %v12401_v24 = vld [vmem:[#allocation3 + $0x146] sm:$0xf]  ;;  %v62_v25 = vld [vmem:[%s19364_s0 + $0x70] sm:$0xff]  ;;  %v1366_v26 = vsel %vm1339_vm6, %v1364_v15, %v1365_v16  ;;  %v1476_v27 = vrot.slane %v12363_v56, 1  ;;  %v1477_v28 = vrot.slane %v1170_v22, 1  ;;  %v63_v32 = vld [vmem:[%s19364_s0 + $0x78] sm:$0xff] }
  0x4e   :  { %11247 = vmatmul.mubr.msk.f32.gmra.mxu0 %vm129_vm1, %v59_v12  ;;  %v3076_v29 = vsel %vm1548_vm7, %v3074_v20, %v3075_v21  ;;  %v4090_v30 = vrot.slane %v12399_v23, 1  ;;  %v4091_v31 = vrot.slane %v12401_v24, 1  ;;  %v3377_v33 = vld [vmem:[#allocation3 + $0x6] sm:$0xff]  ;;  %v3378_v34 = vld [vmem:[#allocation3 + $0xe] sm:$0xf]  ;;  %v1573_v36 = vrot.slane %v1016_v6, 2 }
  0x4f   :  { %11249 = vmatprep.mubr.msk.f32.mxu0 %vm129_vm1, %v60_v13  ;;  %1597 = vrot.lane.b32.xlu0 %v1551_v18, %s11895_s24  ;;  %v64_v35 = vld [vmem:[%s19364_s0 + $0x80] sm:$0xff]  ;;  %v1574_v37 = vrot.slane %v1018_v8, 2  ;;  %v1478_v38 = vsel %vm1339_vm6, %v1476_v27, %v1477_v28  ;;  %v3572_v40 = vrot.slane %v3377_v33, 1  ;;  %v3573_v41 = vrot.slane %v3378_v34, 1  ;;  %v65_v42 = vld [vmem:[%s19364_s0 + $0x88] sm:$0xff]  ;;  %v66_v43 = vld [vmem:[%s19364_s0 + $0x90] sm:$0xff] }
  0x50   :  { %3053 = vrot.lane.b32.xlu1 %v3050_v19, %s11896_s29  ;;  %v4092_v39 = vsel %vm1339_vm6, %v4090_v30, %v4091_v31  ;;  %v1164_v45 = vld [vmem:[#allocation2 + $0x247] ss:$2 sm:$0xff]  ;;  %v3668_v47 = vrot.slane %v3377_v33, 2  ;;  %v3669_v48 = vrot.slane %v3378_v34, 2  ;;  %v67_v49 = vld [vmem:[%s19364_s0 + $0x98] sm:$0xff]  ;;  %v3765_v55 = vrot.slane %v3377_v33, 3 }
  0x51   :  { %v1575_v44 = vsel %vm1548_vm7, %v1573_v36, %v1574_v37  ;;  %v3574_v46 = vsel %vm1339_vm6, %v3572_v40, %v3573_v41  ;;  %v1166_v50 = vld [vmem:[#allocation2 + $0x257] ss:$2 sm:$0x3]  ;;  %v68_v51 = vld [vmem:[%s19364_s0 + $0xa0] sm:$0xff]  ;;  %v3059_v52 = vrot.slane %v1164_v45, 1  ;;  %v3766_v56 = vrot.slane %v3378_v34, 3 }
  0x52   :  { %11250 = vmatmul.mubr.msk.f32.gmra.mxu0 %vm129_vm1, %v61_v17  ;;  %v3060_v53 = vrot.slane %v1166_v50, 1  ;;  %v3670_v54 = vsel %vm1548_vm7, %v3668_v47, %v3669_v48  ;;  %v69_v57 = vld [vmem:[%s19364_s0 + $0xa8] sm:$0xff]  ;;  %v70_v58 = vld [vmem:[%s19364_s0 + $0xb0] sm:$0xff]  ;;  %vm3764_vm8 = vcmask 1044480   ;;  %v3862_v61 = vrot.slane %v3377_v33, 4  ;;  %v71_v63 = vld [vmem:[%s19364_s0 + $0xb8] sm:$0xff] }
  0x53   :  { %11252 = vmatprep.mubr.msk.f32.mxu0 %vm129_vm1, %v62_v25  ;;  %1404 = vrot.lane.b32.xlu0 %v1366_v26, %s11896_s29  ;;  %v3767_v60 = vsel %vm3764_vm8, %v3765_v55, %v3766_v56  ;;  %v3863_v62 = vrot.slane %v3378_v34, 4  ;;  %v1240_v0 = vld [vmem:[#allocation2 + $0x4c7] ss:$2 sm:$0xff]  ;;  %v1242_v1 = vld [vmem:[#allocation2 + $0x4d7] ss:$2 sm:$0x3] }
  0x54   :  { %3079 = vrot.lane.b32.xlu1 %v3076_v29, %s11895_s24  ;;  %v3061_v59 = vsel %vm1339_vm6, %v3059_v52, %v3060_v53  ;;  %v72_v2 = vld [vmem:[%s19364_s0 + $0xc0] sm:$0xff]  ;;  %vm3861_vm9 = vcmask 1043456   ;;  %s11897_s16 = smov 48   ;;  %v3062_v5 = vrot.slane %v1240_v0, 1  ;;  %v3063_v6 = vrot.slane %v1242_v1, 1  ;;  %v73_v9 = vld [vmem:[%s19364_s0 + $0xc8] sm:$0xff] }
  0x55   :  { %v12472_v4 = vld [vmem:[#allocation3 + $0x26] sm:$0xf]  ;;  %v3864_v7 = vsel %vm3861_vm9, %v3862_v61, %v3863_v62  ;;  %v12481_v10 = vld [vmem:[#allocation3 + $0x1e] sm:$0xff]  ;;  %v74_v12 = vld [vmem:[%s19364_s0 + $0xd0] sm:$0xff]  ;;  %s11898_s22 = smov 64   ;;  %v4187_v40 = vrot.slane %v12401_v24, 2 }
  0x56   :  { %11253 = vmatmul.mubr.msk.f32.gmra.mxu0 %vm129_vm1, %v63_v32  ;;  %v3866_v8 = vrot.slane %v12472_v4, 4  ;;  %v3411_v11 = vld [vmem:[#allocation3 + $0x26] sm:$0xf]  ;;  %v4354_v13 = vrot.slane %v12481_v10, 4  ;;  %v3064_v15 = vsel %vm1339_vm6, %v3062_v5, %v3063_v6  ;;  %v4066_v16 = vrot.slane %v12481_v10, 1  ;;  %v75_v19 = vld [vmem:[%s19364_s0 + $0xd8] sm:$0xff] }
  0x57   :  { %11255 = vmatprep.mubr.msk.f32.mxu0 %vm129_vm1, %v64_v35  ;;  %1516 = vrot.lane.b32.xlu0 %v1478_v38, %s11894_s20  ;;  %v4067_v17 = vrot.slane %v3411_v11, 1  ;;  %v76_v20 = vld [vmem:[%s19364_s0 + $0xe0] sm:$0xff]  ;;  %v4162_v22 = vrot.slane %v12481_v10, 2  ;;  %v4163_v25 = vrot.slane %v3411_v11, 2  ;;  %v77_v26 = vld [vmem:[%s19364_s0 + $0xe8] sm:$0xff]  ;;  %v78_v27 = vld [vmem:[%s19364_s0 + $0xf0] sm:$0xff] }
  0x58   :  { %4130 = vrot.lane.b32.xlu1 %v4092_v39, %s11896_s29  ;;  %v3867_v18 = vsel %vm3861_vm9, %v4354_v13, %v3866_v8  ;;  %v4258_v29 = vrot.slane %v12481_v10, 3  ;;  %v4259_v31 = vrot.slane %v3411_v11, 3  ;;  %v79_v32 = vld [vmem:[%s19364_s0 + $0xf8] sm:$0xff]  ;;  %v80_v33 = vld [vmem:[%s19364_s0 + $0x100] sm:$0xff]  ;;  %v4355_v35 = vrot.slane %v3411_v11, 4  ;;  %v81_v36 = vld [vmem:[%s19364_s0 + $0x108] sm:$0xff] }
  0x59   :  { %v4068_v21 = vsel %vm1339_vm6, %v4066_v16, %v4067_v17  ;;  %v4164_v28 = vsel %vm1548_vm7, %v4162_v22, %v4163_v25  ;;  %v82_v37 = vld [vmem:[%s19364_s0 + $0x110] sm:$0xff]  ;;  %v4186_v39 = vrot.slane %v12399_v23, 2  ;;  %v12544_v41 = vld [vmem:[#allocation3 + $0x126] sm:$0xff]  ;;  %v4283_v50 = vrot.slane %v12401_v24, 3  ;;  %v99_v25 = vld [vmem:[%s19364_s0 + $0x198] sm:$0xff] }
  0x5a   :  { %11256 = vmatmul.mubr.msk.f32.gmra.mxu0 %vm129_vm1, %v65_v42  ;;  %v4260_v34 = vsel %vm3764_vm8, %v4258_v29, %v4259_v31  ;;  %v4356_v38 = vsel %vm3861_vm9, %v4354_v13, %v4355_v35  ;;  %v3394_v42 = vld [vmem:[#allocation3 + $0x12e] sm:$0xf]  ;;  %v3789_v52 = vrot.slane %v12544_v41, 3  ;;  %v3672_v1 = vrot.slane %v12472_v4, 2  ;;  %v92_v5 = vld [vmem:[%s19364_s0 + $0x160] sm:$0xff]  ;;  %v95_v13 = vld [vmem:[%s19364_s0 + $0x178] sm:$0xff] }
  0x5b   :  { %11258 = vmatprep.mubr.msk.f32.mxu0 %vm129_vm1, %v66_v43  ;;  %1613 = vrot.lane.b32.xlu0 %v1575_v44, %s11895_s24  ;;  %v83_v43 = vld [vmem:[%s19364_s0 + $0x118] sm:$0xff]  ;;  %v3692_v44 = vrot.slane %v12544_v41, 2  ;;  %v4188_v48 = vsel %vm1548_vm7, %v4186_v39, %v4187_v40  ;;  %v3790_v53 = vrot.slane %v3394_v42, 3  ;;  %v89_v62 = vld [vmem:[%s19364_s0 + $0x148] sm:$0xff]  ;;  %v104_v31 = vld [vmem:[%s19364_s0 + $0x1c0] sm:$0xff]  ;;  %vm1695_vm10 = vcmask 261120  }
  0x5c   :  { %3620 = vrot.lane.b32.xlu1 %v3574_v46, %s11896_s29  ;;  %v84_v46 = vld [vmem:[%s19364_s0 + $0x120] sm:$0xff]  ;;  %v3673_v6 = vsel %vm1548_vm7, %v4162_v22, %v3672_v1  ;;  %v93_v8 = vld [vmem:[%s19364_s0 + $0x168] sm:$0xff]  ;;  %7047 = vst.msk [vmem:[#allocation4] sm:$0xff] %vm1695_vm10, %v19379_v3  ;;  %7048 = vst.msk [vmem:[#allocation4 + $0x8] sm:$0xff] %vm1695_vm10, %v19379_v3  ;;  %vm1678_vm11 = vcmask 195584   ;;  %vm2186_vm12 = vcmask 326656  }
  0x5d   :  { %v3791_v55 = vsel %vm3764_vm8, %v3789_v52, %v3790_v53  ;;  %7051 = vst.msk [vmem:[#allocation4 + $0x18] sm:$0xff] %vm1695_vm10, %v19379_v3  ;;  %7052 = vst.msk [vmem:[#allocation4 + $0x20] sm:$0xff] %vm1695_vm10, %v19379_v3  ;;  %v109_v40 = vld [vmem:[%s19364_s0 + $0x1e8] sm:$0xff]  ;;  %vm4007_vm13 = vcmask 523264   ;;  %vm3990_vm14 = vcmask 392192   ;;  %vm4524_vm15 = vcmask 654336  }
  0x5e   :  { %11259 = vmatmul.mubr.msk.f32.gmra.mxu0 %vm129_vm1, %v67_v49  ;;  %v4282_v49 = vrot.slane %v12399_v23, 3  ;;  %7054 = vst.msk [vmem:[#allocation4 + $0x120] sm:$0xff] %vm1695_vm10, %v19379_v3  ;;  %7055 = vst.msk [vmem:[#allocation4 + $0x128] sm:$0xff] %vm1695_vm10, %v19379_v3  ;;  %vm7049_vm0 = vcmask 254976   ;;  %vm8302_vm3 = vcmask 517120   ;;  %vm11900_vm5 = vmmov 0  }
  0x5f   :  { %11261 = vmatprep.mubr.msk.f32.mxu0 %vm129_vm1, %v68_v51  ;;  %3035 = vrot.lane.b32.xlu0 %v1164_v45, %s11893_s15  ;;  %v3693_v45 = vrot.slane %v3394_v42, 2  ;;  %v85_v51 = vld [vmem:[%s19364_s0 + $0x128] sm:$0xff]  ;;  %7057 = vst.msk [vmem:[#allocation4 + $0x138] sm:$0xff] %vm1695_vm10, %v19379_v3  ;;  %7058 = vst.msk [vmem:[#allocation4 + $0x140] sm:$0xff] %vm1695_vm10, %v19379_v3 }
  0x60   :  { %3716 = vrot.lane.b32.xlu1 %v3670_v54, %s11895_s24  ;;  %v86_v54 = vld [vmem:[%s19364_s0 + $0x130] sm:$0xff]  ;;  %v4284_v56 = vsel %vm3764_vm8, %v4282_v49, %v4283_v50  ;;  %7061 = vst.msk [vmem:[#allocation4 + $0xf0] sm:$0xff] %vm1695_vm10, %v19379_v3  ;;  %7062 = vst.msk [vmem:[#allocation4 + $0xf8] sm:$0xff] %vm1695_vm10, %v19379_v3 }
  0x61   :  { %v3694_v47 = vsel %vm1548_vm7, %v3692_v44, %v3693_v45  ;;  %7067 = vst.msk [vmem:[#allocation4 + $0x210] sm:$0xff] %vm1695_vm10, %v19379_v3  ;;  %7068 = vst.msk [vmem:[#allocation4 + $0x218] sm:$0xff] %vm1695_vm10, %v19379_v3 }
  0x62   :  { %11262 = vmatmul.mubr.msk.f32.gmra.mxu0 %vm129_vm1, %v69_v57  ;;  %v4378_v57 = vrot.slane %v12399_v23, 4  ;;  %v103_v23 = vld [vmem:[%s19364_s0 + $0x1b8] sm:$0xff]  ;;  %8283 = vst.msk [vmem:[#allocation5] sm:$0xff] %vm4007_vm13, %v19379_v3  ;;  %8286 = vst.msk [vmem:[#allocation5 + $0x10] sm:$0xff] %vm4007_vm13, %v19379_v3 }
  0x63   :  { %11264 = vmatprep.mubr.msk.f32.mxu0 %vm129_vm1, %v70_v58  ;;  %3065 = vrot.lane.b32.xlu0 %v3061_v59, %s11894_s20  ;;  %v4379_v58 = vrot.slane %v12401_v24, 4  ;;  %v87_v59 = vld [vmem:[%s19364_s0 + $0x138] sm:$0xff]  ;;  %v3576_v24 = vrot.slane %v12472_v4, 1  ;;  %8288 = vst.msk [vmem:[#allocation5 + $0x80] sm:$0xff] %vm4007_vm13, %v19379_v3  ;;  %8290 = vst.msk [vmem:[#allocation5 + $0x90] sm:$0xff] %vm4007_vm13, %v19379_v3 }
  0x64   :  { %3813 = vrot.lane.b32.xlu1 %v3767_v60, %s11897_s16  ;;  %v88_v60 = vld [vmem:[%s19364_s0 + $0x140] sm:$0xff]  ;;  %8293 = vst.msk [vmem:[#allocation5 + $0x60] sm:$0xff] %vm4007_vm13, %v19379_v3  ;;  %8295 = vst.msk [vmem:[#allocation5 + $0x70] sm:$0xff] %vm4007_vm13, %v19379_v3 }
  0x65   :  { %v4380_v61 = vsel %vm3861_vm9, %v4378_v57, %v4379_v58  ;;  %8297 = vst.msk [vmem:[#allocation5 + $0xe0] sm:$0xff] %vm4007_vm13, %v19379_v3  ;;  %8299 = vst.msk [vmem:[#allocation5 + $0xf0] sm:$0xff] %vm4007_vm13, %v19379_v3 }
  0x66   :  { %11265 = vmatmul.mubr.msk.f32.gmra.mxu0 %vm129_vm1, %v71_v63  ;;  %v90_v63 = vld [vmem:[%s19364_s0 + $0x150] sm:$0xff] }
  0x67   :  { %11267 = vmatprep.mubr.msk.f32.mxu0 %vm129_vm1, %v72_v2  ;;  %3037 = vrot.lane.b32.xlu0 %v1240_v0, %s11893_s15  ;;  %v3577_v0 = vsel %vm1339_vm6, %v4066_v16, %v3576_v24  ;;  %v91_v2 = vld [vmem:[%s19364_s0 + $0x158] sm:$0xff]  ;;  %v96_v16 = vld [vmem:[%s19364_s0 + $0x180] sm:$0xff] }
  0x68   :  { %3910 = vrot.lane.b32.xlu1 %v3864_v7, %s11898_s22  ;;  %v3769_v7 = vrot.slane %v12472_v4, 3  ;;  %v3596_v4 = vrot.slane %v12544_v41, 1 }
  0x6a   :  { %11268 = vmatmul.mubr.msk.f32.gmra.mxu0 %vm129_vm1, %v73_v9  ;;  %v94_v9 = vld [vmem:[%s19364_s0 + $0x170] sm:$0xff]  ;;  %v3770_v11 = vsel %vm3764_vm8, %v4258_v29, %v3769_v7 }
  0x6b   :  { %11270 = vmatprep.mubr.msk.f32.mxu0 %vm129_vm1, %v74_v12  ;;  %3067 = vrot.lane.b32.xlu0 %v3064_v15, %s11894_s20  ;;  %v3597_v12 = vrot.slane %v3394_v42, 1  ;;  %v3396_v15 = vld [vmem:[#allocation3 + $0x146] sm:$0xf]  ;;  %v110_v42 = vld [vmem:[%s19364_s0 + $0x1f0] sm:$0xff] }
  0x6c   :  { %3912 = vrot.lane.b32.xlu1 %v3867_v18, %s11898_s22  ;;  %v3600_v18 = vrot.slane %v3396_v15, 1  ;;  %v3696_v22 = vrot.slane %v3396_v15, 2 }
  0x6d   :  { %v3598_v17 = vsel %vm1339_vm6, %v3596_v4, %v3597_v12 }
  0x6e   :  { %11271 = vmatmul.mubr.msk.f32.gmra.mxu0 %vm129_vm1, %v75_v19  ;;  %v97_v19 = vld [vmem:[%s19364_s0 + $0x188] sm:$0xff] }
  0x6f   :  { %11273 = vmatprep.mubr.msk.f32.mxu0 %vm129_vm1, %v76_v20  ;;  %4114 = vrot.lane.b32.xlu0 %v4068_v21, %s11896_s29  ;;  %v98_v20 = vld [vmem:[%s19364_s0 + $0x190] sm:$0xff]  ;;  %v3601_v21 = vsel %vm1339_vm6, %v4090_v30, %v3600_v18  ;;  %v101_v30 = vld [vmem:[%s19364_s0 + $0x1a8] sm:$0xff] }
  0x70   :  { %3732 = vrot.lane.b32.xlu1 %v3694_v47, %s11895_s24  ;;  %v111_v47 = vld [vmem:[%s19364_s0 + $0x1f8] sm:$0xff] }
  0x72   :  { %11274 = vmatmul.mubr.msk.f32.gmra.mxu0 %vm129_vm1, %v77_v26  ;;  %v100_v26 = vld [vmem:[%s19364_s0 + $0x1a0] sm:$0xff] }
  0x73   :  { %11276 = vmatprep.mubr.msk.f32.mxu0 %vm129_vm1, %v78_v27  ;;  %4210 = vrot.lane.b32.xlu0 %v4164_v28, %s11895_s24  ;;  %v3697_v27 = vsel %vm1548_vm7, %v4186_v39, %v3696_v22  ;;  %v102_v28 = vld [vmem:[%s19364_s0 + $0x1b0] sm:$0xff] }
  0x74   :  { %3829 = vrot.lane.b32.xlu1 %v3791_v55, %s11897_s16 }
  0x76   :  { %11277 = vmatmul.mubr.msk.f32.gmra.mxu0 %vm129_vm1, %v79_v32 }
  0x77   :  { %11279 = vmatprep.mubr.msk.f32.mxu0 %vm129_vm1, %v80_v33  ;;  %4306 = vrot.lane.b32.xlu0 %v4260_v34, %s11897_s16  ;;  %v105_v33 = vld [vmem:[%s19364_s0 + $0x1c8] sm:$0xff]  ;;  %v106_v34 = vld [vmem:[%s19364_s0 + $0x1d0] sm:$0xff] }
  0x7a   :  { %11280 = vmatmul.mubr.msk.f32.gmra.mxu0 %vm129_vm1, %v81_v36 }
  0x7b   :  { %11282 = vmatprep.mubr.msk.f32.mxu0 %vm129_vm1, %v82_v37  ;;  %4402 = vrot.lane.b32.xlu0 %v4356_v38, %s11898_s22  ;;  %v107_v37 = vld [vmem:[%s19364_s0 + $0x1d8] sm:$0xff]  ;;  %v108_v38 = vld [vmem:[%s19364_s0 + $0x1e0] sm:$0xff] }
  0x7c   :  { %v1734_v29 = vpop.permute.xlu0 %1733 }
  0x7d   :  { %v2117_v39 = vsel %vm775_vm2, %v12310_v14, %v1734_v29 }
  0x7e   :  { %11283 = vmatmul.mubr.msk.f32.gmra.mxu0 %vm129_vm1, %v83_v43 }
  0x7f   :  { %11285 = vmatprep.mubr.msk.f32.mxu0 %vm129_vm1, %v84_v46  ;;  %4226 = vrot.lane.b32.xlu0 %v4188_v48, %s11895_s24 }
  0x82   :  { %11286 = vmatmul.mubr.msk.f32.gmra.mxu0 %vm129_vm1, %v85_v51  ;;  %v12686_v35 = vpop.permute.xlu1 %1749 }
  0x83   :  { %11288 = vmatprep.mubr.msk.f32.mxu0 %vm129_vm1, %v86_v54  ;;  %4322 = vrot.lane.b32.xlu0 %v4284_v56, %s11897_s16 }
  0x86   :  { %11289 = vmatmul.mubr.msk.f32.gmra.mxu0 %vm129_vm1, %v87_v59 }
  0x87   :  { %11291 = vmatprep.mubr.msk.f32.mxu0 %vm129_vm1, %v88_v60  ;;  %4418 = vrot.lane.b32.xlu0 %v4380_v61, %s11898_s22 }
  0x8a   :  { %11292 = vmatmul.mubr.msk.f32.gmra.mxu0 %vm129_vm1, %v89_v62 }
  0x8b   :  { %11294 = vmatprep.mubr.msk.f32.mxu0 %vm129_vm1, %v90_v63  ;;  %3622 = vrot.lane.b32.xlu0 %v3577_v0, %s11896_s29 }
  0x8e   :  { %11295 = vmatmul.mubr.msk.f32.gmra.mxu0 %vm129_vm1, %v91_v2  ;;  %v12791_v2 = vld [vmem:[%s19366_s2] ss:$0 sm:$0xff] }
  0x8f   :  { %11297 = vmatprep.mubr.msk.f32.mxu0 %vm129_vm1, %v92_v5  ;;  %3718 = vrot.lane.b32.xlu0 %v3673_v6, %s11895_s24 }
  0x92   :  { %11298 = vmatmul.mubr.msk.f32.gmra.mxu0 %vm129_vm1, %v93_v8 }
  0x93   :  { %11300 = vmatprep.mubr.msk.f32.mxu0 %vm129_vm1, %v94_v9  ;;  %3815 = vrot.lane.b32.xlu0 %v3770_v11, %s11897_s16 }
  0x96   :  { %11301 = vmatmul.mubr.msk.f32.gmra.mxu0 %vm129_vm1, %v95_v13 }
  0x97   :  { %11303 = vmatprep.mubr.msk.f32.mxu0 %vm129_vm1, %v96_v16  ;;  %3636 = vrot.lane.b32.xlu0 %v3598_v17, %s11896_s29 }
  0x9a   :  { %11304 = vmatmul.mubr.msk.f32.gmra.mxu0 %vm129_vm1, %v97_v19 }
  0x9b   :  { %11306 = vmatprep.mubr.msk.f32.mxu0 %vm129_vm1, %v98_v20  ;;  %3638 = vrot.lane.b32.xlu0 %v3601_v21, %s11896_s29  ;;  %v2185_v20 = vld [vmem:[%s19367_s3 + $0x48] sm:$0xff] }
  0x9c   :  { %11327 = vmatprep.subr.mxu1 %v2185_v20 }
  0x9d   :  { %11328 = vmatpush3.msra.mxu1 %v2185_v20 }
  0x9e   :  { %11307 = vmatmul.mubr.msk.f32.gmra.mxu0 %vm129_vm1, %v99_v25  ;;  %v2184_v25 = vld [vmem:[%s19367_s3 + $0x40] sm:$0xff] }
  0x9f   :  { %11309 = vmatprep.mubr.msk.f32.mxu0 %vm129_vm1, %v100_v26  ;;  %3734 = vrot.lane.b32.xlu0 %v3697_v27, %s11895_s24 }
  0xa0   :  { %11329 = vmatprep.subr.mxu1 %v2184_v25 }
  0xa1   :  { %11330 = vmatpush3.msra.mxu1 %v2184_v25 }
  0xa2   :  { %11310 = vmatmul.mubr.msk.f32.gmra.mxu0 %vm129_vm1, %v101_v30 }
  0xa3   :  { %11312 = vmatprep.mubr.msk.f32.mxu0 %vm129_vm1, %v102_v28 }
  0xa4   :  { %v1974_v32 = vpop.permute.xlu0 %1973 }
  0xa6   :  { %11313 = vmatmul.mubr.msk.f32.gmra.mxu0 %vm129_vm1, %v103_v23 }
  0xa7   :  { %11315 = vmatprep.mubr.msk.f32.mxu0 %vm129_vm1, %v104_v31  ;;  %v1862_v41 = vpop.permute.xlu1 %1861 }
  0xa8   :  { %v2070_v36 = vpop.permute.xlu0 %2069  ;;  %v2133_v43 = vsel %vm1661_vm4, %v2117_v39, %v1862_v41  ;;  %v2182_v39 = vld [vmem:[%s19367_s3 + $0x30] sm:$0xff] }
  0xa9   :  { %v2149_v44 = vsel %vm1678_vm11, %v2133_v43, %v1974_v32 }
  0xaa   :  { %11316 = vmatmul.mubr.msk.f32.gmra.mxu0 %vm129_vm1, %v105_v33  ;;  %v2165_v45 = vsel %vm1695_vm10, %v2149_v44, %v2070_v36  ;;  %v2183_v33 = vld [vmem:[%s19367_s3 + $0x38] sm:$0xff] }
  0xab   :  { %11318 = vmatprep.mubr.msk.f32.mxu0 %vm129_vm1, %v106_v34  ;;  %11337 = vmatprep.mubr.msk.f32.mxu1 %vm2186_vm12, %v2165_v45 }
  0xac   :  { %v12723_v14 = vpop.permute.xlu0 %1877  ;;  %11331 = vmatprep.subr.mxu1 %v2183_v33 }
  0xad   :  { %11332 = vmatpush3.msra.mxu1 %v2183_v33 }
  0xae   :  { %11319 = vmatmul.mubr.msk.f32.gmra.mxu0 %vm129_vm1, %v107_v37  ;;  %11333 = vmatprep.subr.mxu1 %v2182_v39 }
  0xaf   :  { %11321 = vmatprep.mubr.msk.f32.mxu0 %vm129_vm1, %v108_v38  ;;  %11334 = vmatpush3.msra.mxu1 %v2182_v39 }
  0xb0   :  { %v12736_v46 = vpop.permute.xlu0 %1989 }
  0xb2   :  { %11322 = vmatmul.mubr.msk.f32.gmra.mxu0 %vm129_vm1, %v109_v40 }
  0xb3   :  { %11324 = vmatprep.mubr.msk.f32.mxu0 %vm129_vm1, %v110_v42 }
  0xb4   :  { %v12744_v48 = vpop.permute.xlu0 %2085 }
  0xb6   :  { %11325 = vmatmul.mubr.msk.f32.gmra.mxu0 %vm129_vm1, %v111_v47  ;;  %vm7338_vm1 = vcmask 785408  }
  0xb8   :  { %v12746_v49 = vpop.permute.xlu0 %1388 }
  0xbd   :  { %v12748_v50 = vpop.permute.xlu0 %1500 }
  0xc1   :  { %v12750_v51 = vpop.permute.xlu0 %1597 }
  0xc5   :  { %v12752_v52 = vpop.permute.xlu0 %1404 }
  0xc9   :  { %v12754_v53 = vpop.permute.xlu0 %1516 }
  0xca   :  { %19429 = vst [vmem:[#allocation12_spill] sm:$0xff] %v12754_v53 }
  0xcd   :  { %v12756_v54 = vpop.permute.xlu0 %1613 }
  0xce   :  { %19430 = vst [vmem:[#allocation13_spill] sm:$0xff] %v12756_v54 }
  0xd1   :  { %v12774_v55 = vpop.permute.xlu0 %3035 }
  0xd2   :  { %19431 = vst [vmem:[#allocation14_spill] sm:$0xff] %v12774_v55 }
  0xd5   :  { %v12776_v56 = vpop.permute.xlu0 %3065 }
  0xd6   :  { %19432 = vst [vmem:[#allocation15_spill] sm:$0xff] %v12776_v56  ;;  %v11233_v5 = vpop.f32.mrf.mxu0 }
  0xd8   :  { %v392_v6 = vpop.f32.mrf.mxu0 }
  0xd9   :  { %v12778_v57 = vpop.permute.xlu0 %3037  ;;  %v393_v8 = vadd.f32 %v12791_v2, %v392_v6 }
  0xda   :  { %19433 = vst [vmem:[#allocation16_spill] sm:$0xff] %v12778_v57  ;;  %v11236_v9 = vpop.f32.mrf.mxu0 }
  0xdb   :  { %v711_v11 = vmax.f32 %v393_v8, 0.0  ;;  %v408_v4 = vadd.f32 %v11236_v9, %v12791_v2 }
  0xdc   :  { %v402_v12 = vpop.f32.mrf.mxu0 }
  0xdd   :  { %v12780_v58 = vpop.permute.xlu0 %3067  ;;  %875 = vst.msk [vmem:[#allocation2 + $0x48] sm:$0xff] %vm775_vm2, %v711_v11  ;;  %v714_v13 = vmax.f32 %v408_v4, 0.0  ;;  %v403_v15 = vadd.f32 %v12791_v2, %v402_v12 }
  0xde   :  { %19434 = vst [vmem:[#allocation17_spill] sm:$0xff] %v12780_v58  ;;  %v11239_v16 = vpop.f32.mrf.mxu0 }
  0xdf   :  { %878 = vst.msk [vmem:[#allocation2 + $0x70] sm:$0xff] %vm775_vm2, %v714_v13  ;;  %v713_v17 = vmax.f32 %v403_v15, 0.0  ;;  %v418_v18 = vadd.f32 %v11239_v16, %v12791_v2 }
  0xe0   :  { %v412_v19 = vpop.f32.mrf.mxu0 }
  0xe1   :  { %v4115_v59 = vpop.permute.xlu0 %4114  ;;  %877 = vst.msk [vmem:[#allocation2 + $0x68] sm:$0xff] %vm775_vm2, %v713_v17  ;;  %v716_v21 = vmax.f32 %v418_v18, 0.0  ;;  %v413_v22 = vadd.f32 %v12791_v2, %v412_v19 }
  0xe2   :  { %v4450_v60 = vsel %vm1661_vm4, %v12481_v10, %v4115_v59  ;;  %v398_v10 = vadd.f32 %v11233_v5, %v12791_v2  ;;  %v11242_v27 = vpop.f32.mrf.mxu0  ;;  %v2181_v5 = vld [vmem:[%s19367_s3 + $0x28] sm:$0xff] }
  0xe3   :  { %880 = vst.msk [vmem:[#allocation2 + $0x90] sm:$0xff] %vm775_vm2, %v716_v21  ;;  %v715_v30 = vmax.f32 %v413_v22, 0.0  ;;  %v428_v28 = vadd.f32 %v11242_v27, %v12791_v2  ;;  %11335 = vmatprep.subr.mxu1 %v2181_v5 }
  0xe4   :  { %v712_v7 = vmax.f32 %v398_v10, 0.0  ;;  %v422_v32 = vpop.f32.mrf.mxu0  ;;  %11336 = vmatpush3.msra.mxu1 %v2181_v5 }
  0xe5   :  { %v4211_v61 = vpop.permute.xlu0 %4210  ;;  %879 = vst.msk [vmem:[#allocation2 + $0x88] sm:$0xff] %vm775_vm2, %v715_v30  ;;  %v718_v38 = vmax.f32 %v428_v28, 0.0  ;;  %v423_v40 = vadd.f32 %v12791_v2, %v422_v32 }
  0xe6   :  { %v4466_v24 = vsel %vm1695_vm10, %v4450_v60, %v4211_v61  ;;  %876 = vst.msk [vmem:[#allocation2 + $0x50] sm:$0xff] %vm775_vm2, %v712_v7  ;;  %v954_v42 = vld [vmem:[#allocation2 + $0x76] ss:$2 sm:$0x3] }
  0xe7   :  { %882 = vst.msk [vmem:[#allocation2 + $0xb0] sm:$0xff] %vm775_vm2, %v718_v38  ;;  %v717_v60 = vmax.f32 %v423_v40, 0.0  ;;  %v1817_v12 = vrot.slane %v954_v42, 1  ;;  %v1106_v20 = vld [vmem:[#allocation2 + $0x77] ss:$2 sm:$0x3] }
  0xe8   :  { %v952_v61 = vld [vmem:[#allocation2 + $0x66] ss:$2 sm:$0xff] }
  0xe9   :  { %v4307_v62 = vpop.permute.xlu0 %4306  ;;  %881 = vst.msk [vmem:[#allocation2 + $0xa8] sm:$0xff] %vm775_vm2, %v717_v60  ;;  %v1816_v4 = vrot.slane %v952_v61, 1 }
  0xea   :  { %v4482_v63 = vsel %vm3990_vm14, %v4466_v24, %v4307_v62  ;;  %v1104_v62 = vld [vmem:[#allocation2 + $0x67] ss:$2 sm:$0xff]  ;;  %v12831_v7 = vld [vmem:[#allocation2 + $0x96] ss:$2 sm:$0x3] }
  0xeb   :  { %v1347_v19 = vrot.slane %v12831_v7, 1  ;;  %v1110_v25 = vld [vmem:[#allocation2 + $0x97] ss:$2 sm:$0x3]  ;;  %v1928_v30 = vrot.slane %v1104_v62, 1  ;;  %v1818_v28 = vsel %vm1339_vm6, %v1816_v4, %v1817_v12  ;;  %v1556_v60 = vrot.slane %v12831_v7, 2 }
  0xec   :  { %v956_v15 = vld [vmem:[#allocation2 + $0x86] ss:$2 sm:$0xff]  ;;  %v1108_v22 = vld [vmem:[#allocation2 + $0x87] ss:$2 sm:$0xff] }
  0xed   :  { %v4403_v0 = vpop.permute.xlu0 %4402  ;;  %v950_v26 = vld [vmem:[#allocation2 + $0x56] ss:$2 sm:$0x3]  ;;  %v1100_v29 = vld [vmem:[#allocation2 + $0x47] ss:$2 sm:$0xff]  ;;  %v1346_v18 = vrot.slane %v956_v15, 1 }
  0xee   :  { %v4498_v1 = vsel %vm4007_vm13, %v4482_v63, %v4403_v0  ;;  %v948_v23 = vld [vmem:[#allocation2 + $0x46] ss:$2 sm:$0xff]  ;;  %v1553_v31 = vrot.slane %v950_v26, 2  ;;  %1261 = vrot.lane.b32.xlu1 %v1100_v29, %s11893_s15  ;;  %v1344_v37 = vrot.slane %v950_v26, 1  ;;  %v1455_v59 = vrot.slane %v1100_v29, 1 }
  0xef   :  { %11517 = vmatprep.mubr.msk.f32.mxu0 %vm4524_vm15, %v4498_v1  ;;  %v1552_v34 = vrot.slane %v948_v23, 2  ;;  %v1343_v36 = vrot.slane %v948_v23, 1  ;;  %v1102_v45 = vld [vmem:[#allocation2 + $0x57] ss:$2 sm:$0x3]  ;;  %v2024_v0 = vrot.slane %v952_v61, 2  ;;  %v1348_v33 = vsel %vm1339_vm6, %v1346_v18, %v1347_v19 }
  0xf0   :  { %v2025_v1 = vrot.slane %v954_v42, 2  ;;  %v1456_v10 = vrot.slane %v1102_v45, 1  ;;  %v1929_v29 = vrot.slane %v1106_v20, 1 }
  0xf1   :  { %v1554_v43 = vsel %vm1548_vm7, %v1552_v34, %v1553_v31  ;;  %v1345_v44 = vsel %vm1339_vm6, %v1343_v36, %v1344_v37  ;;  %v1458_v34 = vrot.slane %v1108_v22, 1  ;;  %v1459_v36 = vrot.slane %v1110_v25, 1 }
  0xf2   :  { %1599 = vrot.lane.b32.xlu0 %v1554_v43, %s11895_s24  ;;  %1390 = vrot.lane.b32.xlu1 %v1345_v44, %s11896_s29  ;;  %v1457_v11 = vsel %vm1339_vm6, %v1455_v59, %v1456_v10  ;;  %v2026_v17 = vsel %vm1548_vm7, %v2024_v0, %v2025_v1  ;;  %v1930_v42 = vsel %vm1339_vm6, %v1928_v30, %v1929_v29  ;;  %v1555_v59 = vrot.slane %v956_v15, 2  ;;  %v962_v0 = vld [vmem:[#allocation2 + $0xb6] ss:$2 sm:$0x3] }
  0xf3   :  { %v1460_v44 = vsel %vm1339_vm6, %v1458_v34, %v1459_v36 }
  0xf6   :  { %1735 = vrot.lane.b32.xlu0 %v1104_v62, %s11893_s15  ;;  %1502 = vrot.lane.b32.xlu1 %v1457_v11, %s11894_s20  ;;  %v1114_v11 = vld [vmem:[#allocation2 + $0xb7] ss:$2 sm:$0x3] }
  0xf7   :  { %v1932_v20 = vrot.slane %v1114_v11, 1 }
  0xfa   :  { %2071 = vrot.lane.b32.xlu0 %v2026_v17, %s11895_s24  ;;  %1863 = vrot.lane.b32.xlu1 %v1818_v28, %s11896_s29 }
  0xfe   :  { %1392 = vrot.lane.b32.xlu0 %v1348_v33, %s11896_s29  ;;  %1975 = vrot.lane.b32.xlu1 %v1930_v42, %s11894_s20 }
 0x102   :  { %1504 = vrot.lane.b32.xlu0 %v1460_v44, %s11894_s20  ;;  %1263 = vrot.lane.b32.xlu1 %v1108_v22, %s11893_s15 }
 0x10a   :  { %v11245_v41 = vpop.f32.mrf.mxu0 }
 0x10b   :  { %v438_v47 = vadd.f32 %v11245_v41, %v12791_v2 }
 0x10c   :  { %v432_v24 = vpop.f32.mrf.mxu0 }
 0x10d   :  { %v720_v63 = vmax.f32 %v438_v47, 0.0  ;;  %v433_v6 = vadd.f32 %v12791_v2, %v432_v24 }
 0x10e   :  { %v11248_v8 = vpop.f32.mrf.mxu0 }
 0x10f   :  { %884 = vst.msk [vmem:[#allocation2 + $0xd0] sm:$0xff] %vm775_vm2, %v720_v63  ;;  %v448_v9 = vadd.f32 %v11248_v8, %v12791_v2  ;;  %v719_v13 = vmax.f32 %v433_v6, 0.0  ;;  %v960_v63 = vld [vmem:[#allocation2 + $0xa6] ss:$2 sm:$0xff]  ;;  %v1557_v6 = vsel %vm1548_vm7, %v1555_v59, %v1556_v60 }
 0x110   :  { %v442_v16 = vpop.f32.mrf.mxu0  ;;  %v1819_v8 = vrot.slane %v960_v63, 1  ;;  %1601 = vrot.lane.b32.xlu0 %v1557_v6, %s11895_s24 }
 0x111   :  { %v722_v21 = vmax.f32 %v448_v9, 0.0  ;;  %883 = vst.msk [vmem:[#allocation2 + $0xc8] sm:$0xff] %vm775_vm2, %v719_v13  ;;  %v443_v26 = vadd.f32 %v12791_v2, %v442_v16  ;;  %v1820_v9 = vrot.slane %v962_v0, 1  ;;  %v1112_v13 = vld [vmem:[#allocation2 + $0xa7] ss:$2 sm:$0xff] }
 0x112   :  { %v11251_v27 = vpop.f32.mrf.mxu0  ;;  %1737 = vrot.lane.b32.xlu1 %v1112_v13, %s11893_s15  ;;  %v1931_v22 = vrot.slane %v1112_v13, 1 }
 0x113   :  { %886 = vst.msk [vmem:[#allocation2 + $0xf0] sm:$0xff] %vm775_vm2, %v722_v21  ;;  %v721_v23 = vmax.f32 %v443_v26, 0.0  ;;  %v458_v31 = vadd.f32 %v11251_v27, %v12791_v2  ;;  %v1821_v25 = vsel %vm1339_vm6, %v1819_v8, %v1820_v9 }
 0x114   :  { %v452_v32 = vpop.f32.mrf.mxu0  ;;  %1865 = vrot.lane.b32.xlu0 %v1821_v25, %s11896_s29  ;;  %v1933_v36 = vsel %vm1339_vm6, %v1931_v22, %v1932_v20 }
 0x115   :  { %v453_v37 = vadd.f32 %v12791_v2, %v452_v32  ;;  %885 = vst.msk [vmem:[#allocation2 + $0xe8] sm:$0xff] %vm775_vm2, %v721_v23  ;;  %v724_v38 = vmax.f32 %v458_v31, 0.0 }
 0x116   :  { %v11254_v39 = vpop.f32.mrf.mxu0  ;;  %v966_v17 = vld [vmem:[#allocation2 + $0xd6] ss:$2 sm:$0x3]  ;;  %v1118_v31 = vld [vmem:[#allocation2 + $0xd7] ss:$2 sm:$0x3] }
 0x117   :  { %v723_v40 = vmax.f32 %v453_v37, 0.0  ;;  %v468_v41 = vadd.f32 %v11254_v39, %v12791_v2  ;;  %888 = vst.msk [vmem:[#allocation2 + $0x110] sm:$0xff] %vm775_vm2, %v724_v38  ;;  %v1350_v29 = vrot.slane %v966_v17, 1  ;;  %v2027_v37 = vrot.slane %v960_v63, 2 }
 0x118   :  { %v462_v43 = vpop.f32.mrf.mxu0  ;;  %v964_v16 = vld [vmem:[#allocation2 + $0xc6] ss:$2 sm:$0xff]  ;;  %v1116_v30 = vld [vmem:[#allocation2 + $0xc7] ss:$2 sm:$0xff]  ;;  %v2028_v38 = vrot.slane %v962_v0, 2  ;;  %1977 = vrot.lane.b32.xlu0 %v1933_v36, %s11894_s20  ;;  %v1462_v42 = vrot.slane %v1118_v31, 1 }
 0x119   :  { %887 = vst.msk [vmem:[#allocation2 + $0x108] sm:$0xff] %vm775_vm2, %v723_v40  ;;  %v726_v45 = vmax.f32 %v468_v41, 0.0  ;;  %v463_v47 = vadd.f32 %v12791_v2, %v462_v43  ;;  %v1349_v28 = vrot.slane %v964_v16, 1  ;;  %1265 = vrot.lane.b32.xlu1 %v1116_v30, %s11893_s15  ;;  %v1461_v40 = vrot.slane %v1116_v30, 1 }
 0x11a   :  { %v11257_v61 = vpop.f32.mrf.mxu0  ;;  %v2029_v60 = vsel %vm1548_vm7, %v2027_v37, %v2028_v38 }
 0x11b   :  { %890 = vst.msk [vmem:[#allocation2 + $0x130] sm:$0xff] %vm775_vm2, %v726_v45  ;;  %v725_v24 = vmax.f32 %v463_v47, 0.0  ;;  %v478_v62 = vadd.f32 %v11257_v61, %v12791_v2  ;;  %v1351_v41 = vsel %vm1339_vm6, %v1349_v28, %v1350_v29  ;;  %v1558_v61 = vrot.slane %v964_v16, 2 }
 0x11c   :  { %v472_v1 = vpop.f32.mrf.mxu0  ;;  %2073 = vrot.lane.b32.xlu0 %v2029_v60, %s11895_s24  ;;  %v1463_v0 = vsel %vm1339_vm6, %v1461_v40, %v1462_v42 }
 0x11d   :  { %889 = vst.msk [vmem:[#allocation2 + $0x128] sm:$0xff] %vm775_vm2, %v725_v24  ;;  %v728_v5 = vmax.f32 %v478_v62, 0.0  ;;  %v473_v10 = vadd.f32 %v12791_v2, %v472_v1  ;;  %1394 = vrot.lane.b32.xlu1 %v1351_v41, %s11896_s29  ;;  %v1559_v24 = vrot.slane %v966_v17, 2  ;;  %v12888_v62 = vpop.permute.xlu1 %1259  ;;  %v12892_v1 = vld [vmem:[#allocation2 + $0xe6] ss:$2 sm:$0xff] }
 0x11e   :  { %v11260_v7 = vpop.f32.mrf.mxu0  ;;  %v12901_v9 = vld [vmem:[#allocation2 + $0x116] ss:$2 sm:$0x3]  ;;  %v2030_v13 = vrot.slane %v12892_v1, 2  ;;  %v1120_v17 = vld [vmem:[#allocation2 + $0xe7] ss:$2 sm:$0xff] }
 0x11f   :  { %892 = vst.msk [vmem:[#allocation2 + $0x150] sm:$0xff] %vm775_vm2, %v728_v5  ;;  %v727_v4 = vmax.f32 %v473_v10, 0.0  ;;  %v488_v12 = vadd.f32 %v11260_v7, %v12791_v2  ;;  %v970_v5 = vld [vmem:[#allocation2 + $0xf6] ss:$2 sm:$0x3]  ;;  %v1353_v25 = vrot.slane %v12901_v9, 1 }
 0x120   :  { %v482_v15 = vpop.f32.mrf.mxu0  ;;  %v12899_v8 = vld [vmem:[#allocation2 + $0x106] ss:$2 sm:$0xff]  ;;  %v1124_v28 = vld [vmem:[#allocation2 + $0x107] ss:$2 sm:$0xff] }
 0x121   :  { %891 = vst.msk [vmem:[#allocation2 + $0x148] sm:$0xff] %vm775_vm2, %v727_v4  ;;  %v730_v18 = vmax.f32 %v488_v12, 0.0  ;;  %v483_v19 = vadd.f32 %v12791_v2, %v482_v15  ;;  %1506 = vrot.lane.b32.xlu1 %v1463_v0, %s11894_s20  ;;  %v1560_v12 = vsel %vm1548_vm7, %v1558_v61, %v1559_v24  ;;  %v2031_v15 = vrot.slane %v970_v5, 2  ;;  %v1126_v29 = vld [vmem:[#allocation2 + $0x117] ss:$2 sm:$0x3] }
 0x122   :  { %v11263_v21 = vpop.f32.mrf.mxu0  ;;  %1603 = vrot.lane.b32.xlu0 %v1560_v12, %s11895_s24  ;;  %v1352_v22 = vrot.slane %v12899_v8, 1  ;;  %v1464_v41 = vrot.slane %v1124_v28, 1  ;;  %v1465_v42 = vrot.slane %v1126_v29, 1 }
 0x123   :  { %894 = vst.msk [vmem:[#allocation2 + $0x170] sm:$0xff] %vm775_vm2, %v730_v18  ;;  %v729_v26 = vmax.f32 %v483_v19, 0.0  ;;  %v498_v27 = vadd.f32 %v11263_v21, %v12791_v2  ;;  %v1822_v18 = vrot.slane %v12892_v1, 1  ;;  %v1823_v19 = vrot.slane %v970_v5, 1 }
 0x124   :  { %v492_v23 = vpop.f32.mrf.mxu0  ;;  %v1354_v40 = vsel %vm1339_vm6, %v1352_v22, %v1353_v25  ;;  %v12939_v12 = vld [vmem:[#allocation2 + $0x126] ss:$2 sm:$0xff]  ;;  %v1128_v25 = vld [vmem:[#allocation2 + $0x127] ss:$2 sm:$0xff] }
 0x125   :  { %893 = vst.msk [vmem:[#allocation2 + $0x168] sm:$0xff] %vm775_vm2, %v729_v26  ;;  %v732_v32 = vmax.f32 %v498_v27, 0.0  ;;  %v493_v33 = vadd.f32 %v12791_v2, %v492_v23  ;;  %1739 = vrot.lane.b32.xlu1 %v1120_v17, %s11893_s15  ;;  %v1122_v26 = vld [vmem:[#allocation2 + $0xf7] ss:$2 sm:$0x3]  ;;  %v12912_v27 = vpop.permute.xlu1 %1275  ;;  %v1824_v36 = vsel %vm1339_vm6, %v1822_v18, %v1823_v19  ;;  %v1825_v19 = vrot.slane %v12939_v12, 1 }
 0x126   :  { %v11266_v34 = vpop.f32.mrf.mxu0  ;;  %v1935_v37 = vrot.slane %v1122_v26, 1  ;;  %v982_v29 = vld [vmem:[#allocation2 + $0x156] ss:$2 sm:$0x3] }
 0x127   :  { %896 = vst.msk [vmem:[#allocation2 + $0x190] sm:$0xff] %vm775_vm2, %v732_v32  ;;  %v731_v39 = vmax.f32 %v493_v33, 0.0  ;;  %v508_v43 = vadd.f32 %v11266_v34, %v12791_v2  ;;  %v2032_v32 = vsel %vm1548_vm7, %v2030_v13, %v2031_v15  ;;  %v1934_v34 = vrot.slane %v1120_v17, 1  ;;  %v978_v13 = vld [vmem:[#allocation2 + $0x136] ss:$2 sm:$0x3] }
 0x128   :  { %v502_v44 = vpop.f32.mrf.mxu0  ;;  %2075 = vrot.lane.b32.xlu0 %v2032_v32, %s11895_s24 }
 0x129   :  { %895 = vst.msk [vmem:[#allocation2 + $0x188] sm:$0xff] %vm775_vm2, %v731_v39  ;;  %v503_v45 = vadd.f32 %v12791_v2, %v502_v44  ;;  %v734_v47 = vmax.f32 %v508_v43, 0.0  ;;  %1867 = vrot.lane.b32.xlu1 %v1824_v36, %s11896_s29  ;;  %v1936_v61 = vsel %vm1339_vm6, %v1934_v34, %v1935_v37  ;;  %v1937_v34 = vrot.slane %v1128_v25, 1 }
 0x12a   :  { %v11269_v59 = vpop.f32.mrf.mxu0 }
 0x12b   :  { %v733_v63 = vmax.f32 %v503_v45, 0.0  ;;  %898 = vst.msk [vmem:[#allocation2 + $0x1b0] sm:$0xff] %vm775_vm2, %v734_v47  ;;  %v518_v10 = vadd.f32 %v11269_v59, %v12791_v2  ;;  %v12925_v47 = vpop.permute.xlu1 %3051 }
 0x12c   :  { %v512_v6 = vpop.f32.mrf.mxu0  ;;  %19435 = vst [vmem:[#allocation18_spill] sm:$0xff] %v12925_v47  ;;  %1396 = vrot.lane.b32.xlu0 %v1354_v40, %s11896_s29  ;;  %v1132_v40 = vld [vmem:[#allocation2 + $0x147] ss:$2 sm:$0xff] }
 0x12d   :  { %897 = vst.msk [vmem:[#allocation2 + $0x1a8] sm:$0xff] %vm775_vm2, %v733_v63  ;;  %v513_v7 = vadd.f32 %v12791_v2, %v512_v6  ;;  %v736_v11 = vmax.f32 %v518_v10, 0.0  ;;  %1979 = vrot.lane.b32.xlu1 %v1936_v61, %s11894_s20  ;;  %v1466_v63 = vsel %vm1339_vm6, %v1464_v41, %v1465_v42  ;;  %v1561_v6 = vrot.slane %v12899_v8, 2 }
 0x12e   :  { %v11272_v4 = vpop.f32.mrf.mxu0  ;;  %v1356_v42 = vrot.slane %v982_v29, 1  ;;  %v2034_v61 = vrot.slane %v978_v13, 2 }
 0x12f   :  { %v735_v16 = vmax.f32 %v513_v7, 0.0  ;;  %900 = vst.msk [vmem:[#allocation2 + $0x1d0] sm:$0xff] %vm775_vm2, %v736_v11  ;;  %v528_v20 = vadd.f32 %v11272_v4, %v12791_v2  ;;  %v1562_v7 = vrot.slane %v12901_v9, 2 }
 0x130   :  { %v522_v21 = vpop.f32.mrf.mxu0  ;;  %1508 = vrot.lane.b32.xlu0 %v1466_v63, %s11894_s20 }
 0x131   :  { %899 = vst.msk [vmem:[#allocation2 + $0x1c8] sm:$0xff] %vm775_vm2, %v735_v16  ;;  %v523_v30 = vadd.f32 %v12791_v2, %v522_v21  ;;  %v738_v23 = vmax.f32 %v528_v20, 0.0  ;;  %1267 = vrot.lane.b32.xlu1 %v1124_v28, %s11893_s15  ;;  %v12943_v16 = vpop.permute.xlu1 %3077  ;;  %v1563_v18 = vsel %vm1548_vm7, %v1561_v6, %v1562_v7  ;;  %v1826_v20 = vrot.slane %v978_v13, 1  ;;  %v1130_v21 = vld [vmem:[#allocation2 + $0x137] ss:$2 sm:$0x3] }
 0x132   :  { %v11275_v31 = vpop.f32.mrf.mxu0  ;;  %19436 = vst [vmem:[#allocation19_spill] sm:$0xff] %v12943_v16  ;;  %v980_v28 = vld [vmem:[#allocation2 + $0x146] ss:$2 sm:$0xff]  ;;  %v1938_v32 = vrot.slane %v1130_v21, 1 }
 0x133   :  { %v737_v33 = vmax.f32 %v523_v30, 0.0  ;;  %902 = vst.msk [vmem:[#allocation2 + $0x1f0] sm:$0xff] %vm775_vm2, %v738_v23  ;;  %v538_v38 = vadd.f32 %v11275_v31, %v12791_v2  ;;  %v1827_v36 = vsel %vm1339_vm6, %v1825_v19, %v1826_v20  ;;  %v1355_v41 = vrot.slane %v980_v28, 1 }
 0x134   :  { %v532_v39 = vpop.f32.mrf.mxu0  ;;  %1605 = vrot.lane.b32.xlu0 %v1563_v18, %s11895_s24  ;;  %v1939_v63 = vsel %vm1339_vm6, %v1937_v34, %v1938_v32  ;;  %v1564_v18 = vrot.slane %v980_v28, 2  ;;  %v1565_v19 = vrot.slane %v982_v29, 2  ;;  %v12987_v29 = vld [vmem:[#allocation2 + $0x186] ss:$2 sm:$0xff] }
 0x135   :  { %901 = vst.msk [vmem:[#allocation2 + $0x1e8] sm:$0xff] %vm775_vm2, %v737_v33  ;;  %v533_v43 = vadd.f32 %v12791_v2, %v532_v39  ;;  %v740_v44 = vmax.f32 %v538_v38, 0.0  ;;  %1741 = vrot.lane.b32.xlu1 %v1128_v25, %s11893_s15  ;;  %v12956_v37 = vpop.permute.xlu1 %3053  ;;  %v1357_v6 = vsel %vm1339_vm6, %v1355_v41, %v1356_v42  ;;  %v12982_v25 = vld [vmem:[#allocation2 + $0x166] ss:$2 sm:$0xff] }
 0x136   :  { %v11278_v45 = vpop.f32.mrf.mxu0  ;;  %19437 = vst [vmem:[#allocation20_spill] sm:$0xff] %v12956_v37  ;;  %v1828_v41 = vrot.slane %v12982_v25, 1 }
 0x137   :  { %v739_v59 = vmax.f32 %v533_v43, 0.0  ;;  %v548_v60 = vadd.f32 %v11278_v45, %v12791_v2  ;;  %904 = vst.msk [vmem:[#allocation2 + $0x210] sm:$0xff] %vm775_vm2, %v740_v44  ;;  %v1134_v44 = vld [vmem:[#allocation2 + $0x157] ss:$2 sm:$0x3] }
 0x138   :  { %v542_v24 = vpop.f32.mrf.mxu0  ;;  %1869 = vrot.lane.b32.xlu0 %v1827_v36, %s11896_s29  ;;  %v1468_v7 = vrot.slane %v1134_v44, 1  ;;  %v2036_v36 = vrot.slane %v12982_v25, 2 }
 0x139   :  { %903 = vst.msk [vmem:[#allocation2 + $0x208] sm:$0xff] %vm775_vm2, %v739_v59  ;;  %v543_v0 = vadd.f32 %v12791_v2, %v542_v24  ;;  %v742_v5 = vmax.f32 %v548_v60, 0.0  ;;  %1269 = vrot.lane.b32.xlu1 %v1132_v40, %s11893_s15  ;;  %v2033_v60 = vrot.slane %v12939_v12, 2 }
 0x13a   :  { %v11281_v10 = vpop.f32.mrf.mxu0 }
 0x13b   :  { %v741_v11 = vmax.f32 %v543_v0, 0.0  ;;  %v558_v4 = vadd.f32 %v11281_v10, %v12791_v2  ;;  %906 = vst.msk [vmem:[#allocation2 + $0x230] sm:$0xff] %vm775_vm2, %v742_v5  ;;  %v1467_v10 = vrot.slane %v1132_v40, 1  ;;  %v1136_v40 = vld [vmem:[#allocation2 + $0x167] ss:$2 sm:$0xff] }
 0x13c   :  { %v552_v15 = vpop.f32.mrf.mxu0  ;;  %1981 = vrot.lane.b32.xlu0 %v1939_v63, %s11894_s20  ;;  %v1140_v63 = vld [vmem:[#allocation2 + $0x187] ss:$2 sm:$0xff] }
 0x13d   :  { %905 = vst.msk [vmem:[#allocation2 + $0x228] sm:$0xff] %vm775_vm2, %v741_v11  ;;  %v744_v8 = vmax.f32 %v558_v4, 0.0  ;;  %v553_v9 = vadd.f32 %v12791_v2, %v552_v15  ;;  %1398 = vrot.lane.b32.xlu1 %v1357_v6, %s11896_s29  ;;  %v12971_v4 = vpop.permute.xlu1 %3079 }
 0x13e   :  { %v11284_v17 = vpop.f32.mrf.mxu0  ;;  %19438 = vst [vmem:[#allocation21_spill] sm:$0xff] %v12971_v4 }
 0x13f   :  { %908 = vst.msk [vmem:[#allocation2 + $0x2d0] sm:$0xff] %vm775_vm2, %v744_v8  ;;  %v568_v22 = vadd.f32 %v11284_v17, %v12791_v2  ;;  %v743_v26 = vmax.f32 %v553_v9, 0.0  ;;  %v2035_v8 = vsel %vm1548_vm7, %v2033_v60, %v2034_v61  ;;  %v12976_v9 = vpop.permute.xlu0 %4226  ;;  %v1138_v61 = vld [vmem:[#allocation2 + $0x177] ss:$2 sm:$0x3] }
 0x140   :  { %v562_v30 = vpop.f32.mrf.mxu0  ;;  %19439 = vst [vmem:[#allocation22_spill] sm:$0xff] %v12976_v9  ;;  %2077 = vrot.lane.b32.xlu0 %v2035_v8, %s11895_s24 }
 0x141   :  { %v746_v23 = vmax.f32 %v568_v22, 0.0  ;;  %v563_v31 = vadd.f32 %v12791_v2, %v562_v30  ;;  %907 = vst.msk [vmem:[#allocation2 + $0x2c8] sm:$0xff] %vm775_vm2, %v743_v26  ;;  %v1469_v22 = vsel %vm1339_vm6, %v1467_v10, %v1468_v7  ;;  %v986_v26 = vld [vmem:[#allocation2 + $0x176] ss:$2 sm:$0x3]  ;;  %v12992_v34 = vpop.permute.xlu1 %4130 }
 0x142   :  { %v11287_v33 = vpop.f32.mrf.mxu0  ;;  %1510 = vrot.lane.b32.xlu1 %v1469_v22, %s11894_s20  ;;  %19440 = vst [vmem:[#allocation23_spill] sm:$0xff] %v12992_v34  ;;  %v1829_v42 = vrot.slane %v986_v26, 1 }
 0x143   :  { %910 = vst.msk [vmem:[#allocation2 + $0x2f0] sm:$0xff] %vm775_vm2, %v746_v23  ;;  %v745_v38 = vmax.f32 %v563_v31, 0.0  ;;  %v578_v39 = vadd.f32 %v11287_v33, %v12791_v2  ;;  %v12989_v31 = vld [vmem:[#allocation2 + $0x196] ss:$2 sm:$0x3]  ;;  %v1566_v33 = vsel %vm1548_vm7, %v1564_v18, %v1565_v19 }
 0x144   :  { %v572_v43 = vpop.f32.mrf.mxu0  ;;  %1607 = vrot.lane.b32.xlu0 %v1566_v33, %s11895_s24  ;;  %v1359_v60 = vrot.slane %v12989_v31, 1 }
 0x145   :  { %909 = vst.msk [vmem:[#allocation2 + $0x2e8] sm:$0xff] %vm775_vm2, %v745_v38  ;;  %v748_v45 = vmax.f32 %v578_v39, 0.0  ;;  %v573_v59 = vadd.f32 %v12791_v2, %v572_v43  ;;  %v2037_v38 = vrot.slane %v986_v26, 2  ;;  %v12998_v43 = vpop.permute.xlu0 %4322  ;;  %v13012_v18 = vpop.permute.xlu1 %3620 }
 0x146   :  { %v11290_v24 = vpop.f32.mrf.mxu0  ;;  %19441 = vst [vmem:[#allocation24_spill] sm:$0xff] %v12998_v43  ;;  %1743 = vrot.lane.b32.xlu1 %v1136_v40, %s11893_s15  ;;  %19442 = vst [vmem:[#allocation25_spill] sm:$0xff] %v13012_v18 }
 0x147   :  { %912 = vst.msk [vmem:[#allocation2 + $0x310] sm:$0xff] %vm775_vm2, %v748_v45  ;;  %v747_v0 = vmax.f32 %v573_v59, 0.0  ;;  %v588_v5 = vadd.f32 %v11290_v24, %v12791_v2  ;;  %v1358_v59 = vrot.slane %v12987_v29, 1  ;;  %v2038_v6 = vsel %vm1548_vm7, %v2036_v36, %v2037_v38 }
 0x148   :  { %v582_v11 = vpop.f32.mrf.mxu0  ;;  %2079 = vrot.lane.b32.xlu0 %v2038_v6, %s11895_s24 }
 0x149   :  { %911 = vst.msk [vmem:[#allocation2 + $0x308] sm:$0xff] %vm775_vm2, %v747_v0  ;;  %v750_v13 = vmax.f32 %v588_v5, 0.0  ;;  %v583_v15 = vadd.f32 %v12791_v2, %v582_v11  ;;  %v1142_v0 = vld [vmem:[#allocation2 + $0x197] ss:$2 sm:$0x3]  ;;  %v1940_v11 = vrot.slane %v1136_v40, 1  ;;  %v1360_v19 = vsel %vm1339_vm6, %v1358_v59, %v1359_v60  ;;  %v13017_v26 = vpop.permute.xlu0 %4418 }
 0x14a   :  { %v11293_v17 = vpop.f32.mrf.mxu0  ;;  %19443 = vst [vmem:[#allocation26_spill] sm:$0xff] %v13017_v26  ;;  %v1568_v59 = vrot.slane %v12989_v31, 2 }
 0x14b   :  { %914 = vst.msk [vmem:[#allocation2 + $0x330] sm:$0xff] %vm775_vm2, %v750_v13  ;;  %v749_v20 = vmax.f32 %v583_v15, 0.0  ;;  %v598_v21 = vadd.f32 %v11293_v17, %v12791_v2  ;;  %v1830_v13 = vsel %vm1339_vm6, %v1828_v41, %v1829_v42  ;;  %v1941_v15 = vrot.slane %v1138_v61, 1  ;;  %v13034_v61 = vld [vmem:[#allocation2 + $0x1a6] ss:$2 sm:$0xff] }
 0x14c   :  { %v592_v30 = vpop.f32.mrf.mxu0  ;;  %1871 = vrot.lane.b32.xlu1 %v1830_v13, %s11896_s29  ;;  %1400 = vrot.lane.b32.xlu0 %v1360_v19, %s11896_s29 }
 0x14d   :  { %913 = vst.msk [vmem:[#allocation2 + $0x328] sm:$0xff] %vm775_vm2, %v749_v20  ;;  %v752_v23 = vmax.f32 %v598_v21, 0.0  ;;  %v593_v28 = vadd.f32 %v12791_v2, %v592_v30  ;;  %v1470_v20 = vrot.slane %v1140_v63, 1  ;;  %v1471_v21 = vrot.slane %v1142_v0, 1  ;;  %v13027_v40 = vpop.permute.xlu0 %3622 }
 0x14e   :  { %v11296_v32 = vpop.f32.mrf.mxu0  ;;  %19444 = vst [vmem:[#allocation27_spill] sm:$0xff] %v13027_v40  ;;  %v1034_v9 = vld [vmem:[#allocation2 + $0x316] ss:$2 sm:$0x3] }
 0x14f   :  { %916 = vst.msk [vmem:[#allocation2 + $0x350] sm:$0xff] %vm775_vm2, %v752_v23  ;;  %v751_v39 = vmax.f32 %v593_v28, 0.0  ;;  %v608_v44 = vadd.f32 %v11296_v32, %v12791_v2  ;;  %v1942_v32 = vsel %vm1339_vm6, %v1940_v11, %v1941_v15  ;;  %v1472_v38 = vsel %vm1339_vm6, %v1470_v20, %v1471_v21  ;;  %v1144_v15 = vld [vmem:[#allocation2 + $0x1a7] ss:$2 sm:$0xff]  ;;  %v996_v20 = vld [vmem:[#allocation2 + $0x1c6] ss:$2 sm:$0xff] }
 0x150   :  { %v602_v45 = vpop.f32.mrf.mxu0  ;;  %1983 = vrot.lane.b32.xlu1 %v1942_v32, %s11894_s20  ;;  %1512 = vrot.lane.b32.xlu0 %v1472_v38, %s11894_s20  ;;  %v998_v21 = vld [vmem:[#allocation2 + $0x1d6] ss:$2 sm:$0x3]  ;;  %v1943_v32 = vrot.slane %v1144_v15, 1  ;;  %v1032_v43 = vld [vmem:[#allocation2 + $0x306] ss:$2 sm:$0xff] }
 0x151   :  { %915 = vst.msk [vmem:[#allocation2 + $0x348] sm:$0xff] %vm775_vm2, %v751_v39  ;;  %v603_v24 = vadd.f32 %v12791_v2, %v602_v45  ;;  %v754_v5 = vmax.f32 %v608_v44, 0.0  ;;  %v13029_v44 = vpop.permute.xlu1 %3716  ;;  %v1567_v45 = vrot.slane %v12987_v29, 2 }
 0x152   :  { %v11299_v10 = vpop.f32.mrf.mxu0  ;;  %19445 = vst [vmem:[#allocation28_spill] sm:$0xff] %v13029_v44 }
 0x153   :  { %v753_v7 = vmax.f32 %v603_v24, 0.0  ;;  %918 = vst.msk [vmem:[#allocation2 + $0x370] sm:$0xff] %vm775_vm2, %v754_v5  ;;  %v618_v8 = vadd.f32 %v11299_v10, %v12791_v2  ;;  %v13036_v24 = vld [vmem:[#allocation2 + $0x1b6] ss:$2 sm:$0x3]  ;;  %v1569_v6 = vsel %vm1548_vm7, %v1567_v45, %v1568_v59 }
 0x154   :  { %v612_v17 = vpop.f32.mrf.mxu0  ;;  %1271 = vrot.lane.b32.xlu1 %v1140_v63, %s11893_s15  ;;  %v1832_v11 = vrot.slane %v13036_v24, 1  ;;  %1609 = vrot.lane.b32.xlu0 %v1569_v6, %s11895_s24 }
 0x155   :  { %917 = vst.msk [vmem:[#allocation2 + $0x368] sm:$0xff] %vm775_vm2, %v753_v7  ;;  %v613_v22 = vadd.f32 %v12791_v2, %v612_v17  ;;  %v756_v30 = vmax.f32 %v618_v8, 0.0  ;;  %v1831_v7 = vrot.slane %v13034_v61, 1  ;;  %v1146_v8 = vld [vmem:[#allocation2 + $0x1b7] ss:$2 sm:$0x3]  ;;  %v13048_v17 = vpop.permute.xlu0 %3718  ;;  %v13051_v19 = vpop.permute.xlu1 %3813 }
 0x156   :  { %v11302_v23 = vpop.f32.mrf.mxu0  ;;  %19446 = vst [vmem:[#allocation29_spill] sm:$0xff] %v13048_v17  ;;  %19447 = vst [vmem:[#allocation30_spill] sm:$0xff] %v13051_v19 }
 0x157   :  { %v755_v28 = vmax.f32 %v613_v22, 0.0  ;;  %920 = vst.msk [vmem:[#allocation2 + $0x390] sm:$0xff] %vm775_vm2, %v756_v30  ;;  %v628_v33 = vadd.f32 %v11302_v23, %v12791_v2 }
 0x158   :  { %v622_v36 = vpop.f32.mrf.mxu0  ;;  %1745 = vrot.lane.b32.xlu1 %v1144_v15, %s11893_s15  ;;  %v13204_v58 = vld [vmem:[#allocation2 + $0x346] ss:$2 sm:$0xff] }
 0x159   :  { %919 = vst.msk [vmem:[#allocation2 + $0x388] sm:$0xff] %vm775_vm2, %v755_v28  ;;  %v623_v39 = vadd.f32 %v12791_v2, %v622_v36  ;;  %v758_v41 = vmax.f32 %v628_v33, 0.0  ;;  %v1833_v33 = vsel %vm1339_vm6, %v1831_v7, %v1832_v11  ;;  %v1944_v36 = vrot.slane %v1146_v8, 1  ;;  %v13066_v6 = vpop.permute.xlu1 %3910  ;;  %19457 = vst [vmem:[#allocation40_spill] sm:$0xff] %v13204_v58 }
 0x15a   :  { %v11305_v42 = vpop.f32.mrf.mxu0  ;;  %1873 = vrot.lane.b32.xlu0 %v1833_v33, %s11896_s29  ;;  %19449 = vst [vmem:[#allocation32_spill] sm:$0xff] %v13066_v6  ;;  %v2039_v11 = vrot.slane %v13034_v61, 2 }
 0x15b   :  { %v757_v60 = vmax.f32 %v623_v39, 0.0  ;;  %922 = vst.msk [vmem:[#allocation2 + $0x3b0] sm:$0xff] %vm775_vm2, %v758_v41  ;;  %v638_v0 = vadd.f32 %v11305_v42, %v12791_v2  ;;  %v1148_v39 = vld [vmem:[#allocation2 + $0x1c7] ss:$2 sm:$0xff]  ;;  %v1361_v41 = vrot.slane %v996_v20, 1  ;;  %v1362_v42 = vrot.slane %v998_v21, 1 }
 0x15c   :  { %v632_v5 = vpop.f32.mrf.mxu0  ;;  %1273 = vrot.lane.b32.xlu1 %v1148_v39, %s11893_s15  ;;  %v1945_v7 = vsel %vm1339_vm6, %v1943_v32, %v1944_v36  ;;  %v1473_v8 = vrot.slane %v1148_v39, 1  ;;  %v1571_v32 = vrot.slane %v998_v21, 2 }
 0x15d   :  { %921 = vst.msk [vmem:[#allocation2 + $0x3a8] sm:$0xff] %vm775_vm2, %v757_v60  ;;  %v633_v29 = vadd.f32 %v12791_v2, %v632_v5  ;;  %v760_v10 = vmax.f32 %v638_v0, 0.0  ;;  %v1150_v60 = vld [vmem:[#allocation2 + $0x1d7] ss:$2 sm:$0x3]  ;;  %v13077_v36 = vpop.permute.xlu1 %3912 }
 0x15e   :  { %v11308_v31 = vpop.f32.mrf.mxu0  ;;  %1985 = vrot.lane.b32.xlu0 %v1945_v7, %s11894_s20  ;;  %19450 = vst [vmem:[#allocation33_spill] sm:$0xff] %v13077_v36  ;;  %v11787_v36 = vld [vmem:[#allocation2 + $0xa6] ss:$2 sm:$0xff] }
 0x15f   :  { %v648_v13 = vadd.f32 %v11308_v31, %v12791_v2  ;;  %924 = vst.msk [vmem:[#allocation2 + $0x3d0] sm:$0xff] %vm775_vm2, %v760_v10  ;;  %v759_v22 = vmax.f32 %v633_v29, 0.0  ;;  %v2040_v29 = vrot.slane %v13036_v24, 2  ;;  %v13063_v10 = vpop.permute.xlu0 %3815  ;;  %v1363_v24 = vsel %vm1339_vm6, %v1361_v41, %v1362_v42 }
 0x160   :  { %v642_v63 = vpop.f32.mrf.mxu0  ;;  %19448 = vst [vmem:[#allocation31_spill] sm:$0xff] %v13063_v10  ;;  %1402 = vrot.lane.b32.xlu1 %v1363_v24, %s11896_s29 }
 0x161   :  { %v762_v30 = vmax.f32 %v648_v13, 0.0  ;;  %v643_v23 = vadd.f32 %v12791_v2, %v642_v63  ;;  %923 = vst.msk [vmem:[#allocation2 + $0x3c8] sm:$0xff] %vm775_vm2, %v759_v22  ;;  %v1474_v63 = vrot.slane %v1150_v60, 1 }
 0x162   :  { %v11311_v28 = vpop.f32.mrf.mxu0  ;;  %v1054_v37 = vld [vmem:[#allocation2 + $0x3b6] ss:$2 sm:$0x3] }
 0x163   :  { %v658_v38 = vadd.f32 %v11311_v28, %v12791_v2  ;;  %926 = vst.msk [vmem:[#allocation2 + $0x3f0] sm:$0xff] %vm775_vm2, %v762_v30  ;;  %v761_v45 = vmax.f32 %v643_v23, 0.0  ;;  %v1570_v28 = vrot.slane %v996_v20, 2  ;;  %v1475_v42 = vsel %vm1339_vm6, %v1473_v8, %v1474_v63  ;;  %v1002_v20 = vld [vmem:[#allocation2 + $0x1f6] ss:$2 sm:$0x3] }
 0x164   :  { %v652_v59 = vpop.f32.mrf.mxu0  ;;  %1514 = vrot.lane.b32.xlu1 %v1475_v42, %s11894_s20  ;;  %v1835_v24 = vrot.slane %v1002_v20, 1  ;;  %v1154_v63 = vld [vmem:[#allocation2 + $0x1f7] ss:$2 sm:$0x3] }
 0x165   :  { %v764_v0 = vmax.f32 %v658_v38, 0.0  ;;  %v653_v5 = vadd.f32 %v12791_v2, %v652_v59  ;;  %925 = vst.msk [vmem:[#allocation2 + $0x3e8] sm:$0xff] %vm775_vm2, %v761_v45  ;;  %v2041_v38 = vsel %vm1548_vm7, %v2039_v11, %v2040_v29  ;;  %v13084_v45 = vpop.permute.xlu0 %3636  ;;  %v13086_v59 = vld [vmem:[#allocation2 + $0x1e6] ss:$2 sm:$0xff]  ;;  %v2043_v11 = vrot.slane %v1002_v20, 2 }
 0x166   :  { %v11314_v31 = vpop.f32.mrf.mxu0  ;;  %2081 = vrot.lane.b32.xlu0 %v2041_v38, %s11895_s24  ;;  %19451 = vst [vmem:[#allocation34_spill] sm:$0xff] %v13084_v45  ;;  %v2042_v7 = vrot.slane %v13086_v59, 2  ;;  %v1834_v8 = vrot.slane %v13086_v59, 1  ;;  %v1156_v38 = vld [vmem:[#allocation2 + $0x207] ss:$2 sm:$0xff] }
 0x167   :  { %928 = vst.msk [vmem:[#allocation2 + $0x410] sm:$0xff] %vm775_vm2, %v764_v0  ;;  %v763_v13 = vmax.f32 %v653_v5, 0.0  ;;  %v668_v15 = vadd.f32 %v11314_v31, %v12791_v2  ;;  %v1572_v5 = vsel %vm1548_vm7, %v1570_v28, %v1571_v32  ;;  %v1152_v31 = vld [vmem:[#allocation2 + $0x1e7] ss:$2 sm:$0xff] }
 0x168   :  { %v662_v22 = vpop.f32.mrf.mxu0  ;;  %1747 = vrot.lane.b32.xlu1 %v1152_v31, %s11893_s15  ;;  %v2044_v42 = vsel %vm1548_vm7, %v2042_v7, %v2043_v11  ;;  %v1006_v7 = vld [vmem:[#allocation2 + $0x216] ss:$2 sm:$0x3] }
 0x169   :  { %927 = vst.msk [vmem:[#allocation2 + $0x408] sm:$0xff] %vm775_vm2, %v763_v13  ;;  %v766_v30 = vmax.f32 %v668_v15, 0.0  ;;  %v663_v23 = vadd.f32 %v12791_v2, %v662_v22 }
 0x16a   :  { %v11317_v33 = vpop.f32.mrf.mxu0  ;;  %1611 = vrot.lane.b32.xlu0 %v1572_v5, %s11895_s24 }
 0x16b   :  { %930 = vst.msk [vmem:[#allocation2 + $0x430] sm:$0xff] %vm775_vm2, %v766_v30  ;;  %v765_v39 = vmax.f32 %v663_v23, 0.0  ;;  %v678_v41 = vadd.f32 %v11317_v33, %v12791_v2  ;;  %v13097_v30 = vpop.permute.xlu1 %3732  ;;  %v1158_v23 = vld [vmem:[#allocation2 + $0x217] ss:$2 sm:$0x3]  ;;  %v13102_v33 = vpop.permute.xlu0 %3638 }
 0x16c   :  { %v672_v21 = vpop.f32.mrf.mxu0  ;;  %19452 = vst [vmem:[#allocation35_spill] sm:$0xff] %v13097_v30  ;;  %19453 = vst [vmem:[#allocation36_spill] sm:$0xff] %v13102_v33  ;;  %v1178_v30 = vld [vmem:[#allocation2 + $0x2d7] ss:$2 sm:$0x3] }
 0x16d   :  { %929 = vst.msk [vmem:[#allocation2 + $0x428] sm:$0xff] %vm775_vm2, %v765_v39  ;;  %v768_v60 = vmax.f32 %v678_v41, 0.0  ;;  %v673_v0 = vadd.f32 %v12791_v2, %v672_v21  ;;  %v1946_v41 = vrot.slane %v1152_v31, 1  ;;  %v1836_v21 = vsel %vm1339_vm6, %v1834_v8, %v1835_v24 }
 0x16e   :  { %v11320_v29 = vpop.f32.mrf.mxu0  ;;  %2083 = vrot.lane.b32.xlu0 %v2044_v42, %s11895_s24  ;;  %1875 = vrot.lane.b32.xlu1 %v1836_v21, %s11896_s29  ;;  %v2599_v31 = vrot.slane %v1156_v38, 1  ;;  %v1162_v21 = vld [vmem:[#allocation2 + $0x237] ss:$2 sm:$0x3] }
 0x16f   :  { %932 = vst.msk [vmem:[#allocation2 + $0x450] sm:$0xff] %vm775_vm2, %v768_v60  ;;  %v767_v13 = vmax.f32 %v673_v0, 0.0  ;;  %v688_v15 = vadd.f32 %v11320_v29, %v12791_v2  ;;  %v1947_v60 = vrot.slane %v1154_v63, 1  ;;  %v2600_v0 = vrot.slane %v1158_v23, 1  ;;  %v13117_v63 = vpop.permute.xlu0 %3734 }
 0x170   :  { %v682_v22 = vpop.f32.mrf.mxu0  ;;  %19455 = vst [vmem:[#allocation38_spill] sm:$0xff] %v13117_v63  ;;  %v2830_v3 = vrot.slane %v1162_v21, 1  ;;  %v1186_v63 = vld [vmem:[#allocation2 + $0x317] ss:$2 sm:$0x3] }
 0x171   :  { %931 = vst.msk [vmem:[#allocation2 + $0x448] sm:$0xff] %vm775_vm2, %v767_v13  ;;  %v770_v28 = vmax.f32 %v688_v15, 0.0  ;;  %v683_v32 = vadd.f32 %v12791_v2, %v682_v22  ;;  %v11785_v2 = vld [vmem:[%s19366_s2] ss:$0 sm:$0xff]  ;;  %v1004_v13 = vld [vmem:[#allocation2 + $0x206] ss:$2 sm:$0xff]  ;;  %v1948_v24 = vsel %vm1339_vm6, %v1946_v41, %v1947_v60 }
 0x172   :  { %v11323_v39 = vpop.f32.mrf.mxu0  ;;  %2575 = vrot.lane.b32.xlu0 %v1156_v38, %s11893_s15  ;;  %v2585_v23 = vrot.slane %v1004_v13, 1  ;;  %1987 = vrot.lane.b32.xlu1 %v1948_v24, %s11894_s20  ;;  %v1024_v24 = vld [vmem:[#allocation2 + $0x2c6] ss:$2 sm:$0xff] }
 0x173   :  { %934 = vst.msk [vmem:[#allocation2 + $0x470] sm:$0xff] %vm775_vm2, %v770_v28  ;;  %v769_v20 = vmax.f32 %v683_v32, 0.0  ;;  %v698_v5 = vadd.f32 %v11785_v2, %v11323_v39  ;;  %v13113_v28 = vpop.permute.xlu1 %3829  ;;  %v2586_v32 = vrot.slane %v1006_v7, 1 }
 0x174   :  { %v692_v29 = vpop.f32.mrf.mxu0  ;;  %19454 = vst [vmem:[#allocation37_spill] sm:$0xff] %v13113_v28 }
 0x175   :  { %933 = vst.msk [vmem:[#allocation2 + $0x468] sm:$0xff] %vm775_vm2, %v769_v20  ;;  %v693_v11 = vadd.f32 %v11785_v2, %v692_v29  ;;  %v772_v15 = vmax.f32 %v698_v5, 0.0  ;;  %v2601_v20 = vsel %vm1339_vm6, %v2599_v31, %v2600_v0  ;;  %v1160_v29 = vld [vmem:[#allocation2 + $0x227] ss:$2 sm:$0xff]  ;;  %v2587_v60 = vsel %vm1339_vm6, %v2585_v23, %v2586_v32  ;;  %v1008_v31 = vld [vmem:[#allocation2 + $0x226] ss:$2 sm:$0xff] }
 0x176   :  { %v11326_v22 = vpop.f32.mrf.mxu0  ;;  %2605 = vrot.lane.b32.xlu0 %v2601_v20, %s11894_s20  ;;  %2591 = vrot.lane.b32.xlu1 %v2587_v60, %s11896_s29  ;;  %v2829_v0 = vrot.slane %v1160_v29, 1  ;;  %v1576_v20 = vrot.slane %v1024_v24, 2 }
 0x177   :  { %v771_v8 = vmax.f32 %v693_v11, 0.0  ;;  %936 = vst.msk [vmem:[#allocation2 + $0x490] sm:$0xff] %vm775_vm2, %v772_v15  ;;  %v708_v39 = vadd.f32 %v11785_v2, %v11326_v22  ;;  %v13123_v11 = vpop.permute.xlu1 %1261  ;;  %v2611_v15 = vrot.slane %v1004_v13, 2  ;;  %v2612_v22 = vrot.slane %v1006_v7, 2 }
 0x178   :  { %v702_v42 = vpop.f32.mrf.mxu0  ;;  %v2815_v7 = vrot.slane %v1008_v31, 1  ;;  %v2831_v32 = vsel %vm1339_vm6, %v2829_v0, %v2830_v3 }
 0x179   :  { %935 = vst.msk [vmem:[#allocation2 + $0x488] sm:$0xff] %vm775_vm2, %v771_v8  ;;  %v703_v5 = vadd.f32 %v11785_v2, %v702_v42  ;;  %v774_v38 = vmax.f32 %v708_v39, 0.0  ;;  %v1010_v8 = vld [vmem:[#allocation2 + $0x236] ss:$2 sm:$0x3]  ;;  %v13130_v2 = vpop.permute.xlu0 %1599  ;;  %v2613_v13 = vsel %vm1548_vm7, %v2611_v15, %v2612_v22  ;;  %v2841_v15 = vrot.slane %v1008_v31, 2 }
 0x17a   :  { %v1026_v39 = vld [vmem:[#allocation2 + $0x2d6] ss:$2 sm:$0x3]  ;;  %2805 = vrot.lane.b32.xlu0 %v1160_v29, %s11893_s15  ;;  %v2816_v23 = vrot.slane %v1010_v8, 1  ;;  %2617 = vrot.lane.b32.xlu1 %v2613_v13, %s11895_s24  ;;  %v2842_v22 = vrot.slane %v1010_v8, 2  ;;  %v1370_v8 = vrot.slane %v1032_v43, 1 }
 0x17b   :  { %v773_v41 = vmax.f32 %v703_v5, 0.0  ;;  %938 = vst.msk [vmem:[#allocation2 + $0x4b0] sm:$0xff] %vm775_vm2, %v774_v38  ;;  %v13132_v42 = vpop.permute.xlu1 %1390  ;;  %v1577_v21 = vrot.slane %v1026_v39, 2  ;;  %v13138_v38 = vld [vmem:[#allocation2 + $0x2e6] ss:$2 sm:$0xff] }
 0x17c   :  { %v2817_v29 = vsel %vm1339_vm6, %v2815_v7, %v2816_v23  ;;  %v2048_v3 = vrot.slane %v13138_v38, 2  ;;  %v1371_v7 = vrot.slane %v1034_v9, 1  ;;  %v11786_v23 = vld [vmem:[#allocation2 + $0x66] ss:$2 sm:$0xff] }
 0x17d   :  { %937 = vst.msk [vmem:[#allocation2 + $0x4a8] sm:$0xff] %vm775_vm2, %v773_v41  ;;  %v1736_v5 = vpop.permute.xlu0 %1735  ;;  %v13140_v41 = vld [vmem:[#allocation2 + $0x2f6] ss:$2 sm:$0x3]  ;;  %v1578_v13 = vsel %vm1548_vm7, %v1576_v20, %v1577_v21 }
 0x17e   :  { %2835 = vrot.lane.b32.xlu0 %v2831_v32, %s11894_s20  ;;  %2821 = vrot.lane.b32.xlu1 %v2817_v29, %s11896_s29  ;;  %v2049_v0 = vrot.slane %v13140_v41, 2  ;;  %v2843_v32 = vsel %vm1548_vm7, %v2841_v15, %v2842_v22  ;;  %v2118_v20 = vsel %vm775_vm2, %v11786_v23, %v1736_v5  ;;  %v13157_v29 = vld [vmem:[#allocation2 + $0x307] ss:$2 sm:$0xff]  ;;  %v1367_v22 = vrot.slane %v1024_v24, 1 }
 0x17f   :  { %v13142_v60 = vpop.permute.xlu1 %1502  ;;  %v1176_v15 = vld [vmem:[#allocation2 + $0x2c7] ss:$2 sm:$0xff]  ;;  %v1372_v5 = vsel %vm1339_vm6, %v1370_v8, %v1371_v7  ;;  %v1483_v23 = vrot.slane %v1186_v63, 1  ;;  %v1580_v63 = vrot.slane %v1034_v9, 2  ;;  %v13180_v7 = vld [vmem:[#allocation2 + $0x326] ss:$2 sm:$0xff] }
 0x180   :  { %v2050_v31 = vsel %vm1548_vm7, %v2048_v3, %v2049_v0  ;;  %v1368_v3 = vrot.slane %v1026_v39, 1  ;;  %v1190_v9 = vld [vmem:[#allocation2 + $0x337] ss:$2 sm:$0x3] }
 0x181   :  { %v2072_v26 = vpop.permute.xlu0 %2071 }
 0x182   :  { %1615 = vrot.lane.b32.xlu0 %v1578_v13, %s11895_s24  ;;  %2847 = vrot.lane.b32.xlu1 %v2843_v32, %s11895_s24  ;;  %v1482_v32 = vrot.slane %v13157_v29, 1  ;;  %v1369_v24 = vsel %vm1339_vm6, %v1367_v22, %v1368_v3  ;;  %v1843_v22 = vrot.slane %v13180_v7, 1 }
 0x183   :  { %v1864_v34 = vpop.permute.xlu1 %1863 }
 0x184   :  { %v2134_v28 = vsel %vm1661_vm4, %v2118_v20, %v1864_v34  ;;  %v1484_v39 = vsel %vm1339_vm6, %v1482_v32, %v1483_v23  ;;  %v1038_v20 = vld [vmem:[#allocation2 + $0x336] ss:$2 sm:$0x3]  ;;  %v1180_v23 = vld [vmem:[#allocation2 + $0x2e7] ss:$2 sm:$0xff] }
 0x185   :  { %v13155_v21 = vpop.permute.xlu0 %1392  ;;  %v1844_v3 = vrot.slane %v1038_v20, 1  ;;  %v1952_v6 = vrot.slane %v1180_v23, 1 }
 0x186   :  { %2087 = vrot.lane.b32.xlu0 %v2050_v31, %s11895_s24  ;;  %1277 = vrot.lane.b32.xlu1 %v1176_v15, %s11893_s15  ;;  %v1579_v31 = vrot.slane %v1032_v43, 2  ;;  %v1188_v43 = vld [vmem:[#allocation2 + $0x327] ss:$2 sm:$0xff] }
 0x187   :  { %v1976_v33 = vpop.permute.xlu1 %1975 }
 0x188   :  { %v2150_v13 = vsel %vm1678_vm11, %v2134_v28, %v1976_v33  ;;  %v1479_v28 = vrot.slane %v1176_v15, 1 }
 0x189   :  { %v13164_v0 = vsel %vm1695_vm10, %v2150_v13, %v2072_v26  ;;  %v13168_v34 = vpop.permute.xlu0 %1504  ;;  %v1480_v26 = vrot.slane %v1178_v30, 1  ;;  %v1581_v30 = vsel %vm1548_vm7, %v1579_v31, %v1580_v63  ;;  %v1956_v31 = vrot.slane %v1190_v9, 1  ;;  %v1182_v63 = vld [vmem:[#allocation2 + $0x2f7] ss:$2 sm:$0x3] }
 0x18a   :  { %19456 = vst [vmem:[#allocation39_spill] sm:$0xff] %v13164_v0  ;;  %11338 = vmatmul.mubr.msk.f32.vlgmr.msra.gmra.mxu1 %vm2186_vm12, %v13164_v0  ;;  %1408 = vrot.lane.b32.xlu0 %v1372_v5, %s11896_s29  ;;  %v1953_v4 = vrot.slane %v1182_v63, 1  ;;  %v2052_v9 = vrot.slane %v1038_v20, 2  ;;  %v13230_v63 = vld [vmem:[#allocation2 + $0x386] ss:$2 sm:$0xff] }
 0x18b   :  { %v13172_v33 = vpop.permute.xlu1 %1263  ;;  %1406 = vrot.lane.b32.xlu1 %v1369_v24, %s11896_s29  ;;  %v1481_v15 = vsel %vm1339_vm6, %v1479_v28, %v1480_v26  ;;  %v1840_v24 = vrot.slane %v13138_v38, 1  ;;  %v1845_v28 = vsel %vm1339_vm6, %v1843_v22, %v1844_v3  ;;  %v1955_v26 = vrot.slane %v1188_v43, 1  ;;  %19459 = vst [vmem:[#allocation42_spill] sm:$0xff] %v13230_v63  ;;  %v13290_v0 = vld [vmem:[#allocation2 + $0x3c6] ss:$2 sm:$0xff] }
 0x18c   :  { %v2051_v3 = vrot.slane %v13180_v7, 2  ;;  %19461 = vst [vmem:[#allocation44_spill] sm:$0xff] %v13290_v0 }
 0x18d   :  { %v13178_v8 = vpop.permute.xlu0 %1601  ;;  %v1957_v22 = vsel %vm1339_vm6, %v1955_v26, %v1956_v31 }
 0x18e   :  { %1520 = vrot.lane.b32.xlu0 %v1484_v39, %s11894_s20  ;;  %v1841_v39 = vrot.slane %v13140_v41, 1  ;;  %v2053_v20 = vsel %vm1548_vm7, %v2051_v3, %v2052_v9 }
 0x18f   :  { %v1738_v13 = vpop.permute.xlu1 %1737  ;;  %1518 = vrot.lane.b32.xlu1 %v1481_v15, %s11894_s20 }
 0x190   :  { %v2119_v10 = vsel %vm775_vm2, %v11787_v36, %v1738_v13  ;;  %v1042_v36 = vld [vmem:[#allocation2 + $0x356] ss:$2 sm:$0x3] }
 0x191   :  { %v1866_v5 = vpop.permute.xlu0 %1865 }
 0x192   :  { %1617 = vrot.lane.b32.xlu0 %v1581_v30, %s11895_s24  ;;  %v1842_v30 = vsel %vm1339_vm6, %v1840_v24, %v1841_v39  ;;  %v2135_v41 = vsel %vm1661_vm4, %v2119_v10, %v1866_v5  ;;  %v1954_v10 = vsel %vm1339_vm6, %v1952_v6, %v1953_v4  ;;  %v1582_v5 = vrot.slane %v13204_v58, 2 }
 0x193   :  { %v13187_v32 = vpop.permute.xlu1 %1265  ;;  %1751 = vrot.lane.b32.xlu1 %v1180_v23, %s11893_s15  ;;  %v1583_v24 = vrot.slane %v1042_v36, 2 }
 0x195   :  { %v1978_v15 = vpop.permute.xlu0 %1977  ;;  %v1584_v4 = vsel %vm1548_vm7, %v1582_v5, %v1583_v24 }
 0x196   :  { %1881 = vrot.lane.b32.xlu0 %v1845_v28, %s11896_s29  ;;  %v2151_v17 = vsel %vm1678_vm11, %v2135_v41, %v1978_v15  ;;  %v1050_v15 = vld [vmem:[#allocation2 + $0x396] ss:$2 sm:$0x3] }
 0x197   :  { %v13194_v45 = vpop.permute.xlu1 %1394  ;;  %1879 = vrot.lane.b32.xlu1 %v1842_v30, %s11896_s29 }
 0x199   :  { %v2074_v19 = vpop.permute.xlu0 %2073 }
 0x19a   :  { %v13207_v13 = vsel %vm1695_vm10, %v2151_v17, %v2074_v19  ;;  %1993 = vrot.lane.b32.xlu0 %v1957_v22, %s11894_s20  ;;  %v13220_v17 = vld [vmem:[#allocation2 + $0x366] ss:$2 sm:$0xff]  ;;  %v13222_v19 = vld [vmem:[#allocation2 + $0x376] ss:$2 sm:$0x3]  ;;  %v1376_v22 = vrot.slane %v13230_v63, 1 }
 0x19b   :  { %19458 = vst [vmem:[#allocation41_spill] sm:$0xff] %v13207_v13  ;;  %v13209_v23 = vpop.permute.xlu1 %1506  ;;  %11340 = vmatprep.mubr.msk.f32.mxu1 %vm2186_vm12, %v13207_v13  ;;  %1991 = vrot.lane.b32.xlu1 %v1954_v10, %s11894_s20  ;;  %v2054_v6 = vrot.slane %v13220_v17, 2  ;;  %v2055_v26 = vrot.slane %v13222_v19, 2  ;;  %v13240_v10 = vld [vmem:[#allocation2 + $0x387] ss:$2 sm:$0xff]  ;;  %v1846_v57 = vrot.slane %v13220_v17, 1 }
 0x19c   :  { %v1488_v40 = vrot.slane %v13240_v10, 1 }
 0x19d   :  { %v13218_v39 = vpop.permute.xlu0 %1603  ;;  %v2056_v41 = vsel %vm1548_vm7, %v2054_v6, %v2055_v26  ;;  %v1373_v6 = vrot.slane %v13204_v58, 1  ;;  %v1374_v26 = vrot.slane %v1042_v36, 1 }
 0x19e   :  { %2089 = vrot.lane.b32.xlu0 %v2053_v20, %s11895_s24  ;;  %v1202_v20 = vld [vmem:[#allocation2 + $0x397] ss:$2 sm:$0x3] }
 0x19f   :  { %v1740_v28 = vpop.permute.xlu1 %1739  ;;  %1279 = vrot.lane.b32.xlu1 %v13157_v29, %s11893_s15  ;;  %v1377_v29 = vrot.slane %v1050_v15, 1  ;;  %v1489_v44 = vrot.slane %v1202_v20, 1  ;;  %v1375_v36 = vsel %vm1339_vm6, %v1373_v6, %v1374_v26  ;;  %v1586_v20 = vrot.slane %v1050_v15, 2  ;;  %v1206_v15 = vld [vmem:[#allocation2 + $0x3b7] ss:$2 sm:$0x3] }
 0x1a0   :  { %v2120_v3 = vsel %vm775_vm2, %v12892_v1, %v1740_v28 }
 0x1a1   :  { %v2076_v31 = vpop.permute.xlu0 %2075  ;;  %v1378_v28 = vsel %vm1339_vm6, %v1376_v22, %v1377_v29  ;;  %v1490_v22 = vsel %vm1339_vm6, %v1488_v40, %v1489_v44  ;;  %v1585_v29 = vrot.slane %v13230_v63, 2  ;;  %v1850_v40 = vrot.slane %v1054_v37, 1 }
 0x1a2   :  { %1619 = vrot.lane.b32.xlu0 %v1584_v4, %s11895_s24 }
 0x1a3   :  { %v1868_v30 = vpop.permute.xlu1 %1867  ;;  %1753 = vrot.lane.b32.xlu1 %v1188_v43, %s11893_s15  ;;  %v1192_v43 = vld [vmem:[#allocation2 + $0x347] ss:$2 sm:$0xff]  ;;  %v1587_v6 = vsel %vm1548_vm7, %v1585_v29, %v1586_v20  ;;  %v1962_v29 = vrot.slane %v1206_v15, 1  ;;  %v1198_v20 = vld [vmem:[#allocation2 + $0x377] ss:$2 sm:$0x3] }
 0x1a4   :  { %v2136_v5 = vsel %vm1661_vm4, %v2120_v3, %v1868_v30  ;;  %v1194_v30 = vld [vmem:[#allocation2 + $0x357] ss:$2 sm:$0x3]  ;;  %v1959_v55 = vrot.slane %v1198_v20, 1  ;;  %v2058_v15 = vrot.slane %v1054_v37, 2 }
 0x1a5   :  { %v13238_v9 = vpop.permute.xlu0 %1396  ;;  %v13316_v20 = vld [vmem:[#allocation2 + $0x406] ss:$2 sm:$0xff] }
 0x1a6   :  { %2091 = vrot.lane.b32.xlu0 %v2056_v41, %s11895_s24  ;;  %19463 = vst [vmem:[#allocation46_spill] sm:$0xff] %v13316_v20 }
 0x1a7   :  { %v1980_v24 = vpop.permute.xlu1 %1979  ;;  %1281 = vrot.lane.b32.xlu1 %v1192_v43, %s11893_s15 }
 0x1a8   :  { %v2152_v4 = vsel %vm1678_vm11, %v2136_v5, %v1980_v24  ;;  %v1485_v5 = vrot.slane %v1192_v43, 1 }
 0x1a9   :  { %v13248_v1 = vsel %vm1695_vm10, %v2152_v4, %v2076_v31  ;;  %v13252_v3 = vpop.permute.xlu0 %1508  ;;  %v1486_v31 = vrot.slane %v1194_v30, 1  ;;  %v13265_v4 = vld [vmem:[#allocation2 + $0x3a6] ss:$2 sm:$0xff] }
 0x1aa   :  { %19460 = vst [vmem:[#allocation43_spill] sm:$0xff] %v13248_v1  ;;  %11341 = vmatmul.mubr.msk.f32.gmra.mxu1 %vm2186_vm12, %v13248_v1  ;;  %1412 = vrot.lane.b32.xlu0 %v1378_v28, %s11896_s29  ;;  %v1849_v26 = vrot.slane %v13265_v4, 1  ;;  %v1204_v28 = vld [vmem:[#allocation2 + $0x3a7] ss:$2 sm:$0xff] }
 0x1ab   :  { %v13256_v41 = vpop.permute.xlu1 %1267  ;;  %1410 = vrot.lane.b32.xlu1 %v1375_v36, %s11896_s29  ;;  %v1487_v43 = vsel %vm1339_vm6, %v1485_v5, %v1486_v31  ;;  %v1196_v36 = vld [vmem:[#allocation2 + $0x367] ss:$2 sm:$0xff]  ;;  %v1961_v31 = vrot.slane %v1204_v28, 1 }
 0x1ac   :  { %v1851_v5 = vsel %vm1339_vm6, %v1849_v26, %v1850_v40  ;;  %v1958_v47 = vrot.slane %v1196_v36, 1  ;;  %v2057_v40 = vrot.slane %v13265_v4, 2 }
 0x1ad   :  { %v13263_v24 = vpop.permute.xlu0 %1605  ;;  %v1963_v26 = vsel %vm1339_vm6, %v1961_v31, %v1962_v29 }
 0x1ae   :  { %1524 = vrot.lane.b32.xlu0 %v1490_v22, %s11894_s20  ;;  %v1847_v22 = vrot.slane %v13222_v19, 1  ;;  %v2059_v37 = vsel %vm1548_vm7, %v2057_v40, %v2058_v15 }
 0x1af   :  { %v1742_v18 = vpop.permute.xlu1 %1741  ;;  %1522 = vrot.lane.b32.xlu1 %v1487_v43, %s11894_s20 }
 0x1b0   :  { %v2121_v56 = vsel %vm775_vm2, %v12939_v12, %v1742_v18  ;;  %v1058_v12 = vld [vmem:[#allocation2 + $0x3d6] ss:$2 sm:$0x3] }
 0x1b1   :  { %v1870_v44 = vpop.permute.xlu0 %1869 }
 0x1b2   :  { %1621 = vrot.lane.b32.xlu0 %v1587_v6, %s11895_s24  ;;  %v1848_v6 = vsel %vm1339_vm6, %v1846_v57, %v1847_v22  ;;  %v2137_v19 = vsel %vm1661_vm4, %v2121_v56, %v1870_v44  ;;  %v1960_v56 = vsel %vm1339_vm6, %v1958_v47, %v1959_v55  ;;  %v1588_v44 = vrot.slane %v13290_v0, 2 }
 0x1b3   :  { %v13272_v30 = vpop.permute.xlu1 %1269  ;;  %1755 = vrot.lane.b32.xlu1 %v1196_v36, %s11893_s15  ;;  %v1589_v36 = vrot.slane %v1058_v12, 2 }
 0x1b5   :  { %v1982_v43 = vpop.permute.xlu0 %1981  ;;  %v1590_v55 = vsel %vm1548_vm7, %v1588_v44, %v1589_v36 }
 0x1b6   :  { %1885 = vrot.lane.b32.xlu0 %v1851_v5, %s11896_s29  ;;  %v2153_v1 = vsel %vm1678_vm11, %v2137_v19, %v1982_v43  ;;  %v1066_v43 = vld [vmem:[#allocation2 + $0x416] ss:$2 sm:$0x3] }
 0x1b7   :  { %v13279_v16 = vpop.permute.xlu1 %1398  ;;  %1883 = vrot.lane.b32.xlu1 %v1848_v6, %s11896_s29 }
 0x1b9   :  { %v2078_v13 = vpop.permute.xlu0 %2077 }
 0x1ba   :  { %v13293_v18 = vsel %vm1695_vm10, %v2153_v1, %v2078_v13  ;;  %1997 = vrot.lane.b32.xlu0 %v1963_v26, %s11894_s20  ;;  %v13306_v13 = vld [vmem:[#allocation2 + $0x3e6] ss:$2 sm:$0xff]  ;;  %v13308_v1 = vld [vmem:[#allocation2 + $0x3f6] ss:$2 sm:$0x3]  ;;  %v1382_v26 = vrot.slane %v13316_v20, 1 }
 0x1bb   :  { %19462 = vst [vmem:[#allocation45_spill] sm:$0xff] %v13293_v18  ;;  %v13295_v57 = vpop.permute.xlu1 %1510  ;;  %11343 = vmatprep.mubr.msk.f32.mxu1 %vm2186_vm12, %v13293_v18  ;;  %1995 = vrot.lane.b32.xlu1 %v1960_v56, %s11894_s20  ;;  %v2060_v47 = vrot.slane %v13306_v13, 2  ;;  %v2061_v31 = vrot.slane %v13308_v1, 2  ;;  %v13326_v56 = vld [vmem:[#allocation2 + $0x407] ss:$2 sm:$0xff] }
 0x1bc   :  { %v1494_v18 = vrot.slane %v13326_v56, 1 }
 0x1bd   :  { %v13304_v22 = vpop.permute.xlu0 %1607  ;;  %v2062_v19 = vsel %vm1548_vm7, %v2060_v47, %v2061_v31  ;;  %v1379_v47 = vrot.slane %v13290_v0, 1  ;;  %v1380_v31 = vrot.slane %v1058_v12, 1 }
 0x1be   :  { %2093 = vrot.lane.b32.xlu0 %v2059_v37, %s11895_s24  ;;  %v1218_v37 = vld [vmem:[#allocation2 + $0x417] ss:$2 sm:$0x3] }
 0x1bf   :  { %v1744_v5 = vpop.permute.xlu1 %1743  ;;  %1283 = vrot.lane.b32.xlu1 %v13240_v10, %s11893_s15  ;;  %v1383_v10 = vrot.slane %v1066_v43, 1  ;;  %v1495_v58 = vrot.slane %v1218_v37, 1  ;;  %v1381_v12 = vsel %vm1339_vm6, %v1379_v47, %v1380_v31  ;;  %v1592_v37 = vrot.slane %v1066_v43, 2  ;;  %v1222_v43 = vld [vmem:[#allocation2 + $0x437] ss:$2 sm:$0x3] }
 0x1c0   :  { %v2122_v40 = vsel %vm775_vm2, %v12982_v25, %v1744_v5 }
 0x1c1   :  { %v2080_v29 = vpop.permute.xlu0 %2079  ;;  %v1384_v5 = vsel %vm1339_vm6, %v1382_v26, %v1383_v10  ;;  %v1496_v26 = vsel %vm1339_vm6, %v1494_v18, %v1495_v58  ;;  %v1591_v10 = vrot.slane %v13316_v20, 2  ;;  %v1852_v20 = vrot.slane %v13306_v13, 1 }
 0x1c2   :  { %1623 = vrot.lane.b32.xlu0 %v1590_v55, %s11895_s24 }
 0x1c3   :  { %v1872_v6 = vpop.permute.xlu1 %1871  ;;  %1757 = vrot.lane.b32.xlu1 %v1204_v28, %s11893_s15  ;;  %v1208_v28 = vld [vmem:[#allocation2 + $0x3c7] ss:$2 sm:$0xff]  ;;  %v1593_v47 = vsel %vm1548_vm7, %v1591_v10, %v1592_v37  ;;  %v1968_v10 = vrot.slane %v1222_v43, 1  ;;  %v1214_v37 = vld [vmem:[#allocation2 + $0x3f7] ss:$2 sm:$0x3] }
 0x1c4   :  { %v2138_v44 = vsel %vm1661_vm4, %v2122_v40, %v1872_v6  ;;  %v1210_v6 = vld [vmem:[#allocation2 + $0x3d7] ss:$2 sm:$0x3] }
 0x1c5   :  { %v13324_v15 = vpop.permute.xlu0 %1400 }
 0x1c6   :  { %2095 = vrot.lane.b32.xlu0 %v2062_v19, %s11895_s24 }
 0x1c7   :  { %v1984_v36 = vpop.permute.xlu1 %1983  ;;  %1285 = vrot.lane.b32.xlu1 %v1208_v28, %s11893_s15 }
 0x1c8   :  { %v2154_v55 = vsel %vm1678_vm11, %v2138_v44, %v1984_v36  ;;  %v1491_v44 = vrot.slane %v1208_v28, 1 }
 0x1c9   :  { %v13334_v25 = vsel %vm1695_vm10, %v2154_v55, %v2080_v29  ;;  %v13338_v40 = vpop.permute.xlu0 %1512  ;;  %v1492_v29 = vrot.slane %v1210_v6, 1  ;;  %v13351_v55 = vld [vmem:[#allocation2 + $0x426] ss:$2 sm:$0xff] }
 0x1ca   :  { %19464 = vst [vmem:[#allocation47_spill] sm:$0xff] %v13334_v25  ;;  %11344 = vmatmul.mubr.msk.f32.gmra.mxu1 %vm2186_vm12, %v13334_v25  ;;  %1416 = vrot.lane.b32.xlu0 %v1384_v5, %s11896_s29  ;;  %v1070_v25 = vld [vmem:[#allocation2 + $0x436] ss:$2 sm:$0x3]  ;;  %v1855_v31 = vrot.slane %v13351_v55, 1 }
 0x1cb   :  { %v13342_v19 = vpop.permute.xlu1 %1271  ;;  %1414 = vrot.lane.b32.xlu1 %v1381_v12, %s11896_s29  ;;  %v1493_v28 = vsel %vm1339_vm6, %v1491_v44, %v1492_v29  ;;  %v1856_v58 = vrot.slane %v1070_v25, 1  ;;  %v1220_v5 = vld [vmem:[#allocation2 + $0x427] ss:$2 sm:$0xff]  ;;  %v2064_v43 = vrot.slane %v1070_v25, 2 }
 0x1cc   :  { %v1212_v12 = vld [vmem:[#allocation2 + $0x3e7] ss:$2 sm:$0xff]  ;;  %v1967_v29 = vrot.slane %v1220_v5, 1 }
 0x1cd   :  { %v13349_v36 = vpop.permute.xlu0 %1609  ;;  %v1857_v44 = vsel %vm1339_vm6, %v1855_v31, %v1856_v58  ;;  %v1964_v53 = vrot.slane %v1212_v12, 1  ;;  %v2063_v58 = vrot.slane %v13351_v55, 2 }
 0x1ce   :  { %1528 = vrot.lane.b32.xlu0 %v1496_v26, %s11894_s20  ;;  %v1853_v26 = vrot.slane %v13308_v1, 1  ;;  %v1969_v31 = vsel %vm1339_vm6, %v1967_v29, %v1968_v10 }
 0x1cf   :  { %v1746_v0 = vpop.permute.xlu1 %1745  ;;  %1526 = vrot.lane.b32.xlu1 %v1493_v28, %s11894_s20 }
 0x1d0   :  { %v2123_v63 = vsel %vm775_vm2, %v13034_v61, %v1746_v0 }
 0x1d1   :  { %v1874_v18 = vpop.permute.xlu0 %1873 }
 0x1d2   :  { %1625 = vrot.lane.b32.xlu0 %v1593_v47, %s11895_s24  ;;  %v1854_v47 = vsel %vm1339_vm6, %v1852_v20, %v1853_v26  ;;  %v2139_v1 = vsel %vm1661_vm4, %v2123_v63, %v1874_v18  ;;  %v13381_v20 = vld [vmem:[#allocation2 + $0x476] ss:$2 sm:$0x3]  ;;  %v2065_v26 = vsel %vm1548_vm7, %v2063_v58, %v2064_v43 }
 0x1d3   :  { %v13358_v6 = vpop.permute.xlu1 %1273  ;;  %1759 = vrot.lane.b32.xlu1 %v1212_v12, %s11893_s15  ;;  %v13379_v12 = vld [vmem:[#allocation2 + $0x466] ss:$2 sm:$0xff]  ;;  %v2067_v29 = vrot.slane %v13381_v20, 2 }
 0x1d4   :  { %19465 = vst [vmem:[#allocation48_spill] sm:$0xff] %v13358_v6  ;;  %v1965_v6 = vrot.slane %v1214_v37, 1 }
 0x1d5   :  { %v1986_v28 = vpop.permute.xlu0 %1985 }
 0x1d6   :  { %1889 = vrot.lane.b32.xlu0 %v1857_v44, %s11896_s29  ;;  %v2155_v61 = vsel %vm1678_vm11, %v2139_v1, %v1986_v28  ;;  %v1966_v25 = vsel %vm1339_vm6, %v1964_v53, %v1965_v6  ;;  %v2066_v44 = vrot.slane %v13379_v12, 2  ;;  %v11788_v28 = vld [vmem:[#allocation2 + $0x2a6] ss:$2 sm:$0xff]  ;;  %v1232_v1 = vld [vmem:[#allocation2 + $0x487] ss:$2 sm:$0xff] }
 0x1d7   :  { %v13365_v54 = vpop.permute.xlu1 %1402  ;;  %1887 = vrot.lane.b32.xlu1 %v1854_v47, %s11896_s29  ;;  %v2125_v53 = vsel %vm775_vm2, %v11788_v28, %v12686_v35  ;;  %v2602_v35 = vrot.slane %v1232_v1, 1  ;;  %v1224_v28 = vld [vmem:[#allocation2 + $0x447] ss:$2 sm:$0xff] }
 0x1d8   :  { %19466 = vst [vmem:[#allocation49_spill] sm:$0xff] %v13365_v54  ;;  %v1716_v54 = vld [vmem:[%s19367_s3 + $0x20] sm:$0xff]  ;;  %v2068_v6 = vsel %vm1548_vm7, %v2066_v44, %v2067_v29  ;;  %v2141_v43 = vsel %vm1661_vm4, %v2125_v53, %v12723_v14  ;;  %v1714_v44 = vld [vmem:[%s19367_s3 + $0x10] sm:$0xff] }
 0x1d9   :  { %v2082_v0 = vpop.permute.xlu0 %2081  ;;  %11361 = vmatprep.subr.mxu1 %v1716_v54 }
 0x1da   :  { %v13384_v63 = vsel %vm1695_vm10, %v2155_v61, %v2082_v0  ;;  %11362 = vmatpush3.msra.mxu1 %v1716_v54  ;;  %2001 = vrot.lane.b32.xlu0 %v1969_v31, %s11894_s20  ;;  %v1715_v54 = vld [vmem:[%s19367_s3 + $0x18] sm:$0xff] }
 0x1db   :  { %19467 = vst [vmem:[#allocation50_spill] sm:$0xff] %v13384_v63  ;;  %v13386_v18 = vpop.permute.xlu1 %1514  ;;  %11346 = vmatprep.mubr.msk.f32.mxu1 %vm2186_vm12, %v13384_v63  ;;  %1999 = vrot.lane.b32.xlu1 %v1966_v25, %s11894_s20  ;;  %v1234_v31 = vld [vmem:[#allocation2 + $0x497] ss:$2 sm:$0x3]  ;;  %v13411_v25 = vld [vmem:[#allocation2 + $0x446] ss:$2 sm:$0xff] }
 0x1dc   :  { %11363 = vmatprep.subr.mxu1 %v1715_v54  ;;  %v1074_v61 = vld [vmem:[#allocation2 + $0x456] ss:$2 sm:$0x3]  ;;  %v2603_v0 = vrot.slane %v1234_v31, 1  ;;  %19469 = vst [vmem:[#allocation52_spill] sm:$0xff] %v13411_v25 }
 0x1dd   :  { %v13396_v10 = vpop.permute.xlu0 %1611  ;;  %11364 = vmatpush3.msra.mxu1 %v1715_v54  ;;  %v2157_v54 = vsel %vm1678_vm11, %v2141_v43, %v12736_v46  ;;  %v1226_v31 = vld [vmem:[#allocation2 + $0x457] ss:$2 sm:$0x3]  ;;  %v13496_v63 = vld [vmem:[#allocation2 + $0x486] ss:$2 sm:$0xff] }
 0x1de   :  { %19468 = vst [vmem:[#allocation51_spill] sm:$0xff] %v13396_v10  ;;  %2097 = vrot.lane.b32.xlu0 %v2065_v26, %s11895_s24  ;;  %11365 = vmatprep.subr.mxu1 %v1714_v44  ;;  %v2173_v46 = vsel %vm1695_vm10, %v2157_v54, %v12744_v48  ;;  %v1238_v43 = vld [vmem:[#allocation2 + $0x4b7] ss:$2 sm:$0x3]  ;;  %19481 = vst [vmem:[#allocation64_spill] sm:$0xff] %v13496_v63 }
 0x1df   :  { %v1748_v37 = vpop.permute.xlu1 %1747  ;;  %1287 = vrot.lane.b32.xlu1 %v13326_v56, %s11893_s15  ;;  %11366 = vmatpush3.msra.mxu1 %v1714_v44  ;;  %v1497_v44 = vrot.slane %v1224_v28, 1  ;;  %v2833_v48 = vrot.slane %v1238_v43, 1  ;;  %v13461_v43 = vld [vmem:[#allocation3 + $0x146] sm:$0xf] }
 0x1e0   :  { %v2124_v56 = vsel %vm775_vm2, %v13086_v59, %v1748_v37  ;;  %v1385_v59 = vrot.slane %v13411_v25, 1  ;;  %v1386_v37 = vrot.slane %v1074_v61, 1 }
 0x1e1   :  { %v2084_v47 = vpop.permute.xlu0 %2083 }
 0x1e2   :  { %2099 = vrot.lane.b32.xlu0 %v2068_v6, %s11895_s24  ;;  %v2604_v6 = vsel %vm1339_vm6, %v2602_v35, %v2603_v0  ;;  %v1498_v35 = vrot.slane %v1226_v31, 1  ;;  %v1713_v0 = vld [vmem:[%s19367_s3 + $0x8] sm:$0xff]  ;;  %v13458_v31 = vld [vmem:[#allocation3 + $0x13e] sm:$0xff] }
 0x1e3   :  { %v1876_v58 = vpop.permute.xlu1 %1875  ;;  %1761 = vrot.lane.b32.xlu1 %v1220_v5, %s11893_s15  ;;  %11367 = vmatprep.subr.mxu1 %v1713_v0 }
 0x1e4   :  { %v2140_v14 = vsel %vm1661_vm4, %v2124_v56, %v1876_v58  ;;  %11368 = vmatpush3.msra.mxu1 %v1713_v0  ;;  %v13472_v0 = vld [vmem:[#allocation3 + $0xfe] sm:$0xf] }
 0x1e5   :  { %v13415_v26 = vpop.permute.xlu0 %2575 }
 0x1e6   :  { %19470 = vst [vmem:[#allocation53_spill] sm:$0xff] %v13415_v26  ;;  %2577 = vrot.lane.b32.xlu0 %v1232_v1, %s11893_s15  ;;  %v1236_v1 = vld [vmem:[#allocation2 + $0x4a7] ss:$2 sm:$0xff] }
 0x1e7   :  { %v1988_v29 = vpop.permute.xlu1 %1987  ;;  %1289 = vrot.lane.b32.xlu1 %v1224_v28, %s11893_s15  ;;  %v1594_v28 = vrot.slane %v13411_v25, 2 }
 0x1e8   :  { %v2156_v5 = vsel %vm1678_vm11, %v2140_v14, %v1988_v29  ;;  %v2832_v14 = vrot.slane %v1236_v1, 1 }
 0x1e9   :  { %v13428_v53 = vsel %vm1695_vm10, %v2156_v5, %v2084_v47  ;;  %v13431_v58 = vpop.permute.xlu0 %2605  ;;  %v1387_v47 = vsel %vm1339_vm6, %v1385_v59, %v1386_v37  ;;  %v1499_v5 = vsel %vm1339_vm6, %v1497_v44, %v1498_v35  ;;  %v1595_v59 = vrot.slane %v1074_v61, 2  ;;  %v1712_v37 = vld [vmem:[%s19367_s3] sm:$0xff]  ;;  %v13470_v35 = vld [vmem:[#allocation3 + $0xf6] sm:$0xff] }
 0x1ea   :  { %19471 = vst [vmem:[#allocation54_spill] sm:$0xff] %v13428_v53  ;;  %19472 = vst [vmem:[#allocation55_spill] sm:$0xff] %v13431_v58  ;;  %11347 = vmatmul.mubr.msk.f32.gmra.mxu1 %vm2186_vm12, %v13428_v53  ;;  %2607 = vrot.lane.b32.xlu0 %v2604_v6, %s11894_s20  ;;  %v2834_v6 = vsel %vm1339_vm6, %v2832_v14, %v2833_v48  ;;  %v5663_v48 = vrot.slane %v13470_v35, 1  ;;  %v5760_v53 = vrot.slane %v13472_v0, 2 }
 0x1eb   :  { %11349 = vmatprep.mubr.msk.f32.mxu1 %vm2186_vm12, %v2173_v46  ;;  %v13438_v56 = vpop.permute.xlu1 %2591  ;;  %1418 = vrot.lane.b32.xlu1 %v1387_v47, %s11896_s29  ;;  %v3792_v46 = vrot.slane %v13458_v31, 3  ;;  %v1596_v47 = vsel %vm1548_vm7, %v1594_v28, %v1595_v59  ;;  %v1858_v28 = vrot.slane %v13379_v12, 1  ;;  %v1859_v59 = vrot.slane %v13381_v20, 1  ;;  %v1082_v20 = vld [vmem:[#allocation2 + $0x496] ss:$2 sm:$0x3] }
 0x1ec   :  { %19473 = vst [vmem:[#allocation56_spill] sm:$0xff] %v13438_v56  ;;  %11369 = vmatprep.subr.mxu1 %v1712_v37  ;;  %v3521_v56 = vld [vmem:[#allocation3 + $0xfe] sm:$0xf]  ;;  %v2589_v10 = vrot.slane %v1082_v20, 1 }
 0x1ed   :  { %v13446_v29 = vpop.permute.xlu0 %2805  ;;  %11370 = vmatpush3.msra.mxu1 %v1712_v37  ;;  %v6360_v26 = vrot.slane %v3521_v56, 1 }
 0x1ee   :  { %19474 = vst [vmem:[#allocation57_spill] sm:$0xff] %v13446_v29  ;;  %2807 = vrot.lane.b32.xlu0 %v1236_v1, %s11893_s15  ;;  %v3793_v1 = vrot.slane %v13461_v43, 3 }
 0x1ef   :  { %v13448_v54 = vpop.permute.xlu1 %2617  ;;  %1530 = vrot.lane.b32.xlu1 %v1499_v5, %s11894_s20  ;;  %v5664_v5 = vrot.slane %v13472_v0, 1 }
 0x1f0   :  { %19475 = vst [vmem:[#allocation58_spill] sm:$0xff] %v13448_v54  ;;  %v3794_v14 = vsel %vm3764_vm8, %v3792_v46, %v3793_v1  ;;  %v1230_v46 = vld [vmem:[#allocation2 + $0x477] ss:$2 sm:$0x3]  ;;  %v1860_v54 = vsel %vm1339_vm6, %v1858_v28, %v1859_v59  ;;  %v6361_v28 = vsel %vm1339_vm6, %v5663_v48, %v6360_v26 }
 0x1f1   :  { %v13464_v44 = vpop.permute.xlu0 %2835  ;;  %v5665_v1 = vsel %vm1339_vm6, %v5663_v48, %v5664_v5  ;;  %v1971_v58 = vrot.slane %v1230_v46, 1 }
 0x1f2   :  { %19476 = vst [vmem:[#allocation59_spill] sm:$0xff] %v13464_v44  ;;  %2837 = vrot.lane.b32.xlu0 %v2834_v6, %s11894_s20  ;;  %v1228_v6 = vld [vmem:[#allocation2 + $0x467] ss:$2 sm:$0xff] }
 0x1f3   :  { %v13466_v61 = vpop.permute.xlu1 %2821  ;;  %1627 = vrot.lane.b32.xlu1 %v1596_v47, %s11895_s24  ;;  %v13488_v47 = vld [vmem:[%s19367_s3 + $0x70] sm:$0xff]  ;;  %v1970_v29 = vrot.slane %v1228_v6, 1 }
 0x1f4   :  { %19477 = vst [vmem:[#allocation60_spill] sm:$0xff] %v13466_v61  ;;  %11395 = vmatprep.subr.mxu1 %v13488_v47  ;;  %v6455_v61 = vrot.slane %v13470_v35, 2 }
 0x1f5   :  { %v13478_v44 = vpop.permute.xlu0 %1615 }
 0x1f6   :  { %19478 = vst [vmem:[#allocation61_spill] sm:$0xff] %v13478_v44  ;;  %3831 = vrot.lane.b32.xlu0 %v3794_v14, %s11897_s16  ;;  %v5761_v5 = vsel %vm1548_vm7, %v6455_v61, %v5760_v53  ;;  %v2588_v44 = vrot.slane %v13496_v63, 1  ;;  %v5856_v53 = vrot.slane %v13472_v0, 3 }
 0x1f7   :  { %v13480_v37 = vpop.permute.xlu1 %2847  ;;  %1763 = vrot.lane.b32.xlu1 %v1228_v6, %s11893_s15  ;;  %v1972_v6 = vsel %vm1339_vm6, %v1970_v29, %v1971_v58  ;;  %v13520_v58 = vld [vmem:[#allocation2 + $0x4a6] ss:$2 sm:$0xff]  ;;  %v1086_v29 = vld [vmem:[#allocation2 + $0x4b6] ss:$2 sm:$0x3] }
 0x1f8   :  { %19479 = vst [vmem:[#allocation62_spill] sm:$0xff] %v13480_v37  ;;  %v2590_v46 = vsel %vm1339_vm6, %v2588_v44, %v2589_v10  ;;  %19486 = vst [vmem:[#allocation69_spill] sm:$0xff] %v13520_v58  ;;  %v2818_v10 = vrot.slane %v13520_v58, 1  ;;  %v2819_v44 = vrot.slane %v1086_v29, 1 }
 0x1f9   :  { %v2088_v14 = vpop.permute.xlu0 %2087 }
 0x1fa   :  { %5704 = vrot.lane.b32.xlu0 %v5665_v1, %s11896_s29  ;;  %v2614_v1 = vrot.slane %v13496_v63, 2  ;;  %v2820_v63 = vsel %vm1339_vm6, %v2818_v10, %v2819_v44 }
 0x1fb   :  { %v13494_v37 = vpop.permute.xlu1 %1277  ;;  %1891 = vrot.lane.b32.xlu1 %v1860_v54, %s11896_s29  ;;  %v5855_v54 = vrot.slane %v13470_v35, 3 }
 0x1fc   :  { %19480 = vst [vmem:[#allocation63_spill] sm:$0xff] %v13494_v37 }
 0x1fd   :  { %v13503_v25 = vpop.permute.xlu0 %1408  ;;  %v5857_v26 = vsel %vm3764_vm8, %v5855_v54, %v5856_v53 }
 0x1fe   :  { %19482 = vst [vmem:[#allocation65_spill] sm:$0xff] %v13503_v25  ;;  %5800 = vrot.lane.b32.xlu0 %v5761_v5, %s11895_s24  ;;  %v2615_v25 = vrot.slane %v1082_v20, 2 }
 0x1ff   :  { %v13506_v37 = vpop.permute.xlu1 %1406  ;;  %2003 = vrot.lane.b32.xlu1 %v1972_v6, %s11894_s20 }
 0x200   :  { %19483 = vst [vmem:[#allocation66_spill] sm:$0xff] %v13506_v37  ;;  %v2616_v5 = vsel %vm1548_vm7, %v2614_v1, %v2615_v25 }
 0x201   :  { %v13514_v59 = vpop.permute.xlu0 %1520 }
 0x202   :  { %19484 = vst [vmem:[#allocation67_spill] sm:$0xff] %v13514_v59  ;;  %6401 = vrot.lane.b32.xlu0 %v6361_v28, %s11896_s29  ;;  %v11791_v28 = vld [vmem:[#allocation3 + $0x126] sm:$0xff] }
 0x203   :  { %v13518_v37 = vpop.permute.xlu1 %1518  ;;  %2593 = vrot.lane.b32.xlu1 %v2590_v46, %s11896_s29  ;;  %v3886_v59 = vrot.slane %v11791_v28, 4  ;;  %v11792_v46 = vld [vmem:[#allocation3 + $0x12e] sm:$0xf] }
 0x204   :  { %19485 = vst [vmem:[#allocation68_spill] sm:$0xff] %v13518_v37  ;;  %v3887_v37 = vrot.slane %v11792_v46, 4 }
 0x205   :  { %v13525_v48 = vpop.permute.xlu0 %1617 }
 0x206   :  { %19487 = vst [vmem:[#allocation70_spill] sm:$0xff] %v13525_v48  ;;  %5896 = vrot.lane.b32.xlu0 %v5857_v26, %s11897_s16  ;;  %v3888_v1 = vsel %vm3861_vm9, %v3886_v59, %v3887_v37  ;;  %v3889_v26 = vrot.slane %v13458_v31, 4  ;;  %v6456_v37 = vrot.slane %v3521_v56, 2 }
 0x207   :  { %v1752_v6 = vpop.permute.xlu1 %1751  ;;  %2619 = vrot.lane.b32.xlu1 %v2616_v5, %s11895_s24  ;;  %v3890_v5 = vrot.slane %v13461_v43, 4 }
 0x208   :  { %v2126_v25 = vsel %vm775_vm2, %v13138_v38, %v1752_v6  ;;  %v6457_v59 = vsel %vm1548_vm7, %v6455_v61, %v6456_v37  ;;  %v2845_v61 = vrot.slane %v1086_v29, 2 }
 0x209   :  { %v1882_v20 = vpop.permute.xlu0 %1881  ;;  %v3891_v38 = vsel %vm3861_vm9, %v3889_v26, %v3890_v5  ;;  %v2844_v26 = vrot.slane %v13520_v58, 2 }
 0x20b   :  { %v1880_v54 = vpop.permute.xlu1 %1879  ;;  %2823 = vrot.lane.b32.xlu1 %v2820_v63, %s11896_s29 }
 0x20c   :  { %v2142_v48 = vsel %vm1661_vm4, %v2126_v25, %v1880_v54 }
 0x20d   :  { %v1994_v53 = vpop.permute.xlu0 %1993 }
 0x20f   :  { %v1992_v10 = vpop.permute.xlu1 %1991  ;;  %3926 = vrot.lane.b32.xlu1 %v3888_v1, %s11898_s22 }
 0x210   :  { %v2158_v44 = vsel %vm1678_vm11, %v2142_v48, %v1992_v10  ;;  %v5951_v48 = vrot.slane %v13470_v35, 4 }
 0x211   :  { %v13542_v28 = vsel %vm1695_vm10, %v2158_v44, %v2088_v14  ;;  %v2090_v63 = vpop.permute.xlu0 %2089  ;;  %v5952_v14 = vrot.slane %v13472_v0, 4  ;;  %v2846_v0 = vsel %vm1548_vm7, %v2844_v26, %v2845_v61 }
 0x212   :  { %19488 = vst [vmem:[#allocation71_spill] sm:$0xff] %v13542_v28  ;;  %11350 = vmatmul.mubr.msk.f32.gmra.mxu1 %vm2186_vm12, %v13542_v28 }
 0x213   :  { %v13547_v31 = vpop.permute.xlu1 %1279  ;;  %3928 = vrot.lane.b32.xlu1 %v3891_v38, %s11898_s22  ;;  %v5953_v1 = vsel %vm3861_vm9, %v5951_v48, %v5952_v14 }
 0x215   :  { %v13550_v43 = vpop.permute.xlu0 %1619 }
 0x217   :  { %v1754_v6 = vpop.permute.xlu1 %1753  ;;  %6497 = vrot.lane.b32.xlu1 %v6457_v59, %s11895_s24 }
 0x218   :  { %v2127_v46 = vsel %vm775_vm2, %v13180_v7, %v1754_v6 }
 0x219   :  { %v2143_v54 = vsel %vm1661_vm4, %v2127_v46, %v1882_v20  ;;  %v2092_v56 = vpop.permute.xlu0 %2091 }
 0x21a   :  { %v2159_v25 = vsel %vm1678_vm11, %v2143_v54, %v1994_v53 }
 0x21b   :  { %v13562_v5 = vpop.permute.xlu1 %1281  ;;  %v13565_v35 = vsel %vm1695_vm10, %v2159_v25, %v2090_v63  ;;  %5992 = vrot.lane.b32.xlu1 %v5953_v1, %s11898_s22 }
 0x21c   :  { %19489 = vst [vmem:[#allocation72_spill] sm:$0xff] %v13565_v35  ;;  %11352 = vmatprep.mubr.msk.f32.mxu1 %vm2186_vm12, %v13565_v35 }
 0x21d   :  { %v13570_v7 = vpop.permute.xlu0 %1412 }
 0x21f   :  { %v13573_v20 = vpop.permute.xlu1 %1410  ;;  %2849 = vrot.lane.b32.xlu1 %v2846_v0, %s11895_s24 }
 0x221   :  { %v13576_v53 = vpop.permute.xlu0 %1524 }
 0x223   :  { %v13578_v29 = vpop.permute.xlu1 %1522 }
 0x225   :  { %v13580_v10 = vpop.permute.xlu0 %1621 }
 0x227   :  { %v1756_v44 = vpop.permute.xlu1 %1755 }
 0x228   :  { %v2128_v37 = vsel %vm775_vm2, %v13220_v17, %v1756_v44 }
 0x229   :  { %v1886_v63 = vpop.permute.xlu0 %1885 }
 0x22b   :  { %v1884_v38 = vpop.permute.xlu1 %1883 }
 0x22c   :  { %v2144_v48 = vsel %vm1661_vm4, %v2128_v37, %v1884_v38 }
 0x22d   :  { %v1998_v59 = vpop.permute.xlu0 %1997 }
 0x22f   :  { %v1996_v14 = vpop.permute.xlu1 %1995 }
 0x230   :  { %v2160_v6 = vsel %vm1678_vm11, %v2144_v48, %v1996_v14 }
 0x231   :  { %v13587_v46 = vsel %vm1695_vm10, %v2160_v6, %v2092_v56  ;;  %v2094_v54 = vpop.permute.xlu0 %2093 }
 0x232   :  { %19490 = vst [vmem:[#allocation73_spill] sm:$0xff] %v13587_v46  ;;  %11353 = vmatmul.mubr.msk.f32.gmra.mxu1 %vm2186_vm12, %v13587_v46 }
 0x233   :  { %v13591_v25 = vpop.permute.xlu1 %1283 }
 0x235   :  { %v13593_v1 = vpop.permute.xlu0 %1623 }
 0x237   :  { %v1758_v26 = vpop.permute.xlu1 %1757 }
 0x238   :  { %v2129_v17 = vsel %vm775_vm2, %v13265_v4, %v1758_v26 }
 0x239   :  { %v2145_v61 = vsel %vm1661_vm4, %v2129_v17, %v1886_v63  ;;  %v2096_v0 = vpop.permute.xlu0 %2095 }
 0x23a   :  { %v2161_v44 = vsel %vm1678_vm11, %v2145_v61, %v1998_v59 }
 0x23b   :  { %v13599_v38 = vpop.permute.xlu1 %1285  ;;  %v13602_v56 = vsel %vm1695_vm10, %v2161_v44, %v2094_v54 }
 0x23c   :  { %19491 = vst [vmem:[#allocation74_spill] sm:$0xff] %v13602_v56  ;;  %11355 = vmatprep.mubr.msk.f32.mxu1 %vm2186_vm12, %v13602_v56 }
 0x23d   :  { %v13606_v37 = vpop.permute.xlu0 %1416 }
 0x23f   :  { %v13608_v48 = vpop.permute.xlu1 %1414 }
 0x241   :  { %v13610_v14 = vpop.permute.xlu0 %1528 }
 0x243   :  { %v13612_v4 = vpop.permute.xlu1 %1526 }
 0x245   :  { %v13614_v6 = vpop.permute.xlu0 %1625 }
 0x247   :  { %v1760_v63 = vpop.permute.xlu1 %1759 }
 0x248   :  { %v2130_v26 = vsel %vm775_vm2, %v13306_v13, %v1760_v63 }
 0x249   :  { %v1890_v54 = vpop.permute.xlu0 %1889 }
 0x24b   :  { %v1888_v59 = vpop.permute.xlu1 %1887 }
 0x24c   :  { %v2146_v17 = vsel %vm1661_vm4, %v2130_v26, %v1888_v59 }
 0x24d   :  { %v2002_v46 = vpop.permute.xlu0 %2001 }
 0x24f   :  { %v2000_v61 = vpop.permute.xlu1 %1999 }
 0x250   :  { %v2162_v44 = vsel %vm1678_vm11, %v2146_v17, %v2000_v61 }
 0x251   :  { %v13621_v58 = vsel %vm1695_vm10, %v2162_v44, %v2096_v0  ;;  %v2098_v63 = vpop.permute.xlu0 %2097 }
 0x252   :  { %19492 = vst [vmem:[#allocation75_spill] sm:$0xff] %v13621_v58  ;;  %11356 = vmatmul.mubr.msk.f32.gmra.mxu1 %vm2186_vm12, %v13621_v58 }
 0x253   :  { %v13625_v56 = vpop.permute.xlu1 %1287 }
 0x257   :  { %v1762_v35 = vpop.permute.xlu1 %1761 }
 0x258   :  { %v2131_v28 = vsel %vm775_vm2, %v13351_v55, %v1762_v35  ;;  %v11793_v35 = vld [vmem:[#allocation2 + $0x6] ss:$2 sm:$0xff] }
 0x259   :  { %v2147_v13 = vsel %vm1661_vm4, %v2131_v28, %v1890_v54  ;;  %v1645_v28 = vsel %vm775_vm2, %v11793_v35, %v12888_v62  ;;  %v2100_v35 = vpop.permute.xlu0 %2099 }
 0x25a   :  { %v2163_v59 = vsel %vm1678_vm11, %v2147_v13, %v2002_v46  ;;  %v1662_v54 = vsel %vm1661_vm4, %v1645_v28, %v12746_v49  ;;  %v11794_v13 = vld [vmem:[#allocation2 + $0x86] ss:$2 sm:$0xff] }
 0x25b   :  { %v13631_v26 = vpop.permute.xlu1 %1289  ;;  %v13634_v0 = vsel %vm1695_vm10, %v2163_v59, %v2098_v63  ;;  %v1647_v63 = vsel %vm775_vm2, %v11794_v13, %v13172_v33 }
 0x25c   :  { %19493 = vst [vmem:[#allocation76_spill] sm:$0xff] %v13634_v0  ;;  %11358 = vmatprep.mubr.msk.f32.mxu1 %vm2186_vm12, %v13634_v0  ;;  %v1664_v49 = vsel %vm1661_vm4, %v1647_v63, %v13155_v21 }
 0x25d   :  { %v1681_v21 = vsel %vm1678_vm11, %v1664_v49, %v13168_v34 }
 0x25e   :  { %v13689_v34 = vsel %vm1695_vm10, %v1681_v21, %v13178_v8  ;;  %v2633_v8 = vld [vmem:[%s19367_s3 + $0x60] sm:$0xff] }
 0x25f   :  { %v13638_v17 = vpop.permute.xlu1 %1418  ;;  %v19501_v21 = vld [vmem:[#allocation51_spill] sm:$0xff] }
 0x263   :  { %v13640_v61 = vpop.permute.xlu1 %1530 }
 0x264   :  { %19494 = vst [vmem:[#allocation77_spill] sm:$0xff] %v13640_v61  ;;  %v11795_v61 = vld [vmem:[#allocation2 + $0x46] ss:$2 sm:$0xff] }
 0x265   :  { %v1646_v62 = vsel %vm775_vm2, %v11795_v61, %v13123_v11 }
 0x266   :  { %v1663_v33 = vsel %vm1661_vm4, %v1646_v62, %v13132_v42  ;;  %v11802_v62 = vld [vmem:[#allocation2 + $0x1c6] ss:$2 sm:$0xff] }
 0x267   :  { %v13642_v44 = vpop.permute.xlu1 %1627 }
 0x268   :  { %19495 = vst [vmem:[#allocation78_spill] sm:$0xff] %v13642_v44  ;;  %v1679_v44 = vsel %vm1678_vm11, %v1662_v54, %v12748_v50  ;;  %v1680_v50 = vsel %vm1678_vm11, %v1663_v33, %v13142_v60  ;;  %v11800_v54 = vld [vmem:[#allocation2 + $0x146] ss:$2 sm:$0xff] }
 0x269   :  { %v1696_v11 = vsel %vm1695_vm10, %v1679_v44, %v12750_v51  ;;  %v2634_v51 = vld [vmem:[%s19367_s3 + $0x68] sm:$0xff]  ;;  %v2632_v44 = vld [vmem:[%s19367_s3 + $0x58] sm:$0xff] }
 0x26a   :  { %v11803_v33 = vld [vmem:[#allocation2 + $0x2c6] ss:$2 sm:$0xff] }
 0x26b   :  { %v1764_v55 = vpop.permute.xlu1 %1763 }
 0x26c   :  { %v2132_v59 = vsel %vm775_vm2, %v13379_v12, %v1764_v55  ;;  %v11796_v12 = vld [vmem:[#allocation2 + $0x106] ss:$2 sm:$0xff] }
 0x26d   :  { %v1649_v55 = vsel %vm775_vm2, %v11796_v12, %v13256_v41  ;;  %v13680_v41 = vsel %vm1695_vm10, %v1680_v50, %v13130_v2  ;;  %v19499_v12 = vld [vmem:[#allocation63_spill] sm:$0xff]  ;;  %v19500_v50 = vld [vmem:[#allocation65_spill] sm:$0xff] }
 0x26e   :  { %v1666_v42 = vsel %vm1661_vm4, %v1649_v55, %v13238_v9  ;;  %v1654_v55 = vsel %vm775_vm2, %v11803_v33, %v19499_v12  ;;  %v19518_v33 = vld [vmem:[#allocation58_spill] sm:$0xff] }
 0x26f   :  { %v1892_v46 = vpop.permute.xlu1 %1891 }
 0x270   :  { %v2148_v0 = vsel %vm1661_vm4, %v2132_v59, %v1892_v46  ;;  %v2865_v59 = vld [vmem:[%s19367_s3 + $0x98] sm:$0xff] }
 0x273   :  { %v2004_v58 = vpop.permute.xlu1 %2003 }
 0x274   :  { %v2164_v28 = vsel %vm1678_vm11, %v2148_v0, %v2004_v58  ;;  %v11797_v58 = vld [vmem:[#allocation2 + $0x186] ss:$2 sm:$0xff] }
 0x275   :  { %v13665_v46 = vsel %vm1695_vm10, %v2164_v28, %v2100_v35  ;;  %v1651_v60 = vsel %vm775_vm2, %v11797_v58, %v13342_v19  ;;  %v11798_v0 = vld [vmem:[#allocation2 + $0xc6] ss:$2 sm:$0xff]  ;;  %v1683_v19 = vsel %vm1678_vm11, %v1666_v42, %v13252_v3 }
 0x276   :  { %11359 = vmatmul.mubr.msk.f32.gmra.mxu1 %vm2186_vm12, %v13665_v46  ;;  %v1648_v9 = vsel %vm775_vm2, %v11798_v0, %v13187_v32  ;;  %v1668_v61 = vsel %vm1661_vm4, %v1651_v60, %v13324_v15  ;;  %v1650_v15 = vsel %vm775_vm2, %v11800_v54, %v13272_v30  ;;  %v19498_v35 = vld [vmem:[#allocation12_spill] sm:$0xff]  ;;  %v19502_v58 = vld [vmem:[#allocation66_spill] sm:$0xff] }
 0x277   :  { %11371 = vmatprep.mubr.msk.f32.mxu1 %vm2186_vm12, %v1696_v11  ;;  %v1665_v2 = vsel %vm1661_vm4, %v1648_v9, %v13194_v45  ;;  %v11799_v45 = vld [vmem:[#allocation2 + $0x286] ss:$2 sm:$0xff]  ;;  %v1671_v60 = vsel %vm1661_vm4, %v1654_v55, %v19502_v58  ;;  %v2594_v55 = vpop.permute.xlu1 %2593 }
 0x278   :  { %v1682_v32 = vsel %vm1678_vm11, %v1665_v2, %v13209_v23  ;;  %v1653_v3 = vsel %vm775_vm2, %v11799_v45, %v12912_v27  ;;  %v13720_v23 = vsel %vm1695_vm10, %v1683_v19, %v13263_v24  ;;  %v1667_v27 = vsel %vm1661_vm4, %v1650_v15, %v13279_v16  ;;  %v2631_v24 = vld [vmem:[%s19367_s3 + $0x50] sm:$0xff] }
 0x279   :  { %v1670_v30 = vsel %vm1661_vm4, %v1653_v3, %v12752_v52  ;;  %v1684_v13 = vsel %vm1678_vm11, %v1667_v27, %v13295_v57  ;;  %v19496_v57 = vld [vmem:[#allocation48_spill] sm:$0xff]  ;;  %v19505_v2 = vld [vmem:[#allocation13_spill] sm:$0xff] }
 0x27a   :  { %11372 = vmatmul.mubr.msk.f32.vlgmr.msra.gmra.mxu1 %vm2186_vm12, %v13680_v41  ;;  %v13741_v16 = vsel %vm1695_vm10, %v1684_v13, %v13304_v22  ;;  %v1652_v49 = vsel %vm775_vm2, %v11802_v62, %v19496_v57  ;;  %v19497_v22 = vld [vmem:[#allocation49_spill] sm:$0xff]  ;;  %v1687_v28 = vsel %vm1678_vm11, %v1670_v30, %v19498_v35  ;;  %v3095_v35 = vld [vmem:[%s19367_s3 + $0xc0] sm:$0xff] }
 0x27b   :  { %11396 = vmatpush3.msra.mxu1 %v13488_v47  ;;  %11374 = vmatprep.mubr.msk.f32.mxu1 %vm2186_vm12, %v13689_v34  ;;  %v13713_v47 = vsel %vm1695_vm10, %v1682_v32, %v13218_v39  ;;  %v1685_v39 = vsel %vm1678_vm11, %v1668_v61, %v13338_v40  ;;  %v11801_v40 = vld [vmem:[#allocation2 + $0x306] ss:$2 sm:$0xff]  ;;  %v1704_v19 = vsel %vm1695_vm10, %v1687_v28, %v19505_v2  ;;  %v19517_v28 = vld [vmem:[#allocation55_spill] sm:$0xff] }
 0x27c   :  { %11397 = vmatprep.subr.mxu1 %v2634_v51  ;;  %v1655_v63 = vsel %vm775_vm2, %v11801_v40, %v13547_v31  ;;  %v13750_v52 = vsel %vm1695_vm10, %v1685_v39, %v13349_v36  ;;  %v1669_v31 = vsel %vm1661_vm4, %v1652_v49, %v19497_v22  ;;  %v19507_v61 = vld [vmem:[#allocation40_spill] sm:$0xff]  ;;  %v19509_v15 = vld [vmem:[#allocation61_spill] sm:$0xff]  ;;  %v19520_v2 = vld [vmem:[#allocation39_spill] sm:$0xff] }
 0x27d   :  { %11398 = vmatpush3.msra.mxu1 %v2634_v51  ;;  %v1686_v36 = vsel %vm1678_vm11, %v1669_v31, %v13386_v18  ;;  %v1672_v11 = vsel %vm1661_vm4, %v1655_v63, %v19500_v50  ;;  %v19503_v51 = vld [vmem:[#allocation42_spill] sm:$0xff]  ;;  %v19504_v18 = vld [vmem:[#allocation68_spill] sm:$0xff]  ;;  %v1656_v45 = vsel %vm775_vm2, %v19507_v61, %v13562_v5  ;;  %v19515_v57 = vld [vmem:[#allocation53_spill] sm:$0xff]  ;;  %v2578_v50 = vpop.permute.xlu0 %2577 }
 0x27e   :  { %11375 = vmatmul.mubr.msk.f32.gmra.mxu1 %vm2186_vm12, %v13713_v47  ;;  %11399 = vmatprep.subr.mxu1 %v2633_v8  ;;  %v13770_v42 = vsel %vm1695_vm10, %v1686_v36, %v19501_v21  ;;  %v1657_v0 = vsel %vm775_vm2, %v19503_v51, %v13591_v25  ;;  %v1688_v9 = vsel %vm1678_vm11, %v1671_v60, %v19504_v18  ;;  %v19514_v63 = vld [vmem:[#allocation78_spill] sm:$0xff]  ;;  %v19516_v22 = vld [vmem:[#allocation56_spill] sm:$0xff]  ;;  %v19523_v61 = vld [vmem:[#allocation43_spill] sm:$0xff] }
 0x27f   :  { %11377 = vmatprep.mubr.msk.f32.mxu1 %vm2186_vm12, %v13720_v23  ;;  %11400 = vmatpush3.msra.mxu1 %v2633_v8  ;;  %v19506_v8 = vld [vmem:[#allocation67_spill] sm:$0xff]  ;;  %v1674_v25 = vsel %vm1661_vm4, %v1657_v0, %v13570_v7  ;;  %v1673_v3 = vsel %vm1661_vm4, %v1656_v45, %v13573_v20  ;;  %v1705_v27 = vsel %vm1695_vm10, %v1688_v9, %v19509_v15  ;;  %v19511_v20 = vld [vmem:[#allocation44_spill] sm:$0xff]  ;;  %v3093_v45 = vld [vmem:[%s19367_s3 + $0xb0] sm:$0xff] }
 0x280   :  { %11401 = vmatprep.subr.mxu1 %v2632_v44  ;;  %v1689_v32 = vsel %vm1678_vm11, %v1672_v11, %v19506_v8  ;;  %v1690_v39 = vsel %vm1678_vm11, %v1673_v3, %v13578_v29  ;;  %v1691_v7 = vsel %vm1678_vm11, %v1674_v25, %v13576_v53  ;;  %v2620_v11 = vpop.permute.xlu1 %2619  ;;  %v19519_v21 = vld [vmem:[#allocation64_spill] sm:$0xff]  ;;  %v19524_v3 = vld [vmem:[#allocation45_spill] sm:$0xff] }
 0x281   :  { %11402 = vmatpush3.msra.mxu1 %v2632_v44  ;;  %v19508_v44 = vld [vmem:[#allocation46_spill] sm:$0xff]  ;;  %v13818_v13 = vsel %vm1695_vm10, %v1690_v39, %v13550_v43  ;;  %v13826_v53 = vsel %vm1695_vm10, %v1691_v7, %v13580_v10  ;;  %v2624_v58 = vsel %vm775_vm2, %v19519_v21, %v2578_v50  ;;  %v2608_v51 = vpop.permute.xlu0 %2607  ;;  %v3092_v25 = vld [vmem:[%s19367_s3 + $0xa8] sm:$0xff] }
 0x282   :  { %11378 = vmatmul.mubr.msk.f32.gmra.mxu1 %vm2186_vm12, %v13741_v16  ;;  %11403 = vmatprep.subr.mxu1 %v2631_v24  ;;  %v1659_v54 = vsel %vm775_vm2, %v19508_v44, %v13625_v56  ;;  %v1658_v56 = vsel %vm775_vm2, %v19511_v20, %v13599_v38  ;;  %v2626_v60 = vsel %vm1661_vm4, %v2624_v58, %v2594_v55  ;;  %v19525_v44 = vld [vmem:[#allocation47_spill] sm:$0xff]  ;;  %v11805_v15 = vld [vmem:[#allocation2 + $0x226] ss:$2 sm:$0xff] }
 0x283   :  { %11380 = vmatprep.mubr.msk.f32.mxu1 %vm2186_vm12, %v13750_v52  ;;  %11404 = vmatpush3.msra.mxu1 %v2631_v24  ;;  %v19510_v24 = vld [vmem:[#allocation70_spill] sm:$0xff]  ;;  %v1676_v30 = vsel %vm1661_vm4, %v1659_v54, %v13606_v37  ;;  %v1675_v29 = vsel %vm1661_vm4, %v1658_v56, %v13608_v48  ;;  %v19512_v37 = vld [vmem:[#allocation52_spill] sm:$0xff]  ;;  %v2628_v0 = vsel %vm1678_vm11, %v2626_v60, %v2608_v51  ;;  %v19544_v60 = vld [vmem:[#allocation15_spill] sm:$0xff] }
 0x284   :  { %11429 = vmatprep.subr.mxu1 %v2865_v59  ;;  %v13803_v5 = vsel %vm1695_vm10, %v1689_v32, %v19510_v24  ;;  %v1692_v40 = vsel %vm1678_vm11, %v1675_v29, %v13612_v4  ;;  %v1693_v38 = vsel %vm1678_vm11, %v1676_v30, %v13610_v14  ;;  %v1660_v48 = vsel %vm775_vm2, %v19512_v37, %v13631_v26  ;;  %v19513_v14 = vld [vmem:[#allocation77_spill] sm:$0xff]  ;;  %v2824_v18 = vpop.permute.xlu1 %2823  ;;  %v3091_v54 = vld [vmem:[%s19367_s3 + $0xa0] sm:$0xff]  ;;  %v19529_v30 = vld [vmem:[#allocation50_spill] sm:$0xff] }
 0x285   :  { %v13834_v43 = vsel %vm1695_vm10, %v1692_v40, %v13593_v1  ;;  %v13843_v10 = vsel %vm1695_vm10, %v1693_v38, %v13614_v6  ;;  %v1677_v4 = vsel %vm1661_vm4, %v1660_v48, %v13638_v17  ;;  %v2864_v6 = vld [vmem:[%s19367_s3 + $0x90] sm:$0xff]  ;;  %v2863_v26 = vld [vmem:[%s19367_s3 + $0x88] sm:$0xff]  ;;  %v2862_v17 = vld [vmem:[%s19367_s3 + $0x80] sm:$0xff]  ;;  %v13916_v9 = vsel %vm1695_vm10, %v2628_v0, %v2620_v11 }
 0x286   :  { %11381 = vmatmul.mubr.msk.f32.gmra.mxu1 %vm2186_vm12, %v13770_v42  ;;  %v1694_v1 = vsel %vm1678_vm11, %v1677_v4, %v19513_v14  ;;  %v19522_v32 = vld [vmem:[#allocation41_spill] sm:$0xff]  ;;  %v19528_v7 = vld [vmem:[#allocation60_spill] sm:$0xff]  ;;  %v19530_v29 = vld [vmem:[#allocation54_spill] sm:$0xff] }
 0x287   :  { %11383 = vmatprep.mubr.msk.f32.mxu1 %vm2186_vm12, %v1704_v19  ;;  %v13853_v62 = vsel %vm1695_vm10, %v1694_v1, %v19514_v63  ;;  %v3094_v19 = vld [vmem:[%s19367_s3 + $0xb8] sm:$0xff]  ;;  %v4033_v56 = vld [vmem:[%s19369_s5 + $0x48] sm:$0xff]  ;;  %v4028_v58 = vld [vmem:[%s19369_s5 + $0x20] sm:$0xff] }
 0x288   :  { %v13925_v8 = vpop.permute.xlu1 %3926  ;;  %v19531_v40 = vld [vmem:[#allocation59_spill] sm:$0xff]  ;;  %v19532_v37 = vld [vmem:[#allocation62_spill] sm:$0xff]  ;;  %v19535_v1 = vld [vmem:[#allocation72_spill] sm:$0xff] }
 0x289   :  { %19521 = vst [vmem:[#allocation48_spill] sm:$0xff] %v13925_v8  ;;  %v19534_v14 = vld [vmem:[#allocation71_spill] sm:$0xff]  ;;  %v19536_v63 = vld [vmem:[#allocation73_spill] sm:$0xff]  ;;  %v19542_v50 = vld [vmem:[#allocation14_spill] sm:$0xff] }
 0x28a   :  { %11384 = vmatmul.mubr.msk.f32.gmra.mxu1 %vm2186_vm12, %v1705_v27  ;;  %v11806_v55 = vld [vmem:[#allocation2 + $0x246] ss:$2 sm:$0xff]  ;;  %v19545_v51 = vld [vmem:[#allocation19_spill] sm:$0xff] }
 0x28b   :  { %11386 = vmatprep.mubr.msk.f32.mxu1 %vm2186_vm12, %v13803_v5  ;;  %v3083_v11 = vsel %vm775_vm2, %v11806_v55, %v19542_v50  ;;  %v4029_v21 = vld [vmem:[%s19369_s5 + $0x28] sm:$0xff] }
 0x28c   :  { %v13946_v24 = vpop.permute.xlu1 %3928 }
 0x28d   :  { %19527 = vst [vmem:[#allocation49_spill] sm:$0xff] %v13946_v24 }
 0x28e   :  { %11387 = vmatmul.mubr.msk.f32.gmra.mxu1 %vm2186_vm12, %v13818_v13 }
 0x28f   :  { %11389 = vmatprep.mubr.msk.f32.mxu1 %vm2186_vm12, %v13826_v53 }
 0x290   :  { %v13961_v4 = vpop.permute.xlu1 %6497 }
 0x291   :  { %19533 = vst [vmem:[#allocation12_spill] sm:$0xff] %v13961_v4 }
 0x292   :  { %11390 = vmatmul.mubr.msk.f32.gmra.mxu1 %vm2186_vm12, %v13834_v43 }
 0x293   :  { %11392 = vmatprep.mubr.msk.f32.mxu1 %vm2186_vm12, %v13843_v10 }
 0x296   :  { %11393 = vmatmul.mubr.msk.f32.gmra.mxu1 %vm2186_vm12, %v13853_v62 }
 0x297   :  { %11405 = vmatprep.mubr.msk.f32.mxu1 %vm2186_vm12, %v13680_v41  ;;  %v2861_v41 = vld [vmem:[%s19367_s3 + $0x78] sm:$0xff] }
 0x29a   :  { %11406 = vmatmul.mubr.msk.f32.vlgmr.msra.gmra.mxu1 %vm2186_vm12, %v13689_v34 }
 0x29b   :  { %11430 = vmatpush3.msra.mxu1 %v2865_v59  ;;  %11408 = vmatprep.mubr.msk.f32.mxu1 %vm2186_vm12, %v13713_v47  ;;  %v11804_v59 = vld [vmem:[#allocation2 + $0x206] ss:$2 sm:$0xff] }
 0x29c   :  { %11431 = vmatprep.subr.mxu1 %v2864_v6  ;;  %v2623_v49 = vsel %vm775_vm2, %v11804_v59, %v19515_v57  ;;  %v19540_v59 = vld [vmem:[#allocation69_spill] sm:$0xff] }
 0x29d   :  { %11432 = vmatpush3.msra.mxu1 %v2864_v6  ;;  %v2625_v31 = vsel %vm1661_vm4, %v2623_v49, %v19516_v22  ;;  %v13970_v6 = vpop.permute.xlu1 %5992 }
 0x29e   :  { %11409 = vmatmul.mubr.msk.f32.gmra.mxu1 %vm2186_vm12, %v13720_v23  ;;  %11433 = vmatprep.subr.mxu1 %v2863_v26  ;;  %v2627_v36 = vsel %vm1678_vm11, %v2625_v31, %v19517_v28  ;;  %19537 = vst [vmem:[#allocation63_spill] sm:$0xff] %v13970_v6  ;;  %v19541_v31 = vld [vmem:[#allocation76_spill] sm:$0xff] }
 0x29f   :  { %11411 = vmatprep.mubr.msk.f32.mxu1 %vm2186_vm12, %v13741_v16  ;;  %11434 = vmatpush3.msra.mxu1 %v2863_v26  ;;  %v13894_v12 = vsel %vm1695_vm10, %v2627_v36, %v19518_v33  ;;  %v2808_v26 = vpop.permute.xlu0 %2807  ;;  %v4032_v33 = vld [vmem:[%s19369_s5 + $0x40] sm:$0xff] }
 0x2a0   :  { %11435 = vmatprep.subr.mxu1 %v2862_v17  ;;  %v2854_v57 = vsel %vm775_vm2, %v19540_v59, %v2808_v26 }
 0x2a1   :  { %11436 = vmatpush3.msra.mxu1 %v2862_v17  ;;  %v19538_v17 = vld [vmem:[#allocation74_spill] sm:$0xff]  ;;  %v2856_v49 = vsel %vm1661_vm4, %v2854_v57, %v2824_v18  ;;  %v2850_v22 = vpop.permute.xlu1 %2849 }
 0x2a2   :  { %11412 = vmatmul.mubr.msk.f32.gmra.mxu1 %vm2186_vm12, %v13750_v52  ;;  %11437 = vmatprep.subr.mxu1 %v2861_v41  ;;  %v4026_v18 = vld [vmem:[%s19369_s5 + $0x10] sm:$0xff] }
 0x2a3   :  { %11414 = vmatprep.mubr.msk.f32.mxu1 %vm2186_vm12, %v13770_v42  ;;  %11438 = vmatpush3.msra.mxu1 %v2861_v41  ;;  %v19539_v41 = vld [vmem:[#allocation75_spill] sm:$0xff] }
 0x2a4   :  { %11463 = vmatprep.subr.mxu1 %v3095_v35 }
 0x2a6   :  { %11415 = vmatmul.mubr.msk.f32.gmra.mxu1 %vm2186_vm12, %v13894_v12 }
 0x2a7   :  { %11417 = vmatprep.mubr.msk.f32.mxu1 %vm2186_vm12, %v1705_v27  ;;  %v19526_v27 = vld [vmem:[#allocation57_spill] sm:$0xff] }
 0x2a8   :  { %v2853_v39 = vsel %vm775_vm2, %v11805_v15, %v19526_v27  ;;  %v19551_v27 = vld [vmem:[#allocation17_spill] sm:$0xff] }
 0x2a9   :  { %v2855_v20 = vsel %vm1661_vm4, %v2853_v39, %v19528_v7 }
 0x2aa   :  { %11418 = vmatmul.mubr.msk.f32.gmra.mxu1 %vm2186_vm12, %v13803_v5  ;;  %v2857_v38 = vsel %vm1678_vm11, %v2855_v20, %v19531_v40  ;;  %v19553_v20 = vld [vmem:[#allocation29_spill] sm:$0xff] }
 0x2ab   :  { %11420 = vmatprep.mubr.msk.f32.mxu1 %vm2186_vm12, %v13818_v13  ;;  %v2859_v48 = vsel %vm1695_vm10, %v2857_v38, %v19532_v37  ;;  %v19556_v38 = vld [vmem:[#allocation31_spill] sm:$0xff] }
 0x2ae   :  { %11421 = vmatmul.mubr.msk.f32.gmra.mxu1 %vm2186_vm12, %v13826_v53 }
 0x2af   :  { %11423 = vmatprep.mubr.msk.f32.mxu1 %vm2186_vm12, %v13834_v43 }
 0x2b2   :  { %11424 = vmatmul.mubr.msk.f32.gmra.mxu1 %vm2186_vm12, %v13843_v10 }
 0x2b3   :  { %11426 = vmatprep.mubr.msk.f32.mxu1 %vm2186_vm12, %v13853_v62 }
 0x2b6   :  { %11427 = vmatmul.mubr.msk.f32.gmra.mxu1 %vm2186_vm12, %v13916_v9 }
 0x2b7   :  { %11439 = vmatprep.mubr.msk.f32.mxu1 %vm2186_vm12, %v19520_v2  ;;  %v19546_v2 = vld [vmem:[#allocation16_spill] sm:$0xff] }
 0x2ba   :  { %11440 = vmatmul.mubr.msk.f32.vlgmr.msra.gmra.mxu1 %vm2186_vm12, %v19522_v32  ;;  %v11808_v32 = vld [vmem:[#allocation3 + $0x6] sm:$0xff] }
 0x2bb   :  { %11464 = vmatpush3.msra.mxu1 %v3095_v35  ;;  %11442 = vmatprep.mubr.msk.f32.mxu1 %vm2186_vm12, %v19523_v61  ;;  %v2838_v35 = vpop.permute.xlu0 %2837  ;;  %v19547_v61 = vld [vmem:[#allocation25_spill] sm:$0xff] }
 0x2bc   :  { %11465 = vmatprep.subr.mxu1 %v3094_v19  ;;  %v2858_v28 = vsel %vm1678_vm11, %v2856_v49, %v2838_v35  ;;  %v3522_v49 = vld [vmem:[#allocation3 + $0x10e] sm:$0xff] }
 0x2bd   :  { %11466 = vmatpush3.msra.mxu1 %v3094_v19  ;;  %v2860_v36 = vsel %vm1695_vm10, %v2858_v28, %v2850_v22  ;;  %v3523_v22 = vld [vmem:[#allocation3 + $0x116] sm:$0xf] }
 0x2be   :  { %11443 = vmatmul.mubr.msk.f32.gmra.mxu1 %vm2186_vm12, %v19524_v3  ;;  %11467 = vmatprep.subr.mxu1 %v3093_v45  ;;  %v6363_v35 = vrot.slane %v3523_v22, 1 }
 0x2bf   :  { %11445 = vmatprep.mubr.msk.f32.mxu1 %vm2186_vm12, %v19525_v44  ;;  %11468 = vmatpush3.msra.mxu1 %v3093_v45  ;;  %v3958_v45 = vsel %vm1661_vm4, %v11808_v32, %v19547_v61  ;;  %v11809_v44 = vld [vmem:[#allocation3 + $0x1e] sm:$0xff] }
 0x2c0   :  { %11469 = vmatprep.subr.mxu1 %v3092_v25 }
 0x2c1   :  { %11470 = vmatpush3.msra.mxu1 %v3092_v25  ;;  %v19548_v25 = vld [vmem:[#allocation20_spill] sm:$0xff] }
 0x2c2   :  { %11446 = vmatmul.mubr.msk.f32.gmra.mxu1 %vm2186_vm12, %v19529_v30  ;;  %11471 = vmatprep.subr.mxu1 %v3091_v54 }
 0x2c3   :  { %11448 = vmatprep.mubr.msk.f32.mxu1 %vm2186_vm12, %v19530_v29  ;;  %11472 = vmatpush3.msra.mxu1 %v3091_v54  ;;  %v19550_v54 = vld [vmem:[#allocation27_spill] sm:$0xff]  ;;  %v19555_v29 = vld [vmem:[#allocation32_spill] sm:$0xff] }
 0x2c4   :  { %11541 = vmatprep.subr.mxu1 %v4033_v56  ;;  %v3959_v15 = vsel %vm1661_vm4, %v11809_v44, %v19550_v54 }
 0x2c6   :  { %11449 = vmatmul.mubr.msk.f32.gmra.mxu1 %vm2186_vm12, %v2859_v48 }
 0x2c7   :  { %11451 = vmatprep.mubr.msk.f32.mxu1 %vm2186_vm12, %v19534_v14  ;;  %v14077_v14 = vpop.f32.mrf.mxu1 }
 0x2ca   :  { %11452 = vmatmul.mubr.msk.f32.gmra.mxu1 %vm2186_vm12, %v19535_v1 }
 0x2cb   :  { %11454 = vmatprep.mubr.msk.f32.mxu1 %vm2186_vm12, %v19536_v63 }
 0x2ce   :  { %11455 = vmatmul.mubr.msk.f32.gmra.mxu1 %vm2186_vm12, %v19538_v17 }
 0x2cf   :  { %11457 = vmatprep.mubr.msk.f32.mxu1 %vm2186_vm12, %v19539_v41 }
 0x2d2   :  { %11458 = vmatmul.mubr.msk.f32.gmra.mxu1 %vm2186_vm12, %v19541_v31  ;;  %v6362_v31 = vrot.slane %v3522_v49, 1 }
 0x2d3   :  { %11460 = vmatprep.mubr.msk.f32.mxu1 %vm2186_vm12, %v13665_v46  ;;  %v4031_v46 = vld [vmem:[%s19369_s5 + $0x38] sm:$0xff] }
 0x2d6   :  { %11461 = vmatmul.mubr.msk.f32.gmra.mxu1 %vm2186_vm12, %v2860_v36  ;;  %v6364_v36 = vsel %vm1339_vm6, %v6362_v31, %v6363_v35 }
 0x2d7   :  { %11473 = vmatprep.mubr.msk.f32.mxu1 %vm2186_vm12, %v13689_v34  ;;  %v4030_v34 = vld [vmem:[%s19369_s5 + $0x30] sm:$0xff]  ;;  %6403 = vrot.lane.b32.xlu0 %v6364_v36, %s11896_s29 }
 0x2da   :  { %11474 = vmatmul.mubr.msk.f32.vlgmr.msra.gmra.mxu1 %vm2186_vm12, %v13713_v47  ;;  %v19543_v47 = vld [vmem:[#allocation18_spill] sm:$0xff] }
 0x2db   :  { %11476 = vmatprep.mubr.msk.f32.mxu1 %vm2186_vm12, %v13720_v23  ;;  %11542 = vmatpush3.msra.mxu1 %v4033_v56  ;;  %v3085_v23 = vsel %vm1661_vm4, %v3083_v11, %v19543_v47  ;;  %v3975_v56 = vsel %vm1695_vm10, %v3959_v15, %v19553_v20 }
 0x2dc   :  { %11543 = vmatprep.subr.mxu1 %v4032_v33  ;;  %v3992_v37 = vsel %vm3990_vm14, %v3975_v56, %v19556_v38 }
 0x2dd   :  { %11544 = vmatpush3.msra.mxu1 %v4032_v33 }
 0x2de   :  { %11477 = vmatmul.mubr.msk.f32.gmra.mxu1 %vm2186_vm12, %v13741_v16  ;;  %11545 = vmatprep.subr.mxu1 %v4031_v46  ;;  %v3087_v16 = vsel %vm1678_vm11, %v3085_v23, %v19544_v60 }
 0x2df   :  { %11479 = vmatprep.mubr.msk.f32.mxu1 %vm2186_vm12, %v13750_v52  ;;  %11546 = vmatpush3.msra.mxu1 %v4031_v46  ;;  %v4027_v52 = vld [vmem:[%s19369_s5 + $0x18] sm:$0xff]  ;;  %v3089_v0 = vsel %vm1695_vm10, %v3087_v16, %v19545_v51 }
 0x2e0   :  { %11547 = vmatprep.subr.mxu1 %v4030_v34 }
 0x2e1   :  { %11548 = vmatpush3.msra.mxu1 %v4030_v34 }
 0x2e2   :  { %11480 = vmatmul.mubr.msk.f32.gmra.mxu1 %vm2186_vm12, %v13770_v42  ;;  %11549 = vmatprep.subr.mxu1 %v4029_v21  ;;  %v4025_v42 = vld [vmem:[%s19369_s5 + $0x8] sm:$0xff] }
 0x2e3   :  { %11482 = vmatprep.mubr.msk.f32.mxu1 %vm2186_vm12, %v13894_v12  ;;  %11550 = vmatpush3.msra.mxu1 %v4029_v21  ;;  %v4024_v12 = vld [vmem:[%s19369_s5] sm:$0xff] }
 0x2e4   :  { %11551 = vmatprep.subr.mxu1 %v4028_v58 }
 0x2e5   :  { %11552 = vmatpush3.msra.mxu1 %v4028_v58 }
 0x2e6   :  { %11483 = vmatmul.mubr.msk.f32.gmra.mxu1 %vm2186_vm12, %v3089_v0  ;;  %11553 = vmatprep.subr.mxu1 %v4027_v52 }
 0x2e7   :  { %11485 = vmatprep.mubr.msk.f32.mxu1 %vm2186_vm12, %v13803_v5  ;;  %11554 = vmatpush3.msra.mxu1 %v4027_v52  ;;  %v11807_v5 = vld [vmem:[#allocation2 + $0x4c6] ss:$2 sm:$0xff] }
 0x2e8   :  { %11555 = vmatprep.subr.mxu1 %v4026_v18  ;;  %v3084_v19 = vsel %vm775_vm2, %v11807_v5, %v19546_v2  ;;  %vm8284_vm2 = vcmask 521216  }
 0x2e9   :  { %11556 = vmatpush3.msra.mxu1 %v4026_v18 }
 0x2ea   :  { %11486 = vmatmul.mubr.msk.f32.gmra.mxu1 %vm2186_vm12, %v13818_v13  ;;  %11557 = vmatprep.subr.mxu1 %v4025_v42  ;;  %v3086_v13 = vsel %vm1661_vm4, %v3084_v19, %v19548_v25 }
 0x2eb   :  { %11488 = vmatprep.mubr.msk.f32.mxu1 %vm2186_vm12, %v13826_v53  ;;  %11558 = vmatpush3.msra.mxu1 %v4025_v42  ;;  %v19549_v53 = vld [vmem:[#allocation28_spill] sm:$0xff]  ;;  %v3088_v39 = vsel %vm1678_vm11, %v3086_v13, %v19551_v27 }
 0x2ec   :  { %11559 = vmatprep.subr.mxu1 %v4024_v12  ;;  %v3974_v3 = vsel %vm1695_vm10, %v3958_v45, %v19549_v53 }
 0x2ed   :  { %11560 = vmatpush3.msra.mxu1 %v4024_v12 }
 0x2ee   :  { %11489 = vmatmul.mubr.msk.f32.gmra.mxu1 %vm2186_vm12, %v13834_v43  ;;  %v19552_v43 = vld [vmem:[#allocation30_spill] sm:$0xff] }
 0x2ef   :  { %11491 = vmatprep.mubr.msk.f32.mxu1 %vm2186_vm12, %v13843_v10  ;;  %v3991_v7 = vsel %vm3990_vm14, %v3974_v3, %v19552_v43  ;;  %v19554_v10 = vld [vmem:[#allocation21_spill] sm:$0xff] }
 0x2f0   :  { %v3090_v30 = vsel %vm1695_vm10, %v3088_v39, %v19554_v10  ;;  %v4008_v40 = vsel %vm4007_vm13, %v3991_v7, %v19555_v29 }
 0x2f2   :  { %11492 = vmatmul.mubr.msk.f32.gmra.mxu1 %vm2186_vm12, %v13853_v62  ;;  %v19557_v62 = vld [vmem:[#allocation33_spill] sm:$0xff] }
 0x2f3   :  { %11494 = vmatprep.mubr.msk.f32.mxu1 %vm2186_vm12, %v13916_v9  ;;  %v4009_v48 = vsel %vm4007_vm13, %v3992_v37, %v19557_v62  ;;  %v14079_v9 = vpop.f32.mrf.mxu1 }
 0x2f5   :  { %v14081_v1 = vpop.f32.mrf.mxu1 }
 0x2f6   :  { %11495 = vmatmul.mubr.msk.f32.gmra.mxu1 %vm2186_vm12, %v3090_v30 }
 0x2f7   :  { %11561 = vmatprep.mubr.msk.f32.mxu1 %vm4524_vm15, %v4008_v40  ;;  %v14083_v63 = vpop.f32.mrf.mxu1 }
 0x2f9   :  { %v14085_v26 = vpop.f32.mrf.mxu1 }
 0x2fa   :  { %11562 = vmatmul.mubr.msk.f32.vlgmr.msra.gmra.mxu1 %vm4524_vm15, %v4009_v48 }
 0x2fb   :  { %v14087_v17 = vpop.f32.mrf.mxu1 }
 0x2fd   :  { %v14089_v41 = vpop.f32.mrf.mxu1 }
 0x2ff   :  { %v14091_v59 = vpop.f32.mrf.mxu1 }
 0x301   :  { %v14093_v57 = vpop.f32.mrf.mxu1 }
 0x303   :  { %v14095_v28 = vpop.f32.mrf.mxu1 }
 0x305   :  { %v14099_v33 = vpop.f32.mrf.mxu1 }
 0x307   :  { %v14101_v46 = vpop.f32.mrf.mxu1 }
 0x312   :  { %v11357_v55 = vpop.f32.mrf.mxu1 }
 0x314   :  { %v14103_v50 = vpop.f32.mrf.mxu1 }
 0x336   :  { %v11360_v11 = vpop.f32.mrf.mxu1 }
 0x338   :  { %v14105_v34 = vpop.f32.mrf.mxu1 }
 0x33a   :  { %v11373_v47 = vpop.f32.mrf.mxu1 }
 0x33b   :  { %v2500_v4 = vadd.f32 %v11373_v47, %v14077_v14 }
 0x33c   :  { %v2494_v23 = vpop.f32.mrf.mxu1 }
 0x33d   :  { %v2495_v24 = vadd.f32 %v2494_v23, %v14079_v9 }
 0x33e   :  { %v11376_v21 = vpop.f32.mrf.mxu1 }
 0x340   :  { %v2504_v58 = vpop.f32.mrf.mxu1 }
 0x342   :  { %v11379_v60 = vpop.f32.mrf.mxu1 }
 0x343   :  { %v2520_v9 = vadd.f32 %v11379_v60, %v14085_v26 }
 0x344   :  { %v14107_v16 = vpop.f32.mrf.mxu1 }
 0x346   :  { %v14109_v52 = vpop.f32.mrf.mxu1 }
 0x348   :  { %v14111_v51 = vpop.f32.mrf.mxu1 }
 0x34a   :  { %v14113_v0 = vpop.f32.mrf.mxu1 }
 0x34c   :  { %v14115_v18 = vpop.f32.mrf.mxu1 }
 0x34e   :  { %v14117_v42 = vpop.f32.mrf.mxu1 }
 0x350   :  { %v14119_v12 = vpop.f32.mrf.mxu1 }
 0x352   :  { %v11391_v5 = vpop.f32.mrf.mxu1 }
 0x353   :  { %v14121_v2 = vadd.f32 %v11391_v5, %v11357_v55 }
 0x354   :  { %v14123_v19 = vpop.f32.mrf.mxu1 }
 0x356   :  { %v11394_v32 = vpop.f32.mrf.mxu1 }
 0x357   :  { %v14125_v61 = vadd.f32 %v11394_v32, %v11360_v11 }
 0x358   :  { %v14127_v45 = vpop.f32.mrf.mxu1 }
 0x359   :  { %19558 = vst [vmem:[#allocation65_spill] sm:$0xff] %v14125_v61 }
 0x35a   :  { %v11407_v25 = vpop.f32.mrf.mxu1 }
 0x35b   :  { %v2788_v8 = vadd.f32 %v11407_v25, %v2500_v4 }
 0x35c   :  { %v2708_v13 = vpop.f32.mrf.mxu1 }
 0x35d   :  { %v2787_v61 = vadd.f32 %v2708_v13, %v2495_v24 }
 0x35e   :  { %v11410_v53 = vpop.f32.mrf.mxu1 }
 0x360   :  { %v2718_v3 = vpop.f32.mrf.mxu1 }
 0x362   :  { %v11413_v44 = vpop.f32.mrf.mxu1 }
 0x364   :  { %v2728_v54 = vpop.f32.mrf.mxu1 }
 0x366   :  { %v11416_v15 = vpop.f32.mrf.mxu1 }
 0x368   :  { %v14129_v27 = vpop.f32.mrf.mxu1 }
 0x36a   :  { %v14131_v39 = vpop.f32.mrf.mxu1 }
 0x36c   :  { %v14133_v43 = vpop.f32.mrf.mxu1 }
 0x36e   :  { %v14135_v7 = vpop.f32.mrf.mxu1 }
 0x370   :  { %v14137_v20 = vpop.f32.mrf.mxu1 }
 0x372   :  { %v14139_v56 = vpop.f32.mrf.mxu1 }
 0x373   :  { %19559 = vst [vmem:[#allocation51_spill] sm:$0xff] %v14139_v56 }
 0x374   :  { %v14141_v10 = vpop.f32.mrf.mxu1 }
 0x375   :  { %19560 = vst [vmem:[#allocation66_spill] sm:$0xff] %v14141_v10 }
 0x376   :  { %v14143_v30 = vpop.f32.mrf.mxu1 }
 0x377   :  { %19561 = vst [vmem:[#allocation42_spill] sm:$0xff] %v14143_v30  ;;  %v2510_v30 = vadd.f32 %v11376_v21, %v14081_v1  ;;  %v2792_v21 = vadd.f32 %v11413_v44, %v2520_v9 }
 0x378   :  { %v14145_v29 = vpop.f32.mrf.mxu1 }
 0x379   :  { %19562 = vst [vmem:[#allocation68_spill] sm:$0xff] %v14145_v29  ;;  %v2790_v14 = vadd.f32 %v11410_v53, %v2510_v30 }
 0x37a   :  { %v11441_v40 = vpop.f32.mrf.mxu1 }
 0x37b   :  { %v3018_v10 = vadd.f32 %v11441_v40, %v2788_v8  ;;  %v2515_v8 = vadd.f32 %v14107_v16, %v14087_v17  ;;  %v2525_v17 = vadd.f32 %v14111_v51, %v14091_v59 }
 0x37c   :  { %v2938_v38 = vpop.f32.mrf.mxu1 }
 0x37d   :  { %v3017_v47 = vadd.f32 %v2938_v38, %v2787_v61  ;;  %v2530_v61 = vadd.f32 %v14109_v52, %v14089_v41  ;;  %v2791_v26 = vadd.f32 %v2728_v54, %v2515_v8  ;;  %v2540_v54 = vadd.f32 %v14113_v0, %v14093_v57 }
 0x37e   :  { %v11444_v37 = vpop.f32.mrf.mxu1  ;;  %v2550_v38 = vadd.f32 %v14117_v42, %v14099_v33  ;;  %v2793_v59 = vadd.f32 %v14129_v27, %v2525_v17  ;;  %v2555_v57 = vadd.f32 %v14123_v19, %v14103_v50 }
 0x37f   :  { %v3020_v25 = vadd.f32 %v11444_v37, %v2790_v14  ;;  %v2794_v16 = vadd.f32 %v11416_v15, %v2530_v61 }
 0x380   :  { %v2948_v62 = vpop.f32.mrf.mxu1 }
 0x382   :  { %v11447_v48 = vpop.f32.mrf.mxu1 }
 0x383   :  { %v3022_v53 = vadd.f32 %v11447_v48, %v2792_v21 }
 0x384   :  { %v2958_v49 = vpop.f32.mrf.mxu1 }
 0x386   :  { %v11450_v22 = vpop.f32.mrf.mxu1 }
 0x387   :  { %v3024_v15 = vadd.f32 %v11450_v22, %v2794_v16  ;;  %v19568_v16 = vld [vmem:[#allocation66_spill] sm:$0xff] }
 0x388   :  { %v14147_v31 = vpop.f32.mrf.mxu1 }
 0x38a   :  { %v14149_v35 = vpop.f32.mrf.mxu1 }
 0x38c   :  { %v14151_v36 = vpop.f32.mrf.mxu1 }
 0x38e   :  { %v14153_v55 = vpop.f32.mrf.mxu1 }
 0x390   :  { %v14155_v11 = vpop.f32.mrf.mxu1 }
 0x392   :  { %v14157_v5 = vpop.f32.mrf.mxu1 }
 0x393   :  { %19563 = vst [vmem:[#allocation13_spill] sm:$0xff] %v14157_v5  ;;  %v14171_v5 = vld [vmem:[%s19368_s4] ss:$0 sm:$0xff] }
 0x394   :  { %v14159_v32 = vpop.f32.mrf.mxu1 }
 0x395   :  { %19564 = vst [vmem:[#allocation67_spill] sm:$0xff] %v14159_v32  ;;  %v2505_v32 = vadd.f32 %v2504_v58, %v14083_v63 }
 0x396   :  { %v14162_v6 = vpop.f32.mrf.mxu1 }
 0x397   :  { %19565 = vst [vmem:[#allocation40_spill] sm:$0xff] %v14162_v6  ;;  %v2789_v23 = vadd.f32 %v2718_v3, %v2505_v32  ;;  %v2798_v32 = vadd.f32 %v14135_v7, %v2550_v38 }
 0x398   :  { %v14165_v29 = vpop.f32.mrf.mxu1 }
 0x399   :  { %19566 = vst [vmem:[#allocation46_spill] sm:$0xff] %v14165_v29  ;;  %v3019_v40 = vadd.f32 %v2948_v62, %v2789_v23  ;;  %v3028_v61 = vadd.f32 %v14153_v55, %v2798_v32  ;;  %v2799_v55 = vadd.f32 %v19568_v16, %v2555_v57  ;;  %v19572_v57 = vld [vmem:[#allocation68_spill] sm:$0xff] }
 0x39a   :  { %v11475_v56 = vpop.f32.mrf.mxu1  ;;  %v19569_v38 = vld [vmem:[#allocation13_spill] sm:$0xff] }
 0x39b   :  { %v3248_v6 = vadd.f32 %v11475_v56, %v3018_v10  ;;  %v3021_v10 = vadd.f32 %v2958_v49, %v2791_v26  ;;  %v2545_v49 = vadd.f32 %v14119_v12, %v14101_v46 }
 0x39c   :  { %v3168_v4 = vpop.f32.mrf.mxu1 }
 0x39d   :  { %v3271_v1 = vadd.f32 %v14171_v5, %v3248_v6  ;;  %v3247_v24 = vadd.f32 %v3168_v4, %v3017_v47  ;;  %v2797_v46 = vadd.f32 %v14137_v20, %v2545_v49 }
 0x39e   :  { %v11478_v13 = vpop.f32.mrf.mxu1 }
 0x39f   :  { %v3287_v29 = vmax.f32 %v3271_v1, 0.0  ;;  %v3270_v63 = vadd.f32 %v14171_v5, %v3247_v24  ;;  %v3250_v58 = vadd.f32 %v11478_v13, %v3020_v25 }
 0x3a0   :  { %v3178_v60 = vpop.f32.mrf.mxu1 }
 0x3a1   :  { %3362 = vst.msk [vmem:[#allocation3 + $0x50] sm:$0xff] %vm1661_vm4, %v3287_v29  ;;  %v3286_v6 = vmax.f32 %v3270_v63, 0.0  ;;  %v3273_v3 = vadd.f32 %v14171_v5, %v3250_v58  ;;  %v3249_v56 = vadd.f32 %v3178_v60, %v3019_v40  ;;  %v2535_v29 = vadd.f32 %v14115_v18, %v14095_v28 }
 0x3a2   :  { %v11481_v44 = vpop.f32.mrf.mxu1  ;;  %v2796_v28 = vadd.f32 %v14131_v39, %v2540_v54  ;;  %v3023_v18 = vadd.f32 %v14147_v31, %v2793_v59 }
 0x3a3   :  { %3361 = vst.msk [vmem:[#allocation3 + $0x38] sm:$0xff] %vm1661_vm4, %v3286_v6  ;;  %v3289_v30 = vmax.f32 %v3273_v3, 0.0  ;;  %v3272_v41 = vadd.f32 %v14171_v5, %v3249_v56  ;;  %v3252_v52 = vadd.f32 %v11481_v44, %v3022_v53  ;;  %v2795_v33 = vadd.f32 %v14133_v43, %v2535_v29  ;;  %v19567_v56 = vld [vmem:[#allocation51_spill] sm:$0xff] }
 0x3a4   :  { %v3188_v51 = vpop.f32.mrf.mxu1  ;;  %v3026_v12 = vadd.f32 %v14149_v35, %v2796_v28  ;;  %v2565_v3 = vadd.f32 %v14127_v45, %v14105_v34  ;;  %v2800_v17 = vadd.f32 %v19567_v56, %v14121_v2 }
 0x3a5   :  { %3364 = vst.msk [vmem:[#allocation3 + $0x80] sm:$0xff] %vm1661_vm4, %v3289_v30  ;;  %v3288_v37 = vmax.f32 %v3272_v41, 0.0  ;;  %v3275_v62 = vadd.f32 %v14171_v5, %v3252_v52  ;;  %v3251_v48 = vadd.f32 %v3188_v51, %v3021_v10  ;;  %v3025_v50 = vadd.f32 %v14151_v36, %v2795_v33 }
 0x3a6   :  { %v11484_v0 = vpop.f32.mrf.mxu1  ;;  %v3027_v10 = vadd.f32 %v14155_v11, %v2797_v46  ;;  %v3030_v59 = vadd.f32 %v19569_v38, %v2800_v17  ;;  %v2801_v28 = vadd.f32 %v19572_v57, %v2565_v3  ;;  %v4521_v17 = vld [vmem:[%s19369_s5 + $0x88] sm:$0xff] }
 0x3a7   :  { %3363 = vst.msk [vmem:[#allocation3 + $0x68] sm:$0xff] %vm1661_vm4, %v3288_v37  ;;  %v3291_v42 = vmax.f32 %v3275_v62, 0.0  ;;  %v3274_v27 = vadd.f32 %v14171_v5, %v3251_v48  ;;  %v3254_v22 = vadd.f32 %v11484_v0, %v3024_v15  ;;  %v19570_v62 = vld [vmem:[#allocation65_spill] sm:$0xff]  ;;  %v19571_v48 = vld [vmem:[#allocation42_spill] sm:$0xff]  ;;  %v19573_v0 = vld [vmem:[#allocation67_spill] sm:$0xff] }
 0x3a8   :  { %v3198_v19 = vpop.f32.mrf.mxu1  ;;  %v14209_v39 = vld [vmem:[#allocation3 + $0x4e] sm:$0xff]  ;;  %v3415_v43 = vld [vmem:[#allocation3 + $0x56] sm:$0xf]  ;;  %v2802_v49 = vadd.f32 %v19571_v48, %v19570_v62 }
 0x3a9   :  { %3366 = vst.msk [vmem:[#allocation3 + $0xb0] sm:$0xff] %vm1661_vm4, %v3291_v42  ;;  %v3290_v31 = vmax.f32 %v3274_v27, 0.0  ;;  %v3277_v14 = vadd.f32 %v14171_v5, %v3254_v22  ;;  %v3253_v47 = vadd.f32 %v3198_v19, %v3023_v18  ;;  %v14214_v9 = vrot.slane %v14209_v39, 2  ;;  %v14216_v7 = vld [vmem:[#allocation3 + $0x56] sm:$0xf] }
 0x3aa   :  { %v11487_v20 = vpop.f32.mrf.mxu1  ;;  %v4169_v4 = vrot.slane %v3415_v43, 2  ;;  %v14219_v35 = vrot.slane %v14209_v39, 1  ;;  %v4073_v36 = vrot.slane %v3415_v43, 1  ;;  %v14222_v23 = vrot.slane %v14209_v39, 3  ;;  %v14239_v6 = vld [vmem:[#allocation3 + $0x56] sm:$0xf] }
 0x3ab   :  { %3365 = vst.msk [vmem:[#allocation3 + $0x98] sm:$0xff] %vm1661_vm4, %v3290_v31  ;;  %v3293_v25 = vmax.f32 %v3277_v14, 0.0  ;;  %v3276_v1 = vadd.f32 %v14171_v5, %v3253_v47  ;;  %v3256_v24 = vadd.f32 %v11487_v20, %v3026_v12  ;;  %v4265_v8 = vrot.slane %v3415_v43, 3  ;;  %v14259_v37 = vld [vmem:[#allocation3 + $0x56] sm:$0xf]  ;;  %v19574_v31 = vld [vmem:[#allocation40_spill] sm:$0xff] }
 0x3ac   :  { %v4170_v21 = vsel %vm1548_vm7, %v14214_v9, %v4169_v4  ;;  %v4074_v13 = vsel %vm1339_vm6, %v14219_v35, %v4073_v36  ;;  %v3208_v40 = vpop.f32.mrf.mxu1  ;;  %v14231_v63 = vrot.slane %v14209_v39, 4  ;;  %v5235_v58 = vrot.slane %v14216_v7, 4  ;;  %v4522_v36 = vld [vmem:[%s19369_s5 + $0x90] sm:$0xff] }
 0x3ad   :  { %3368 = vst.msk [vmem:[#allocation3 + $0xe0] sm:$0xff] %vm1661_vm4, %v3293_v25  ;;  %v3292_v26 = vmax.f32 %v3276_v1, 0.0  ;;  %v3279_v60 = vadd.f32 %v14171_v5, %v3256_v24  ;;  %4214 = vrot.lane.b32.xlu0 %v4170_v21, %s11895_s24  ;;  %4118 = vrot.lane.b32.xlu1 %v4074_v13, %s11896_s29  ;;  %v3255_v53 = vadd.f32 %v3208_v40, %v3025_v50  ;;  %v4361_v29 = vrot.slane %v3415_v43, 4  ;;  %v4523_v43 = vld [vmem:[%s19369_s5 + $0x98] sm:$0xff] }
 0x3ae   :  { %v11490_v44 = vpop.f32.mrf.mxu1  ;;  %v4266_v54 = vsel %vm3764_vm8, %v14222_v23, %v4265_v8  ;;  %v5236_v34 = vsel %vm3861_vm9, %v14231_v63, %v5235_v58  ;;  %v3872_v2 = vrot.slane %v14239_v6, 4  ;;  %v3029_v18 = vadd.f32 %v19573_v0, %v2799_v55  ;;  %11497 = vmatprep.subr.mxu0 %v4523_v43  ;;  %v19575_v1 = vld [vmem:[#allocation46_spill] sm:$0xff] }
 0x3af   :  { %3367 = vst.msk [vmem:[#allocation3 + $0xc8] sm:$0xff] %vm1661_vm4, %v3292_v26  ;;  %v3295_v30 = vmax.f32 %v3279_v60, 0.0  ;;  %v3278_v41 = vadd.f32 %v14171_v5, %v3255_v53  ;;  %v3258_v52 = vadd.f32 %v11490_v44, %v3028_v61  ;;  %v4362_v32 = vsel %vm3861_vm9, %v14231_v63, %v4361_v29  ;;  %11498 = vmatpush3.msra.mxu0 %v4523_v43  ;;  %v4520_v44 = vld [vmem:[%s19369_s5 + $0x80] sm:$0xff] }
 0x3b0   :  { %v3218_v45 = vpop.f32.mrf.mxu1  ;;  %v3873_v46 = vsel %vm3861_vm9, %v14231_v63, %v3872_v2  ;;  %v4947_v50 = vrot.slane %v14216_v7, 1  ;;  %v5643_v19 = vrot.slane %v14259_v37, 1  ;;  %v3032_v14 = vadd.f32 %v19574_v31, %v2802_v49  ;;  %11499 = vmatprep.subr.mxu0 %v4522_v36  ;;  %v4516_v49 = vld [vmem:[%s19369_s5 + $0x60] sm:$0xff] }
 0x3b1   :  { %3370 = vst.msk [vmem:[#allocation3 + $0x170] sm:$0xff] %vm1661_vm4, %v3295_v30  ;;  %v3294_v11 = vmax.f32 %v3278_v41, 0.0  ;;  %v3281_v51 = vadd.f32 %v14171_v5, %v3258_v52  ;;  %4310 = vrot.lane.b32.xlu0 %v4266_v54, %s11897_s16  ;;  %5281 = vrot.lane.b32.xlu1 %v5236_v34, %s11898_s22  ;;  %v3257_v15 = vadd.f32 %v3218_v45, %v3027_v10  ;;  %v5043_v26 = vrot.slane %v14216_v7, 2  ;;  %v3413_v34 = vld [vmem:[#allocation3 + $0x3e] sm:$0xf] }
 0x3b2   :  { %v11493_v33 = vpop.f32.mrf.mxu1  ;;  %v3031_v24 = vadd.f32 %v19575_v1, %v2801_v28  ;;  %v4948_v40 = vsel %vm1339_vm6, %v14219_v35, %v4947_v50  ;;  %v5644_v58 = vsel %vm1339_vm6, %v14219_v35, %v5643_v19  ;;  %v5739_v60 = vrot.slane %v14259_v37, 2  ;;  %11500 = vmatpush3.msra.mxu0 %v4522_v36  ;;  %v4519_v45 = vld [vmem:[%s19369_s5 + $0x78] sm:$0xff]  ;;  %v3419_v36 = vld [vmem:[#allocation3 + $0x86] sm:$0xf] }
 0x3b3   :  { %3369 = vst.msk [vmem:[#allocation3 + $0x158] sm:$0xff] %vm1661_vm4, %v3294_v11  ;;  %v3297_v42 = vmax.f32 %v3281_v51, 0.0  ;;  %v3280_v27 = vadd.f32 %v14171_v5, %v3257_v15  ;;  %v3260_v22 = vadd.f32 %v11493_v33, %v3030_v59  ;;  %11501 = vmatprep.subr.mxu0 %v4521_v17  ;;  %v5044_v10 = vsel %vm1548_vm7, %v14214_v9, %v5043_v26  ;;  %v4518_v51 = vld [vmem:[%s19369_s5 + $0x70] sm:$0xff] }
 0x3b4   :  { %v3228_v12 = vpop.f32.mrf.mxu1  ;;  %v5740_v30 = vsel %vm1548_vm7, %v14214_v9, %v5739_v60  ;;  %v5931_v41 = vrot.slane %v14259_v37, 4  ;;  %v3582_v52 = vrot.slane %v14239_v6, 1  ;;  %11502 = vmatpush3.msra.mxu0 %v4521_v17  ;;  %v5139_v29 = vrot.slane %v14216_v7, 3 }
 0x3b5   :  { %3372 = vst.msk [vmem:[#allocation3 + $0x1a0] sm:$0xff] %vm1661_vm4, %v3297_v42  ;;  %v3296_v47 = vmax.f32 %v3280_v27, 0.0  ;;  %v3283_v20 = vadd.f32 %v14171_v5, %v3260_v22  ;;  %4406 = vrot.lane.b32.xlu0 %v4362_v32, %s11898_s22  ;;  %3916 = vrot.lane.b32.xlu1 %v3873_v46, %s11898_s22  ;;  %v3259_v4 = vadd.f32 %v3228_v12, %v3029_v18  ;;  %v4070_v11 = vrot.slane %v3413_v34, 1  ;;  %v4515_v42 = vld [vmem:[%s19369_s5 + $0x58] sm:$0xff] }
 0x3b6   :  { %v11496_v25 = vpop.f32.mrf.mxu1  ;;  %11503 = vmatprep.subr.mxu0 %v4520_v44  ;;  %v5932_v2 = vsel %vm3861_vm9, %v14231_v63, %v5931_v41  ;;  %v3583_v38 = vsel %vm1339_vm6, %v14219_v35, %v3582_v52  ;;  %v5140_v7 = vsel %vm3764_vm8, %v14222_v23, %v5139_v29  ;;  %v4517_v35 = vld [vmem:[%s19369_s5 + $0x68] sm:$0xff]  ;;  %v3678_v15 = vrot.slane %v14239_v6, 2  ;;  %v3443_v27 = vld [vmem:[#allocation3 + $0x3e] sm:$0xf] }
 0x3b7   :  { %3371 = vst.msk [vmem:[#allocation3 + $0x188] sm:$0xff] %vm1661_vm4, %v3296_v47  ;;  %v3299_v8 = vmax.f32 %v3283_v20, 0.0  ;;  %v3282_v21 = vadd.f32 %v14171_v5, %v3259_v4  ;;  %v3262_v13 = vadd.f32 %v11496_v25, %v3032_v14  ;;  %11504 = vmatpush3.msra.mxu0 %v4520_v44  ;;  %v4166_v48 = vrot.slane %v3413_v34, 2  ;;  %v3388_v29 = vld [vmem:[#allocation3 + $0x86] sm:$0xf] }
 0x3b8   :  { %v3238_v61 = vpop.f32.mrf.mxu1  ;;  %11505 = vmatprep.subr.mxu0 %v4519_v45  ;;  %v3775_v57 = vrot.slane %v14239_v6, 3  ;;  %v3679_v28 = vsel %vm1548_vm7, %v14214_v9, %v3678_v15  ;;  %v4262_v18 = vrot.slane %v3413_v34, 3  ;;  %v4514_v9 = vld [vmem:[%s19369_s5 + $0x50] sm:$0xff]  ;;  %v5835_v32 = vrot.slane %v14259_v37, 3  ;;  %v3382_v37 = vld [vmem:[#allocation3 + $0x3e] sm:$0xf] }
 0x3b9   :  { %3374 = vst.msk [vmem:[#allocation3 + $0x1d0] sm:$0xff] %vm1661_vm4, %v3299_v8  ;;  %v3298_v53 = vmax.f32 %v3282_v21, 0.0  ;;  %v3285_v3 = vadd.f32 %v14171_v5, %v3262_v13  ;;  %4993 = vrot.lane.b32.xlu0 %v4948_v40, %s11896_s29  ;;  %5690 = vrot.lane.b32.xlu1 %v5644_v58, %s11896_s29  ;;  %v3261_v56 = vadd.f32 %v3238_v61, %v3031_v24  ;;  %v4944_v46 = vrot.slane %v3443_v27, 1  ;;  %v3511_v15 = vld [vmem:[#allocation3 + $0x86] sm:$0xf] }
 0x3ba   :  { %11506 = vmatpush3.msra.mxu0 %v4519_v45  ;;  %v3776_v6 = vsel %vm3764_vm8, %v14222_v23, %v3775_v57  ;;  %v5836_v50 = vsel %vm3764_vm8, %v14222_v23, %v5835_v32  ;;  %v4358_v43 = vrot.slane %v3413_v34, 4  ;;  %v5040_v31 = vrot.slane %v3443_v27, 2  ;;  %v14373_v23 = vld [vmem:[#allocation3 + $0x7e] sm:$0xff]  ;;  %v14436_v32 = vpop.permute.xlu0 %3831 }
 0x3bb   :  { %3373 = vst.msk [vmem:[#allocation3 + $0x1b8] sm:$0xff] %vm1661_vm4, %v3298_v53  ;;  %v3301_v16 = vmax.f32 %v3285_v3, 0.0  ;;  %v3284_v55 = vadd.f32 %v14171_v5, %v3261_v56  ;;  %v14314_v5 = vld [vmem:[#allocation3 + $0x36] sm:$0xff]  ;;  %11507 = vmatprep.subr.mxu0 %v4518_v51  ;;  %v5136_v14 = vrot.slane %v3443_v27, 3  ;;  %v3579_v4 = vrot.slane %v3382_v37, 1 }
 0x3bc   :  { %v4069_v59 = vrot.slane %v14314_v5, 1  ;;  %v4165_v62 = vrot.slane %v14314_v5, 2  ;;  %11508 = vmatpush3.msra.mxu0 %v4518_v51  ;;  %v4261_v0 = vrot.slane %v14314_v5, 3  ;;  %v4357_v12 = vrot.slane %v14314_v5, 4 }
 0x3bd   :  { %3376 = vst.msk [vmem:[#allocation3 + $0x200] sm:$0xff] %vm1661_vm4, %v3301_v16  ;;  %v3300_v54 = vmax.f32 %v3284_v55, 0.0  ;;  %5089 = vrot.lane.b32.xlu0 %v5044_v10, %s11895_s24  ;;  %5786 = vrot.lane.b32.xlu1 %v5740_v30, %s11895_s24  ;;  %v3675_v24 = vrot.slane %v3382_v37, 2  ;;  %v14378_v8 = vrot.slane %v14373_v23, 2  ;;  %v4175_v21 = vrot.slane %v3419_v36, 2 }
 0x3be   :  { %v4071_v63 = vsel %vm1339_vm6, %v4069_v59, %v4070_v11  ;;  %11509 = vmatprep.subr.mxu0 %v4517_v35  ;;  %v4167_v33 = vsel %vm1548_vm7, %v4165_v62, %v4166_v48  ;;  %v4263_v22 = vsel %vm3764_vm8, %v4261_v0, %v4262_v18  ;;  %v4945_v19 = vsel %vm1339_vm6, %v4069_v59, %v4944_v46  ;;  %v3449_v16 = vld [vmem:[#allocation3 + $0x86] sm:$0xf] }
 0x3bf   :  { %3375 = vst.msk [vmem:[#allocation3 + $0x1e8] sm:$0xff] %vm1661_vm4, %v3300_v54  ;;  %11510 = vmatpush3.msra.mxu0 %v4517_v35  ;;  %v4359_v47 = vsel %vm3861_vm9, %v4357_v12, %v4358_v43  ;;  %v5041_v20 = vsel %vm1548_vm7, %v4165_v62, %v5040_v31  ;;  %v5137_v25 = vsel %vm3764_vm8, %v4261_v0, %v5136_v14  ;;  %v5232_v13 = vrot.slane %v3443_v27, 4  ;;  %v14443_v43 = vld [vmem:[#allocation3 + $0x66] sm:$0xff]  ;;  %v3417_v31 = vld [vmem:[#allocation3 + $0x6e] sm:$0xf] }
 0x3c0   :  { %11511 = vmatprep.subr.mxu0 %v4516_v49  ;;  %v3580_v1 = vsel %vm1339_vm6, %v4069_v59, %v3579_v4  ;;  %v3676_v40 = vsel %vm1548_vm7, %v4165_v62, %v3675_v24  ;;  %v4176_v58 = vsel %vm1548_vm7, %v14378_v8, %v4175_v21  ;;  %v14386_v61 = vrot.slane %v14373_v23, 3 }
 0x3c1   :  { %5978 = vrot.lane.b32.xlu1 %v5932_v2, %s11898_s22  ;;  %3626 = vrot.lane.b32.xlu0 %v3583_v38, %s11896_s29  ;;  %v4271_v26 = vrot.slane %v3419_v36, 3  ;;  %v3772_v60 = vrot.slane %v3382_v37, 3  ;;  %v5233_v53 = vsel %vm3861_vm9, %v4357_v12, %v5232_v13  ;;  %v14394_v56 = vrot.slane %v14373_v23, 4 }
 0x3c2   :  { %11512 = vmatpush3.msra.mxu0 %v4516_v49  ;;  %v4367_v17 = vrot.slane %v3419_v36, 4  ;;  %v3869_v55 = vrot.slane %v3382_v37, 4  ;;  %v4952_v30 = vrot.slane %v14373_v23, 1  ;;  %v4953_v41 = vrot.slane %v3449_v16, 1  ;;  %v14445_v37 = vpop.permute.xlu0 %5704 }
 0x3c3   :  { %11513 = vmatprep.subr.mxu0 %v4515_v42  ;;  %v4272_v3 = vsel %vm3764_vm8, %v14386_v61, %v4271_v26  ;;  %v3773_v44 = vsel %vm3764_vm8, %v4261_v0, %v3772_v60  ;;  %v5049_v34 = vrot.slane %v3449_v16, 2  ;;  %v4079_v45 = vrot.slane %v3419_v36, 1 }
 0x3c4   :  { %11514 = vmatpush3.msra.mxu0 %v4515_v42  ;;  %v4368_v10 = vsel %vm3861_vm9, %v14394_v56, %v4367_v17  ;;  %v3870_v52 = vsel %vm3861_vm9, %v4357_v12, %v3869_v55  ;;  %v4954_v54 = vsel %vm1339_vm6, %v4952_v30, %v4953_v41  ;;  %v5241_v59 = vrot.slane %v3449_v16, 4 }
 0x3c5   :  { %5185 = vrot.lane.b32.xlu0 %v5140_v7, %s11897_s16  ;;  %4116 = vrot.lane.b32.xlu1 %v4071_v63, %s11896_s29  ;;  %v5050_v2 = vsel %vm1548_vm7, %v14378_v8, %v5049_v34  ;;  %v4080_v38 = vsel %vm1339_vm6, %v4952_v30, %v4079_v45  ;;  %v3588_v11 = vrot.slane %v3388_v29, 1  ;;  %v3878_v35 = vrot.slane %v3388_v29, 4  ;;  %v3478_v45 = vld [vmem:[#allocation3 + $0x6e] sm:$0xf] }
 0x3c6   :  { %11515 = vmatprep.subr.mxu0 %v4514_v9  ;;  %v5242_v51 = vsel %vm3861_vm9, %v14394_v56, %v5241_v59  ;;  %v5145_v63 = vrot.slane %v3449_v16, 3  ;;  %v6441_v49 = vrot.slane %v3511_v15, 2  ;;  %v3684_v57 = vrot.slane %v3388_v29, 2 }
 0x3c7   :  { %11516 = vmatpush3.msra.mxu0 %v4514_v9  ;;  %v3589_v7 = vsel %vm1339_vm6, %v4952_v30, %v3588_v11  ;;  %v3879_v62 = vsel %vm3861_vm9, %v14394_v56, %v3878_v35  ;;  %v6537_v0 = vrot.slane %v3511_v15, 3  ;;  %v3781_v18 = vrot.slane %v3388_v29, 3 }
 0x3c8   :  { %v5146_v48 = vsel %vm3764_vm8, %v14386_v61, %v5145_v63  ;;  %v6633_v9 = vrot.slane %v3511_v15, 4  ;;  %v14451_v4 = vrot.slane %v14443_v43, 1  ;;  %v4076_v36 = vrot.slane %v3417_v31, 1 }
 0x3c9   :  { %3722 = vrot.lane.b32.xlu0 %v3679_v28, %s11895_s24  ;;  %4212 = vrot.lane.b32.xlu1 %v4167_v33, %s11895_s24  ;;  %v6442_v28 = vsel %vm1548_vm7, %v14378_v8, %v6441_v49  ;;  %v3685_v33 = vsel %vm1548_vm7, %v14378_v8, %v3684_v57  ;;  %v6538_v42 = vsel %vm3764_vm8, %v14386_v61, %v6537_v0  ;;  %v14460_v21 = vrot.slane %v14443_v43, 2 }
 0x3ca   :  { %v3782_v27 = vsel %vm3764_vm8, %v14386_v61, %v3781_v18  ;;  %v6634_v46 = vsel %vm3861_vm9, %v14394_v56, %v6633_v9  ;;  %v4172_v13 = vrot.slane %v3417_v31, 2  ;;  %v4364_v26 = vrot.slane %v3417_v31, 4 }
 0x3cb   :  { %v5646_v59 = vrot.slane %v3478_v45, 1  ;;  %v5838_v63 = vrot.slane %v3478_v45, 3 }
 0x3cc   :  { %v4173_v60 = vsel %vm1548_vm7, %v14460_v21, %v4172_v13 }
 0x3cd   :  { %3819 = vrot.lane.b32.xlu0 %v3776_v6, %s11897_s16  ;;  %4308 = vrot.lane.b32.xlu1 %v4263_v22, %s11897_s16  ;;  %v6345_v6 = vrot.slane %v3511_v15, 1  ;;  %v3480_v22 = vld [vmem:[#allocation3 + $0x86] sm:$0xf] }
 0x3ce   :  { %v5745_v14 = vrot.slane %v3480_v22, 2  ;;  %v5841_v24 = vrot.slane %v3480_v22, 3 }
 0x3cf   :  { %v6346_v12 = vsel %vm1339_vm6, %v4952_v30, %v6345_v6 }
 0x3d1   :  { %5882 = vrot.lane.b32.xlu0 %v5836_v50, %s11897_s16  ;;  %4991 = vrot.lane.b32.xlu1 %v4945_v19, %s11896_s29  ;;  %v5937_v50 = vrot.slane %v3480_v22, 4  ;;  %v5649_v19 = vrot.slane %v3480_v22, 1 }
 0x3d5   :  { %4404 = vrot.lane.b32.xlu0 %v4359_v47, %s11898_s22  ;;  %5087 = vrot.lane.b32.xlu1 %v5041_v20, %s11895_s24  ;;  %v5938_v47 = vsel %vm3861_vm9, %v14394_v56, %v5937_v50  ;;  %v5650_v20 = vsel %vm1339_vm6, %v4952_v30, %v5649_v19  ;;  %v3447_v56 = vld [vmem:[#allocation3 + $0x6e] sm:$0xf]  ;;  %v5742_v19 = vrot.slane %v3478_v45, 2 }
 0x3d6   :  { %v5238_v35 = vrot.slane %v3447_v56, 4 }
 0x3d9   :  { %5183 = vrot.lane.b32.xlu1 %v5137_v25, %s11897_s16  ;;  %3624 = vrot.lane.b32.xlu0 %v3580_v1, %s11896_s29  ;;  %v5746_v25 = vsel %vm1548_vm7, %v14378_v8, %v5745_v14  ;;  %v4077_v1 = vsel %vm1339_vm6, %v14451_v4, %v4076_v36  ;;  %v5842_v8 = vsel %vm3764_vm8, %v14386_v61, %v5841_v24  ;;  %v5046_v61 = vrot.slane %v3447_v56, 2  ;;  %v14531_v14 = vld [vmem:[#allocation3 + $0xae] sm:$0xff] }
 0x3da   :  { %v14542_v13 = vrot.slane %v14531_v14, 2 }
 0x3db   :  { %v5047_v41 = vsel %vm1548_vm7, %v14460_v21, %v5046_v61  ;;  %v14564_v61 = vrot.slane %v14531_v14, 4 }
 0x3dd   :  { %3720 = vrot.lane.b32.xlu1 %v3676_v40, %s11895_s24  ;;  %4218 = vrot.lane.b32.xlu0 %v4176_v58, %s11895_s24  ;;  %v14462_v40 = vpop.permute.xlu0 %5800  ;;  %v14467_v58 = vrot.slane %v14443_v43, 4 }
 0x3de   :  { %19576 = vst [vmem:[#allocation61_spill] sm:$0xff] %v14462_v40  ;;  %v15697_v40 = vld [vmem:[#allocation3 + $0x116] sm:$0xf] }
 0x3df   :  { %v4365_v16 = vsel %vm3861_vm9, %v14467_v58, %v4364_v26 }
 0x3e1   :  { %5279 = vrot.lane.b32.xlu1 %v5233_v53, %s11898_s22  ;;  %4314 = vrot.lane.b32.xlu0 %v4272_v3, %s11897_s16  ;;  %v4267_v53 = vrot.slane %v14443_v43, 3  ;;  %v4268_v3 = vrot.slane %v3417_v31, 3  ;;  %v14476_v17 = vpop.permute.xlu0 %6401 }
 0x3e2   :  { %19577 = vst [vmem:[#allocation70_spill] sm:$0xff] %v14476_v17 }
 0x3e3   :  { %v4269_v55 = vsel %vm3764_vm8, %v4267_v53, %v4268_v3  ;;  %v5839_v49 = vsel %vm3764_vm8, %v4267_v53, %v5838_v63 }
 0x3e5   :  { %3817 = vrot.lane.b32.xlu1 %v3773_v44, %s11897_s16  ;;  %4410 = vrot.lane.b32.xlu0 %v4368_v10, %s11898_s22  ;;  %v4950_v44 = vrot.slane %v3447_v56, 1  ;;  %v3386_v10 = vld [vmem:[#allocation3 + $0x6e] sm:$0xf]  ;;  %v14487_v34 = vpop.permute.xlu0 %5896 }
 0x3e6   :  { %19578 = vst [vmem:[#allocation44_spill] sm:$0xff] %v14487_v34  ;;  %v3778_v57 = vrot.slane %v3386_v10, 3  ;;  %v3875_v9 = vrot.slane %v3386_v10, 4 }
 0x3e7   :  { %v4951_v30 = vsel %vm1339_vm6, %v14451_v4, %v4950_v44 }
 0x3e9   :  { %3914 = vrot.lane.b32.xlu1 %v3870_v52, %s11898_s22  ;;  %4997 = vrot.lane.b32.xlu0 %v4954_v54, %s11896_s29  ;;  %v5142_v52 = vrot.slane %v3447_v56, 3  ;;  %v3585_v54 = vrot.slane %v3386_v10, 1  ;;  %v14496_v11 = vpop.permute.xlu0 %6403 }
 0x3ea   :  { %19579 = vst [vmem:[#allocation52_spill] sm:$0xff] %v14496_v11 }
 0x3eb   :  { %v5143_v29 = vsel %vm3764_vm8, %v4267_v53, %v5142_v52 }
 0x3ed   :  { %5093 = vrot.lane.b32.xlu0 %v5050_v2, %s11895_s24  ;;  %4122 = vrot.lane.b32.xlu1 %v4080_v38, %s11896_s29  ;;  %v3586_v2 = vsel %vm1339_vm6, %v14451_v4, %v3585_v54  ;;  %v3681_v38 = vrot.slane %v3386_v10, 2  ;;  %v3453_v54 = vld [vmem:[#allocation3 + $0xb6] sm:$0xf] }
 0x3f1   :  { %5285 = vrot.lane.b32.xlu1 %v5242_v51, %s11898_s22  ;;  %3630 = vrot.lane.b32.xlu0 %v3589_v7, %s11896_s29  ;;  %v3682_v51 = vsel %vm1548_vm7, %v14460_v21, %v3681_v38  ;;  %v5647_v7 = vsel %vm1339_vm6, %v14451_v4, %v5646_v59  ;;  %v4959_v38 = vrot.slane %v3453_v54, 1  ;;  %v5247_v59 = vrot.slane %v3453_v54, 4 }
 0x3f5   :  { %3920 = vrot.lane.b32.xlu1 %v3879_v62, %s11898_s22  ;;  %5189 = vrot.lane.b32.xlu0 %v5146_v48, %s11897_s16  ;;  %v5239_v48 = vsel %vm3861_vm9, %v14467_v58, %v5238_v35 }
 0x3f9   :  { %6487 = vrot.lane.b32.xlu1 %v6442_v28, %s11895_s24  ;;  %3726 = vrot.lane.b32.xlu0 %v3685_v33, %s11895_s24  ;;  %v5934_v28 = vrot.slane %v3478_v45, 4  ;;  %v3509_v33 = vld [vmem:[#allocation3 + $0x6e] sm:$0xf] }
 0x3fa   :  { %v6534_v6 = vrot.slane %v3509_v33, 3  ;;  %v6630_v31 = vrot.slane %v3509_v33, 4  ;;  %v6438_v56 = vrot.slane %v3509_v33, 2 }
 0x3fc   :  { %v6535_v50 = vsel %vm3764_vm8, %v4267_v53, %v6534_v6  ;;  %v6631_v24 = vsel %vm3861_vm9, %v14467_v58, %v6630_v31  ;;  %v6439_v10 = vsel %vm1548_vm7, %v14460_v21, %v6438_v56 }
 0x3fd   :  { %6583 = vrot.lane.b32.xlu1 %v6538_v42, %s11897_s16  ;;  %3823 = vrot.lane.b32.xlu0 %v3782_v27, %s11897_s16  ;;  %v3779_v42 = vsel %vm3764_vm8, %v4267_v53, %v3778_v57  ;;  %v5935_v27 = vsel %vm3861_vm9, %v14467_v58, %v5934_v28  ;;  %v14594_v28 = vld [vmem:[#allocation3 + $0xb6] sm:$0xf] }
 0x3fe   :  { %v5751_v6 = vrot.slane %v14594_v28, 2 }
 0x401   :  { %6679 = vrot.lane.b32.xlu1 %v6634_v46, %s11898_s22  ;;  %6391 = vrot.lane.b32.xlu0 %v6346_v12, %s11896_s29  ;;  %v3876_v12 = vsel %vm3861_vm9, %v14467_v58, %v3875_v9  ;;  %v14555_v58 = vrot.slane %v14531_v14, 3 }
 0x405   :  { %5982 = vrot.lane.b32.xlu1 %v5938_v47, %s11898_s22  ;;  %5694 = vrot.lane.b32.xlu0 %v5650_v20, %s11896_s29  ;;  %v3423_v47 = vld [vmem:[#allocation3 + $0xb6] sm:$0xf] }
 0x406   :  { %v4181_v26 = vrot.slane %v3423_v47, 2  ;;  %v4085_v52 = vrot.slane %v3423_v47, 1 }
 0x408   :  { %v4182_v3 = vsel %vm1548_vm7, %v14542_v13, %v4181_v26  ;;  %v5151_v26 = vrot.slane %v3453_v54, 3 }
 0x409   :  { %5790 = vrot.lane.b32.xlu0 %v5746_v25, %s11895_s24  ;;  %4120 = vrot.lane.b32.xlu1 %v4077_v1, %s11896_s29  ;;  %v6342_v25 = vrot.slane %v3509_v33, 1  ;;  %v5743_v1 = vsel %vm1548_vm7, %v14460_v21, %v5742_v19 }
 0x40b   :  { %v6343_v53 = vsel %vm1339_vm6, %v14451_v4, %v6342_v25  ;;  %v4373_v4 = vrot.slane %v3423_v47, 4 }
 0x40d   :  { %5886 = vrot.lane.b32.xlu0 %v5842_v8, %s11897_s16  ;;  %4216 = vrot.lane.b32.xlu1 %v4173_v60, %s11895_s24 }
 0x411   :  { %4408 = vrot.lane.b32.xlu0 %v4365_v16, %s11898_s22  ;;  %4312 = vrot.lane.b32.xlu1 %v4269_v55, %s11897_s16  ;;  %v4277_v16 = vrot.slane %v3423_v47, 3  ;;  %v5752_v47 = vsel %vm1548_vm7, %v14542_v13, %v5751_v6 }
 0x415   :  { %4995 = vrot.lane.b32.xlu0 %v4951_v30, %s11896_s29  ;;  %5091 = vrot.lane.b32.xlu1 %v5047_v41, %s11895_s24  ;;  %v4278_v30 = vsel %vm3764_vm8, %v14555_v58, %v4277_v16  ;;  %v14571_v41 = vrot.slane %v14531_v14, 1 }
 0x417   :  { %v4086_v21 = vsel %vm1339_vm6, %v14571_v41, %v4085_v52  ;;  %v4960_v63 = vsel %vm1339_vm6, %v14571_v41, %v4959_v38 }
 0x419   :  { %5187 = vrot.lane.b32.xlu1 %v5143_v29, %s11897_s16  ;;  %3628 = vrot.lane.b32.xlu0 %v3586_v2, %s11896_s29  ;;  %v4374_v2 = vsel %vm3861_vm9, %v14564_v61, %v4373_v4 }
 0x41d   :  { %3724 = vrot.lane.b32.xlu1 %v3682_v51, %s11895_s24  ;;  %5692 = vrot.lane.b32.xlu0 %v5647_v7, %s11896_s29  ;;  %v14583_v51 = vld [vmem:[#allocation3 + $0xb6] sm:$0xf] }
 0x41e   :  { %v3884_v57 = vrot.slane %v14583_v51, 4 }
 0x41f   :  { %v14504_v15 = vpop.permute.xlu0 %4214  ;;  %v14506_v62 = vpop.permute.xlu1 %4118 }
 0x420   :  { %v3885_v9 = vsel %vm3861_vm9, %v14564_v61, %v3884_v57  ;;  %v4452_v31 = vsel %vm1661_vm4, %v14209_v39, %v14506_v62 }
 0x421   :  { %5283 = vrot.lane.b32.xlu1 %v5239_v48, %s11898_s22  ;;  %5884 = vrot.lane.b32.xlu0 %v5839_v49, %s11897_s16  ;;  %v5248_v48 = vsel %vm3861_vm9, %v14564_v61, %v5247_v59  ;;  %v5055_v49 = vrot.slane %v3453_v54, 2 }
 0x423   :  { %v14513_v0 = vpop.permute.xlu0 %4310  ;;  %v14515_v18 = vpop.permute.xlu1 %5281 }
 0x424   :  { %19580 = vst [vmem:[#allocation77_spill] sm:$0xff] %v14515_v18  ;;  %v3434_v18 = vld [vmem:[#allocation3 + $0x19e] sm:$0xff] }
 0x425   :  { %3821 = vrot.lane.b32.xlu1 %v3779_v42, %s11897_s16  ;;  %5980 = vrot.lane.b32.xlu0 %v5935_v27, %s11898_s22  ;;  %v5056_v27 = vsel %vm1548_vm7, %v14542_v13, %v5055_v49 }
 0x427   :  { %v14522_v22 = vpop.permute.xlu0 %4406  ;;  %v14524_v46 = vpop.permute.xlu1 %3916 }
 0x429   :  { %3918 = vrot.lane.b32.xlu1 %v3876_v12, %s11898_s22  ;;  %6581 = vrot.lane.b32.xlu0 %v6535_v50, %s11897_s16  ;;  %v3594_v12 = vrot.slane %v14583_v51, 1 }
 0x42b   :  { %v14533_v20 = vpop.permute.xlu0 %4993  ;;  %v14535_v36 = vpop.permute.xlu1 %5690  ;;  %v3595_v25 = vsel %vm1339_vm6, %v14571_v41, %v3594_v12 }
 0x42c   :  { %19581 = vst [vmem:[#allocation78_spill] sm:$0xff] %v14533_v20 }
 0x42d   :  { %5788 = vrot.lane.b32.xlu1 %v5743_v1, %s11895_s24  ;;  %6677 = vrot.lane.b32.xlu0 %v6631_v24, %s11898_s22  ;;  %v5847_v1 = vrot.slane %v14594_v28, 3 }
 0x42f   :  { %v14546_v8 = vpop.permute.xlu0 %5089  ;;  %v14548_v60 = vpop.permute.xlu1 %5786  ;;  %v5848_v52 = vsel %vm3764_vm8, %v14555_v58, %v5847_v1 }
 0x430   :  { %19582 = vst [vmem:[#allocation53_spill] sm:$0xff] %v14546_v8 }
 0x431   :  { %6389 = vrot.lane.b32.xlu1 %v6343_v53, %s11896_s29  ;;  %4222 = vrot.lane.b32.xlu0 %v4182_v3, %s11895_s24  ;;  %v14622_v53 = vld [vmem:[#allocation3 + $0xb6] sm:$0xf]  ;;  %v4468_v3 = vsel %vm1695_vm10, %v4452_v31, %v14504_v15  ;;  %v5152_v15 = vsel %vm3764_vm8, %v14555_v58, %v5151_v26 }
 0x432   :  { %v6639_v54 = vrot.slane %v14622_v53, 4  ;;  %v6351_v6 = vrot.slane %v14622_v53, 1 }
 0x433   :  { %v14559_v55 = vpop.permute.xlu1 %5978  ;;  %v14561_v44 = vpop.permute.xlu0 %3626 }
 0x434   :  { %19583 = vst [vmem:[#allocation56_spill] sm:$0xff] %v14559_v55  ;;  %v6640_v38 = vsel %vm3861_vm9, %v14564_v61, %v6639_v54  ;;  %v6352_v1 = vsel %vm1339_vm6, %v14571_v41, %v6351_v6 }
 0x435   :  { %6485 = vrot.lane.b32.xlu1 %v6439_v10, %s11895_s24  ;;  %4318 = vrot.lane.b32.xlu0 %v4278_v30, %s11897_s16  ;;  %v4484_v10 = vsel %vm3990_vm14, %v4468_v3, %v14513_v0  ;;  %v3961_v3 = vsel %vm1661_vm4, %v14209_v39, %v14561_v44  ;;  %v6447_v39 = vrot.slane %v14622_v53, 2  ;;  %v3451_v44 = vld [vmem:[#allocation3 + $0x9e] sm:$0xf] }
 0x437   :  { %v14575_v45 = vpop.permute.xlu0 %5185  ;;  %v4117_v29 = vpop.permute.xlu1 %4116 }
 0x438   :  { %19584 = vst [vmem:[#allocation55_spill] sm:$0xff] %v14575_v45  ;;  %v4451_v24 = vsel %vm1661_vm4, %v14314_v5, %v4117_v29  ;;  %v4500_v29 = vsel %vm4007_vm13, %v4484_v10, %v14522_v22  ;;  %v5943_v22 = vrot.slane %v14594_v28, 4  ;;  %v19659_v45 = vld [vmem:[#allocation23_spill] sm:$0xff] }
 0x439   :  { %4414 = vrot.lane.b32.xlu0 %v4374_v2, %s11898_s22  ;;  %4126 = vrot.lane.b32.xlu1 %v4086_v21, %s11896_s29  ;;  %v3690_v2 = vrot.slane %v14583_v51, 2 }
 0x43b   :  { %v14585_v7 = vpop.permute.xlu0 %3722  ;;  %v4213_v35 = vpop.permute.xlu1 %4212  ;;  %v3691_v59 = vsel %vm1548_vm7, %v14542_v13, %v3690_v2 }
 0x43c   :  { %v4467_v62 = vsel %vm1695_vm10, %v4451_v24, %v4213_v35  ;;  %v3787_v35 = vrot.slane %v14583_v51, 3  ;;  %v5655_v24 = vrot.slane %v14594_v28, 1  ;;  %v3977_v28 = vsel %vm1695_vm10, %v3961_v3, %v14585_v7 }
 0x43d   :  { %5001 = vrot.lane.b32.xlu0 %v4960_v63, %s11896_s29  ;;  %5289 = vrot.lane.b32.xlu1 %v5248_v48, %s11898_s22  ;;  %v14654_v63 = vld [vmem:[#allocation3 + $0x96] sm:$0xff]  ;;  %v14656_v48 = vld [vmem:[#allocation3 + $0x9e] sm:$0xf]  ;;  %v5244_v3 = vrot.slane %v3451_v44, 4 }
 0x43e   :  { %v3788_v51 = vsel %vm3764_vm8, %v14555_v58, %v3787_v35  ;;  %v4274_v10 = vrot.slane %v14656_v48, 3 }
 0x43f   :  { %v14596_v33 = vpop.permute.xlu0 %3819  ;;  %v4309_v42 = vpop.permute.xlu1 %4308 }
 0x440   :  { %v4483_v56 = vsel %vm3990_vm14, %v4467_v62, %v4309_v42  ;;  %v5944_v42 = vsel %vm3861_vm9, %v14564_v61, %v5943_v22  ;;  %v3994_v54 = vsel %vm3990_vm14, %v3977_v28, %v14596_v33  ;;  %v6448_v33 = vsel %vm1548_vm7, %v14542_v13, %v6447_v39  ;;  %v14759_v28 = vld [vmem:[#allocation3 + $0x9e] sm:$0xf] }
 0x441   :  { %5097 = vrot.lane.b32.xlu0 %v5056_v27, %s11895_s24  ;;  %3924 = vrot.lane.b32.xlu1 %v3885_v9, %s11898_s22  ;;  %v14664_v27 = vrot.slane %v14654_v63, 1  ;;  %v4082_v9 = vrot.slane %v14656_v48, 1  ;;  %v6543_v22 = vrot.slane %v14622_v53, 3  ;;  %v4370_v53 = vrot.slane %v14656_v48, 4 }
 0x443   :  { %v14606_v50 = vpop.permute.xlu0 %5882  ;;  %v14608_v19 = vpop.permute.xlu1 %4991  ;;  %v4083_v61 = vsel %vm1339_vm6, %v14664_v27, %v4082_v9  ;;  %v6544_v13 = vsel %vm3764_vm8, %v14555_v58, %v6543_v22  ;;  %v3390_v9 = vld [vmem:[#allocation3 + $0x9e] sm:$0xf] }
 0x444   :  { %19585 = vst [vmem:[#allocation58_spill] sm:$0xff] %v14608_v19  ;;  %v6096_v19 = vld [vmem:[%s19369_s5 + $0x120] sm:$0xff] }
 0x445   :  { %5794 = vrot.lane.b32.xlu1 %v5752_v47, %s11895_s24  ;;  %3634 = vrot.lane.b32.xlu0 %v3595_v25, %s11896_s29  ;;  %v14679_v47 = vrot.slane %v14654_v63, 2  ;;  %v4178_v25 = vrot.slane %v14656_v48, 2 }
 0x447   :  { %v4405_v16 = vpop.permute.xlu0 %4404  ;;  %v14628_v4 = vpop.permute.xlu1 %5087 }
 0x448   :  { %19586 = vst [vmem:[#allocation64_spill] sm:$0xff] %v14628_v4  ;;  %v4499_v30 = vsel %vm4007_vm13, %v4483_v56, %v4405_v16  ;;  %v4179_v56 = vsel %vm1548_vm7, %v14679_v47, %v4178_v25  ;;  %v14695_v16 = vrot.slane %v14654_v63, 3  ;;  %v3687_v25 = vrot.slane %v3390_v9, 2 }
 0x449   :  { %11518 = vmatmul.mubr.msk.f32.vlgmr.msra.gmra.mxu0 %vm4524_vm15, %v4499_v30  ;;  %5890 = vrot.lane.b32.xlu1 %v5848_v52, %s11897_s16  ;;  %v5656_v52 = vsel %vm1339_vm6, %v14571_v41, %v5655_v24 }
 0x44a   :  { %5193 = vrot.lane.b32.xlu0 %v5152_v15, %s11897_s16  ;;  %11520 = vmatprep.mubr.msk.f32.mxu0 %vm4524_vm15, %v4500_v29  ;;  %v4275_v41 = vsel %vm3764_vm8, %v14695_v16, %v4274_v10  ;;  %v3591_v10 = vrot.slane %v3390_v9, 1 }
 0x44b   :  { %v14645_v0 = vpop.permute.xlu1 %5183  ;;  %v3625_v21 = vpop.permute.xlu0 %3624 }
 0x44c   :  { %19587 = vst [vmem:[#allocation39_spill] sm:$0xff] %v14645_v0  ;;  %v3960_v30 = vsel %vm1661_vm4, %v14314_v5, %v3625_v21  ;;  %v5052_v21 = vrot.slane %v3451_v44, 2 }
 0x44d   :  { %6683 = vrot.lane.b32.xlu1 %v6640_v38, %s11898_s22  ;;  %v4011_v38 = vsel %vm4007_vm13, %v3994_v54, %v14524_v46  ;;  %v14735_v46 = vrot.slane %v14654_v63, 4  ;;  %v3784_v54 = vrot.slane %v3390_v9, 3 }
 0x44e   :  { %3730 = vrot.lane.b32.xlu0 %v3691_v59, %s11895_s24 }
 0x44f   :  { %v3721_v49 = vpop.permute.xlu1 %3720  ;;  %v14659_v57 = vpop.permute.xlu0 %4218  ;;  %v4371_v58 = vsel %vm3861_vm9, %v14735_v46, %v4370_v53  ;;  %v5245_v39 = vsel %vm3861_vm9, %v14735_v46, %v5244_v3 }
 0x450   :  { %v3976_v29 = vsel %vm1695_vm10, %v3960_v30, %v3721_v49  ;;  %v5053_v49 = vsel %vm1548_vm7, %v14679_v47, %v5052_v21  ;;  %v3785_v21 = vsel %vm3764_vm8, %v14695_v16, %v3784_v54 }
 0x451   :  { %5986 = vrot.lane.b32.xlu1 %v5944_v42, %s11898_s22  ;;  %v5148_v42 = vrot.slane %v3451_v44, 3 }
 0x452   :  { %3827 = vrot.lane.b32.xlu0 %v3788_v51, %s11897_s16 }
 0x453   :  { %v14672_v12 = vpop.permute.xlu1 %5279  ;;  %v14674_v31 = vpop.permute.xlu0 %4314 }
 0x454   :  { %19588 = vst [vmem:[#allocation41_spill] sm:$0xff] %v14672_v12 }
 0x455   :  { %4124 = vrot.lane.b32.xlu1 %v4083_v61, %s11896_s29  ;;  %v5149_v61 = vsel %vm3764_vm8, %v14695_v16, %v5148_v42 }
 0x456   :  { %6395 = vrot.lane.b32.xlu0 %v6352_v1, %s11896_s29  ;;  %v4956_v1 = vrot.slane %v3451_v44, 1  ;;  %v3592_v44 = vsel %vm1339_vm6, %v14664_v27, %v3591_v10 }
 0x457   :  { %v3818_v26 = vpop.permute.xlu1 %3817  ;;  %v14687_v62 = vpop.permute.xlu0 %4410 }
 0x458   :  { %v3993_v7 = vsel %vm3990_vm14, %v3976_v29, %v3818_v26  ;;  %v3688_v26 = vsel %vm1548_vm7, %v14679_v47, %v3687_v25  ;;  %v5844_v29 = vrot.slane %v14759_v28, 3 }
 0x459   :  { %4220 = vrot.lane.b32.xlu1 %v4179_v56, %s11895_s24  ;;  %v4957_v56 = vsel %vm1339_vm6, %v14664_v27, %v4956_v1 }
 0x45a   :  { %5698 = vrot.lane.b32.xlu0 %v5656_v52, %s11896_s29 }
 0x45b   :  { %v3915_v15 = vpop.permute.xlu1 %3914  ;;  %v14711_v2 = vpop.permute.xlu0 %4997 }
 0x45c   :  { %19589 = vst [vmem:[#allocation43_spill] sm:$0xff] %v14711_v2  ;;  %v4010_v5 = vsel %vm4007_vm13, %v3993_v7, %v3915_v15  ;;  %v14772_v7 = vld [vmem:[#allocation3 + $0xde] sm:$0xff]  ;;  %v14774_v15 = vld [vmem:[#allocation3 + $0xe6] sm:$0xf] }
 0x45d   :  { %11564 = vmatprep.mubr.msk.f32.mxu1 %vm4524_vm15, %v4010_v5  ;;  %4316 = vrot.lane.b32.xlu1 %v4275_v41, %s11897_s16  ;;  %v4964_v22 = vrot.slane %v14772_v7, 1  ;;  %v14798_v25 = vrot.slane %v14772_v7, 2  ;;  %v5157_v54 = vrot.slane %v14774_v15, 3 }
 0x45e   :  { %6491 = vrot.lane.b32.xlu0 %v6448_v33, %s11895_s24  ;;  %11565 = vmatmul.mubr.msk.f32.gmra.mxu1 %vm4524_vm15, %v4011_v38  ;;  %v3881_v33 = vrot.slane %v3390_v9, 4  ;;  %v5845_v38 = vsel %vm3764_vm8, %v14695_v16, %v5844_v29  ;;  %v5652_v9 = vrot.slane %v14759_v28, 1  ;;  %v14817_v29 = vld [vmem:[#allocation3 + $0xe6] sm:$0xf] }
 0x45f   :  { %v14725_v59 = vpop.permute.xlu0 %5093  ;;  %v14727_v35 = vpop.permute.xlu1 %4122 }
 0x460   :  { %19590 = vst [vmem:[#allocation45_spill] sm:$0xff] %v14725_v59  ;;  %v3882_v53 = vsel %vm3861_vm9, %v14735_v46, %v3881_v33  ;;  %v5653_v3 = vsel %vm1339_vm6, %v14664_v27, %v5652_v9 }
 0x461   :  { %5095 = vrot.lane.b32.xlu1 %v5053_v49, %s11895_s24  ;;  %v4965_v49 = vrot.slane %v14774_v15, 1 }
 0x462   :  { %6587 = vrot.lane.b32.xlu0 %v6544_v13, %s11897_s16 }
 0x463   :  { %v14739_v51 = vpop.permute.xlu1 %5285  ;;  %v14741_v6 = vpop.permute.xlu0 %3630 }
 0x464   :  { %19591 = vst [vmem:[#allocation47_spill] sm:$0xff] %v14739_v51 }
 0x465   :  { %5191 = vrot.lane.b32.xlu1 %v5149_v61, %s11897_s16  ;;  %v4966_v61 = vsel %vm1339_vm6, %v4964_v22, %v4965_v49 }
 0x466   :  { %4412 = vrot.lane.b32.xlu0 %v4371_v58, %s11898_s22  ;;  %v5061_v58 = vrot.slane %v14774_v15, 2 }
 0x467   :  { %v14749_v48 = vpop.permute.xlu1 %3920  ;;  %v14751_v24 = vpop.permute.xlu0 %5189 }
 0x468   :  { %19592 = vst [vmem:[#allocation57_spill] sm:$0xff] %v14751_v24  ;;  %v5062_v10 = vsel %vm1548_vm7, %v14798_v25, %v5061_v58  ;;  %v14831_v58 = vld [vmem:[#allocation3 + $0xe6] sm:$0xf] }
 0x469   :  { %3728 = vrot.lane.b32.xlu1 %v3688_v26, %s11895_s24 }
 0x46a   :  { %4999 = vrot.lane.b32.xlu0 %v4957_v56, %s11896_s29  ;;  %v5748_v56 = vrot.slane %v14759_v28, 2 }
 0x46b   :  { %v14761_v30 = vpop.permute.xlu1 %6487  ;;  %v14763_v52 = vpop.permute.xlu0 %3726 }
 0x46c   :  { %19593 = vst [vmem:[#allocation60_spill] sm:$0xff] %v14761_v30 }
 0x46d   :  { %5287 = vrot.lane.b32.xlu1 %v5245_v39, %s11898_s22  ;;  %v14813_v39 = vrot.slane %v14772_v7, 3 }
 0x46e   :  { %3632 = vrot.lane.b32.xlu0 %v3592_v44, %s11896_s29  ;;  %v3513_v44 = vld [vmem:[#allocation3 + $0x9e] sm:$0xf] }
 0x46f   :  { %v14776_v5 = vpop.permute.xlu1 %6583  ;;  %v14778_v41 = vpop.permute.xlu0 %3823  ;;  %v6348_v49 = vrot.slane %v3513_v44, 1  ;;  %v5158_v9 = vsel %vm3764_vm8, %v14813_v39, %v5157_v54  ;;  %v6444_v11 = vrot.slane %v3513_v44, 2 }
 0x470   :  { %19594 = vst [vmem:[#allocation50_spill] sm:$0xff] %v14776_v5 }
 0x471   :  { %3825 = vrot.lane.b32.xlu1 %v3785_v21, %s11897_s16 }
 0x472   :  { %5888 = vrot.lane.b32.xlu0 %v5845_v38, %s11897_s16  ;;  %v5749_v38 = vsel %vm1548_vm7, %v14679_v47, %v5748_v56 }
 0x473   :  { %v14788_v42 = vpop.permute.xlu1 %6679  ;;  %v14790_v13 = vpop.permute.xlu0 %6391 }
 0x474   :  { %19595 = vst [vmem:[#allocation54_spill] sm:$0xff] %v14788_v42  ;;  %19596 = vst [vmem:[#allocation59_spill] sm:$0xff] %v14790_v13  ;;  %v15049_v13 = vld [vmem:[#allocation3 + $0x176] sm:$0xf] }
 0x475   :  { %3922 = vrot.lane.b32.xlu1 %v3882_v53, %s11898_s22  ;;  %v4454_v53 = vsel %vm1661_vm4, %v14373_v23, %v14727_v35  ;;  %v6349_v35 = vsel %vm1339_vm6, %v14664_v27, %v6348_v49  ;;  %v6445_v49 = vsel %vm1548_vm7, %v14679_v47, %v6444_v11 }
 0x476   :  { %5005 = vrot.lane.b32.xlu0 %v4966_v61, %s11896_s29  ;;  %v6357_v61 = vrot.slane %v14817_v29, 1  ;;  %v4470_v56 = vsel %vm1695_vm10, %v4454_v53, %v14659_v57  ;;  %v5940_v53 = vrot.slane %v14759_v28, 4  ;;  %v6540_v28 = vrot.slane %v3513_v44, 3 }
 0x477   :  { %v14802_v1 = vpop.permute.xlu1 %5982  ;;  %v14804_v26 = vpop.permute.xlu0 %5694  ;;  %v4486_v57 = vsel %vm3990_vm14, %v4470_v56, %v14674_v31 }
 0x478   :  { %19597 = vst [vmem:[#allocation62_spill] sm:$0xff] %v14802_v1  ;;  %19598 = vst [vmem:[#allocation71_spill] sm:$0xff] %v14804_v26  ;;  %v6358_v54 = vsel %vm1339_vm6, %v4964_v22, %v6357_v61  ;;  %v5941_v47 = vsel %vm3861_vm9, %v14735_v46, %v5940_v53 }
 0x479   :  { %5696 = vrot.lane.b32.xlu1 %v5653_v3, %s11896_s29 }
 0x47a   :  { %5101 = vrot.lane.b32.xlu0 %v5062_v10, %s11895_s24 }
 0x47b   :  { %v14819_v21 = vpop.permute.xlu0 %5790  ;;  %v4121_v33 = vpop.permute.xlu1 %4120 }
 0x47c   :  { %19599 = vst [vmem:[#allocation72_spill] sm:$0xff] %v14819_v21 }
 0x47d   :  { %5792 = vrot.lane.b32.xlu1 %v5749_v38, %s11895_s24  ;;  %v5661_v38 = vrot.slane %v14831_v58, 1 }
 0x47e   :  { %5197 = vrot.lane.b32.xlu0 %v5158_v9, %s11897_s16  ;;  %v4453_v9 = vsel %vm1661_vm4, %v14443_v43, %v4121_v33 }
 0x47f   :  { %v14833_v3 = vpop.permute.xlu0 %5886  ;;  %v4217_v10 = vpop.permute.xlu1 %4216  ;;  %v5662_v33 = vsel %vm1339_vm6, %v4964_v22, %v5661_v38  ;;  %v6549_v22 = vrot.slane %v14817_v29, 3  ;;  %v6636_v38 = vrot.slane %v3513_v44, 4  ;;  %v5252_v44 = vrot.slane %v14772_v7, 4 }
 0x480   :  { %19600 = vst [vmem:[#allocation73_spill] sm:$0xff] %v14833_v3  ;;  %v4469_v17 = vsel %vm1695_vm10, %v4453_v9, %v4217_v10  ;;  %v6453_v10 = vrot.slane %v14817_v29, 2 }
 0x481   :  { %6393 = vrot.lane.b32.xlu1 %v6349_v35, %s11896_s29  ;;  %v6550_v9 = vsel %vm3764_vm8, %v14813_v39, %v6549_v22 }
 0x482   :  { %6399 = vrot.lane.b32.xlu0 %v6358_v54, %s11896_s29  ;;  %v6541_v54 = vsel %vm3764_vm8, %v14695_v16, %v6540_v28  ;;  %v6637_v16 = vsel %vm3861_vm9, %v14735_v46, %v6636_v38  ;;  %v14904_v28 = vld [vmem:[#allocation3 + $0xce] sm:$0xf] }
 0x483   :  { %v4409_v42 = vpop.permute.xlu0 %4408  ;;  %v4313_v5 = vpop.permute.xlu1 %4312 }
 0x484   :  { %v4485_v27 = vsel %vm3990_vm14, %v4469_v17, %v4313_v5  ;;  %v4502_v17 = vsel %vm4007_vm13, %v4486_v57, %v14687_v62  ;;  %v6454_v5 = vsel %vm1548_vm7, %v14798_v25, %v6453_v10  ;;  %v14872_v62 = vld [vmem:[#allocation3 + $0xc6] sm:$0xff] }
 0x485   :  { %6489 = vrot.lane.b32.xlu1 %v6445_v49, %s11895_s24  ;;  %v4501_v61 = vsel %vm4007_vm13, %v4485_v27, %v4409_v42  ;;  %v14874_v42 = vld [vmem:[#allocation3 + $0xce] sm:$0xf]  ;;  %v14884_v57 = vrot.slane %v14872_v62, 4 }
 0x486   :  { %5702 = vrot.lane.b32.xlu0 %v5662_v33, %s11896_s29  ;;  %11521 = vmatmul.mubr.msk.f32.gmra.mxu0 %vm4524_vm15, %v4501_v61  ;;  %v4376_v27 = vrot.slane %v14874_v42, 4  ;;  %v14888_v49 = vld [vmem:[#allocation3 + $0xce] sm:$0xf]  ;;  %v5253_v61 = vrot.slane %v14774_v15, 4  ;;  %v5757_v15 = vrot.slane %v14831_v58, 2 }
 0x487   :  { %v14860_v31 = vpop.permute.xlu0 %4995  ;;  %11523 = vmatprep.mubr.msk.f32.mxu0 %vm4524_vm15, %v4502_v17  ;;  %v14863_v11 = vpop.permute.xlu1 %5091  ;;  %v14900_v17 = vrot.slane %v14872_v62, 1  ;;  %v5250_v51 = vrot.slane %v14888_v49, 4 }
 0x488   :  { %19601 = vst [vmem:[#allocation74_spill] sm:$0xff] %v14860_v31  ;;  %19602 = vst [vmem:[#allocation75_spill] sm:$0xff] %v14863_v11  ;;  %v4377_v10 = vsel %vm3861_vm9, %v14884_v57, %v4376_v27  ;;  %v5254_v7 = vsel %vm3861_vm9, %v5252_v44, %v5253_v61  ;;  %v3963_v27 = vsel %vm1661_vm4, %v14373_v23, %v14741_v6  ;;  %v5853_v61 = vrot.slane %v14831_v58, 3 }
 0x489   :  { %5984 = vrot.lane.b32.xlu1 %v5941_v47, %s11898_s22  ;;  %v4962_v47 = vrot.slane %v14888_v49, 1  ;;  %v5754_v23 = vrot.slane %v14904_v28, 2 }
 0x48a   :  { %6495 = vrot.lane.b32.xlu0 %v6454_v5, %s11895_s24 }
 0x48b   :  { %v14876_v56 = vpop.permute.xlu1 %5187  ;;  %v3629_v35 = vpop.permute.xlu0 %3628  ;;  %v4963_v22 = vsel %vm1339_vm6, %v14900_v17, %v4962_v47  ;;  %v3979_v47 = vsel %vm1695_vm10, %v3963_v27, %v14763_v52 }
 0x48c   :  { %19603 = vst [vmem:[#allocation69_spill] sm:$0xff] %v14876_v56  ;;  %v3996_v6 = vsel %vm3990_vm14, %v3979_v47, %v14778_v41 }
 0x48d   :  { %6585 = vrot.lane.b32.xlu1 %v6541_v54, %s11897_s16  ;;  %v5658_v54 = vrot.slane %v14904_v28, 1 }
 0x48e   :  { %6591 = vrot.lane.b32.xlu0 %v6550_v9, %s11897_s16 }
 0x48f   :  { %v3725_v53 = vpop.permute.xlu1 %3724  ;;  %v14890_v33 = vpop.permute.xlu0 %5692 }
 0x491   :  { %6681 = vrot.lane.b32.xlu1 %v6637_v16, %s11898_s22  ;;  %v5758_v16 = vsel %vm1548_vm7, %v14798_v25, %v5757_v15  ;;  %v14940_v15 = vld [vmem:[#allocation3 + $0xce] sm:$0xf] }
 0x492   :  { %4416 = vrot.lane.b32.xlu0 %v4377_v10, %s11898_s22  ;;  %v14926_v10 = vrot.slane %v14872_v62, 2 }
 0x493   :  { %v14906_v5 = vpop.permute.xlu1 %5283  ;;  %v14908_v46 = vpop.permute.xlu0 %5884 }
 0x494   :  { %19604 = vst [vmem:[#allocation76_spill] sm:$0xff] %v14906_v5  ;;  %19605 = vst [vmem:[#allocation14_spill] sm:$0xff] %v14908_v46  ;;  %v5755_v41 = vsel %vm1548_vm7, %v14926_v10, %v5754_v23  ;;  %v14972_v23 = vld [vmem:[#allocation3 + $0x16e] sm:$0xff] }
 0x495   :  { %5293 = vrot.lane.b32.xlu1 %v5254_v7, %s11898_s22  ;;  %v3962_v7 = vsel %vm1661_vm4, %v14443_v43, %v3629_v35 }
 0x496   :  { %5003 = vrot.lane.b32.xlu0 %v4963_v22, %s11896_s29  ;;  %v5659_v22 = vsel %vm1339_vm6, %v14900_v17, %v5658_v54  ;;  %v3978_v25 = vsel %vm1695_vm10, %v3962_v7, %v3725_v53  ;;  %v5854_v54 = vsel %vm3764_vm8, %v14813_v39, %v5853_v61  ;;  %v4013_v53 = vsel %vm4007_vm13, %v3996_v6, %v14749_v48  ;;  %v14974_v6 = vld [vmem:[#allocation3 + $0x176] sm:$0xf] }
 0x497   :  { %v3822_v38 = vpop.permute.xlu1 %3821  ;;  %v14917_v9 = vpop.permute.xlu0 %5980  ;;  %v5949_v61 = vrot.slane %v14831_v58, 4  ;;  %v14968_v48 = vrot.slane %v14872_v62, 3 }
 0x498   :  { %19606 = vst [vmem:[#allocation18_spill] sm:$0xff] %v14917_v9  ;;  %v3995_v52 = vsel %vm3990_vm14, %v3978_v25, %v3822_v38  ;;  %v6354_v38 = vrot.slane %v14940_v15, 1 }
 0x499   :  { %5798 = vrot.lane.b32.xlu1 %v5758_v16, %s11895_s24  ;;  %v6645_v16 = vrot.slane %v14817_v29, 4  ;;  %v5950_v58 = vsel %vm3861_vm9, %v5252_v44, %v5949_v61  ;;  %v15001_v61 = vrot.slane %v14972_v23, 3 }
 0x49a   :  { %5700 = vrot.lane.b32.xlu0 %v5659_v22, %s11896_s29  ;;  %v6355_v7 = vsel %vm1339_vm6, %v14900_v17, %v6354_v38  ;;  %v5850_v22 = vrot.slane %v14904_v28, 3  ;;  %v4184_v38 = vrot.slane %v14874_v42, 2 }
 0x49b   :  { %v3919_v27 = vpop.permute.xlu1 %3918  ;;  %v14943_v43 = vpop.permute.xlu0 %6581  ;;  %v6646_v29 = vsel %vm3861_vm9, %v5252_v44, %v6645_v16  ;;  %v4193_v16 = vrot.slane %v14974_v6, 2 }
 0x49c   :  { %19607 = vst [vmem:[#allocation15_spill] sm:$0xff] %v14943_v43  ;;  %v4012_v35 = vsel %vm4007_vm13, %v3995_v52, %v3919_v27  ;;  %v4088_v27 = vrot.slane %v14874_v42, 1 }
 0x49d   :  { %11567 = vmatprep.mubr.msk.f32.mxu1 %vm4524_vm15, %v4012_v35  ;;  %5894 = vrot.lane.b32.xlu1 %v5854_v54, %s11897_s16  ;;  %v5851_v35 = vsel %vm3764_vm8, %v14968_v48, %v5850_v22  ;;  %v14986_v54 = vrot.slane %v14972_v23, 2 }
 0x49e   :  { %5796 = vrot.lane.b32.xlu0 %v5755_v41, %s11895_s24  ;;  %11568 = vmatmul.mubr.msk.f32.gmra.mxu1 %vm4524_vm15, %v4013_v53  ;;  %v4089_v44 = vsel %vm1339_vm6, %v14900_v17, %v4088_v27  ;;  %v4185_v17 = vsel %vm1548_vm7, %v14926_v10, %v4184_v38  ;;  %v4280_v27 = vrot.slane %v14874_v42, 3  ;;  %v5058_v38 = vrot.slane %v14888_v49, 2 }
 0x49f   :  { %v14958_v47 = vpop.permute.xlu1 %5788  ;;  %v14960_v39 = vpop.permute.xlu0 %6677 }
 0x4a0   :  { %19608 = vst [vmem:[#allocation19_spill] sm:$0xff] %v14960_v39  ;;  %v4281_v42 = vsel %vm3764_vm8, %v14968_v48, %v4280_v27  ;;  %v5059_v27 = vsel %vm1548_vm7, %v14926_v10, %v5058_v38 }
 0x4a1   :  { %6687 = vrot.lane.b32.xlu1 %v6646_v29, %s11898_s22  ;;  %v4194_v29 = vsel %vm1548_vm7, %v14986_v54, %v4193_v16  ;;  %v15016_v16 = vrot.slane %v14972_v23, 4 }
 0x4a2   :  { %6397 = vrot.lane.b32.xlu0 %v6355_v7, %s11896_s29  ;;  %v4289_v7 = vrot.slane %v14974_v6, 3 }
 0x4a3   :  { %v14976_v25 = vpop.permute.xlu1 %6389  ;;  %v14978_v52 = vpop.permute.xlu0 %4222 }
 0x4a4   :  { %19609 = vst [vmem:[#allocation16_spill] sm:$0xff] %v14976_v25  ;;  %v5154_v25 = vrot.slane %v14888_v49, 3 }
 0x4a5   :  { %5990 = vrot.lane.b32.xlu1 %v5950_v58, %s11898_s22 }
 0x4a6   :  { %5892 = vrot.lane.b32.xlu0 %v5851_v35, %s11897_s16  ;;  %v4290_v35 = vsel %vm3764_vm8, %v15001_v61, %v4289_v7  ;;  %v5155_v38 = vsel %vm3764_vm8, %v14968_v48, %v5154_v25  ;;  %v6450_v25 = vrot.slane %v14940_v15, 2 }
 0x4a7   :  { %v14990_v41 = vpop.permute.xlu1 %6485  ;;  %v14992_v53 = vpop.permute.xlu0 %4318 }
 0x4a8   :  { %19610 = vst [vmem:[#allocation25_spill] sm:$0xff] %v14990_v41 }
 0x4a9   :  { %4128 = vrot.lane.b32.xlu1 %v4089_v44, %s11896_s29  ;;  %v4385_v44 = vrot.slane %v14974_v6, 4 }
 0x4aa   :  { %4230 = vrot.lane.b32.xlu0 %v4194_v29, %s11895_s24  ;;  %v15020_v29 = vld [vmem:[#allocation3 + $0x176] sm:$0xf] }
 0x4ab   :  { %v15005_v22 = vpop.permute.xlu0 %4414  ;;  %v15007_v58 = vpop.permute.xlu1 %4126  ;;  %v4386_v7 = vsel %vm3861_vm9, %v15016_v16, %v4385_v44 }
 0x4ad   :  { %4224 = vrot.lane.b32.xlu1 %v4185_v17, %s11895_s24  ;;  %v15033_v17 = vrot.slane %v14972_v23, 1 }
 0x4ae   :  { %4326 = vrot.lane.b32.xlu0 %v4290_v35, %s11897_s16  ;;  %v4971_v35 = vrot.slane %v15020_v29, 1 }
 0x4af   :  { %v15022_v39 = vpop.permute.xlu0 %5001  ;;  %v15024_v43 = vpop.permute.xlu1 %5289 }
 0x4b0   :  { %19611 = vst [vmem:[#allocation20_spill] sm:$0xff] %v15022_v39  ;;  %19612 = vst [vmem:[#allocation28_spill] sm:$0xff] %v15024_v43  ;;  %v4972_v44 = vsel %vm1339_vm6, %v15033_v17, %v4971_v35  ;;  %v5251_v39 = vsel %vm3861_vm9, %v14884_v57, %v5250_v51  ;;  %v5946_v51 = vrot.slane %v14904_v28, 4  ;;  %v3799_v28 = vrot.slane %v15049_v13, 3 }
 0x4b1   :  { %4320 = vrot.lane.b32.xlu1 %v4281_v42, %s11897_s16  ;;  %v5067_v42 = vrot.slane %v15020_v29, 2 }
 0x4b2   :  { %4422 = vrot.lane.b32.xlu0 %v4386_v7, %s11898_s22 }
 0x4b3   :  { %v15037_v30 = vpop.permute.xlu0 %5097  ;;  %v15039_v41 = vpop.permute.xlu1 %3924  ;;  %v5068_v35 = vsel %vm1548_vm7, %v14986_v54, %v5067_v42  ;;  %v5163_v42 = vrot.slane %v15020_v29, 3 }
 0x4b4   :  { %19613 = vst [vmem:[#allocation27_spill] sm:$0xff] %v15037_v30 }
 0x4b5   :  { %5099 = vrot.lane.b32.xlu1 %v5059_v27, %s11895_s24  ;;  %v3606_v27 = vrot.slane %v15049_v13, 1 }
 0x4b6   :  { %5009 = vrot.lane.b32.xlu0 %v4972_v44, %s11896_s29 }
 0x4b7   :  { %v15051_v7 = vpop.permute.xlu1 %5794  ;;  %v15053_v43 = vpop.permute.xlu0 %3634  ;;  %v3607_v49 = vsel %vm1339_vm6, %v15033_v17, %v3606_v27  ;;  %v3702_v27 = vrot.slane %v15049_v13, 2 }
 0x4b8   :  { %19614 = vst [vmem:[#allocation17_spill] sm:$0xff] %v15051_v7  ;;  %v6459_v7 = vrot.slane %v15697_v40, 2 }
 0x4b9   :  { %5195 = vrot.lane.b32.xlu1 %v5155_v38, %s11897_s16 }
 0x4ba   :  { %5105 = vrot.lane.b32.xlu0 %v5068_v35, %s11895_s24 }
 0x4bb   :  { %v15063_v44 = vpop.permute.xlu1 %5890 }
 0x4bc   :  { %19615 = vst [vmem:[#allocation30_spill] sm:$0xff] %v15063_v44  ;;  %v15065_v30 = vpop.permute.xlu0 %5193 }
 0x4bd   :  { %19616 = vst [vmem:[#allocation29_spill] sm:$0xff] %v15065_v30  ;;  %5291 = vrot.lane.b32.xlu1 %v5251_v39, %s11898_s22  ;;  %v6451_v30 = vsel %vm1548_vm7, %v14926_v10, %v6450_v25  ;;  %v5164_v39 = vsel %vm3764_vm8, %v15001_v61, %v5163_v42  ;;  %v6546_v10 = vrot.slane %v14940_v15, 3  ;;  %v3492_v25 = vld [vmem:[#allocation3 + $0x176] sm:$0xf] }
 0x4be   :  { %3642 = vrot.lane.b32.xlu0 %v3607_v49, %s11896_s29  ;;  %v5667_v56 = vrot.slane %v3492_v25, 1 }
 0x4bf   :  { %v15075_v38 = vpop.permute.xlu1 %6683  ;;  %v6547_v24 = vsel %vm3764_vm8, %v14968_v48, %v6546_v10 }
 0x4c0   :  { %19617 = vst [vmem:[#allocation21_spill] sm:$0xff] %v15075_v38  ;;  %v15077_v35 = vpop.permute.xlu0 %3730  ;;  %v5947_v38 = vsel %vm3861_vm9, %v14884_v57, %v5946_v51  ;;  %v6642_v51 = vrot.slane %v14940_v15, 4  ;;  %v4097_v15 = vrot.slane %v14974_v6, 1  ;;  %v5259_v6 = vrot.slane %v15020_v29, 4 }
 0x4c1   :  { %6493 = vrot.lane.b32.xlu1 %v6451_v30, %s11895_s24  ;;  %v3703_v30 = vsel %vm1548_vm7, %v14986_v54, %v3702_v27  ;;  %v15108_v54 = vld [vmem:[#allocation3 + $0x156] sm:$0xff]  ;;  %v15110_v27 = vld [vmem:[#allocation3 + $0x15e] sm:$0xf] }
 0x4c2   :  { %5201 = vrot.lane.b32.xlu0 %v5164_v39, %s11897_s16  ;;  %v6643_v48 = vsel %vm3861_vm9, %v14884_v57, %v6642_v51  ;;  %v4382_v10 = vrot.slane %v15110_v27, 4  ;;  %v4098_v57 = vsel %vm1339_vm6, %v15033_v17, %v4097_v15 }
 0x4c3   :  { %v15087_v5 = vpop.permute.xlu1 %5986 }
 0x4c4   :  { %19618 = vst [vmem:[#allocation32_spill] sm:$0xff] %v15087_v5  ;;  %v15089_v49 = vpop.permute.xlu0 %3827 }
 0x4c5   :  { %5988 = vrot.lane.b32.xlu1 %v5947_v38, %s11898_s22  ;;  %v3800_v38 = vsel %vm3764_vm8, %v15001_v61, %v3799_v28  ;;  %v15121_v61 = vrot.slane %v15108_v54, 4  ;;  %v15125_v28 = vld [vmem:[#allocation3 + $0x15e] sm:$0xf] }
 0x4c6   :  { %3738 = vrot.lane.b32.xlu0 %v3703_v30, %s11895_s24 }
 0x4c7   :  { %v4125_v42 = vpop.permute.xlu1 %4124  ;;  %v4383_v51 = vsel %vm3861_vm9, %v15121_v61, %v4382_v10  ;;  %v3896_v10 = vrot.slane %v15049_v13, 4 }
 0x4c8   :  { %v15099_v39 = vpop.permute.xlu0 %6395 }
 0x4c9   :  { %19619 = vst [vmem:[#allocation31_spill] sm:$0xff] %v15099_v39  ;;  %6589 = vrot.lane.b32.xlu1 %v6547_v24, %s11897_s16  ;;  %v5668_v24 = vsel %vm1339_vm6, %v15033_v17, %v5667_v56  ;;  %v4456_v56 = vsel %vm1661_vm4, %v14531_v14, %v15007_v58  ;;  %v5260_v58 = vsel %vm3861_vm9, %v15016_v16, %v5259_v6 }
 0x4ca   :  { %3835 = vrot.lane.b32.xlu0 %v3800_v38, %s11897_s16  ;;  %v4472_v29 = vsel %vm1695_vm10, %v4456_v56, %v14978_v52  ;;  %v4455_v39 = vsel %vm1661_vm4, %v14654_v63, %v4125_v42  ;;  %v15158_v52 = vld [vmem:[#allocation3 + $0x1a6] sm:$0xf]  ;;  %v4094_v42 = vrot.slane %v15110_v27, 1 }
 0x4cb   :  { %v4221_v30 = vpop.permute.xlu1 %4220  ;;  %v4488_v13 = vsel %vm3990_vm14, %v4472_v29, %v14992_v53 }
 0x4cc   :  { %v15112_v59 = vpop.permute.xlu0 %5698  ;;  %v4471_v56 = vsel %vm1695_vm10, %v4455_v39, %v4221_v30  ;;  %v15172_v39 = vrot.slane %v3434_v18, 2  ;;  %v4199_v30 = vrot.slane %v15158_v52, 2  ;;  %v4504_v53 = vsel %vm4007_vm13, %v4488_v13, %v15005_v22 }
 0x4cd   :  { %19620 = vst [vmem:[#allocation33_spill] sm:$0xff] %v15112_v59  ;;  %6685 = vrot.lane.b32.xlu1 %v6643_v48, %s11898_s22  ;;  %v4967_v48 = vrot.slane %v15108_v54, 1  ;;  %v4295_v22 = vrot.slane %v15158_v52, 3 }
 0x4ce   :  { %5706 = vrot.lane.b32.xlu0 %v5668_v24, %s11896_s29  ;;  %v4968_v24 = vrot.slane %v15125_v28, 1 }
 0x4cf   :  { %v4317_v25 = vpop.permute.xlu1 %4316  ;;  %v4095_v29 = vsel %vm1339_vm6, %v4967_v48, %v4094_v42 }
 0x4d0   :  { %v15127_v38 = vpop.permute.xlu0 %6491  ;;  %v4487_v6 = vsel %vm3990_vm14, %v4471_v56, %v4317_v25  ;;  %v15190_v56 = vrot.slane %v3434_v18, 3 }
 0x4d1   :  { %19621 = vst [vmem:[#allocation51_spill] sm:$0xff] %v15127_v38  ;;  %4134 = vrot.lane.b32.xlu1 %v4098_v57, %s11896_s29  ;;  %v15141_v38 = vld [vmem:[#allocation3 + $0x15e] sm:$0xf]  ;;  %v4969_v57 = vsel %vm1339_vm6, %v4967_v48, %v4968_v24 }
 0x4d2   :  { %4420 = vrot.lane.b32.xlu0 %v4383_v51, %s11898_s22  ;;  %v3603_v51 = vrot.slane %v15141_v38, 1  ;;  %v4296_v42 = vsel %vm3764_vm8, %v15190_v56, %v4295_v22  ;;  %v3965_v22 = vsel %vm1661_vm4, %v14531_v14, %v15053_v43  ;;  %v19629_v14 = vld [vmem:[#allocation35_spill] sm:$0xff] }
 0x4d3   :  { %v15143_v17 = vpop.permute.xlu1 %5095  ;;  %v3981_v11 = vsel %vm1695_vm10, %v3965_v22, %v15077_v35  ;;  %v15238_v22 = vld [vmem:[#allocation3 + $0x13e] sm:$0xff] }
 0x4d4   :  { %19622 = vst [vmem:[#allocation66_spill] sm:$0xff] %v15143_v17  ;;  %v15147_v15 = vpop.permute.xlu0 %6587  ;;  %v3604_v17 = vsel %vm1339_vm6, %v4967_v48, %v3603_v51  ;;  %v4190_v51 = vrot.slane %v15110_v27, 2 }
 0x4d5   :  { %19623 = vst [vmem:[#allocation13_spill] sm:$0xff] %v15147_v15  ;;  %5297 = vrot.lane.b32.xlu1 %v5260_v58, %s11898_s22  ;;  %v3897_v58 = vsel %vm3861_vm9, %v15016_v16, %v3896_v10  ;;  %v15184_v10 = vrot.slane %v15108_v54, 2 }
 0x4d6   :  { %5007 = vrot.lane.b32.xlu0 %v4969_v57, %s11896_s29 }
 0x4d7   :  { %v15161_v15 = vpop.permute.xlu1 %5191  ;;  %v4191_v48 = vsel %vm1548_vm7, %v15184_v10, %v4190_v51  ;;  %v19627_v51 = vld [vmem:[#allocation34_spill] sm:$0xff] }
 0x4d8   :  { %19624 = vst [vmem:[#allocation65_spill] sm:$0xff] %v15161_v15  ;;  %v4413_v24 = vpop.permute.xlu0 %4412 }
 0x4d9   :  { %v4503_v57 = vsel %vm4007_vm13, %v4487_v6, %v4413_v24  ;;  %3932 = vrot.lane.b32.xlu1 %v3897_v58, %s11898_s22  ;;  %v15199_v24 = vrot.slane %v15108_v54, 3  ;;  %v4286_v58 = vrot.slane %v15110_v27, 3 }
 0x4da   :  { %11524 = vmatmul.mubr.msk.f32.gmra.mxu0 %vm4524_vm15, %v4503_v57  ;;  %3640 = vrot.lane.b32.xlu0 %v3604_v17, %s11896_s29  ;;  %v4200_v17 = vsel %vm1548_vm7, %v15172_v39, %v4199_v30  ;;  %v15205_v57 = vrot.slane %v3434_v18, 4  ;;  %v4391_v30 = vrot.slane %v15158_v52, 4 }
 0x4db   :  { %11526 = vmatprep.mubr.msk.f32.mxu0 %vm4524_vm15, %v4504_v53  ;;  %v3729_v16 = vpop.permute.xlu1 %3728  ;;  %v15209_v53 = vld [vmem:[#allocation3 + $0x1a6] sm:$0xf]  ;;  %v4287_v15 = vsel %vm3764_vm8, %v15199_v24, %v4286_v58  ;;  %v3998_v58 = vsel %vm3990_vm14, %v3981_v11, %v15089_v49  ;;  %v5160_v49 = vrot.slane %v15125_v28, 3 }
 0x4dc   :  { %v15180_v25 = vpop.permute.xlu0 %4999 }
 0x4dd   :  { %19625 = vst [vmem:[#allocation42_spill] sm:$0xff] %v15180_v25  ;;  %4132 = vrot.lane.b32.xlu1 %v4095_v29, %s11896_s29  ;;  %v11810_v29 = vld [vmem:[#allocation3 + $0x126] sm:$0xff] }
 0x4de   :  { %4234 = vrot.lane.b32.xlu0 %v4200_v17, %s11895_s24  ;;  %v3966_v17 = vsel %vm1661_vm4, %v11810_v29, %v19627_v51  ;;  %v4977_v29 = vrot.slane %v15209_v53, 1 }
 0x4df   :  { %v15194_v13 = vpop.permute.xlu1 %5287  ;;  %v3982_v43 = vsel %vm1695_vm10, %v3966_v17, %v19629_v14  ;;  %v19633_v14 = vld [vmem:[#allocation48_spill] sm:$0xff] }
 0x4e0   :  { %19626 = vst [vmem:[#allocation68_spill] sm:$0xff] %v15194_v13  ;;  %v3633_v6 = vpop.permute.xlu0 %3632 }
 0x4e1   :  { %4228 = vrot.lane.b32.xlu1 %v4191_v48, %s11895_s24  ;;  %v3964_v27 = vsel %vm1661_vm4, %v14654_v63, %v3633_v6  ;;  %v4392_v63 = vsel %vm3861_vm9, %v15205_v57, %v4391_v30  ;;  %v15228_v6 = vrot.slane %v3434_v18, 1  ;;  %v19630_v30 = vld [vmem:[#allocation36_spill] sm:$0xff] }
 0x4e2   :  { %4330 = vrot.lane.b32.xlu0 %v4296_v42, %s11897_s16  ;;  %v5064_v42 = vrot.slane %v15125_v28, 2  ;;  %v3980_v51 = vsel %vm1695_vm10, %v3964_v27, %v3729_v16  ;;  %v3967_v18 = vsel %vm1661_vm4, %v15238_v22, %v19630_v30  ;;  %v19632_v16 = vld [vmem:[#allocation37_spill] sm:$0xff]  ;;  %v4015_v27 = vsel %vm4007_vm13, %v3998_v58, %v15039_v41 }
 0x4e3   :  { %v3826_v13 = vpop.permute.xlu1 %3825  ;;  %v3999_v17 = vsel %vm3990_vm14, %v3982_v43, %v19632_v16  ;;  %v15262_v43 = vld [vmem:[#allocation3 + $0x1a6] sm:$0xf]  ;;  %v5161_v58 = vsel %vm3764_vm8, %v15199_v24, %v5160_v49  ;;  %v19637_v30 = vld [vmem:[#allocation49_spill] sm:$0xff] }
 0x4e4   :  { %v15218_v48 = vpop.permute.xlu0 %5888  ;;  %v3997_v35 = vsel %vm3990_vm14, %v3980_v51, %v3826_v13  ;;  %v5065_v11 = vsel %vm1548_vm7, %v15184_v10, %v5064_v42  ;;  %v4978_v13 = vsel %vm1339_vm6, %v15228_v6, %v4977_v29  ;;  %v4016_v42 = vsel %vm4007_vm13, %v3999_v17, %v19633_v14 }
 0x4e5   :  { %19628 = vst [vmem:[#allocation67_spill] sm:$0xff] %v15218_v48  ;;  %4324 = vrot.lane.b32.xlu1 %v4287_v15, %s11897_s16  ;;  %v3612_v16 = vrot.slane %v15262_v43, 1 }
 0x4e6   :  { %4426 = vrot.lane.b32.xlu0 %v4392_v63, %s11898_s22  ;;  %v5073_v63 = vrot.slane %v15209_v53, 2 }
 0x4e7   :  { %v3923_v15 = vpop.permute.xlu1 %3922 }
 0x4e8   :  { %v4014_v2 = vsel %vm4007_vm13, %v3997_v35, %v3923_v15  ;;  %v15244_v12 = vpop.permute.xlu0 %5005  ;;  %v3699_v15 = vrot.slane %v15141_v38, 2 }
 0x4e9   :  { %19631 = vst [vmem:[#allocation40_spill] sm:$0xff] %v15244_v12  ;;  %11570 = vmatprep.mubr.msk.f32.mxu1 %vm4524_vm15, %v4014_v2  ;;  %5103 = vrot.lane.b32.xlu1 %v5065_v11, %s11895_s24  ;;  %v19634_v2 = vld [vmem:[#allocation38_spill] sm:$0xff] }
 0x4ea   :  { %5013 = vrot.lane.b32.xlu0 %v4978_v13, %s11896_s29  ;;  %11571 = vmatmul.mubr.msk.f32.gmra.mxu1 %vm4524_vm15, %v4015_v27  ;;  %v3983_v51 = vsel %vm1695_vm10, %v3967_v18, %v19634_v2  ;;  %v5074_v18 = vsel %vm1548_vm7, %v15172_v39, %v5073_v63  ;;  %v3700_v49 = vsel %vm1548_vm7, %v15184_v10, %v3699_v15  ;;  %v5256_v13 = vrot.slane %v15125_v28, 4 }
 0x4eb   :  { %v15266_v35 = vpop.permute.xlu1 %5696  ;;  %11573 = vmatprep.mubr.msk.f32.mxu1 %vm4524_vm15, %v4016_v42  ;;  %v4000_v41 = vsel %vm3990_vm14, %v3983_v51, %v14436_v32  ;;  %v3613_v27 = vsel %vm1339_vm6, %v15228_v6, %v3612_v16  ;;  %v5169_v63 = vrot.slane %v15209_v53, 3  ;;  %v3796_v10 = vrot.slane %v15141_v38, 3  ;;  %v15320_v16 = vld [vmem:[#allocation3 + $0x186] sm:$0xff] }
 0x4ec   :  { %19635 = vst [vmem:[#allocation46_spill] sm:$0xff] %v15266_v35  ;;  %v15271_v29 = vpop.permute.xlu0 %5101  ;;  %v4017_v11 = vsel %vm4007_vm13, %v4000_v41, %v19637_v30  ;;  %v5257_v2 = vsel %vm3861_vm9, %v15121_v61, %v5256_v13  ;;  %v3708_v51 = vrot.slane %v15262_v43, 2  ;;  %v3893_v30 = vrot.slane %v15141_v38, 4 }
 0x4ed   :  { %19636 = vst [vmem:[#allocation34_spill] sm:$0xff] %v15271_v29  ;;  %5199 = vrot.lane.b32.xlu1 %v5161_v58, %s11897_s16  ;;  %v5170_v28 = vsel %vm3764_vm8, %v15190_v56, %v5169_v63  ;;  %v3797_v15 = vsel %vm3764_vm8, %v15199_v24, %v3796_v10  ;;  %v4103_v24 = vrot.slane %v15158_v52, 1  ;;  %v5265_v52 = vrot.slane %v15209_v53, 4 }
 0x4ee   :  { %5109 = vrot.lane.b32.xlu0 %v5074_v18, %s11895_s24  ;;  %11574 = vmatmul.mubr.msk.f32.gmra.mxu1 %vm4524_vm15, %v4017_v11  ;;  %v3709_v11 = vsel %vm1548_vm7, %v15172_v39, %v3708_v51  ;;  %v3805_v18 = vrot.slane %v15262_v43, 3  ;;  %v3894_v38 = vsel %vm3861_vm9, %v15121_v61, %v3893_v30  ;;  %v15352_v30 = vrot.slane %v15320_v16, 1 }
 0x4ef   :  { %v15284_v32 = vpop.permute.xlu1 %5792  ;;  %v4104_v61 = vsel %vm1339_vm6, %v15228_v6, %v4103_v24  ;;  %v5266_v53 = vsel %vm3861_vm9, %v15205_v57, %v5265_v52  ;;  %v3902_v24 = vrot.slane %v15262_v43, 4  ;;  %v15416_v29 = vrot.slane %v15320_v16, 3 }
 0x4f0   :  { %19638 = vst [vmem:[#allocation35_spill] sm:$0xff] %v15284_v32  ;;  %v15286_v17 = vpop.permute.xlu0 %5197  ;;  %v3806_v63 = vsel %vm3764_vm8, %v15190_v56, %v3805_v18  ;;  %v15356_v18 = vld [vmem:[#allocation3 + $0x18e] sm:$0xf] }
 0x4f1   :  { %19639 = vst [vmem:[#allocation36_spill] sm:$0xff] %v15286_v17  ;;  %3736 = vrot.lane.b32.xlu1 %v3700_v49, %s11895_s24  ;;  %v15322_v49 = vld [vmem:[#allocation3 + $0x18e] sm:$0xf]  ;;  %v3903_v43 = vsel %vm3861_vm9, %v15205_v57, %v3902_v24  ;;  %v15398_v24 = vrot.slane %v15320_v16, 2 }
 0x4f2   :  { %3646 = vrot.lane.b32.xlu0 %v3613_v27, %s11896_s29  ;;  %v4388_v10 = vrot.slane %v15322_v49, 4  ;;  %v4100_v52 = vrot.slane %v15322_v49, 1 }
 0x4f3   :  { %v15296_v14 = vpop.permute.xlu1 %6393 }
 0x4f4   :  { %19640 = vst [vmem:[#allocation37_spill] sm:$0xff] %v15296_v14  ;;  %v15298_v42 = vpop.permute.xlu0 %6399  ;;  %v4101_v57 = vsel %vm1339_vm6, %v15352_v30, %v4100_v52 }
 0x4f5   :  { %19641 = vst [vmem:[#allocation48_spill] sm:$0xff] %v15298_v42  ;;  %5295 = vrot.lane.b32.xlu1 %v5257_v2, %s11898_s22  ;;  %v15335_v2 = vrot.slane %v15320_v16, 4 }
 0x4f6   :  { %5205 = vrot.lane.b32.xlu0 %v5170_v28, %s11897_s16  ;;  %v15339_v28 = vld [vmem:[#allocation3 + $0x18e] sm:$0xf] }
 0x4f7   :  { %v15308_v41 = vpop.permute.xlu1 %6489  ;;  %v4389_v56 = vsel %vm3861_vm9, %v15335_v2, %v4388_v10  ;;  %v5262_v5 = vrot.slane %v15339_v28, 4 }
 0x4f8   :  { %19642 = vst [vmem:[#allocation38_spill] sm:$0xff] %v15308_v41  ;;  %v15310_v58 = vpop.permute.xlu0 %5702 }
 0x4f9   :  { %19643 = vst [vmem:[#allocation49_spill] sm:$0xff] %v15310_v58  ;;  %3833 = vrot.lane.b32.xlu1 %v3797_v15, %s11897_s16  ;;  %v19660_v58 = vld [vmem:[#allocation22_spill] sm:$0xff] }
 0x4fa   :  { %3742 = vrot.lane.b32.xlu0 %v3709_v11, %s11895_s24  ;;  %v4974_v11 = vrot.slane %v15339_v28, 1 }
 0x4fb   :  { %v15324_v13 = vpop.permute.xlu1 %5984 }
 0x4fc   :  { %19644 = vst [vmem:[#allocation79_spill] sm:$0xff] %v15324_v13  ;;  %v15326_v27 = vpop.permute.xlu0 %6495  ;;  %v4975_v10 = vsel %vm1339_vm6, %v15352_v30, %v4974_v11 }
 0x4fd   :  { %19645 = vst [vmem:[#allocation80_spill] sm:$0xff] %v15326_v27  ;;  %3930 = vrot.lane.b32.xlu1 %v3894_v38, %s11898_s22 }
 0x4fe   :  { %3839 = vrot.lane.b32.xlu0 %v3806_v63, %s11897_s16 }
 0x4ff   :  { %v15341_v51 = vpop.permute.xlu1 %6585 }
 0x500   :  { %19646 = vst [vmem:[#allocation81_spill] sm:$0xff] %v15341_v51  ;;  %v15343_v15 = vpop.permute.xlu0 %6591 }
 0x501   :  { %19647 = vst [vmem:[#allocation82_spill] sm:$0xff] %v15343_v15  ;;  %4138 = vrot.lane.b32.xlu1 %v4104_v61, %s11896_s29  ;;  %v3609_v61 = vrot.slane %v15356_v18, 1  ;;  %v15372_v15 = vld [vmem:[#allocation3 + $0x1d6] sm:$0xf] }
 0x502   :  { %4424 = vrot.lane.b32.xlu0 %v4389_v56, %s11898_s22  ;;  %v15370_v56 = vld [vmem:[#allocation3 + $0x1ce] sm:$0xff] }
 0x503   :  { %v15358_v38 = vpop.permute.xlu1 %6681  ;;  %v3610_v11 = vsel %vm1339_vm6, %v15352_v30, %v3609_v61  ;;  %v4196_v61 = vrot.slane %v15322_v49, 2 }
 0x504   :  { %19648 = vst [vmem:[#allocation83_spill] sm:$0xff] %v15358_v38  ;;  %v15360_v63 = vpop.permute.xlu0 %4416  ;;  %v15389_v38 = vld [vmem:[#allocation3 + $0x1d6] sm:$0xf] }
 0x505   :  { %5301 = vrot.lane.b32.xlu1 %v5266_v53, %s11898_s22  ;;  %v15385_v53 = vrot.slane %v15370_v56, 2  ;;  %v4983_v14 = vrot.slane %v15389_v38, 1  ;;  %v4197_v17 = vsel %vm1548_vm7, %v15398_v24, %v4196_v61  ;;  %v5079_v12 = vrot.slane %v15389_v38, 2 }
 0x506   :  { %5011 = vrot.lane.b32.xlu0 %v4975_v10, %s11896_s29  ;;  %v4205_v10 = vrot.slane %v15372_v15, 2 }
 0x507   :  { %v15374_v27 = vpop.permute.xlu1 %5293 }
 0x508   :  { %19649 = vst [vmem:[#allocation84_spill] sm:$0xff] %v15374_v27  ;;  %v15376_v42 = vpop.permute.xlu0 %5003 }
 0x509   :  { %19650 = vst [vmem:[#allocation85_spill] sm:$0xff] %v15376_v42  ;;  %3936 = vrot.lane.b32.xlu1 %v3903_v43, %s11898_s22  ;;  %v4206_v43 = vsel %vm1548_vm7, %v15385_v53, %v4205_v10 }
 0x50a   :  { %3644 = vrot.lane.b32.xlu0 %v3610_v11, %s11896_s29  ;;  %v15405_v11 = vrot.slane %v15370_v56, 1 }
 0x50b   :  { %v15391_v51 = vpop.permute.xlu1 %5798 }
 0x50c   :  { %19651 = vst [vmem:[#allocation86_spill] sm:$0xff] %v15391_v51  ;;  %v15393_v41 = vpop.permute.xlu0 %5700  ;;  %v4984_v10 = vsel %vm1339_vm6, %v15405_v11, %v4983_v14  ;;  %v5070_v51 = vrot.slane %v15339_v28, 2 }
 0x50d   :  { %19652 = vst [vmem:[#allocation87_spill] sm:$0xff] %v15393_v41  ;;  %4136 = vrot.lane.b32.xlu1 %v4101_v57, %s11896_s29  ;;  %v4292_v57 = vrot.slane %v15322_v49, 3 }
 0x50e   :  { %4238 = vrot.lane.b32.xlu0 %v4206_v43, %s11895_s24  ;;  %v3408_v43 = vld [vmem:[#allocation3 + $0x1d6] sm:$0xf] }
 0x50f   :  { %v15409_v27 = vpop.permute.xlu1 %5894  ;;  %v4293_v61 = vsel %vm3764_vm8, %v15416_v29, %v4292_v57  ;;  %v3618_v14 = vrot.slane %v3408_v43, 1 }
 0x510   :  { %19653 = vst [vmem:[#allocation88_spill] sm:$0xff] %v15409_v27  ;;  %v15411_v52 = vpop.permute.xlu0 %5796 }
 0x511   :  { %19654 = vst [vmem:[#allocation89_spill] sm:$0xff] %v15411_v52  ;;  %4232 = vrot.lane.b32.xlu1 %v4197_v17, %s11895_s24  ;;  %v5080_v17 = vsel %vm1548_vm7, %v15385_v53, %v5079_v12  ;;  %v3619_v57 = vsel %vm1339_vm6, %v15405_v11, %v3618_v14  ;;  %v5175_v12 = vrot.slane %v15389_v38, 3  ;;  %v3714_v52 = vrot.slane %v3408_v43, 2 }
 0x512   :  { %5017 = vrot.lane.b32.xlu0 %v4984_v10, %s11896_s29 }
 0x513   :  { %v15424_v42 = vpop.permute.xlu1 %6687 }
 0x514   :  { %19655 = vst [vmem:[#allocation90_spill] sm:$0xff] %v15424_v42  ;;  %v15426_v27 = vpop.permute.xlu0 %6397  ;;  %v5071_v42 = vsel %vm1548_vm7, %v15398_v24, %v5070_v51 }
 0x515   :  { %19656 = vst [vmem:[#allocation91_spill] sm:$0xff] %v15426_v27  ;;  %4328 = vrot.lane.b32.xlu1 %v4293_v61, %s11897_s16  ;;  %v5166_v27 = vrot.slane %v15339_v28, 3  ;;  %v15446_v61 = vrot.slane %v15370_v56, 3 }
 0x516   :  { %5113 = vrot.lane.b32.xlu0 %v5080_v17, %s11895_s24 }
 0x517   :  { %v15435_v49 = vpop.permute.xlu1 %5990  ;;  %v5167_v51 = vsel %vm3764_vm8, %v15416_v29, %v5166_v27  ;;  %v5176_v14 = vsel %vm3764_vm8, %v15446_v61, %v5175_v12 }
 0x518   :  { %19657 = vst [vmem:[#allocation92_spill] sm:$0xff] %v15435_v49  ;;  %v15437_v10 = vpop.permute.xlu0 %5892 }
 0x519   :  { %19658 = vst [vmem:[#allocation93_spill] sm:$0xff] %v15437_v10  ;;  %5107 = vrot.lane.b32.xlu1 %v5071_v42, %s11895_s24  ;;  %v3705_v10 = vrot.slane %v15356_v18, 2  ;;  %v4458_v42 = vsel %vm1661_vm4, %v15238_v22, %v19659_v45  ;;  %v3715_v45 = vsel %vm1548_vm7, %v15385_v53, %v3714_v52  ;;  %v3811_v22 = vrot.slane %v3408_v43, 3 }
 0x51a   :  { %3650 = vrot.lane.b32.xlu0 %v3619_v57, %s11896_s29  ;;  %v4474_v25 = vsel %vm1695_vm10, %v4458_v42, %v19660_v58  ;;  %v3802_v52 = vrot.slane %v15356_v18, 3 }
 0x51b   :  { %v4129_v17 = vpop.permute.xlu1 %4128  ;;  %v3706_v27 = vsel %vm1548_vm7, %v15398_v24, %v3705_v10 }
 0x51c   :  { %v15450_v49 = vpop.permute.xlu0 %4230  ;;  %v4457_v12 = vsel %vm1661_vm4, %v14872_v62, %v4129_v17  ;;  %v3812_v62 = vsel %vm3764_vm8, %v15446_v61, %v3811_v22  ;;  %v3907_v17 = vrot.slane %v15370_v56, 4  ;;  %v3899_v56 = vrot.slane %v15356_v18, 4 }
 0x51d   :  { %5203 = vrot.lane.b32.xlu1 %v5167_v51, %s11897_s16  ;;  %v19661_v51 = vld [vmem:[#allocation24_spill] sm:$0xff] }
 0x51e   :  { %5209 = vrot.lane.b32.xlu0 %v5176_v14, %s11897_s16  ;;  %v4490_v58 = vsel %vm3990_vm14, %v4474_v25, %v19661_v51  ;;  %v15496_v51 = vld [vmem:[#allocation3 + $0x1be] sm:$0xf]  ;;  %v3900_v18 = vsel %vm3861_vm9, %v15335_v2, %v3899_v56 }
 0x51f   :  { %v4225_v57 = vpop.permute.xlu1 %4224 }
 0x520   :  { %v15464_v41 = vpop.permute.xlu0 %4326  ;;  %v4473_v42 = vsel %vm1695_vm10, %v4457_v12, %v4225_v57  ;;  %v3908_v57 = vrot.slane %v3408_v43, 4 }
 0x521   :  { %3740 = vrot.lane.b32.xlu1 %v3706_v27, %s11895_s24  ;;  %v5263_v27 = vsel %vm3861_vm9, %v15335_v2, %v5262_v5  ;;  %v15494_v5 = vld [vmem:[#allocation3 + $0x1b6] sm:$0xff] }
 0x522   :  { %3746 = vrot.lane.b32.xlu0 %v3715_v45, %s11895_s24  ;;  %v19662_v45 = vld [vmem:[#allocation26_spill] sm:$0xff]  ;;  %v3909_v43 = vsel %vm3861_vm9, %v3907_v17, %v3908_v57  ;;  %v15526_v57 = vrot.slane %v15494_v5, 1  ;;  %v15615_v4 = vrot.slane %v15494_v5, 3 }
 0x523   :  { %v4321_v14 = vpop.permute.xlu1 %4320  ;;  %v4506_v12 = vsel %vm4007_vm13, %v4490_v58, %v19662_v45  ;;  %v15509_v58 = vrot.slane %v15494_v5, 4 }
 0x524   :  { %v4489_v10 = vsel %vm3990_vm14, %v4473_v42, %v4321_v14  ;;  %v15479_v28 = vpop.permute.xlu0 %4422  ;;  %v4394_v14 = vrot.slane %v15496_v51, 4 }
 0x525   :  { %5299 = vrot.lane.b32.xlu1 %v5263_v27, %s11898_s22  ;;  %v4505_v25 = vsel %vm4007_vm13, %v4489_v10, %v15360_v63  ;;  %v3803_v63 = vsel %vm3764_vm8, %v15416_v29, %v3802_v52  ;;  %v15513_v10 = vld [vmem:[#allocation3 + $0x1be] sm:$0xf]  ;;  %v4109_v52 = vrot.slane %v15372_v15, 1 }
 0x526   :  { %3843 = vrot.lane.b32.xlu0 %v3812_v62, %s11897_s16  ;;  %11527 = vmatmul.mubr.msk.f32.gmra.mxu0 %vm4524_vm15, %v4505_v25  ;;  %v4395_v25 = vsel %vm3861_vm9, %v15509_v58, %v4394_v14  ;;  %v4980_v45 = vrot.slane %v15513_v10, 1  ;;  %v5172_v32 = vrot.slane %v15513_v10, 3  ;;  %v5268_v55 = vrot.slane %v15513_v10, 4 }
 0x527   :  { %11529 = vmatprep.mubr.msk.f32.mxu0 %vm4524_vm15, %v4506_v12  ;;  %v15499_v22 = vpop.permute.xlu1 %5099  ;;  %v15530_v12 = vld [vmem:[#allocation3 + $0x1be] sm:$0xf]  ;;  %v4110_v56 = vsel %vm1339_vm6, %v15405_v11, %v4109_v52 }
 0x528   :  { %19663 = vst [vmem:[#allocation23_spill] sm:$0xff] %v15499_v22  ;;  %v15501_v42 = vpop.permute.xlu0 %5009  ;;  %v4981_v14 = vsel %vm1339_vm6, %v15526_v57, %v4980_v45 }
 0x529   :  { %19664 = vst [vmem:[#allocation22_spill] sm:$0xff] %v15501_v42  ;;  %3837 = vrot.lane.b32.xlu1 %v3803_v63, %s11897_s16  ;;  %v15546_v42 = vld [vmem:[#allocation3 + $0x206] sm:$0xf] }
 0x52a   :  { %3940 = vrot.lane.b32.xlu0 %v3909_v43, %s11898_s22  ;;  %v4989_v22 = vrot.slane %v15546_v42, 1  ;;  %v5181_v13 = vrot.slane %v15546_v42, 3  ;;  %v5277_v31 = vrot.slane %v15546_v42, 4 }
 0x52b   :  { %v15515_v27 = vpop.permute.xlu1 %5195 }
 0x52c   :  { %19665 = vst [vmem:[#allocation24_spill] sm:$0xff] %v15515_v27  ;;  %v15517_v62 = vpop.permute.xlu0 %5105 }
 0x52d   :  { %19666 = vst [vmem:[#allocation26_spill] sm:$0xff] %v15517_v62  ;;  %3934 = vrot.lane.b32.xlu1 %v3900_v18, %s11898_s22  ;;  %v4301_v18 = vrot.slane %v15372_v15, 3  ;;  %v3615_v62 = vrot.slane %v15530_v12, 1 }
 0x52e   :  { %4428 = vrot.lane.b32.xlu0 %v4395_v25, %s11898_s22  ;;  %v15544_v25 = vld [vmem:[#allocation3 + $0x1fe] sm:$0xff] }
 0x52f   :  { %v15532_v63 = vpop.permute.xlu1 %5291  ;;  %v4302_v52 = vsel %vm3764_vm8, %v15446_v61, %v4301_v18  ;;  %v3616_v45 = vsel %vm1339_vm6, %v15526_v57, %v3615_v62 }
 0x530   :  { %19667 = vst [vmem:[#allocation94_spill] sm:$0xff] %v15532_v63  ;;  %v15534_v43 = vpop.permute.xlu0 %3642 }
 0x531   :  { %4142 = vrot.lane.b32.xlu1 %v4110_v56, %s11896_s29  ;;  %v4397_v56 = vrot.slane %v15372_v15, 4  ;;  %v5271_v15 = vrot.slane %v15389_v38, 4  ;;  %v4106_v38 = vrot.slane %v15496_v51, 1 }
 0x532   :  { %5015 = vrot.lane.b32.xlu0 %v4981_v14, %s11896_s29  ;;  %v15559_v14 = vrot.slane %v15544_v25, 1 }
 0x533   :  { %v15548_v63 = vpop.permute.xlu1 %6493  ;;  %v4398_v18 = vsel %vm3861_vm9, %v3907_v17, %v4397_v56  ;;  %v5272_v56 = vsel %vm3861_vm9, %v3907_v17, %v5271_v15  ;;  %v4107_v15 = vsel %vm1339_vm6, %v15526_v57, %v4106_v38 }
 0x534   :  { %19668 = vst [vmem:[#allocation95_spill] sm:$0xff] %v15548_v63  ;;  %v15550_v27 = vpop.permute.xlu0 %5201  ;;  %v4990_v62 = vsel %vm1339_vm6, %v15559_v14, %v4989_v22 }
 0x535   :  { %19669 = vst [vmem:[#allocation96_spill] sm:$0xff] %v15550_v27  ;;  %4334 = vrot.lane.b32.xlu1 %v4302_v52, %s11897_s16  ;;  %v15573_v52 = vrot.slane %v15544_v25, 3 }
 0x536   :  { %3648 = vrot.lane.b32.xlu0 %v3616_v45, %s11896_s29 }
 0x537   :  { %v15563_v63 = vpop.permute.xlu1 %5988  ;;  %v5182_v22 = vsel %vm3764_vm8, %v15573_v52, %v5181_v13  ;;  %v4202_v13 = vrot.slane %v15496_v51, 2 }
 0x538   :  { %19670 = vst [vmem:[#allocation97_spill] sm:$0xff] %v15563_v63  ;;  %v15565_v27 = vpop.permute.xlu0 %3738 }
 0x539   :  { %4430 = vrot.lane.b32.xlu1 %v4398_v18, %s11898_s22  ;;  %v15587_v18 = vrot.slane %v15544_v25, 4 }
 0x53a   :  { %5021 = vrot.lane.b32.xlu0 %v4990_v62, %s11896_s29  ;;  %v3440_v62 = vld [vmem:[#allocation3 + $0x1e6] sm:$0xff] }
 0x53b   :  { %v15577_v45 = vpop.permute.xlu1 %6589  ;;  %19672 = vst [vmem:[#allocation99_spill] sm:$0xff] %v15587_v18  ;;  %v15606_v0 = vrot.slane %v3440_v62, 2  ;;  %v15621_v20 = vrot.slane %v3440_v62, 3  ;;  %v15641_v1 = vrot.slane %v3440_v62, 4 }
 0x53c   :  { %19671 = vst [vmem:[#allocation98_spill] sm:$0xff] %v15577_v45  ;;  %v15579_v63 = vpop.permute.xlu0 %3835  ;;  %v15591_v45 = vld [vmem:[#allocation3 + $0x1ee] sm:$0xf] }
 0x53d   :  { %5305 = vrot.lane.b32.xlu1 %v5272_v56, %s11898_s22  ;;  %v15600_v56 = vrot.slane %v15494_v5, 2  ;;  %v4208_v8 = vrot.slane %v15591_v45, 2 }
 0x53e   :  { %5213 = vrot.lane.b32.xlu0 %v5182_v22, %s11897_s16  ;;  %v5278_v22 = vsel %vm3861_vm9, %v15587_v18, %v5277_v31 }
 0x53f   :  { %v15593_v48 = vpop.permute.xlu1 %6685  ;;  %v4203_v38 = vsel %vm1548_vm7, %v15600_v56, %v4202_v13  ;;  %v4209_v31 = vsel %vm1548_vm7, %v15606_v0, %v4208_v8  ;;  %v6099_v13 = vld [vmem:[%s19369_s5 + $0x138] sm:$0xff]  ;;  %v5076_v8 = vrot.slane %v15513_v10, 2  ;;  %v15719_v10 = vld [vmem:[#allocation3 + $0x18e] sm:$0xf] }
 0x540   :  { %19673 = vst [vmem:[#allocation100_spill] sm:$0xff] %v15593_v48  ;;  %v15595_v17 = vpop.permute.xlu0 %5706  ;;  %11629 = vmatprep.subr.mxu1 %v6099_v13 }
 0x541   :  { %19674 = vst [vmem:[#allocation101_spill] sm:$0xff] %v15595_v17  ;;  %4140 = vrot.lane.b32.xlu1 %v4107_v15, %s11896_s29  ;;  %v4298_v15 = vrot.slane %v15496_v51, 3  ;;  %11630 = vmatpush3.msra.mxu1 %v6099_v13  ;;  %v6097_v13 = vld [vmem:[%s19369_s5 + $0x128] sm:$0xff] }
 0x542   :  { %5309 = vrot.lane.b32.xlu0 %v5278_v22, %s11898_s22  ;;  %v4304_v22 = vrot.slane %v15591_v45, 3 }
 0x543   :  { %v4135_v48 = vpop.permute.xlu1 %4134  ;;  %v4299_v51 = vsel %vm3764_vm8, %v15615_v4, %v4298_v15  ;;  %v15645_v15 = vld [vmem:[#allocation3 + $0x1ee] sm:$0xf] }
 0x544   :  { %v15610_v17 = vpop.permute.xlu0 %4420  ;;  %v4986_v9 = vrot.slane %v15645_v15, 1  ;;  %v4460_v18 = vsel %vm1661_vm4, %v14972_v23, %v4135_v48  ;;  %v5399_v23 = vld [vmem:[%s19369_s5 + $0xe0] sm:$0xff] }
 0x545   :  { %4236 = vrot.lane.b32.xlu1 %v4203_v38, %s11895_s24  ;;  %v6098_v38 = vld [vmem:[%s19369_s5 + $0x130] sm:$0xff]  ;;  %v4476_v46 = vsel %vm1695_vm10, %v4460_v18, %v15450_v49  ;;  %v6092_v49 = vld [vmem:[%s19369_s5 + $0x100] sm:$0xff] }
 0x546   :  { %4240 = vrot.lane.b32.xlu0 %v4209_v31, %s11895_s24  ;;  %v4305_v31 = vsel %vm3764_vm8, %v15621_v20, %v4304_v22  ;;  %11631 = vmatprep.subr.mxu1 %v6098_v38  ;;  %v5077_v22 = vsel %vm1548_vm7, %v15600_v56, %v5076_v8  ;;  %v6095_v8 = vld [vmem:[%s19369_s5 + $0x118] sm:$0xff] }
 0x547   :  { %v15628_v34 = vpop.permute.xlu1 %5297  ;;  %11632 = vmatpush3.msra.mxu1 %v6098_v38 }
 0x548   :  { %19675 = vst [vmem:[#allocation102_spill] sm:$0xff] %v15628_v34  ;;  %v15630_v44 = vpop.permute.xlu0 %5007  ;;  %v4400_v34 = vrot.slane %v15591_v45, 4  ;;  %11633 = vmatprep.subr.mxu1 %v6097_v13 }
 0x549   :  { %19676 = vst [vmem:[#allocation103_spill] sm:$0xff] %v15630_v44  ;;  %4332 = vrot.lane.b32.xlu1 %v4299_v51, %s11897_s16  ;;  %11634 = vmatpush3.msra.mxu1 %v6097_v13 }
 0x54a   :  { %4336 = vrot.lane.b32.xlu0 %v4305_v31, %s11897_s16  ;;  %v4401_v38 = vsel %vm3861_vm9, %v15641_v1, %v4400_v34  ;;  %v15660_v31 = vrot.slane %v3440_v62, 1  ;;  %11635 = vmatprep.subr.mxu1 %v6096_v19  ;;  %v5173_v34 = vsel %vm3764_vm8, %v15615_v4, %v5172_v32  ;;  %v3711_v62 = vrot.slane %v15530_v12, 2  ;;  %v6094_v32 = vld [vmem:[%s19369_s5 + $0x110] sm:$0xff] }
 0x54b   :  { %v15650_v44 = vpop.permute.xlu1 %3932  ;;  %11636 = vmatpush3.msra.mxu1 %v6096_v19  ;;  %v5400_v19 = vld [vmem:[%s19369_s5 + $0xe8] sm:$0xff] }
 0x54c   :  { %v15652_v51 = vpop.permute.xlu0 %3640  ;;  %11637 = vmatprep.subr.mxu1 %v6095_v8  ;;  %v4987_v35 = vsel %vm1339_vm6, %v15660_v31, %v4986_v9  ;;  %11585 = vmatprep.subr.mxu0 %v5400_v19  ;;  %v6093_v9 = vld [vmem:[%s19369_s5 + $0x108] sm:$0xff]  ;;  %v3712_v3 = vsel %vm1548_vm7, %v15600_v56, %v3711_v62 }
 0x54d   :  { %5111 = vrot.lane.b32.xlu1 %v5077_v22, %s11895_s24  ;;  %11638 = vmatpush3.msra.mxu1 %v6095_v8  ;;  %v15694_v8 = vld [vmem:[#allocation3 + $0x10e] sm:$0xff] }
 0x54e   :  { %4432 = vrot.lane.b32.xlu0 %v4401_v38, %s11898_s22  ;;  %v5178_v38 = vrot.slane %v15645_v15, 3  ;;  %11639 = vmatprep.subr.mxu1 %v6094_v32 }
 0x54f   :  { %v4133_v13 = vpop.permute.xlu1 %4132  ;;  %11586 = vmatpush3.msra.mxu0 %v5400_v19  ;;  %11640 = vmatpush3.msra.mxu1 %v6094_v32  ;;  %v5398_v19 = vld [vmem:[%s19369_s5 + $0xd8] sm:$0xff]  ;;  %v4492_v32 = vsel %vm3990_vm14, %v4476_v46, %v15464_v41  ;;  %v5670_v41 = vrot.slane %v15719_v10, 1 }
 0x550   :  { %v15670_v22 = vpop.permute.xlu0 %4234  ;;  %11587 = vmatprep.subr.mxu0 %v5399_v23  ;;  %v5179_v21 = vsel %vm3764_vm8, %v15621_v20, %v5178_v38  ;;  %11641 = vmatprep.subr.mxu1 %v6093_v9  ;;  %v4459_v18 = vsel %vm1661_vm4, %v15108_v54, %v4133_v13  ;;  %v3808_v13 = vrot.slane %v15530_v12, 3 }
 0x551   :  { %5207 = vrot.lane.b32.xlu1 %v5173_v34, %s11897_s16  ;;  %v6458_v34 = vrot.slane %v15694_v8, 2  ;;  %11588 = vmatpush3.msra.mxu0 %v5399_v23  ;;  %v4508_v23 = vsel %vm4007_vm13, %v4492_v32, %v15479_v28  ;;  %v3905_v28 = vrot.slane %v15530_v12, 4 }
 0x552   :  { %5019 = vrot.lane.b32.xlu0 %v4987_v35, %s11896_s29  ;;  %11642 = vmatpush3.msra.mxu1 %v6093_v9 }
 0x553   :  { %v4229_v48 = vpop.permute.xlu1 %4228  ;;  %v6460_v38 = vsel %vm1548_vm7, %v6458_v34, %v6459_v7  ;;  %11589 = vmatprep.subr.mxu0 %v5398_v19  ;;  %11643 = vmatprep.subr.mxu1 %v6092_v49  ;;  %v5397_v7 = vld [vmem:[%s19369_s5 + $0xd0] sm:$0xff] }
 0x554   :  { %v15702_v35 = vpop.permute.xlu0 %4330  ;;  %11590 = vmatpush3.msra.mxu0 %v5398_v19  ;;  %11644 = vmatpush3.msra.mxu1 %v6092_v49  ;;  %v3809_v19 = vsel %vm3764_vm8, %v15615_v4, %v3808_v13  ;;  %v6090_v49 = vld [vmem:[%s19369_s5 + $0xf0] sm:$0xff]  ;;  %v15779_v13 = vrot.slane %v15544_v25, 2 }
 0x555   :  { %3744 = vrot.lane.b32.xlu1 %v3712_v3, %s11895_s24  ;;  %v4475_v3 = vsel %vm1695_vm10, %v4459_v18, %v4229_v48  ;;  %11591 = vmatprep.subr.mxu0 %v5397_v7  ;;  %v5396_v48 = vld [vmem:[%s19369_s5 + $0xc8] sm:$0xff]  ;;  %v5671_v18 = vsel %vm1339_vm6, %v15352_v30, %v5670_v41  ;;  %v5393_v41 = vld [vmem:[%s19369_s5 + $0xb0] sm:$0xff] }
 0x556   :  { %5211 = vrot.lane.b32.xlu0 %v5179_v21, %s11897_s16  ;;  %v5269_v21 = vsel %vm3861_vm9, %v15509_v58, %v5268_v55  ;;  %v6091_v55 = vld [vmem:[%s19369_s5 + $0xf8] sm:$0xff]  ;;  %11592 = vmatpush3.msra.mxu0 %v5397_v7  ;;  %v5085_v7 = vrot.slane %v15546_v42, 2  ;;  %v5392_v42 = vld [vmem:[%s19369_s5 + $0xa8] sm:$0xff] }
 0x557   :  { %v4325_v62 = vpop.permute.xlu1 %4324  ;;  %11645 = vmatprep.subr.mxu1 %v6091_v55  ;;  %11593 = vmatprep.subr.mxu0 %v5396_v48 }
 0x558   :  { %v4491_v59 = vsel %vm3990_vm14, %v4475_v3, %v4325_v62  ;;  %v15726_v26 = vpop.permute.xlu0 %4426  ;;  %11646 = vmatpush3.msra.mxu1 %v6091_v55  ;;  %v5395_v3 = vld [vmem:[%s19369_s5 + $0xc0] sm:$0xff]  ;;  %11594 = vmatpush3.msra.mxu0 %v5396_v48  ;;  %v15788_v55 = vld [vmem:[#allocation3 + $0x18e] sm:$0xf]  ;;  %v4112_v48 = vrot.slane %v15591_v45, 1 }
 0x559   :  { %5303 = vrot.lane.b32.xlu1 %v5269_v21, %s11898_s22  ;;  %v4507_v46 = vsel %vm4007_vm13, %v4491_v59, %v15610_v17  ;;  %v6554_v59 = vrot.slane %v15694_v8, 3  ;;  %v6555_v17 = vrot.slane %v15697_v40, 3  ;;  %11647 = vmatprep.subr.mxu1 %v6090_v49  ;;  %v3906_v21 = vsel %vm3861_vm9, %v15509_v58, %v3905_v28 }
 0x55a   :  { %6499 = vrot.lane.b32.xlu0 %v6460_v38, %s11895_s24  ;;  %11530 = vmatmul.mubr.msk.f32.gmra.mxu0 %vm4524_vm15, %v4507_v46  ;;  %v5394_v38 = vld [vmem:[%s19369_s5 + $0xb8] sm:$0xff]  ;;  %v5766_v46 = vrot.slane %v15719_v10, 2  ;;  %v6366_v28 = vrot.slane %v15788_v55, 1 }
 0x55b   :  { %11532 = vmatprep.mubr.msk.f32.mxu0 %vm4524_vm15, %v4508_v23  ;;  %v15746_v9 = vpop.permute.xlu1 %5103  ;;  %v6556_v62 = vsel %vm3764_vm8, %v6554_v59, %v6555_v17  ;;  %11648 = vmatpush3.msra.mxu1 %v6090_v49  ;;  %v19679_v23 = vmov 0.0   ;;  %v5086_v17 = vsel %vm1548_vm7, %v15779_v13, %v5085_v7  ;;  %v5391_v49 = vld [vmem:[%s19369_s5 + $0xa0] sm:$0xff] }
 0x55c   :  { %v15753_v34 = vpop.permute.xlu0 %5013  ;;  %11595 = vmatprep.subr.mxu0 %v5395_v3  ;;  %7575 = vmatprep.subr.mxu1 %v19679_v23  ;;  %v15819_v7 = vld [vmem:[#allocation3 + $0x1a6] sm:$0xf] }
 0x55d   :  { %19677 = vst [vmem:[#allocation104_spill] sm:$0xff] %v15753_v34  ;;  %3841 = vrot.lane.b32.xlu1 %v3809_v19, %s11897_s16  ;;  %11596 = vmatpush3.msra.mxu0 %v5395_v3  ;;  %v5767_v19 = vsel %vm1548_vm7, %v15398_v24, %v5766_v46  ;;  %v4113_v3 = vsel %vm1339_vm6, %v15660_v31, %v4112_v48 }
 0x55e   :  { %5708 = vrot.lane.b32.xlu0 %v5671_v18, %s11896_s29  ;;  %11597 = vmatprep.subr.mxu0 %v5394_v38 }
 0x55f   :  { %v15768_v12 = vpop.permute.xlu1 %5199  ;;  %11598 = vmatpush3.msra.mxu0 %v5394_v38  ;;  %v6367_v38 = vsel %vm1339_vm6, %v15352_v30, %v6366_v28  ;;  %v3968_v30 = vsel %vm1661_vm4, %v15108_v54, %v15652_v51  ;;  %v15833_v28 = vld [vmem:[#allocation3 + $0x16e] sm:$0xff]  ;;  %v15842_v54 = vld [vmem:[#allocation3 + $0xf6] sm:$0xff] }
 0x560   :  { %v15774_v32 = vpop.permute.xlu0 %5109  ;;  %11599 = vmatprep.subr.mxu0 %v5393_v41  ;;  %v6551_v51 = vrot.slane %v15842_v54, 3 }
 0x561   :  { %19678 = vst [vmem:[#allocation105_spill] sm:$0xff] %v15774_v32  ;;  %3938 = vrot.lane.b32.xlu1 %v3906_v21, %s11898_s22  ;;  %11600 = vmatpush3.msra.mxu0 %v5393_v41  ;;  %v5862_v21 = vrot.slane %v15719_v10, 3 }
 0x562   :  { %6595 = vrot.lane.b32.xlu0 %v6556_v62, %s11897_s16  ;;  %11601 = vmatprep.subr.mxu0 %v5392_v42  ;;  %v5082_v62 = vrot.slane %v15645_v15, 2 }
 0x563   :  { %v3737_v25 = vpop.permute.xlu1 %3736  ;;  %11602 = vmatpush3.msra.mxu0 %v5392_v42  ;;  %v5863_v48 = vsel %vm3764_vm8, %v15416_v29, %v5862_v21 }
 0x564   :  { %v15794_v59 = vpop.permute.xlu0 %3646  ;;  %11603 = vmatprep.subr.mxu0 %v5391_v49  ;;  %v5083_v42 = vsel %vm1548_vm7, %v15606_v0, %v5082_v62  ;;  %v11816_v62 = vld [vmem:[#allocation3 + $0xfe] sm:$0xf] }
 0x565   :  { %5117 = vrot.lane.b32.xlu1 %v5086_v17, %s11895_s24  ;;  %11604 = vmatpush3.msra.mxu0 %v5391_v49  ;;  %v5274_v17 = vrot.slane %v15645_v15, 4  ;;  %v3969_v49 = vsel %vm1661_vm4, %v15833_v28, %v15534_v43  ;;  %v15840_v15 = vld [vmem:[#allocation3 + $0x1a6] sm:$0xf] }
 0x566   :  { %5804 = vrot.lane.b32.xlu0 %v5767_v19, %s11895_s24  ;;  %v6369_v19 = vrot.slane %v15819_v7, 1  ;;  %v3985_v21 = vsel %vm1695_vm10, %v3969_v49, %v15565_v27  ;;  %v11817_v49 = vld [vmem:[#allocation3 + $0x176] sm:$0xf] }
 0x567   :  { %v15807_v18 = vpop.permute.xlu1 %5295  ;;  %v4002_v43 = vsel %vm3990_vm14, %v3985_v21, %v15579_v63  ;;  %v15865_v63 = vld [vmem:[%s19369_s5 + $0x188] sm:$0xff] }
 0x568   :  { %19680 = vst [vmem:[#allocation106_spill] sm:$0xff] %v15807_v18  ;;  %v15809_v45 = vpop.permute.xlu0 %5205  ;;  %v6370_v27 = vsel %vm1339_vm6, %v15228_v6, %v6369_v19  ;;  %11673 = vmatprep.subr.mxu0 %v15865_v63  ;;  %v5762_v19 = vrot.slane %v15833_v28, 2  ;;  %v5955_v18 = vrot.slane %v11817_v49, 4 }
 0x569   :  { %19681 = vst [vmem:[#allocation107_spill] sm:$0xff] %v15809_v45  ;;  %4144 = vrot.lane.b32.xlu1 %v4113_v3, %s11896_s29  ;;  %v3984_v3 = vsel %vm1695_vm10, %v3968_v30, %v3737_v25  ;;  %v4019_v45 = vsel %vm4007_vm13, %v4002_v43, %v15650_v44 }
 0x56a   :  { %6405 = vrot.lane.b32.xlu0 %v6367_v38, %s11896_s29  ;;  %v6552_v38 = vrot.slane %v11816_v62, 3 }
 0x56b   :  { %v3834_v46 = vpop.permute.xlu1 %3833 }
 0x56c   :  { %v15821_v41 = vpop.permute.xlu0 %3742  ;;  %v6553_v44 = vsel %vm3764_vm8, %v6551_v51, %v6552_v38  ;;  %v6647_v51 = vrot.slane %v15842_v54, 4  ;;  %v6648_v38 = vrot.slane %v11816_v62, 4 }
 0x56d   :  { %5115 = vrot.lane.b32.xlu1 %v5083_v42, %s11895_s24  ;;  %v4001_v42 = vsel %vm3990_vm14, %v3984_v3, %v3834_v46  ;;  %v5673_v46 = vrot.slane %v15840_v15, 1  ;;  %v5763_v3 = vrot.slane %v11817_v49, 2 }
 0x56e   :  { %5900 = vrot.lane.b32.xlu0 %v5863_v48, %s11897_s16  ;;  %v5275_v48 = vsel %vm3861_vm9, %v15641_v1, %v5274_v17 }
 0x56f   :  { %v3931_v23 = vpop.permute.xlu1 %3930  ;;  %v5674_v21 = vsel %vm1339_vm6, %v15228_v6, %v5673_v46  ;;  %v6649_v46 = vsel %vm3861_vm9, %v6647_v51, %v6648_v38  ;;  %v6650_v51 = vrot.slane %v15694_v8, 4  ;;  %v6651_v38 = vrot.slane %v15697_v40, 4  ;;  %v15918_v8 = vld [vmem:[#allocation3 + $0x1be] sm:$0xf] }
 0x570   :  { %v4018_v25 = vsel %vm4007_vm13, %v4001_v42, %v3931_v23  ;;  %v15851_v30 = vpop.permute.xlu0 %3839  ;;  %v6465_v42 = vrot.slane %v15819_v7, 2 }
 0x571   :  { %11576 = vmatprep.mubr.msk.f32.mxu1 %vm4524_vm15, %v4018_v25  ;;  %5307 = vrot.lane.b32.xlu1 %v5275_v48, %s11898_s22  ;;  %v5764_v48 = vsel %vm1548_vm7, %v5762_v19, %v5763_v3  ;;  %v15899_v3 = vld [vmem:[#allocation3 + $0x19e] sm:$0xff]  ;;  %v6652_v40 = vsel %vm3861_vm9, %v6650_v51, %v6651_v38 }
 0x572   :  { %6407 = vrot.lane.b32.xlu0 %v6370_v27, %s11896_s29  ;;  %11577 = vmatmul.mubr.msk.f32.gmra.mxu1 %vm4524_vm15, %v4019_v45  ;;  %v15877_v45 = vld [vmem:[#allocation3 + $0x1be] sm:$0xf]  ;;  %v6466_v6 = vsel %vm1548_vm7, %v15172_v39, %v6465_v42  ;;  %v19403_v42 = vrot.slane %v15899_v3, 3 }
 0x573   :  { %v4139_v23 = vpop.permute.xlu1 %4138  ;;  %v5676_v27 = vrot.slane %v15877_v45, 1 }
 0x574   :  { %v4425_v17 = vpop.permute.xlu0 %4424 }
 0x575   :  { %6593 = vrot.lane.b32.xlu1 %v6553_v44, %s11897_s16  ;;  %v5677_v19 = vsel %vm1339_vm6, %v15526_v57, %v5676_v27  ;;  %v4462_v27 = vsel %vm1661_vm4, %v15899_v3, %v4139_v23  ;;  %v5954_v23 = vrot.slane %v15833_v28, 4 }
 0x576   :  { %5710 = vrot.lane.b32.xlu0 %v5674_v21, %s11896_s29  ;;  %v5858_v21 = vrot.slane %v15833_v28, 3 }
 0x577   :  { %v15880_v43 = vpop.permute.xlu1 %5301 }
 0x578   :  { %19682 = vst [vmem:[#allocation108_spill] sm:$0xff] %v15880_v43  ;;  %v15882_v25 = vpop.permute.xlu0 %5011  ;;  %v5859_v43 = vrot.slane %v11817_v49, 3 }
 0x579   :  { %19683 = vst [vmem:[#allocation109_spill] sm:$0xff] %v15882_v25  ;;  %5802 = vrot.lane.b32.xlu1 %v5764_v48, %s11895_s24  ;;  %v6561_v48 = vrot.slane %v15819_v7, 3 }
 0x57a   :  { %6503 = vrot.lane.b32.xlu0 %v6466_v6, %s11895_s24  ;;  %v5860_v34 = vsel %vm3764_vm8, %v5858_v21, %v5859_v43  ;;  %v4478_v43 = vsel %vm1695_vm10, %v4462_v27, %v15670_v22 }
 0x57b   :  { %v15891_v44 = vpop.permute.xlu1 %3936  ;;  %v4494_v27 = vsel %vm3990_vm14, %v4478_v43, %v15702_v35  ;;  %v15949_v43 = vld [vmem:[#allocation3 + $0x1d6] sm:$0xf] }
 0x57c   :  { %v15893_v62 = vpop.permute.xlu0 %3644  ;;  %v4510_v35 = vsel %vm4007_vm13, %v4494_v27, %v15726_v26  ;;  %v6375_v26 = vrot.slane %v15949_v43, 1 }
 0x57d   :  { %6689 = vrot.lane.b32.xlu1 %v6649_v46, %s11898_s22  ;;  %v6562_v46 = vsel %vm3764_vm8, %v19403_v42, %v6561_v48  ;;  %v6372_v48 = vrot.slane %v15918_v8, 1 }
 0x57e   :  { %5712 = vrot.lane.b32.xlu0 %v5677_v19, %s11896_s29  ;;  %v5772_v19 = vrot.slane %v15877_v45, 2 }
 0x57f   :  { %v4137_v6 = vpop.permute.xlu1 %4136  ;;  %v6373_v42 = vsel %vm1339_vm6, %v15526_v57, %v6372_v48 }
 0x580   :  { %v15906_v32 = vpop.permute.xlu0 %4238  ;;  %v4461_v51 = vsel %vm1661_vm4, %v15320_v16, %v4137_v6 }
 0x581   :  { %5898 = vrot.lane.b32.xlu1 %v5860_v34, %s11897_s16  ;;  %v5773_v34 = vsel %vm1548_vm7, %v15600_v56, %v5772_v19  ;;  %v5956_v19 = vsel %vm3861_vm9, %v5954_v23, %v5955_v18  ;;  %v5958_v23 = vrot.slane %v15719_v10, 4  ;;  %v6558_v10 = vrot.slane %v15788_v55, 3 }
 0x582   :  { %6599 = vrot.lane.b32.xlu0 %v6562_v46, %s11897_s16 }
 0x583   :  { %v4233_v25 = vpop.permute.xlu1 %4232 }
 0x584   :  { %v15922_v21 = vpop.permute.xlu0 %5017  ;;  %v4477_v38 = vsel %vm1695_vm10, %v4461_v51, %v4233_v25  ;;  %v5868_v25 = vrot.slane %v15877_v45, 3 }
 0x585   :  { %6691 = vrot.lane.b32.xlu1 %v6652_v40, %s11898_s22  ;;  %v6462_v40 = vrot.slane %v15788_v55, 2 }
 0x586   :  { %5808 = vrot.lane.b32.xlu0 %v5773_v34, %s11895_s24  ;;  %v15964_v34 = vld [vmem:[#allocation3 + $0x1d6] sm:$0xf] }
 0x587   :  { %v4329_v22 = vpop.permute.xlu1 %4328 }
 0x588   :  { %v4493_v49 = vsel %vm3990_vm14, %v4477_v38, %v4329_v22  ;;  %v15936_v46 = vpop.permute.xlu0 %5113  ;;  %v6376_v38 = vsel %vm1339_vm6, %v15405_v11, %v6375_v26  ;;  %v5679_v22 = vrot.slane %v15964_v34, 1 }
 0x589   :  { %5994 = vrot.lane.b32.xlu1 %v5956_v19, %s11898_s22  ;;  %v4509_v6 = vsel %vm4007_vm13, %v4493_v49, %v4425_v17  ;;  %v6463_v17 = vsel %vm1548_vm7, %v15398_v24, %v6462_v40  ;;  %v5959_v24 = vsel %vm3861_vm9, %v15335_v2, %v5958_v23  ;;  %v6559_v19 = vsel %vm3764_vm8, %v15416_v29, %v6558_v10 }
 0x58a   :  { %6409 = vrot.lane.b32.xlu0 %v6373_v42, %s11896_s29  ;;  %11533 = vmatmul.mubr.msk.f32.gmra.mxu0 %vm4524_vm15, %v4509_v6  ;;  %v5869_v42 = vsel %vm3764_vm8, %v15615_v4, %v5868_v25  ;;  %v5769_v40 = vrot.slane %v15840_v15, 2  ;;  %v5680_v6 = vsel %vm1339_vm6, %v15405_v11, %v5679_v22  ;;  %v6471_v25 = vrot.slane %v15949_v43, 2 }
 0x58b   :  { %11535 = vmatprep.mubr.msk.f32.mxu0 %vm4524_vm15, %v4510_v35  ;;  %v15952_v18 = vpop.permute.xlu1 %5107  ;;  %v15988_v35 = vld [vmem:[#allocation3 + $0x1ee] sm:$0xf]  ;;  %v5865_v22 = vrot.slane %v15840_v15, 3 }
 0x58c   :  { %v15954_v57 = vpop.permute.xlu0 %3650  ;;  %v5770_v29 = vsel %vm1548_vm7, %v15172_v39, %v5769_v40  ;;  %v6472_v11 = vsel %vm1548_vm7, %v15385_v53, %v6471_v25  ;;  %v5682_v26 = vrot.slane %v15988_v35, 1  ;;  %v3970_v39 = vsel %vm1661_vm4, %v15320_v16, %v15893_v62 }
 0x58d   :  { %6501 = vrot.lane.b32.xlu1 %v6463_v17, %s11895_s24 }
 0x58e   :  { %5904 = vrot.lane.b32.xlu0 %v5869_v42, %s11897_s16  ;;  %v6654_v42 = vrot.slane %v15788_v55, 4  ;;  %v5683_v53 = vsel %vm1339_vm6, %v15660_v31, %v5682_v26  ;;  %v6567_v55 = vrot.slane %v15949_v43, 3 }
 0x58f   :  { %v15966_v48 = vpop.permute.xlu1 %5203 }
 0x590   :  { %v15968_v51 = vpop.permute.xlu0 %5209  ;;  %v6568_v26 = vsel %vm3764_vm8, %v15446_v61, %v6567_v55 }
 0x591   :  { %5996 = vrot.lane.b32.xlu1 %v5959_v24, %s11898_s22 }
 0x592   :  { %6411 = vrot.lane.b32.xlu0 %v6376_v38, %s11896_s29  ;;  %v6655_v38 = vsel %vm3861_vm9, %v15335_v2, %v6654_v42 }
 0x593   :  { %v3741_v27 = vpop.permute.xlu1 %3740 }
 0x594   :  { %v15978_v49 = vpop.permute.xlu0 %3746  ;;  %v3986_v40 = vsel %vm1695_vm10, %v3970_v39, %v3741_v27 }
 0x595   :  { %6597 = vrot.lane.b32.xlu1 %v6559_v19, %s11897_s16  ;;  %v3971_v19 = vsel %vm1661_vm4, %v15899_v3, %v15794_v59  ;;  %v19684_v59 = vrot.slane %v15899_v3, 3 }
 0x596   :  { %5714 = vrot.lane.b32.xlu0 %v5680_v6, %s11896_s29  ;;  %v3987_v2 = vsel %vm1695_vm10, %v3971_v19, %v15821_v41  ;;  %v6656_v6 = vrot.slane %v15899_v3, 4 }
 0x597   :  { %v15990_v17 = vpop.permute.xlu1 %5299  ;;  %v4004_v25 = vsel %vm3990_vm14, %v3987_v2, %v15851_v30  ;;  %v5866_v27 = vsel %vm3764_vm8, %v19684_v59, %v5865_v22  ;;  %v5778_v30 = vrot.slane %v15988_v35, 2  ;;  %v5961_v22 = vrot.slane %v15840_v15, 4 }
 0x598   :  { %v15992_v23 = vpop.permute.xlu0 %3843  ;;  %v4021_v41 = vsel %vm4007_vm13, %v4004_v25, %v15891_v44  ;;  %v5874_v15 = vrot.slane %v15988_v35, 3 }
 0x599   :  { %5806 = vrot.lane.b32.xlu1 %v5770_v29, %s11895_s24  ;;  %v5779_v61 = vsel %vm1548_vm7, %v15606_v0, %v5778_v30  ;;  %v5962_v19 = vsel %vm3861_vm9, %v6656_v6, %v5961_v22 }
 0x59a   :  { %6507 = vrot.lane.b32.xlu0 %v6472_v11, %s11895_s24  ;;  %v6657_v11 = vrot.slane %v15819_v7, 4  ;;  %v5875_v59 = vsel %vm3764_vm8, %v15621_v20, %v5874_v15 }
 0x59b   :  { %v3838_v24 = vpop.permute.xlu1 %3837 }
 0x59c   :  { %v16002_v10 = vpop.permute.xlu0 %3940  ;;  %v4003_v16 = vsel %vm3990_vm14, %v3986_v40, %v3838_v24  ;;  %v16041_v24 = vld [vmem:[#allocation3 + $0x1ee] sm:$0xf]  ;;  %v6658_v44 = vsel %vm3861_vm9, %v6656_v6, %v6657_v11  ;;  %v6468_v40 = vrot.slane %v15918_v8, 2  ;;  %v5964_v6 = vrot.slane %v15877_v45, 4 }
 0x59d   :  { %6693 = vrot.lane.b32.xlu1 %v6655_v38, %s11898_s22  ;;  %v6378_v39 = vrot.slane %v16041_v24, 1 }
 0x59e   :  { %5716 = vrot.lane.b32.xlu0 %v5683_v53, %s11896_s29 }
 0x59f   :  { %v3935_v62 = vpop.permute.xlu1 %3934  ;;  %v6379_v2 = vsel %vm1339_vm6, %v15660_v31, %v6378_v39 }
 0x5a0   :  { %v4020_v29 = vsel %vm4007_vm13, %v4003_v16, %v3935_v62  ;;  %v16026_v42 = vpop.permute.xlu0 %4428  ;;  %v16061_v16 = vld [vmem:[#allocation3 + $0x206] sm:$0xf] }
 0x5a1   :  { %11579 = vmatprep.mubr.msk.f32.mxu1 %vm4524_vm15, %v4020_v29  ;;  %5902 = vrot.lane.b32.xlu1 %v5866_v27, %s11897_s16  ;;  %v6469_v29 = vsel %vm1548_vm7, %v15600_v56, %v6468_v40  ;;  %v6381_v31 = vrot.slane %v16061_v16, 1  ;;  %v6564_v56 = vrot.slane %v15918_v8, 3 }
 0x5a2   :  { %6603 = vrot.lane.b32.xlu0 %v6568_v26, %s11897_s16  ;;  %11580 = vmatmul.mubr.msk.f32.gmra.mxu1 %vm4524_vm15, %v4021_v41  ;;  %v5965_v41 = vsel %vm3861_vm9, %v15509_v58, %v5964_v6  ;;  %v5970_v26 = vrot.slane %v15988_v35, 4  ;;  %v6570_v35 = vrot.slane %v16041_v24, 3 }
 0x5a3   :  { %v4143_v38 = vpop.permute.xlu1 %4142  ;;  %v6382_v45 = vsel %vm1339_vm6, %v15559_v14, %v6381_v31  ;;  %v6565_v22 = vsel %vm3764_vm8, %v15615_v4, %v6564_v56  ;;  %v6666_v31 = vrot.slane %v16041_v24, 4  ;;  %v16111_v56 = vld [vmem:[#allocation3 + $0x206] sm:$0xf] }
 0x5a4   :  { %v16043_v7 = vpop.permute.xlu0 %5015  ;;  %v5971_v40 = vsel %vm3861_vm9, %v15641_v1, %v5970_v26 }
 0x5a5   :  { %6695 = vrot.lane.b32.xlu1 %v6658_v44, %s11898_s22 }
 0x5a6   :  { %5812 = vrot.lane.b32.xlu0 %v5779_v61, %s11895_s24  ;;  %v16089_v61 = vld [vmem:[#allocation3 + $0x1ce] sm:$0xff] }
 0x5a7   :  { %v4335_v53 = vpop.permute.xlu1 %4334  ;;  %v5774_v39 = vrot.slane %v16089_v61, 2  ;;  %v4464_v6 = vsel %vm1661_vm4, %v16089_v61, %v4143_v38  ;;  %v5870_v26 = vrot.slane %v16089_v61, 3 }
 0x5a8   :  { %v16052_v55 = vpop.permute.xlu0 %3648  ;;  %v4480_v38 = vsel %vm1695_vm10, %v4464_v6, %v15906_v32  ;;  %v5685_v32 = vrot.slane %v16111_v56, 1 }
 0x5a9   :  { %5998 = vrot.lane.b32.xlu1 %v5962_v19, %s11898_s22  ;;  %v5775_v19 = vrot.slane %v15964_v34, 2 }
 0x5aa   :  { %6413 = vrot.lane.b32.xlu0 %v6379_v2, %s11896_s29 }
 0x5ab   :  { %v4431_v62 = vpop.permute.xlu1 %4430  ;;  %v5776_v4 = vsel %vm1548_vm7, %v5774_v39, %v5775_v19  ;;  %v6667_v19 = vsel %vm3861_vm9, %v15641_v1, %v6666_v31  ;;  %v5967_v31 = vrot.slane %v15964_v34, 4 }
 0x5ac   :  { %v16063_v25 = vpop.permute.xlu0 %5021 }
 0x5ad   :  { %6505 = vrot.lane.b32.xlu1 %v6469_v29, %s11895_s24  ;;  %v6660_v29 = vrot.slane %v15918_v8, 4 }
 0x5ae   :  { %5908 = vrot.lane.b32.xlu0 %v5875_v59, %s11897_s16  ;;  %v6571_v59 = vsel %vm3764_vm8, %v15621_v20, %v6570_v35 }
 0x5af   :  { %v16073_v27 = vpop.permute.xlu1 %5305  ;;  %v6661_v39 = vsel %vm3861_vm9, %v15509_v58, %v6660_v29 }
 0x5b0   :  { %v16075_v11 = vpop.permute.xlu0 %5213 }
 0x5b1   :  { %6000 = vrot.lane.b32.xlu1 %v5965_v41, %s11898_s22 }
 0x5b2   :  { %6415 = vrot.lane.b32.xlu0 %v6382_v45, %s11896_s29 }
 0x5b3   :  { %v4141_v30 = vpop.permute.xlu1 %4140 }
 0x5b4   :  { %v16085_v44 = vpop.permute.xlu0 %5309  ;;  %v4463_v41 = vsel %vm1661_vm4, %v15494_v5, %v4141_v30  ;;  %v5871_v5 = vrot.slane %v15964_v34, 3  ;;  %v4496_v30 = vsel %vm3990_vm14, %v4480_v38, %v4335_v53 }
 0x5b5   :  { %6601 = vrot.lane.b32.xlu1 %v6565_v22, %s11897_s16  ;;  %v4512_v35 = vsel %vm4007_vm13, %v4496_v30, %v4431_v62  ;;  %v5781_v62 = vrot.slane %v16111_v56, 2  ;;  %v16169_v30 = vld [vmem:[#allocation3 + $0x236] sm:$0xf] }
 0x5b6   :  { %6004 = vrot.lane.b32.xlu0 %v5971_v40, %s11898_s22  ;;  %v5872_v1 = vsel %vm3764_vm8, %v5870_v26, %v5871_v5  ;;  %v16167_v5 = vld [vmem:[#allocation3 + $0x22e] sm:$0xff] }
 0x5b7   :  { %v4237_v2 = vpop.permute.xlu1 %4236 }
 0x5b8   :  { %v16098_v15 = vpop.permute.xlu0 %4240  ;;  %v4479_v45 = vsel %vm1695_vm10, %v4463_v41, %v4237_v2  ;;  %v6662_v2 = vrot.slane %v16089_v61, 4  ;;  %v16157_v41 = vld [vmem:[#allocation3 + $0x216] sm:$0xff] }
 0x5b9   :  { %5810 = vrot.lane.b32.xlu1 %v5776_v4, %s11895_s24  ;;  %v5686_v4 = vsel %vm1339_vm6, %v15559_v14, %v5685_v32  ;;  %v5877_v14 = vrot.slane %v16111_v56, 3  ;;  %v5879_v26 = vrot.slane %v16157_v41, 3 }
 0x5ba   :  { %6605 = vrot.lane.b32.xlu0 %v6571_v59, %s11897_s16  ;;  %v5968_v34 = vsel %vm3861_vm9, %v6662_v2, %v5967_v31 }
 0x5bb   :  { %v4333_v8 = vpop.permute.xlu1 %4332 }
 0x5bc   :  { %v4495_v20 = vsel %vm3990_vm14, %v4479_v45, %v4333_v8  ;;  %v16118_v22 = vpop.permute.xlu0 %4336  ;;  %v16159_v45 = vld [vmem:[#allocation3 + $0x21e] sm:$0xf] }
 0x5bd   :  { %6697 = vrot.lane.b32.xlu1 %v6661_v39, %s11898_s22  ;;  %v4511_v40 = vsel %vm4007_vm13, %v4495_v20, %v16026_v42  ;;  %v6663_v42 = vrot.slane %v15949_v43, 4  ;;  %v5782_v43 = vsel %vm1548_vm7, %v15779_v13, %v5781_v62  ;;  %v5880_v38 = vrot.slane %v16159_v45, 3 }
 0x5be   :  { %6701 = vrot.lane.b32.xlu0 %v6667_v19, %s11898_s22  ;;  %11536 = vmatmul.mubr.msk.f32.gmra.mxu0 %vm4524_vm15, %v4511_v40  ;;  %v6474_v39 = vrot.slane %v16041_v24, 2  ;;  %v5878_v19 = vsel %vm3764_vm8, %v15573_v52, %v5877_v14  ;;  %v6387_v24 = vrot.slane %v16169_v30, 1  ;;  %v19404_v14 = vrot.slane %v16157_v41, 4 }
 0x5bf   :  { %11538 = vmatprep.mubr.msk.f32.mxu0 %vm4524_vm15, %v4512_v35  ;;  %v16134_v58 = vpop.permute.xlu1 %5111  ;;  %v6664_v59 = vsel %vm3861_vm9, %v6662_v2, %v6663_v42  ;;  %v5881_v32 = vsel %vm3764_vm8, %v5879_v26, %v5880_v38  ;;  %v6386_v35 = vrot.slane %v16167_v5, 1  ;;  %v6477_v42 = vrot.slane %v16061_v16, 2 }
 0x5c0   :  { %v16136_v53 = vpop.permute.xlu0 %4432  ;;  %v6475_v2 = vsel %vm1548_vm7, %v15606_v0, %v6474_v39  ;;  %v5976_v38 = vrot.slane %v16159_v45, 4 }
 0x5c1   :  { %5906 = vrot.lane.b32.xlu1 %v5872_v1, %s11897_s16  ;;  %v6388_v0 = vsel %vm1339_vm6, %v6386_v35, %v6387_v24  ;;  %v16214_v35 = vld [vmem:[#allocation3 + $0x1b6] sm:$0xff] }
 0x5c2   :  { %5718 = vrot.lane.b32.xlu0 %v5686_v4, %s11896_s29  ;;  %v16188_v4 = vld [vmem:[#allocation3 + $0x4e] sm:$0xff] }
 0x5c3   :  { %v16146_v29 = vpop.permute.xlu1 %5207  ;;  %v6026_v62 = vsel %vm1661_vm4, %v16188_v4, %v14535_v36 }
 0x5c4   :  { %v16148_v6 = vpop.permute.xlu0 %5019  ;;  %v6042_v31 = vsel %vm1695_vm10, %v6026_v62, %v14548_v60  ;;  %v16209_v60 = vld [vmem:[#allocation3 + $0x66] sm:$0xff]  ;;  %v19686_v62 = vld [vmem:[#allocation71_spill] sm:$0xff] }
 0x5c5   :  { %6699 = vrot.lane.b32.xlu1 %v6664_v59, %s11898_s22  ;;  %v6573_v59 = vrot.slane %v16061_v16, 3  ;;  %v6058_v36 = vsel %vm3990_vm14, %v6042_v31, %v14606_v50  ;;  %v6669_v50 = vrot.slane %v16061_v16, 4  ;;  %v19687_v31 = vld [vmem:[#allocation33_spill] sm:$0xff] }
 0x5c6   :  { %5814 = vrot.lane.b32.xlu0 %v5782_v43, %s11895_s24 }
 0x5c7   :  { %v3745_v8 = vpop.permute.xlu1 %3744 }
 0x5c8   :  { %v16163_v20 = vpop.permute.xlu0 %5211 }
 0x5c9   :  { %6002 = vrot.lane.b32.xlu1 %v5968_v34, %s11898_s22  ;;  %v6033_v34 = vsel %vm1661_vm4, %v15842_v54, %v14445_v37  ;;  %v3972_v37 = vsel %vm1661_vm4, %v16214_v35, %v16052_v55 }
 0x5ca   :  { %5910 = vrot.lane.b32.xlu0 %v5878_v19, %s11897_s16  ;;  %v6478_v19 = vsel %vm1548_vm7, %v15779_v13, %v6477_v42  ;;  %v3973_v13 = vsel %vm1661_vm4, %v16089_v61, %v15954_v57  ;;  %v3988_v24 = vsel %vm1695_vm10, %v3972_v37, %v3745_v8  ;;  %v16239_v8 = vld [vmem:[#allocation3 + $0x7e] sm:$0xff] }
 0x5cb   :  { %v16175_v40 = vpop.permute.xlu1 %5303  ;;  %v3989_v55 = vsel %vm1695_vm10, %v3973_v13, %v15978_v49  ;;  %v19690_v13 = vld [vmem:[#allocation56_spill] sm:$0xff] }
 0x5cc   :  { %v16182_v1 = vpop.permute.xlu0 %6499 }
 0x5cd   :  { %19685 = vst [vmem:[#allocation110_spill] sm:$0xff] %v16182_v1  ;;  %6509 = vrot.lane.b32.xlu1 %v6475_v2, %s11895_s24  ;;  %v16229_v2 = vld [vmem:[#allocation3 + $0x21e] sm:$0xf] }
 0x5ce   :  { %5912 = vrot.lane.b32.xlu0 %v5881_v32, %s11897_s16  ;;  %v6027_v32 = vsel %vm1661_vm4, %v16209_v60, %v14890_v33  ;;  %v6574_v33 = vsel %vm3764_vm8, %v15573_v52, %v6573_v59  ;;  %v6576_v57 = vrot.slane %v16229_v2, 3  ;;  %v6028_v52 = vsel %vm1661_vm4, %v16239_v8, %v19686_v62  ;;  %v16244_v59 = vld [vmem:[#allocation3 + $0xae] sm:$0xff] }
 0x5cf   :  { %v3842_v43 = vpop.permute.xlu1 %3841  ;;  %v6043_v54 = vsel %vm1695_vm10, %v6027_v32, %v14958_v47  ;;  %v5977_v47 = vsel %vm3861_vm9, %v19404_v14, %v5976_v38  ;;  %v6030_v49 = vsel %vm1661_vm4, %v16244_v59, %v19687_v31  ;;  %v19691_v62 = vld [vmem:[#allocation73_spill] sm:$0xff]  ;;  %v19701_v14 = vld [vmem:[#allocation30_spill] sm:$0xff] }
 0x5d0   :  { %v16205_v39 = vpop.permute.xlu0 %5708  ;;  %v4005_v16 = vsel %vm3990_vm14, %v3988_v24, %v3842_v43  ;;  %v4006_v43 = vsel %vm3990_vm14, %v3989_v55, %v15992_v23  ;;  %v6074_v24 = vsel %vm4007_vm13, %v6058_v36, %v19690_v13  ;;  %v19692_v55 = vld [vmem:[#allocation14_spill] sm:$0xff]  ;;  %v6577_v31 = vsel %vm3764_vm8, %v5879_v26, %v6576_v57 }
 0x5d1   :  { %6511 = vrot.lane.b32.xlu1 %v6478_v19, %s11895_s24  ;;  %v19689_v19 = vld [vmem:[#allocation72_spill] sm:$0xff]  ;;  %v4023_v37 = vsel %vm4007_vm13, %v4006_v43, %v16002_v10  ;;  %v19693_v10 = vld [vmem:[#allocation17_spill] sm:$0xff]  ;;  %v19698_v57 = vld [vmem:[#allocation18_spill] sm:$0xff] }
 0x5d2   :  { %6419 = vrot.lane.b32.xlu0 %v6388_v0, %s11896_s29  ;;  %v6044_v32 = vsel %vm1695_vm10, %v6028_v52, %v19689_v19  ;;  %v5688_v52 = vrot.slane %v16159_v45, 1  ;;  %v19694_v43 = vld [vmem:[#allocation61_spill] sm:$0xff]  ;;  %v16281_v19 = vld [vmem:[#allocation3 + $0x96] sm:$0xff] }
 0x5d3   :  { %v3939_v42 = vpop.permute.xlu1 %3938  ;;  %v6060_v23 = vsel %vm3990_vm14, %v6044_v32, %v19691_v62  ;;  %v19695_v32 = vld [vmem:[#allocation46_spill] sm:$0xff] }
 0x5d4   :  { %v4022_v0 = vsel %vm4007_vm13, %v4005_v16, %v3939_v42  ;;  %v16252_v38 = vpop.permute.xlu0 %6595  ;;  %v6059_v16 = vsel %vm3990_vm14, %v6043_v54, %v19692_v55  ;;  %v19405_v42 = vrot.slane %v16157_v41, 1  ;;  %v6672_v54 = vrot.slane %v16229_v2, 4  ;;  %v19697_v62 = vld [vmem:[#allocation58_spill] sm:$0xff] }
 0x5d5   :  { %19688 = vst [vmem:[#allocation71_spill] sm:$0xff] %v16252_v38  ;;  %11582 = vmatprep.mubr.msk.f32.mxu1 %vm4524_vm15, %v4022_v0  ;;  %6607 = vrot.lane.b32.xlu1 %v6574_v33, %s11897_s16  ;;  %v6046_v33 = vsel %vm1695_vm10, %v6030_v49, %v19693_v10  ;;  %v6049_v0 = vsel %vm1695_vm10, %v6033_v34, %v19694_v43  ;;  %v19699_v10 = vld [vmem:[#allocation35_spill] sm:$0xff]  ;;  %v19700_v43 = vld [vmem:[#allocation62_spill] sm:$0xff] }
 0x5d6   :  { %11583 = vmatmul.mubr.msk.f32.gmra.mxu1 %vm4524_vm15, %v4023_v37  ;;  %6008 = vrot.lane.b32.xlu0 %v5977_v47, %s11898_s22  ;;  %v6029_v47 = vsel %vm1661_vm4, %v16281_v19, %v19695_v32  ;;  %v19696_v37 = vld [vmem:[#allocation99_spill] sm:$0xff]  ;;  %v6075_v55 = vsel %vm4007_vm13, %v6059_v16, %v19698_v57  ;;  %v6076_v32 = vsel %vm4007_vm13, %v6060_v23, %v19700_v43  ;;  %v5784_v16 = vrot.slane %v16159_v45, 2  ;;  %v19703_v57 = vld [vmem:[#allocation78_spill] sm:$0xff]  ;;  %v19706_v45 = vld [vmem:[#allocation53_spill] sm:$0xff] }
 0x5d7   :  { %11649 = vmatprep.mubr.msk.f32.mxu1 %vm4524_vm15, %v6074_v24  ;;  %v16273_v36 = vpop.permute.xlu1 %5117  ;;  %v6670_v13 = vsel %vm3861_vm9, %v19696_v37, %v6669_v50  ;;  %v11826_v24 = vld [vmem:[#allocation3 + $0x36] sm:$0xff]  ;;  %v6045_v34 = vsel %vm1695_vm10, %v6029_v47, %v19699_v10  ;;  %v5689_v50 = vsel %vm1339_vm6, %v19405_v42, %v5688_v52  ;;  %v19702_v47 = vld [vmem:[#allocation44_spill] sm:$0xff]  ;;  %v5328_v23 = vsel %vm1661_vm4, %v16188_v4, %v19703_v57 }
 0x5d8   :  { %v16286_v49 = vpop.permute.xlu0 %5804  ;;  %v5327_v26 = vsel %vm1661_vm4, %v11826_v24, %v19697_v62  ;;  %v6062_v24 = vsel %vm3990_vm14, %v6046_v33, %v19701_v14  ;;  %v19406_v62 = vrot.slane %v16157_v41, 2  ;;  %v19705_v14 = vrot.slane %v16157_v41, 4  ;;  %v19707_v43 = vld [vmem:[#allocation39_spill] sm:$0xff]  ;;  %v16327_v57 = vld [vmem:[#allocation3 + $0x1e6] sm:$0xff] }
 0x5d9   :  { %6703 = vrot.lane.b32.xlu1 %v6670_v13, %s11898_s22  ;;  %v6065_v13 = vsel %vm3990_vm14, %v6049_v0, %v19702_v47  ;;  %v19708_v47 = vld [vmem:[#allocation67_spill] sm:$0xff] }
 0x5da   :  { %11650 = vmatmul.mubr.msk.f32.vlgmr.msra.gmra.mxu1 %vm4524_vm15, %v6075_v55  ;;  %6609 = vrot.lane.b32.xlu0 %v6577_v31, %s11897_s16  ;;  %v19704_v55 = vld [vmem:[#allocation64_spill] sm:$0xff]  ;;  %v6673_v33 = vsel %vm3861_vm9, %v19705_v14, %v6672_v54  ;;  %v5344_v31 = vsel %vm1695_vm10, %v5328_v23, %v19706_v45  ;;  %v6061_v42 = vsel %vm3990_vm14, %v6045_v34, %v19708_v47 }
 0x5db   :  { %v5343_v10 = vsel %vm1695_vm10, %v5327_v26, %v19704_v55  ;;  %11652 = vmatprep.mubr.msk.f32.mxu1 %vm4524_vm15, %v6076_v32  ;;  %v4145_v52 = vpop.permute.xlu1 %4144  ;;  %v19709_v32 = vld [vmem:[#allocation74_spill] sm:$0xff]  ;;  %v19710_v55 = vld [vmem:[#allocation79_spill] sm:$0xff]  ;;  %v19711_v34 = vld [vmem:[#allocation32_spill] sm:$0xff] }
 0x5dc   :  { %v5359_v0 = vsel %vm3990_vm14, %v5343_v10, %v19707_v43  ;;  %v16325_v4 = vpop.permute.xlu0 %6405  ;;  %v4465_v26 = vsel %vm1661_vm4, %v16327_v57, %v4145_v52  ;;  %v5329_v54 = vsel %vm1661_vm4, %v16209_v60, %v19709_v32  ;;  %v6077_v23 = vsel %vm4007_vm13, %v6061_v42, %v19710_v55  ;;  %v16341_v45 = vld [vmem:[#allocation3 + $0xc6] sm:$0xff]  ;;  %v19712_v43 = vld [vmem:[#allocation87_spill] sm:$0xff] }
 0x5dd   :  { %v4481_v10 = vsel %vm1695_vm10, %v4465_v26, %v16098_v15  ;;  %5720 = vrot.lane.b32.xlu1 %v5689_v50, %s11896_s29  ;;  %v6078_v14 = vsel %vm4007_vm13, %v6062_v24, %v19711_v34  ;;  %v6031_v52 = vsel %vm1661_vm4, %v16341_v45, %v19712_v43  ;;  %v5785_v15 = vsel %vm1548_vm7, %v19406_v62, %v5784_v16  ;;  %v19713_v50 = vld [vmem:[#allocation42_spill] sm:$0xff]  ;;  %v16357_v26 = vld [vmem:[#allocation3 + $0xde] sm:$0xff]  ;;  %v19714_v32 = vld [vmem:[#allocation49_spill] sm:$0xff] }
 0x5de   :  { %11653 = vmatmul.mubr.msk.f32.gmra.mxu1 %vm4524_vm15, %v6077_v23  ;;  %v4497_v47 = vsel %vm3990_vm14, %v4481_v10, %v16118_v22  ;;  %v6384_v42 = vrot.slane %v16229_v2, 1  ;;  %6705 = vrot.lane.b32.xlu0 %v6673_v33, %s11898_s22  ;;  %v5331_v24 = vsel %vm1661_vm4, %v16281_v19, %v19713_v50  ;;  %v6032_v55 = vsel %vm1661_vm4, %v16357_v26, %v19714_v32  ;;  %v19715_v23 = vld [vmem:[#allocation89_spill] sm:$0xff]  ;;  %v19716_v10 = vld [vmem:[#allocation55_spill] sm:$0xff]  ;;  %v19718_v62 = vld [vmem:[#allocation86_spill] sm:$0xff] }
 0x5df   :  { %v6047_v22 = vsel %vm1695_vm10, %v6031_v52, %v19715_v23  ;;  %11655 = vmatprep.mubr.msk.f32.mxu1 %vm4524_vm15, %v6078_v14  ;;  %v16365_v16 = vpop.permute.xlu1 %5115  ;;  %v4513_v33 = vsel %vm4007_vm13, %v4497_v47, %v16136_v53  ;;  %v5360_v34 = vsel %vm3990_vm14, %v5344_v31, %v19716_v10  ;;  %v19717_v43 = vld [vmem:[#allocation41_spill] sm:$0xff]  ;;  %v6048_v38 = vsel %vm1695_vm10, %v6032_v55, %v19718_v62  ;;  %v19720_v14 = vld [vmem:[#allocation43_spill] sm:$0xff]  ;;  %v19721_v47 = vld [vmem:[#allocation88_spill] sm:$0xff] }
 0x5e0   :  { %v5375_v50 = vsel %vm4007_vm13, %v5359_v0, %v19717_v43  ;;  %v19719_v32 = vld [vmem:[#allocation93_spill] sm:$0xff]  ;;  %v16377_v52 = vpop.permute.xlu0 %5900  ;;  %11539 = vmatmul.mubr.msk.f32.gmra.mxu0 %vm4524_vm15, %v4513_v33  ;;  %v5330_v53 = vsel %vm1661_vm4, %v16239_v8, %v19720_v14  ;;  %v6064_v31 = vsel %vm3990_vm14, %v6048_v38, %v19721_v47  ;;  %v19723_v62 = vld [vmem:[#allocation75_spill] sm:$0xff]  ;;  %v19725_v10 = vld [vmem:[#allocation92_spill] sm:$0xff]  ;;  %v19726_v38 = vrot.slane %v16157_v41, 1 }
 0x5e1   :  { %v6063_v1 = vsel %vm3990_vm14, %v6047_v22, %v19719_v32  ;;  %v19722_v23 = vld [vmem:[#allocation97_spill] sm:$0xff]  ;;  %5816 = vrot.lane.b32.xlu1 %v5785_v15, %s11895_s24  ;;  %11605 = vmatprep.mubr.msk.f32.mxu0 %vm4524_vm15, %v5375_v50  ;;  %v5345_v55 = vsel %vm1695_vm10, %v5329_v54, %v19723_v62  ;;  %v19724_v22 = vld [vmem:[#allocation66_spill] sm:$0xff]  ;;  %v6080_v43 = vsel %vm4007_vm13, %v6064_v31, %v19725_v10  ;;  %v19733_v10 = vld [vmem:[#allocation63_spill] sm:$0xff] }
 0x5e2   :  { %v6079_v0 = vsel %vm4007_vm13, %v6063_v1, %v19722_v23  ;;  %v5347_v33 = vsel %vm1695_vm10, %v5331_v24, %v19724_v22  ;;  %v6385_v32 = vsel %vm1339_vm6, %v19726_v38, %v6384_v42  ;;  %v19727_v1 = vld [vmem:[#allocation77_spill] sm:$0xff]  ;;  %v19734_v38 = vld [vmem:[#allocation20_spill] sm:$0xff]  ;;  %vm10136_vm6 = vcmask 1041409  }
 0x5e3   :  { %11656 = vmatmul.mubr.msk.f32.gmra.mxu1 %vm4524_vm15, %v6079_v0  ;;  %v5376_v15 = vsel %vm4007_vm13, %v5360_v34, %v19727_v1  ;;  %v19728_v14 = vld [vmem:[#allocation45_spill] sm:$0xff]  ;;  %v16406_v24 = vpop.permute.xlu1 %5307  ;;  %v19731_v0 = vld [vmem:[#allocation76_spill] sm:$0xff]  ;;  %v5973_v34 = vrot.slane %v16111_v56, 4  ;;  %v5332_v1 = vsel %vm1661_vm4, %v16244_v59, %v19734_v38  ;;  %v6480_v56 = vrot.slane %v16229_v2, 2  ;;  %v6796_v2 = vld [vmem:[%s19369_s5 + $0x178] sm:$0xff] }
 0x5e4   :  { %v5346_v50 = vsel %vm1695_vm10, %v5330_v53, %v19728_v14  ;;  %v19729_v47 = vld [vmem:[#allocation69_spill] sm:$0xff]  ;;  %11658 = vmatprep.mubr.msk.f32.mxu1 %vm4524_vm15, %v6080_v43  ;;  %v16412_v42 = vpop.permute.xlu0 %6407  ;;  %11606 = vmatmul.mubr.msk.f32.vlgmr.msra.gmra.mxu0 %vm4524_vm15, %v5376_v15  ;;  %v6797_v53 = vld [vmem:[%s19369_s5 + $0x180] sm:$0xff]  ;;  %v6081_v43 = vsel %vm4007_vm13, %v6065_v13, %v19733_v10  ;;  %v19741_v10 = vrot.slane %v16157_v41, 2 }
 0x5e5   :  { %v5361_v54 = vsel %vm3990_vm14, %v5345_v55, %v19729_v47  ;;  %v19730_v31 = vld [vmem:[#allocation57_spill] sm:$0xff]  ;;  %6417 = vrot.lane.b32.xlu1 %v6385_v32, %s11896_s29  ;;  %11674 = vmatpush3.msra.mxu0 %v15865_v63  ;;  %v19735_v15 = vld [vmem:[#allocation27_spill] sm:$0xff]  ;;  %v5974_v63 = vsel %vm3861_vm9, %v19696_v37, %v5973_v34  ;;  %v6482_v37 = vrot.slane %v16167_v5, 2  ;;  %v6483_v34 = vrot.slane %v16169_v30, 2  ;;  %v19742_v38 = vld [vmem:[#allocation40_spill] sm:$0xff] }
 0x5e6   :  { %v5362_v23 = vsel %vm3990_vm14, %v5346_v50, %v19730_v31  ;;  %v5377_v62 = vsel %vm4007_vm13, %v5361_v54, %v19731_v0  ;;  %v19732_v55 = vld [vmem:[#allocation65_spill] sm:$0xff]  ;;  %v19736_v32 = vld [vmem:[#allocation47_spill] sm:$0xff]  ;;  %11675 = vmatprep.subr.mxu0 %v6797_v53  ;;  %v19738_v54 = vld [vmem:[#allocation68_spill] sm:$0xff] }
 0x5e7   :  { %v5363_v22 = vsel %vm3990_vm14, %v5347_v33, %v19732_v55  ;;  %11608 = vmatprep.mubr.msk.f32.mxu0 %vm4524_vm15, %v5377_v62  ;;  %11659 = vmatmul.mubr.msk.f32.gmra.mxu1 %vm4524_vm15, %v6081_v43  ;;  %v5348_v33 = vsel %vm1695_vm10, %v5332_v1, %v19735_v15  ;;  %v16433_v14 = vpop.permute.xlu1 %6593  ;;  %v5378_v50 = vsel %vm4007_vm13, %v5362_v23, %v19736_v32  ;;  %v19737_v13 = vld [vmem:[#allocation29_spill] sm:$0xff]  ;;  %v19740_v55 = vld [vmem:[#allocation23_spill] sm:$0xff]  ;;  %v19743_v15 = vld [vmem:[#allocation24_spill] sm:$0xff] }
 0x5e8   :  { %v5364_v47 = vsel %vm3990_vm14, %v5348_v33, %v19737_v13  ;;  %v5379_v31 = vsel %vm4007_vm13, %v5363_v22, %v19738_v54  ;;  %v16441_v0 = vpop.permute.xlu0 %5710  ;;  %11609 = vmatmul.mubr.msk.f32.gmra.mxu0 %vm4524_vm15, %v5378_v50  ;;  %v19739_v62 = vld [vmem:[#allocation85_spill] sm:$0xff]  ;;  %v6481_v43 = vsel %vm1548_vm7, %v19741_v10, %v6480_v56  ;;  %v5334_v1 = vsel %vm1661_vm4, %v16357_v26, %v19742_v38  ;;  %v19744_v50 = vld [vmem:[#allocation28_spill] sm:$0xff]  ;;  %v19745_v54 = vld [vmem:[#allocation34_spill] sm:$0xff] }
 0x5e9   :  { %v5333_v23 = vsel %vm1661_vm4, %v16341_v45, %v19739_v62  ;;  %6006 = vrot.lane.b32.xlu1 %v5974_v63, %s11898_s22  ;;  %11611 = vmatprep.mubr.msk.f32.mxu0 %vm4524_vm15, %v5379_v31  ;;  %v5380_v13 = vsel %vm4007_vm13, %v5364_v47, %v19744_v50  ;;  %v5350_v56 = vsel %vm1695_vm10, %v5334_v1, %v19745_v54  ;;  %v19746_v31 = vld [vmem:[#allocation94_spill] sm:$0xff]  ;;  %v19748_v47 = vld [vmem:[#allocation103_spill] sm:$0xff]  ;;  %v19749_v50 = vld [vmem:[#allocation84_spill] sm:$0xff] }
 0x5ea   :  { %v5349_v22 = vsel %vm1695_vm10, %v5333_v23, %v19740_v55  ;;  %11676 = vmatpush3.msra.mxu0 %v6797_v53  ;;  %v6795_v62 = vld [vmem:[%s19369_s5 + $0x170] sm:$0xff]  ;;  %v19747_v23 = vld [vmem:[#allocation36_spill] sm:$0xff]  ;;  %v6484_v1 = vsel %vm1548_vm7, %v6482_v37, %v6483_v34 }
 0x5eb   :  { %v5365_v33 = vsel %vm3990_vm14, %v5349_v22, %v19743_v15  ;;  %v16466_v32 = vpop.permute.xlu1 %5802  ;;  %11677 = vmatprep.subr.mxu0 %v6796_v2  ;;  %v5366_v55 = vsel %vm3990_vm14, %v5350_v56, %v19747_v23  ;;  %v11830_v22 = vld [vmem:[#allocation3 + $0x156] sm:$0xff]  ;;  %v6578_v15 = vrot.slane %v16167_v5, 3  ;;  %v6794_v23 = vld [vmem:[%s19369_s5 + $0x168] sm:$0xff] }
 0x5ec   :  { %v5381_v63 = vsel %vm4007_vm13, %v5365_v33, %v19746_v31  ;;  %v16474_v53 = vpop.permute.xlu0 %6503  ;;  %11612 = vmatmul.mubr.msk.f32.gmra.mxu0 %vm4524_vm15, %v5380_v13  ;;  %v5335_v10 = vsel %vm1661_vm4, %v11830_v22, %v19748_v47  ;;  %v6579_v33 = vrot.slane %v16169_v30, 3  ;;  %v5382_v13 = vsel %vm4007_vm13, %v5366_v55, %v19749_v50  ;;  %v19750_v54 = vld [vmem:[#allocation22_spill] sm:$0xff]  ;;  %v19753_v55 = vld [vmem:[#allocation96_spill] sm:$0xff]  ;;  %v19754_v47 = vld [vmem:[#allocation109_spill] sm:$0xff] }
 0x5ed   :  { %6513 = vrot.lane.b32.xlu1 %v6481_v43, %s11895_s24  ;;  %11614 = vmatprep.mubr.msk.f32.mxu0 %vm4524_vm15, %v5381_v63  ;;  %v5351_v38 = vsel %vm1695_vm10, %v5335_v10, %v15746_v9  ;;  %v5336_v56 = vsel %vm1661_vm4, %v15833_v28, %v19750_v54  ;;  %v19751_v9 = vld [vmem:[#allocation26_spill] sm:$0xff]  ;;  %v16512_v22 = vld [vmem:[#allocation3 + $0x186] sm:$0xff]  ;;  %v6675_v54 = vrot.slane %v16169_v30, 4 }
 0x5ee   :  { %11678 = vmatpush3.msra.mxu0 %v6796_v2  ;;  %v5367_v43 = vsel %vm3990_vm14, %v5351_v38, %v15768_v12  ;;  %v5352_v37 = vsel %vm1695_vm10, %v5336_v56, %v19751_v9  ;;  %v19752_v34 = vld [vmem:[#allocation106_spill] sm:$0xff]  ;;  %v5337_v10 = vsel %vm1661_vm4, %v16512_v22, %v19754_v47  ;;  %v6580_v50 = vsel %vm3764_vm8, %v6578_v15, %v6579_v33  ;;  %v6793_v30 = vld [vmem:[%s19369_s5 + $0x160] sm:$0xff]  ;;  %v19757_v15 = vld [vmem:[#allocation105_spill] sm:$0xff] }
 0x5ef   :  { %v16498_v31 = vpop.permute.xlu1 %6689  ;;  %11679 = vmatprep.subr.mxu0 %v6795_v62  ;;  %v5383_v63 = vsel %vm4007_vm13, %v5367_v43, %v19752_v34  ;;  %v5368_v12 = vsel %vm3990_vm14, %v5352_v37, %v19753_v55  ;;  %v5353_v38 = vsel %vm1695_vm10, %v5337_v10, %v15952_v18  ;;  %v19755_v56 = vld [vmem:[#allocation102_spill] sm:$0xff]  ;;  %v5339_v33 = vsel %vm1661_vm4, %v16214_v35, %v16043_v7 }
 0x5f0   :  { %v16504_v2 = vpop.permute.xlu0 %5712  ;;  %11615 = vmatmul.mubr.msk.f32.gmra.mxu0 %vm4524_vm15, %v5382_v13  ;;  %v6674_v13 = vrot.slane %v16167_v5, 4  ;;  %v5384_v43 = vsel %vm4007_vm13, %v5368_v12, %v19755_v56  ;;  %v5369_v9 = vsel %vm3990_vm14, %v5353_v38, %v15966_v48  ;;  %v19759_v12 = vld [vmem:[#allocation108_spill] sm:$0xff]  ;;  %v5341_v7 = vsel %vm1661_vm4, %v16327_v57, %v16148_v6  ;;  %v6792_v6 = vld [vmem:[%s19369_s5 + $0x158] sm:$0xff]  ;;  %v19761_v56 = vld [vmem:[#allocation101_spill] sm:$0xff] }
 0x5f1   :  { %6515 = vrot.lane.b32.xlu1 %v6484_v1, %s11895_s24  ;;  %11617 = vmatprep.mubr.msk.f32.mxu0 %vm4524_vm15, %v5383_v63  ;;  %v19756_v1 = vld [vmem:[#allocation104_spill] sm:$0xff]  ;;  %v5385_v18 = vsel %vm4007_vm13, %v5369_v9, %v15990_v17  ;;  %v5355_v63 = vsel %vm1695_vm10, %v5339_v33, %v16134_v58 }
 0x5f2   :  { %11680 = vmatpush3.msra.mxu0 %v6795_v62  ;;  %v5338_v34 = vsel %vm1661_vm4, %v15899_v3, %v19756_v1  ;;  %v19758_v3 = vld [vmem:[#allocation107_spill] sm:$0xff]  ;;  %v6676_v55 = vsel %vm3861_vm9, %v6674_v13, %v6675_v54  ;;  %v5371_v10 = vsel %vm3990_vm14, %v5355_v63, %v16146_v29  ;;  %v5357_v29 = vsel %vm1695_vm10, %v5341_v7, %v16365_v16  ;;  %v19762_v16 = vld [vmem:[#allocation16_spill] sm:$0xff] }
 0x5f3   :  { %v5899_v37 = vpop.permute.xlu1 %5898  ;;  %11681 = vmatprep.subr.mxu0 %v6794_v23  ;;  %v5354_v48 = vsel %vm1695_vm10, %v5338_v34, %v19757_v15  ;;  %v5387_v13 = vsel %vm4007_vm13, %v5371_v10, %v16175_v40  ;;  %v6725_v9 = vsel %vm1661_vm4, %v16209_v60, %v19762_v16  ;;  %v19763_v34 = vld [vmem:[#allocation25_spill] sm:$0xff]  ;;  %v5373_v15 = vsel %vm3990_vm14, %v5357_v29, %v16163_v20  ;;  %v19767_v7 = vld [vmem:[#allocation19_spill] sm:$0xff]  ;;  %v19770_v29 = vld [vmem:[#allocation38_spill] sm:$0xff] }
 0x5f4   :  { %v16533_v62 = vpop.permute.xlu0 %6599  ;;  %11618 = vmatmul.mubr.msk.f32.gmra.mxu0 %vm4524_vm15, %v5384_v43  ;;  %v5370_v17 = vsel %vm3990_vm14, %v5354_v48, %v19758_v3  ;;  %v16581_v43 = vld [vmem:[#allocation3 + $0x1fe] sm:$0xff]  ;;  %v6790_v3 = vld [vmem:[%s19369_s5 + $0x148] sm:$0xff]  ;;  %v6035_v10 = vsel %vm1661_vm4, %v16512_v22, %v16205_v39 }
 0x5f5   :  { %6611 = vrot.lane.b32.xlu1 %v6580_v50, %s11897_s16  ;;  %11620 = vmatprep.mubr.msk.f32.mxu0 %vm4524_vm15, %v5385_v18  ;;  %v5386_v47 = vsel %vm4007_vm13, %v5370_v17, %v19759_v12  ;;  %v19760_v50 = vld [vmem:[#allocation59_spill] sm:$0xff]  ;;  %v5342_v40 = vsel %vm1661_vm4, %v16581_v43, %v16063_v25  ;;  %v6741_v25 = vsel %vm1695_vm10, %v6725_v9, %v19763_v34  ;;  %v19766_v12 = vld [vmem:[#allocation50_spill] sm:$0xff] }
 0x5f6   :  { %11682 = vmatpush3.msra.mxu0 %v6794_v23  ;;  %v6726_v58 = vsel %vm1661_vm4, %v16239_v8, %v19760_v50  ;;  %v5340_v23 = vsel %vm1661_vm4, %v16089_v61, %v15922_v21  ;;  %v6034_v8 = vsel %vm1661_vm4, %v15833_v28, %v19761_v56 }
 0x5f7   :  { %v16558_v38 = vpop.permute.xlu1 %6691  ;;  %11683 = vmatprep.subr.mxu0 %v6793_v30  ;;  %v5356_v21 = vsel %vm1695_vm10, %v5340_v23, %v15936_v46  ;;  %v5358_v46 = vsel %vm1695_vm10, %v5342_v40, %v16273_v36  ;;  %v6050_v1 = vsel %vm1695_vm10, %v6034_v8, %v16466_v32  ;;  %v6051_v23 = vsel %vm1695_vm10, %v6035_v10, %v16286_v49  ;;  %v19772_v40 = vld [vmem:[#allocation81_spill] sm:$0xff] }
 0x5f8   :  { %v16570_v54 = vpop.permute.xlu0 %5808  ;;  %11621 = vmatmul.mubr.msk.f32.gmra.mxu0 %vm4524_vm15, %v5386_v47  ;;  %v5372_v28 = vsel %vm3990_vm14, %v5356_v21, %v15968_v51  ;;  %v6066_v60 = vsel %vm3990_vm14, %v6050_v1, %v5899_v37  ;;  %v5389_v51 = vsel %vm4007_vm13, %v5373_v15, %v16406_v24  ;;  %v5374_v20 = vsel %vm3990_vm14, %v5358_v46, %v16075_v11  ;;  %v19764_v37 = vld [vmem:[#allocation60_spill] sm:$0xff]  ;;  %v19771_v21 = vld [vmem:[#allocation51_spill] sm:$0xff]  ;;  %v19774_v46 = vld [vmem:[#allocation13_spill] sm:$0xff] }
 0x5f9   :  { %6707 = vrot.lane.b32.xlu1 %v6676_v55, %s11898_s22  ;;  %11623 = vmatprep.mubr.msk.f32.mxu0 %vm4524_vm15, %v5387_v13  ;;  %v5388_v18 = vsel %vm4007_vm13, %v5372_v28, %v16073_v27  ;;  %v6791_v27 = vld [vmem:[%s19369_s5 + $0x150] sm:$0xff]  ;;  %v6742_v24 = vsel %vm1695_vm10, %v6726_v58, %v19764_v37  ;;  %v5390_v11 = vsel %vm4007_vm13, %v5374_v20, %v16085_v44  ;;  %v6789_v55 = vld [vmem:[%s19369_s5 + $0x140] sm:$0xff]  ;;  %v19777_v15 = vmov 0.0   ;;  %s11899_s5 = smov 96  }
 0x5fa   :  { %11684 = vmatpush3.msra.mxu0 %v6793_v30  ;;  %v19765_v30 = vld [vmem:[#allocation15_spill] sm:$0xff]  ;;  %v6758_v47 = vsel %vm3990_vm14, %v6742_v24, %v19766_v12  ;;  %v19768_v58 = vld [vmem:[#allocation37_spill] sm:$0xff]  ;;  %v6067_v56 = vsel %vm3990_vm14, %v6051_v23, %v16377_v52  ;;  %v19780_v37 = vld [vmem:[#allocation98_spill] sm:$0xff]  ;;  %7053 = vst.msk [vmem:[#allocation4 + $0x28] sm:$0x3] %vm7049_vm0, %v19777_v15 }
 0x5fb   :  { %v5995_v48 = vpop.permute.xlu1 %5994  ;;  %11685 = vmatprep.subr.mxu0 %v6792_v6  ;;  %v6757_v33 = vsel %vm3990_vm14, %v6741_v25, %v19765_v30  ;;  %v6727_v44 = vsel %vm1661_vm4, %v16281_v19, %v19768_v58  ;;  %v19769_v13 = vld [vmem:[#allocation31_spill] sm:$0xff]  ;;  %v19786_v58 = vld [vmem:[#allocation12_spill] sm:$0xff]  ;;  %7050 = vst.msk [vmem:[#allocation4 + $0x10] sm:$0x3] %vm7049_vm0, %v19777_v15  ;;  %7056 = vst.msk [vmem:[#allocation4 + $0x130] sm:$0x3] %vm7049_vm0, %v19777_v15 }
 0x5fc   :  { %v16606_v36 = vpop.permute.xlu0 %6409  ;;  %v6082_v32 = vsel %vm4007_vm13, %v6066_v60, %v5995_v48  ;;  %11624 = vmatmul.mubr.msk.f32.gmra.mxu0 %vm4524_vm15, %v5388_v18  ;;  %v6773_v50 = vsel %vm4007_vm13, %v6757_v33, %v19767_v7  ;;  %v6728_v39 = vsel %vm1661_vm4, %v16244_v59, %v19769_v13  ;;  %v19773_v59 = vld [vmem:[#allocation54_spill] sm:$0xff]  ;;  %v19775_v52 = vld [vmem:[#allocation83_spill] sm:$0xff]  ;;  %v19781_v33 = vld [vmem:[#allocation21_spill] sm:$0xff]  ;;  %7059 = vst.msk [vmem:[#allocation4 + $0x148] sm:$0x3] %vm7049_vm0, %v19777_v15 }
 0x5fd   :  { %11626 = vmatprep.mubr.msk.f32.mxu0 %vm4524_vm15, %v5389_v51  ;;  %11661 = vmatprep.mubr.msk.f32.mxu1 %vm4524_vm15, %v6082_v32  ;;  %v6744_v19 = vsel %vm1695_vm10, %v6728_v39, %v19771_v21  ;;  %v6774_v28 = vsel %vm4007_vm13, %v6758_v47, %v19773_v59  ;;  %v19776_v25 = vld [vmem:[#allocation91_spill] sm:$0xff]  ;;  %v19784_v47 = vld [vmem:[#allocation80_spill] sm:$0xff]  ;;  %v19785_v7 = vld [vmem:[#allocation82_spill] sm:$0xff]  ;;  %v6733_v21 = vsel %vm1661_vm4, %v16512_v22, %v16325_v4 }
 0x5fe   :  { %11686 = vmatpush3.msra.mxu0 %v6792_v6  ;;  %v6743_v6 = vsel %vm1695_vm10, %v6727_v44, %v19770_v29  ;;  %v6760_v1 = vsel %vm3990_vm14, %v6744_v19, %v19774_v46  ;;  %v6729_v18 = vsel %vm1661_vm4, %v16341_v45, %v19776_v25  ;;  %v19778_v60 = vld [vmem:[#allocation95_spill] sm:$0xff]  ;;  %v19787_v13 = vld [vmem:[#allocation90_spill] sm:$0xff]  ;;  %7063 = vst.msk [vmem:[#allocation4 + $0x100] sm:$0x3] %vm7049_vm0, %v19777_v15  ;;  %7069 = vst.msk [vmem:[#allocation4 + $0x220] sm:$0x3] %vm7049_vm0, %v19777_v15 }
 0x5ff   :  { %11687 = vmatprep.subr.mxu0 %v6791_v27  ;;  %v6502_v17 = vpop.permute.xlu1 %6501  ;;  %v6759_v49 = vsel %vm3990_vm14, %v6743_v6, %v19772_v40  ;;  %v6745_v48 = vsel %vm1695_vm10, %v6729_v18, %v19778_v60  ;;  %v11833_v32 = vld [vmem:[#allocation3 + $0xf6] sm:$0xff]  ;;  %v6776_v45 = vsel %vm4007_vm13, %v6760_v1, %v19781_v33  ;;  %v11834_v6 = vld [vmem:[#allocation3 + $0x10e] sm:$0xff]  ;;  %7074 = vst.msk [vmem:[#allocation4 + $0x36] sm:$0x3] %vm7049_vm0, %v19777_v15  ;;  %7075 = vst.msk [vmem:[#allocation4 + $0x4e] sm:$0x3] %vm7049_vm0, %v19777_v15 }
 0x600   :  { %v16624_v63 = vpop.permute.xlu0 %5904  ;;  %11688 = vmatpush3.msra.mxu0 %v6791_v27  ;;  %v6775_v34 = vsel %vm4007_vm13, %v6759_v49, %v19775_v52  ;;  %v19779_v27 = vld [vmem:[#allocation70_spill] sm:$0xff]  ;;  %v6761_v24 = vsel %vm3990_vm14, %v6745_v48, %v19780_v37  ;;  %v11835_v52 = vld [vmem:[#allocation3 + $0x19e] sm:$0xff]  ;;  %7076 = vst.msk [vmem:[#allocation4 + $0x66] sm:$0x3] %vm7049_vm0, %v19777_v15  ;;  %7077 = vst.msk [vmem:[#allocation4 + $0x7e] sm:$0x3] %vm7049_vm0, %v19777_v15 }
 0x601   :  { %11627 = vmatmul.mubr.msk.f32.gmra.mxu0 %vm4524_vm15, %v5390_v11  ;;  %11689 = vmatprep.subr.mxu0 %v6790_v3  ;;  %v6731_v20 = vsel %vm1661_vm4, %v11833_v32, %v19779_v27  ;;  %v19789_v40 = vld [vmem:[#allocation110_spill] sm:$0xff]  ;;  %7078 = vst.msk [vmem:[#allocation4 + $0x96] sm:$0x3] %vm7049_vm0, %v19777_v15  ;;  %7079 = vst.msk [vmem:[#allocation4 + $0xae] sm:$0x3] %vm7049_vm0, %v19777_v15 }
 0x602   :  { %11690 = vmatpush3.msra.mxu0 %v6790_v3  ;;  %11693 = vmatprep.mubr.msk.f32.mxu0 %vm4524_vm15, %v6773_v50  ;;  %v19782_v3 = vld [vmem:[#allocation48_spill] sm:$0xff]  ;;  %v6747_v44 = vsel %vm1695_vm10, %v6731_v20, %v19786_v58  ;;  %7080 = vst.msk [vmem:[#allocation4 + $0xc6] sm:$0x3] %vm7049_vm0, %v19777_v15  ;;  %7081 = vst.msk [vmem:[#allocation4 + $0xde] sm:$0x3] %vm7049_vm0, %v19777_v15 }
 0x603   :  { %11691 = vmatprep.subr.mxu0 %v6789_v55  ;;  %v5997_v8 = vpop.permute.xlu1 %5996  ;;  %v6730_v11 = vsel %vm1661_vm4, %v16357_v26, %v19782_v3  ;;  %v6763_v39 = vsel %vm3990_vm14, %v6747_v44, %v16433_v14  ;;  %v19790_v14 = vld [vmem:[#allocation71_spill] sm:$0xff]  ;;  %7082 = vst.msk [vmem:[#allocation4 + $0x156] sm:$0x3] %vm7049_vm0, %v19777_v15  ;;  %7083 = vst.msk [vmem:[#allocation4 + $0x16e] sm:$0x3] %vm7049_vm0, %v19777_v15 }
 0x604   :  { %v16656_v16 = vpop.permute.xlu0 %6411  ;;  %11692 = vmatpush3.msra.mxu0 %v6789_v55  ;;  %v6083_v9 = vsel %vm4007_vm13, %v6067_v56, %v5997_v8  ;;  %v19783_v55 = vld [vmem:[#allocation100_spill] sm:$0xff]  ;;  %v6746_v10 = vsel %vm1695_vm10, %v6730_v11, %v19784_v47  ;;  %v6779_v19 = vsel %vm4007_vm13, %v6763_v39, %v16498_v31  ;;  %7084 = vst.msk [vmem:[#allocation4 + $0x186] sm:$0x3] %vm7049_vm0, %v19777_v15  ;;  %7085 = vst.msk [vmem:[#allocation4 + $0x19e] sm:$0x3] %vm7049_vm0, %v19777_v15 }
 0x605   :  { %11694 = vmatmul.mubr.msk.f32.vlgmr.msra.gmra.mxu0 %vm4524_vm15, %v6774_v28  ;;  %11662 = vmatmul.mubr.msk.f32.gmra.mxu1 %vm4524_vm15, %v6083_v9  ;;  %v6777_v12 = vsel %vm4007_vm13, %v6761_v24, %v19783_v55  ;;  %v6762_v50 = vsel %vm3990_vm14, %v6746_v10, %v19785_v7  ;;  %v19788_v56 = vld [vmem:[#allocation52_spill] sm:$0xff]  ;;  %v6749_v9 = vsel %vm1695_vm10, %v6733_v21, %v6502_v17 }
 0x606   :  { %11696 = vmatprep.mubr.msk.f32.mxu0 %vm4524_vm15, %v6775_v34  ;;  %7680 = vmatprep.subr.mxu0 %v19777_v15  ;;  %v6778_v26 = vsel %vm4007_vm13, %v6762_v50, %v19787_v13  ;;  %v6732_v8 = vsel %vm1661_vm4, %v11834_v6, %v19788_v56  ;;  %v6734_v34 = vsel %vm1661_vm4, %v11835_v52, %v16412_v42 }
 0x607   :  { %v6598_v51 = vpop.permute.xlu1 %6597  ;;  %v6748_v49 = vsel %vm1695_vm10, %v6732_v8, %v19789_v40  ;;  %v6750_v25 = vsel %vm1695_vm10, %v6734_v34, %v16474_v53  ;;  %7086 = vst.msk [vmem:[#allocation4 + $0x1b6] sm:$0x3] %vm7049_vm0, %v19777_v15  ;;  %7087 = vst.msk [vmem:[#allocation4 + $0x1ce] sm:$0x3] %vm7049_vm0, %v19777_v15 }
 0x608   :  { %v16678_v30 = vpop.permute.xlu0 %5714  ;;  %v6764_v59 = vsel %vm3990_vm14, %v6748_v49, %v19790_v14  ;;  %v6765_v28 = vsel %vm3990_vm14, %v6749_v9, %v6598_v51  ;;  %v6036_v51 = vsel %vm1661_vm4, %v11835_v52, %v16441_v0  ;;  %v6037_v0 = vsel %vm1661_vm4, %v16214_v35, %v16504_v2  ;;  %7088 = vst.msk [vmem:[#allocation4 + $0x1e6] sm:$0x3] %vm7049_vm0, %v19777_v15  ;;  %v7169_v14 = vld [vmem:[#allocation4 + $0x1f] ss:$2 sm:$0x3f] }
 0x609   :  { %11697 = vmatmul.mubr.msk.f32.gmra.mxu0 %vm4524_vm15, %v6776_v45  ;;  %v6780_v4 = vsel %vm4007_vm13, %v6764_v59, %v16558_v38  ;;  %v6766_v38 = vsel %vm3990_vm14, %v6750_v25, %v16533_v62  ;;  %v6053_v24 = vsel %vm1695_vm10, %v6037_v0, %v16570_v54  ;;  %v6735_v2 = vsel %vm1661_vm4, %v16214_v35, %v16606_v36  ;;  %v16870_v59 = vld [vmem:[#allocation4 + $0x1e] ss:$2 sm:$0x3f]  ;;  %v7191_v25 = vld [vmem:[#allocation4 + $0x13f] ss:$2 sm:$0x3f] }
 0x60a   :  { %11699 = vmatprep.mubr.msk.f32.mxu0 %vm4524_vm15, %v6777_v12  ;;  %v6069_v33 = vsel %vm3990_vm14, %v6053_v24, %v16624_v63  ;;  %7089 = vst.msk [vmem:[#allocation4 + $0x1fe] sm:$0x3] %vm7049_vm0, %v19777_v15  ;;  %7090 = vst.msk [vmem:[#allocation4 + $0x40] sm:$0x3] %vm7049_vm0, %v19777_v15  ;;  %7391 = vrot.lane.b32.xlu0 %v7169_v14, %s11895_s24  ;;  %v16895_v24 = vpop.f32.mrf.mxu1 }
 0x60b   :  { %v5807_v23 = vpop.permute.xlu1 %5806  ;;  %7091 = vst.msk [vmem:[#allocation4 + $0x58] sm:$0x3] %vm7049_vm0, %v19777_v15  ;;  %7092 = vst.msk [vmem:[#allocation4 + $0x70] sm:$0x3] %vm7049_vm0, %v19777_v15 }
 0x60c   :  { %v6508_v29 = vpop.permute.xlu0 %6507  ;;  %v6052_v32 = vsel %vm1695_vm10, %v6036_v51, %v5807_v23  ;;  %v6736_v23 = vsel %vm1661_vm4, %v16089_v61, %v16656_v16  ;;  %7093 = vst.msk [vmem:[#allocation4 + $0x88] sm:$0x3] %vm7049_vm0, %v19777_v15  ;;  %7094 = vst.msk [vmem:[#allocation4 + $0xa0] sm:$0x3] %vm7049_vm0, %v19777_v15  ;;  %v6038_v16 = vsel %vm1661_vm4, %v16089_v61, %v16678_v30 }
 0x60d   :  { %11700 = vmatmul.mubr.msk.f32.gmra.mxu0 %vm4524_vm15, %v6778_v26  ;;  %v6752_v13 = vsel %vm1695_vm10, %v6736_v23, %v6508_v29  ;;  %7095 = vst.msk [vmem:[#allocation4 + $0xb8] sm:$0x3] %vm7049_vm0, %v19777_v15  ;;  %7096 = vst.msk [vmem:[#allocation4 + $0xd0] sm:$0x3] %vm7049_vm0, %v19777_v15 }
 0x60e   :  { %11702 = vmatprep.mubr.msk.f32.mxu0 %vm4524_vm15, %v6779_v19  ;;  %7097 = vst.msk [vmem:[#allocation4 + $0xe8] sm:$0x3] %vm7049_vm0, %v19777_v15  ;;  %7098 = vst.msk [vmem:[#allocation4 + $0x160] sm:$0x3] %vm7049_vm0, %v19777_v15 }
 0x60f   :  { %v6694_v46 = vpop.permute.xlu1 %6693  ;;  %7099 = vst.msk [vmem:[#allocation4 + $0x178] sm:$0x3] %vm7049_vm0, %v19777_v15  ;;  %7100 = vst.msk [vmem:[#allocation4 + $0x190] sm:$0x3] %vm7049_vm0, %v19777_v15 }
 0x610   :  { %v16716_v22 = vpop.permute.xlu0 %5716  ;;  %v6781_v31 = vsel %vm4007_vm13, %v6765_v28, %v6694_v46  ;;  %7101 = vst.msk [vmem:[#allocation4 + $0x1a8] sm:$0x3] %vm7049_vm0, %v19777_v15  ;;  %7102 = vst.msk [vmem:[#allocation4 + $0x1c0] sm:$0x3] %vm7049_vm0, %v19777_v15  ;;  %v7423_v46 = vrot.slane %v16870_v59, 1 }
 0x611   :  { %11703 = vmatmul.mubr.msk.f32.gmra.mxu0 %vm4524_vm15, %v6780_v4  ;;  %7103 = vst.msk [vmem:[#allocation4 + $0x1d8] sm:$0x3] %vm7049_vm0, %v19777_v15  ;;  %7104 = vst.msk [vmem:[#allocation4 + $0x1f0] sm:$0x3] %vm7049_vm0, %v19777_v15  ;;  %v6039_v29 = vsel %vm1661_vm4, %v16327_v57, %v16716_v22 }
 0x612   :  { %11705 = vmatprep.mubr.msk.f32.mxu0 %vm4524_vm15, %v6781_v31  ;;  %7105 = vst.msk [vmem:[#allocation4 + $0x208] sm:$0x3] %vm7049_vm0, %v19777_v15  ;;  %7431 = vrot.lane.b32.xlu0 %v7423_v46, %s11898_s22 }
 0x613   :  { %v5903_v17 = vpop.permute.xlu1 %5902  ;;  %8287 = vst.msk [vmem:[#allocation5 + $0x18] sm:$0x3f] %vm8284_vm2, %v19777_v15  ;;  %8285 = vst.msk [vmem:[#allocation5 + $0x8] sm:$0x3f] %vm8284_vm2, %v19777_v15 }
 0x614   :  { %v6604_v1 = vpop.permute.xlu0 %6603  ;;  %v6068_v42 = vsel %vm3990_vm14, %v6052_v32, %v5903_v17  ;;  %v7455_v17 = vrot.slane %v7169_v14, 1  ;;  %v7147_v32 = vld [vmem:[#allocation4 + $0x13e] ss:$2 sm:$0x3f]  ;;  %8289 = vst.msk [vmem:[#allocation5 + $0x88] sm:$0x3f] %vm8284_vm2, %v19777_v15 }
 0x615   :  { %v6768_v35 = vsel %vm3990_vm14, %v6752_v13, %v6604_v1  ;;  %8291 = vst.msk [vmem:[#allocation5 + $0x98] sm:$0x3f] %vm8284_vm2, %v19777_v15  ;;  %8294 = vst.msk [vmem:[#allocation5 + $0x68] sm:$0x3f] %vm8284_vm2, %v19777_v15 }
 0x616   :  { %7463 = vrot.lane.b32.xlu0 %v7455_v17, %s11899_s5  ;;  %8296 = vst.msk [vmem:[#allocation5 + $0x78] sm:$0x3f] %vm8284_vm2, %v19777_v15  ;;  %8298 = vst.msk [vmem:[#allocation5 + $0xe8] sm:$0x3f] %vm8284_vm2, %v19777_v15 }
 0x617   :  { %v6696_v18 = vpop.permute.xlu1 %6695  ;;  %8300 = vst.msk [vmem:[#allocation5 + $0xf8] sm:$0x3f] %vm8284_vm2, %v19777_v15 }
 0x618   :  { %v16727_v60 = vpop.permute.xlu0 %5812  ;;  %v6782_v48 = vsel %vm4007_vm13, %v6766_v38, %v6696_v18  ;;  %8303 = vst.msk [vmem:[#allocation5 + $0x26] sm:$0x3] %vm8302_vm3, %v19777_v15  ;;  %8311 = vst.msk [vmem:[#allocation5 + $0x2c] sm:$0x3] %vm8302_vm3, %v19777_v15 }
 0x619   :  { %11706 = vmatmul.mubr.msk.f32.gmra.mxu0 %vm4524_vm15, %v6782_v48  ;;  %v6055_v56 = vsel %vm1695_vm10, %v6039_v29, %v16727_v60  ;;  %8304 = vst.msk [vmem:[#allocation5 + $0x36] sm:$0x3] %vm8302_vm3, %v19777_v15  ;;  %8305 = vst.msk [vmem:[#allocation5 + $0x46] sm:$0x3] %vm8302_vm3, %v19777_v15 }
 0x61a   :  { %7399 = vrot.lane.b32.xlu0 %v7191_v25, %s11895_s24  ;;  %8306 = vst.msk [vmem:[#allocation5 + $0x56] sm:$0x3] %vm8302_vm3, %v19777_v15  ;;  %8307 = vst.msk [vmem:[#allocation5 + $0xa6] sm:$0x3] %vm8302_vm3, %v19777_v15 }
 0x61b   :  { %v5999_v27 = vpop.permute.xlu1 %5998  ;;  %8308 = vst.msk [vmem:[#allocation5 + $0xb6] sm:$0x3] %vm8302_vm3, %v19777_v15  ;;  %8309 = vst.msk [vmem:[#allocation5 + $0xc6] sm:$0x3] %vm8302_vm3, %v19777_v15 }
 0x61c   :  { %v16735_v20 = vpop.permute.xlu0 %6413  ;;  %v6084_v53 = vsel %vm4007_vm13, %v6068_v42, %v5999_v27  ;;  %v7427_v27 = vrot.slane %v7147_v32, 1  ;;  %8310 = vst.msk [vmem:[#allocation5 + $0xd6] sm:$0x3] %vm8302_vm3, %v19777_v15  ;;  %8312 = vst.msk [vmem:[#allocation5 + $0x3c] sm:$0x3] %vm8302_vm3, %v19777_v15 }
 0x61d   :  { %11664 = vmatprep.mubr.msk.f32.mxu1 %vm4524_vm15, %v6084_v53  ;;  %v6737_v49 = vsel %vm1661_vm4, %v16327_v57, %v16735_v20  ;;  %v7459_v20 = vrot.slane %v7191_v25, 1  ;;  %8313 = vst.msk [vmem:[#allocation5 + $0x4c] sm:$0x3] %vm8302_vm3, %v19777_v15  ;;  %8314 = vst.msk [vmem:[#allocation5 + $0x5c] sm:$0x3] %vm8302_vm3, %v19777_v15 }
 0x61e   :  { %7439 = vrot.lane.b32.xlu0 %v7427_v27, %s11898_s22  ;;  %8315 = vst.msk [vmem:[#allocation5 + $0xac] sm:$0x3] %vm8302_vm3, %v19777_v15  ;;  %8316 = vst.msk [vmem:[#allocation5 + $0xbc] sm:$0x3] %vm8302_vm3, %v19777_v15 }
 0x61f   :  { %v6506_v62 = vpop.permute.xlu1 %6505  ;;  %8317 = vst.msk [vmem:[#allocation5 + $0xcc] sm:$0x3] %vm8302_vm3, %v19777_v15  ;;  %8318 = vst.msk [vmem:[#allocation5 + $0xdc] sm:$0x3] %vm8302_vm3, %v19777_v15 }
 0x620   :  { %v16739_v37 = vpop.permute.xlu0 %5908  ;;  %v6751_v54 = vsel %vm1695_vm10, %v6735_v2, %v6506_v62 }
 0x621   :  { %v6071_v19 = vsel %vm3990_vm14, %v6055_v56, %v16739_v37 }
 0x622   :  { %7471 = vrot.lane.b32.xlu0 %v7459_v20, %s11899_s5 }
 0x623   :  { %v6001_v45 = vpop.permute.xlu1 %6000 }
 0x624   :  { %v16748_v3 = vpop.permute.xlu0 %6415  ;;  %v6085_v11 = vsel %vm4007_vm13, %v6069_v33, %v6001_v45  ;;  %v7167_v33 = vld [vmem:[#allocation4 + $0x7] ss:$2 sm:$0x3f] }
 0x625   :  { %11665 = vmatmul.mubr.msk.f32.gmra.mxu1 %vm4524_vm15, %v6085_v11  ;;  %v6738_v34 = vsel %vm1661_vm4, %v16581_v43, %v16748_v3  ;;  %v7282_v3 = vrot.slane %v7167_v33, 1 }
 0x626   :  { %7218 = vrot.lane.b32.xlu0 %v7167_v33, %s11895_s24 }
 0x627   :  { %v6602_v55 = vpop.permute.xlu1 %6601  ;;  %7290 = vrot.lane.b32.xlu1 %v7282_v3, %s11899_s5 }
 0x628   :  { %v16752_v12 = vpop.permute.xlu0 %6004  ;;  %v6767_v63 = vsel %vm3990_vm14, %v6751_v54, %v6602_v55  ;;  %v16908_v54 = vld [vmem:[#allocation4 + $0x6] ss:$2 sm:$0x3f] }
 0x629   :  { %v6087_v61 = vsel %vm4007_vm13, %v6071_v19, %v16752_v12 }
 0x62b   :  { %v5811_v47 = vpop.permute.xlu1 %5810 }
 0x62c   :  { %v16754_v10 = vpop.permute.xlu0 %6605  ;;  %v6054_v6 = vsel %vm1695_vm10, %v6038_v16, %v5811_v47  ;;  %v16903_v47 = vpop.f32.mrf.mxu1 }
 0x62f   :  { %v6698_v7 = vpop.permute.xlu1 %6697 }
 0x630   :  { %v6783_v50 = vsel %vm4007_vm13, %v6767_v63, %v6698_v7  ;;  %v16762_v58 = vpop.permute.xlu0 %6701 }
 0x631   :  { %11708 = vmatprep.mubr.msk.f32.mxu0 %vm4524_vm15, %v6783_v50 }
 0x633   :  { %v5907_v44 = vpop.permute.xlu1 %5906 }
 0x634   :  { %v16770_v36 = vpop.permute.xlu0 %5718  ;;  %v6070_v8 = vsel %vm3990_vm14, %v6054_v6, %v5907_v44 }
 0x635   :  { %v6040_v55 = vsel %vm1661_vm4, %v16581_v43, %v16770_v36  ;;  %v7250_v43 = vrot.slane %v16908_v54, 1 }
 0x637   :  { %v6700_v26 = vpop.permute.xlu1 %6699  ;;  %7258 = vrot.lane.b32.xlu0 %v7250_v43, %s11898_s22 }
 0x638   :  { %v6784_v39 = vsel %vm4007_vm13, %v6768_v35, %v6700_v26  ;;  %v5815_v30 = vpop.permute.xlu0 %5814 }
 0x639   :  { %11709 = vmatmul.mubr.msk.f32.gmra.mxu0 %vm4524_vm15, %v6784_v39  ;;  %v6056_v2 = vsel %vm1695_vm10, %v6040_v55, %v5815_v30  ;;  %v7549_v55 = vld [vmem:[%s19371_s7 + $0x110] sm:$0xff] }
 0x63b   :  { %v6003_v21 = vpop.permute.xlu1 %6002 }
 0x63c   :  { %v6086_v40 = vsel %vm4007_vm13, %v6070_v8, %v6003_v21  ;;  %v5911_v31 = vpop.permute.xlu0 %5910 }
 0x63d   :  { %11667 = vmatprep.mubr.msk.f32.mxu1 %vm4524_vm15, %v6086_v40  ;;  %v6072_v63 = vsel %vm3990_vm14, %v6056_v2, %v5911_v31 }
 0x63e   :  { %11668 = vmatmul.mubr.msk.f32.gmra.mxu1 %vm4524_vm15, %v6087_v61 }
 0x63f   :  { %v6510_v9 = vpop.permute.xlu1 %6509 }
 0x640   :  { %v6753_v28 = vsel %vm1695_vm10, %v6737_v49, %v6510_v9  ;;  %v5913_v52 = vpop.permute.xlu0 %5912 }
 0x641   :  { %v6769_v4 = vsel %vm3990_vm14, %v6753_v28, %v16754_v10  ;;  %v16905_v10 = vpop.f32.mrf.mxu0 }
 0x642   :  { %v6785_v22 = vsel %vm4007_vm13, %v6769_v4, %v16762_v58  ;;  %v16913_v58 = vpop.f32.mrf.mxu1 }
 0x643   :  { %11711 = vmatprep.mubr.msk.f32.mxu0 %vm4524_vm15, %v6785_v22  ;;  %v6512_v57 = vpop.permute.xlu1 %6511  ;;  %v16920_v13 = vpop.f32.mrf.mxu0 }
 0x644   :  { %v6754_v38 = vsel %vm1695_vm10, %v6738_v34, %v6512_v57  ;;  %v6420_v51 = vpop.permute.xlu0 %6419  ;;  %v16923_v26 = vpop.f32.mrf.mxu1 }
 0x645   :  { %v16925_v39 = vpop.f32.mrf.mxu0  ;;  %v6740_v56 = vsel %vm1661_vm4, %v16167_v5, %v6420_v51 }
 0x646   :  { %v16929_v6 = vpop.f32.mrf.mxu1 }
 0x647   :  { %v6608_v1 = vpop.permute.xlu1 %6607  ;;  %v16935_v21 = vpop.f32.mrf.mxu0 }
 0x648   :  { %v6770_v18 = vsel %vm3990_vm14, %v6754_v38, %v6608_v1  ;;  %v6009_v37 = vpop.permute.xlu0 %6008  ;;  %v16937_v19 = vpop.f32.mrf.mxu1 }
 0x649   :  { %v16939_v40 = vpop.f32.mrf.mxu0 }
 0x64a   :  { %v16942_v49 = vpop.f32.mrf.mxu1 }
 0x64b   :  { %v6704_v60 = vpop.permute.xlu1 %6703  ;;  %v16945_v14 = vpop.f32.mrf.mxu0 }
 0x64c   :  { %v6786_v48 = vsel %vm4007_vm13, %v6770_v18, %v6704_v60  ;;  %v6610_v12 = vpop.permute.xlu0 %6609  ;;  %v16947_v5 = vpop.f32.mrf.mxu1 }
 0x64d   :  { %11712 = vmatmul.mubr.msk.f32.gmra.mxu0 %vm4524_vm15, %v6786_v48  ;;  %v16949_v46 = vpop.f32.mrf.mxu0 }
 0x64e   :  { %v16953_v22 = vpop.f32.mrf.mxu1 }
 0x64f   :  { %v5721_v42 = vpop.permute.xlu1 %5720  ;;  %v16955_v31 = vpop.f32.mrf.mxu0 }
 0x650   :  { %v6041_v53 = vsel %vm1661_vm4, %v16157_v41, %v5721_v42  ;;  %v6706_v36 = vpop.permute.xlu0 %6705  ;;  %v16959_v17 = vpop.f32.mrf.mxu1 }
 0x651   :  { %v16957_v57 = vpop.f32.mrf.mxu0 }
 0x653   :  { %v5817_v62 = vpop.permute.xlu1 %5816  ;;  %v16961_v1 = vpop.f32.mrf.mxu0 }
 0x654   :  { %v6057_v0 = vsel %vm1695_vm10, %v6041_v53, %v5817_v62 }
 0x655   :  { %v6073_v11 = vsel %vm3990_vm14, %v6057_v0, %v5913_v52  ;;  %v16963_v52 = vpop.f32.mrf.mxu1  ;;  %v16965_v34 = vpop.f32.mrf.mxu0 }
 0x656   :  { %v6089_v50 = vsel %vm4007_vm13, %v6073_v11, %v6009_v37  ;;  %v7550_v11 = vld [vmem:[%s19371_s7 + $0x118] sm:$0xff] }
 0x657   :  { %v6418_v45 = vpop.permute.xlu1 %6417  ;;  %v16967_v25 = vpop.f32.mrf.mxu1  ;;  %7576 = vmatpush1.msra.mxu1 %v7550_v11  ;;  %v7373_v11 = vld [vmem:[%s19371_s7 + $0x50] sm:$0xff] }
 0x658   :  { %v6739_v23 = vsel %vm1661_vm4, %v16157_v41, %v6418_v45  ;;  %v16969_v38 = vpop.f32.mrf.mxu0  ;;  %7577 = vmatprep.subr.mxu1 %v19777_v15  ;;  %vm8319_vm4 = vcmask 519168  }
 0x659   :  { %7578 = vmatpush1.msra.mxu1 %v7549_v55  ;;  %v7541_v55 = vld [vmem:[%s19371_s7 + $0xd0] sm:$0xff] }
 0x65a   :  { %7579 = vmatprep.subr.mxu1 %v19777_v15 }
 0x65b   :  { %v6007_v7 = vpop.permute.xlu1 %6006 }
 0x65c   :  { %v6088_v44 = vsel %vm4007_vm13, %v6072_v63, %v6007_v7 }
 0x65d   :  { %11670 = vmatprep.mubr.msk.f32.mxu1 %vm4524_vm15, %v6088_v44  ;;  %v7548_v44 = vld [vmem:[%s19371_s7 + $0x108] sm:$0xff] }
 0x65e   :  { %11671 = vmatmul.mubr.msk.f32.gmra.mxu1 %vm4524_vm15, %v6089_v50 }
 0x65f   :  { %v6514_v35 = vpop.permute.xlu1 %6513  ;;  %7580 = vmatpush1.msra.mxu1 %v7548_v44  ;;  %v7372_v44 = vld [vmem:[%s19371_s7 + $0x48] sm:$0xff] }
 0x660   :  { %v6755_v16 = vsel %vm1695_vm10, %v6739_v23, %v6514_v35  ;;  %7581 = vmatprep.subr.mxu1 %v19777_v15 }
 0x661   :  { %v6771_v29 = vsel %vm3990_vm14, %v6755_v16, %v6610_v12  ;;  %v7546_v16 = vld [vmem:[%s19371_s7 + $0xf8] sm:$0xff] }
 0x662   :  { %v6787_v41 = vsel %vm4007_vm13, %v6771_v29, %v6706_v36  ;;  %v11581_v18 = vpop.f32.mrf.mxu1  ;;  %v7547_v36 = vld [vmem:[%s19371_s7 + $0x100] sm:$0xff]  ;;  %v7378_v29 = vld [vmem:[%s19371_s7 + $0x78] sm:$0xff] }
 0x663   :  { %v6516_v8 = vpop.permute.xlu1 %6515  ;;  %11714 = vmatprep.mubr.msk.f32.mxu0 %vm4524_vm15, %v6787_v41  ;;  %7582 = vmatpush1.msra.mxu1 %v7547_v36  ;;  %v7377_v41 = vld [vmem:[%s19371_s7 + $0x70] sm:$0xff] }
 0x664   :  { %v6756_v61 = vsel %vm1695_vm10, %v6740_v56, %v6516_v8  ;;  %v4892_v51 = vpop.f32.mrf.mxu1  ;;  %7681 = vmatpush1.msra.mxu0 %v7378_v29  ;;  %7583 = vmatprep.subr.mxu1 %v19777_v15  ;;  %v7545_v8 = vld [vmem:[%s19371_s7 + $0xf0] sm:$0xff]  ;;  %v7371_v29 = vld [vmem:[%s19371_s7 + $0x40] sm:$0xff] }
 0x665   :  { %7682 = vmatprep.subr.mxu0 %v19777_v15  ;;  %7584 = vmatpush1.msra.mxu1 %v7546_v16  ;;  %v7540_v16 = vld [vmem:[%s19371_s7 + $0xc8] sm:$0xff] }
 0x666   :  { %7683 = vmatpush1.msra.mxu0 %v7377_v41  ;;  %7585 = vmatprep.subr.mxu1 %v19777_v15 }
 0x667   :  { %v6612_v30 = vpop.permute.xlu1 %6611  ;;  %7684 = vmatprep.subr.mxu0 %v19777_v15  ;;  %7586 = vmatpush1.msra.mxu1 %v7545_v8  ;;  %v7539_v8 = vld [vmem:[%s19371_s7 + $0xc0] sm:$0xff] }
 0x668   :  { %v6772_v9 = vsel %vm3990_vm14, %v6756_v61, %v6612_v30  ;;  %v7376_v61 = vld [vmem:[%s19371_s7 + $0x68] sm:$0xff]  ;;  %7587 = vmatprep.subr.mxu1 %v19777_v15 }
 0x669   :  { %7685 = vmatpush1.msra.mxu0 %v7376_v61 }
 0x66a   :  { %7686 = vmatprep.subr.mxu0 %v19777_v15 }
 0x66b   :  { %v6708_v28 = vpop.permute.xlu1 %6707 }
 0x66c   :  { %v6788_v4 = vsel %vm4007_vm13, %v6772_v9, %v6708_v28  ;;  %v7544_v28 = vld [vmem:[%s19371_s7 + $0xe8] sm:$0xff] }
 0x66d   :  { %11715 = vmatmul.mubr.msk.f32.gmra.mxu0 %vm4524_vm15, %v6788_v4  ;;  %v7375_v4 = vld [vmem:[%s19371_s7 + $0x60] sm:$0xff]  ;;  %7588 = vmatpush1.msra.mxu1 %v7544_v28 }
 0x66e   :  { %7687 = vmatpush1.msra.mxu0 %v7375_v4  ;;  %7589 = vmatprep.subr.mxu1 %v19777_v15 }
 0x66f   :  { %7688 = vmatprep.subr.mxu0 %v19777_v15 }
 0x67e   :  { %v11537_v60 = vpop.f32.mrf.mxu0 }
 0x67f   :  { %v4898_v48 = vadd.f32 %v11581_v18, %v11537_v60  ;;  %v7543_v60 = vld [vmem:[%s19371_s7 + $0xe0] sm:$0xff] }
 0x680   :  { %v4699_v32 = vpop.f32.mrf.mxu0  ;;  %7590 = vmatpush1.msra.mxu1 %v7543_v60 }
 0x681   :  { %v16971_v42 = vadd.f32 %v4892_v51, %v4699_v32  ;;  %v7374_v51 = vld [vmem:[%s19371_s7 + $0x58] sm:$0xff]  ;;  %7591 = vmatprep.subr.mxu1 %v19777_v15 }
 0x682   :  { %7689 = vmatpush1.msra.mxu0 %v7374_v51 }
 0x683   :  { %7690 = vmatprep.subr.mxu0 %v19777_v15 }
 0x684   :  { %7691 = vmatpush1.msra.mxu0 %v7373_v11 }
 0x685   :  { %7692 = vmatprep.subr.mxu0 %v19777_v15 }
 0x686   :  { %7693 = vmatpush1.msra.mxu0 %v7372_v44  ;;  %v7536_v44 = vld [vmem:[%s19371_s7 + $0xa8] sm:$0xff] }
 0x687   :  { %7694 = vmatprep.subr.mxu0 %v19777_v15 }
 0x688   :  { %7695 = vmatpush1.msra.mxu0 %v7371_v29  ;;  %v7535_v29 = vld [vmem:[%s19371_s7 + $0xa0] sm:$0xff] }
 0x689   :  { %7696 = vmatprep.subr.mxu0 %v19777_v15 }
 0x696   :  { %v11584_v27 = vpop.f32.mrf.mxu1 }
 0x698   :  { %v4902_v62 = vpop.f32.mrf.mxu1 }
 0x69a   :  { %v17004_v23 = vpop.f32.mrf.mxu1 }
 0x69c   :  { %v17031_v30 = vpop.f32.mrf.mxu1 }
 0x69e   :  { %v11654_v32 = vpop.f32.mrf.mxu1 }
 0x6a0   :  { %v11540_v20 = vpop.f32.mrf.mxu0 }
 0x6a1   :  { %v16973_v53 = vadd.f32 %v11584_v27, %v11540_v20  ;;  %v4838_v20 = vadd.f32 %v16895_v24, %v16905_v10  ;;  %v4833_v24 = vadd.f32 %v16903_v47, %v16920_v13  ;;  %v4848_v47 = vadd.f32 %v16913_v58, %v16925_v39 }
 0x6a2   :  { %v4709_v37 = vpop.f32.mrf.mxu0  ;;  %v4843_v58 = vadd.f32 %v16923_v26, %v16935_v21  ;;  %v7370_v26 = vld [vmem:[%s19371_s7 + $0x38] sm:$0xff]  ;;  %v4858_v21 = vadd.f32 %v16929_v6, %v16939_v40  ;;  %v7369_v40 = vld [vmem:[%s19371_s7 + $0x30] sm:$0xff] }
 0x6a3   :  { %v16975_v0 = vadd.f32 %v4902_v62, %v4709_v37  ;;  %v7542_v37 = vld [vmem:[%s19371_s7 + $0xd8] sm:$0xff]  ;;  %7697 = vmatpush1.msra.mxu0 %v7370_v26 }
 0x6a4   :  { %v11607_v33 = vpop.f32.mrf.mxu0  ;;  %7592 = vmatpush1.msra.mxu1 %v7542_v37  ;;  %v7538_v6 = vld [vmem:[%s19371_s7 + $0xb8] sm:$0xff]  ;;  %7698 = vmatprep.subr.mxu0 %v19777_v15 }
 0x6a5   :  { %v5595_v10 = vadd.f32 %v11607_v33, %v4838_v20  ;;  %7593 = vmatprep.subr.mxu1 %v19777_v15  ;;  %7699 = vmatpush1.msra.mxu0 %v7369_v40  ;;  %v7554_v26 = vld [vmem:[%s19371_s7 + $0x138] sm:$0xff] }
 0x6a6   :  { %v16977_v45 = vpop.f32.mrf.mxu0  ;;  %7594 = vmatpush1.msra.mxu1 %v7541_v55  ;;  %7700 = vmatprep.subr.mxu0 %v19777_v15 }
 0x6a7   :  { %v5594_v13 = vadd.f32 %v16977_v45, %v4833_v24  ;;  %v6294_v41 = vadd.f32 %v17004_v23, %v5595_v10  ;;  %7595 = vmatprep.subr.mxu1 %v19777_v15  ;;  %v17110_v23 = vld [vmem:[%s19370_s6] ss:$0 sm:$0xff] }
 0x6a8   :  { %v16979_v3 = vpop.f32.mrf.mxu0  ;;  %7596 = vmatpush1.msra.mxu1 %v7540_v16 }
 0x6a9   :  { %v6293_v4 = vadd.f32 %v17031_v30, %v5594_v13  ;;  %7597 = vmatprep.subr.mxu1 %v19777_v15 }
 0x6aa   :  { %v16987_v12 = vpop.f32.mrf.mxu0  ;;  %7598 = vmatpush1.msra.mxu1 %v7539_v8 }
 0x6ab   :  { %v5596_v61 = vadd.f32 %v16987_v12, %v4843_v58  ;;  %7599 = vmatprep.subr.mxu1 %v19777_v15 }
 0x6ac   :  { %v16990_v2 = vpop.f32.mrf.mxu0  ;;  %7600 = vmatpush1.msra.mxu1 %v7538_v6  ;;  %v7364_v6 = vld [vmem:[%s19371_s7 + $0x8] sm:$0xff] }
 0x6ad   :  { %v5599_v12 = vadd.f32 %v16990_v2, %v4858_v21  ;;  %7601 = vmatprep.subr.mxu1 %v19777_v15  ;;  %v7365_v21 = vld [vmem:[%s19371_s7 + $0x10] sm:$0xff] }
 0x6ae   :  { %v16993_v63 = vpop.f32.mrf.mxu0 }
 0x6b0   :  { %v16995_v7 = vpop.f32.mrf.mxu0 }
 0x6b2   :  { %v16997_v50 = vpop.f32.mrf.mxu0 }
 0x6b4   :  { %v16999_v43 = vpop.f32.mrf.mxu0 }
 0x6b6   :  { %v17006_v35 = vpop.f32.mrf.mxu0 }
 0x6b8   :  { %v17021_v56 = vpop.f32.mrf.mxu0 }
 0x6ba   :  { %v17033_v9 = vpop.f32.mrf.mxu0 }
 0x6bc   :  { %v11625_v18 = vpop.f32.mrf.mxu0 }
 0x6bd   :  { %v17051_v27 = vadd.f32 %v11625_v18, %v4898_v48  ;;  %v4853_v18 = vadd.f32 %v16937_v19, %v16945_v14  ;;  %v7368_v19 = vld [vmem:[%s19371_s7 + $0x28] sm:$0xff]  ;;  %v4868_v14 = vadd.f32 %v16942_v49, %v16949_v46  ;;  %v7367_v49 = vld [vmem:[%s19371_s7 + $0x20] sm:$0xff]  ;;  %v4863_v46 = vadd.f32 %v16947_v5, %v16955_v31  ;;  %v7366_v5 = vld [vmem:[%s19371_s7 + $0x18] sm:$0xff] }
 0x6be   :  { %v5575_v62 = vpop.f32.mrf.mxu0  ;;  %7701 = vmatpush1.msra.mxu0 %v7368_v19  ;;  %v7363_v19 = vld [vmem:[%s19371_s7] sm:$0xff] }
 0x6bf   :  { %v17064_v48 = vadd.f32 %v5575_v62, %v16971_v42  ;;  %v6224_v42 = vpop.f32.mrf.mxu1  ;;  %v7537_v62 = vld [vmem:[%s19371_s7 + $0xb0] sm:$0xff]  ;;  %v5598_v37 = vadd.f32 %v16993_v63, %v4853_v18  ;;  %7702 = vmatprep.subr.mxu0 %v19777_v15 }
 0x6c0   :  { %v6295_v55 = vadd.f32 %v6224_v42, %v5596_v61  ;;  %7602 = vmatpush1.msra.mxu1 %v7537_v62  ;;  %v5601_v42 = vadd.f32 %v16995_v7, %v4868_v14  ;;  %7703 = vmatpush1.msra.mxu0 %v7367_v49  ;;  %v7552_v62 = vld [vmem:[%s19371_s7 + $0x128] sm:$0xff]  ;;  %v4878_v14 = vadd.f32 %v16953_v22, %v16957_v57  ;;  %v7551_v22 = vld [vmem:[%s19371_s7 + $0x120] sm:$0xff] }
 0x6c1   :  { %v11628_v36 = vpop.f32.mrf.mxu0  ;;  %7603 = vmatprep.subr.mxu1 %v19777_v15  ;;  %7704 = vmatprep.subr.mxu0 %v19777_v15  ;;  %v4873_v57 = vadd.f32 %v16959_v17, %v16961_v1  ;;  %v7382_v17 = vld [vmem:[%s19371_s7 + $0x98] sm:$0xff] }
 0x6c2   :  { %v17080_v33 = vadd.f32 %v11628_v36, %v16973_v53  ;;  %v5597_v53 = vadd.f32 %v16979_v3, %v4848_v47  ;;  %v11657_v3 = vpop.f32.mrf.mxu1  ;;  %7604 = vmatpush1.msra.mxu1 %v7536_v44  ;;  %7705 = vmatpush1.msra.mxu0 %v7366_v5  ;;  %v7314_v44 = vrot.slane %v16908_v54, 2  ;;  %v5603_v49 = vadd.f32 %v16999_v43, %v4878_v14 }
 0x6c3   :  { %v5585_v39 = vpop.f32.mrf.mxu0  ;;  %v6298_v36 = vadd.f32 %v11657_v3, %v5599_v12  ;;  %7605 = vmatprep.subr.mxu1 %v19777_v15  ;;  %7706 = vmatprep.subr.mxu0 %v19777_v15  ;;  %v7487_v12 = vrot.slane %v16870_v59, 2  ;;  %v5602_v5 = vadd.f32 %v17006_v35, %v4873_v57  ;;  %v4883_v57 = vadd.f32 %v16967_v25, %v16969_v38 }
 0x6c4   :  { %v17094_v45 = vadd.f32 %v5585_v39, %v16975_v0  ;;  %v6296_v20 = vadd.f32 %v11654_v32, %v5597_v53  ;;  %v6234_v2 = vpop.f32.mrf.mxu1  ;;  %v5600_v39 = vadd.f32 %v16997_v50, %v4863_v46  ;;  %7606 = vmatpush1.msra.mxu1 %v7535_v29  ;;  %7707 = vmatpush1.msra.mxu0 %v7365_v21 }
 0x6c5   :  { %v11695_v0 = vpop.f32.mrf.mxu0  ;;  %v6297_v58 = vadd.f32 %v6234_v2, %v5598_v37  ;;  %7631 = vmatprep.subr.mxu1 %v19777_v15  ;;  %7708 = vmatprep.subr.mxu0 %v19777_v15 }
 0x6c6   :  { %v6993_v28 = vadd.f32 %v11695_v0, %v6294_v41  ;;  %v11660_v31 = vpop.f32.mrf.mxu1  ;;  %7632 = vmatpush2.msra.mxu1 %v7554_v26  ;;  %7709 = vmatpush1.msra.mxu0 %v7364_v6 }
 0x6c7   :  { %v6913_v60 = vpop.f32.mrf.mxu0  ;;  %7633 = vmatprep.subr.mxu1 %v19777_v15  ;;  %7710 = vmatprep.subr.mxu0 %v19777_v15 }
 0x6c8   :  { %v7016_v30 = vadd.f32 %v17110_v23, %v6993_v28  ;;  %v6992_v51 = vadd.f32 %v6913_v60, %v6293_v4  ;;  %v6300_v28 = vadd.f32 %v11660_v31, %v5601_v42  ;;  %v7553_v4 = vld [vmem:[%s19371_s7 + $0x130] sm:$0xff]  ;;  %v6244_v40 = vpop.f32.mrf.mxu1  ;;  %7711 = vmatpush1.msra.mxu0 %v7363_v19 }
 0x6c9   :  { %v11698_v11 = vpop.f32.mrf.mxu0  ;;  %7634 = vmatpush2.msra.mxu1 %v7553_v4  ;;  %7736 = vmatprep.subr.mxu0 %v19777_v15 }
 0x6ca   :  { %v7032_v32 = vmax.f32 %v7016_v30, 0.0  ;;  %v7015_v24 = vadd.f32 %v17110_v23, %v6992_v51  ;;  %v6995_v10 = vadd.f32 %v11698_v11, %v6296_v20  ;;  %v6299_v20 = vadd.f32 %v6244_v40, %v5600_v39  ;;  %v11663_v2 = vpop.f32.mrf.mxu1  ;;  %7635 = vmatprep.subr.mxu1 %v19777_v15  ;;  %v7381_v39 = vld [vmem:[%s19371_s7 + $0x90] sm:$0xff]  ;;  %7737 = vmatpush2.msra.mxu0 %v7382_v17  ;;  %v7379_v40 = vld [vmem:[%s19371_s7 + $0x80] sm:$0xff] }
 0x6cb   :  { %v6923_v63 = vpop.f32.mrf.mxu0  ;;  %7636 = vmatpush2.msra.mxu1 %v7552_v62  ;;  %v6302_v31 = vadd.f32 %v11663_v2, %v5603_v49  ;;  %7738 = vmatprep.subr.mxu0 %v19777_v15 }
 0x6cc   :  { %7107 = vst.msk [vmem:[#allocation4 + $0x50] sm:$0xff] %vm1695_vm10, %v7032_v32  ;;  %v7031_v47 = vmax.f32 %v7015_v24, 0.0  ;;  %v7018_v13 = vadd.f32 %v17110_v23, %v6995_v10  ;;  %v6994_v16 = vadd.f32 %v6923_v63, %v6295_v55  ;;  %7637 = vmatprep.subr.mxu1 %v19777_v15  ;;  %v6254_v1 = vpop.f32.mrf.mxu1  ;;  %7739 = vmatpush2.msra.mxu0 %v7381_v39 }
 0x6cd   :  { %v11701_v7 = vpop.f32.mrf.mxu0  ;;  %7638 = vmatpush2.msra.mxu1 %v7551_v22  ;;  %7740 = vmatprep.subr.mxu0 %v19777_v15  ;;  %v4888_v22 = vadd.f32 %v16963_v52, %v16965_v34 }
 0x6ce   :  { %7106 = vst.msk [vmem:[#allocation4 + $0x38] sm:$0xff] %vm1695_vm10, %v7031_v47  ;;  %v7034_v53 = vmax.f32 %v7018_v13, 0.0  ;;  %v7017_v41 = vadd.f32 %v17110_v23, %v6994_v16  ;;  %v6997_v8 = vadd.f32 %v11701_v7, %v6298_v36  ;;  %7843 = vmatprep.subr.mxu1 %v19777_v15 }
 0x6cf   :  { %v6933_v3 = vpop.f32.mrf.mxu0  ;;  %v5605_v49 = vadd.f32 %v17021_v56, %v4888_v22 }
 0x6d0   :  { %7109 = vst.msk [vmem:[#allocation4 + $0x80] sm:$0xff] %vm1695_vm10, %v7034_v53  ;;  %v7033_v50 = vmax.f32 %v7017_v41, 0.0  ;;  %v7020_v0 = vadd.f32 %v17110_v23, %v6997_v8  ;;  %v6996_v61 = vadd.f32 %v6933_v3, %v6297_v58  ;;  %v6301_v41 = vadd.f32 %v6254_v1, %v5602_v5 }
 0x6d1   :  { %v11704_v18 = vpop.f32.mrf.mxu0 }
 0x6d2   :  { %7108 = vst.msk [vmem:[#allocation4 + $0x68] sm:$0xff] %vm1695_vm10, %v7033_v50  ;;  %v7036_v60 = vmax.f32 %v7020_v0, 0.0  ;;  %v7019_v30 = vadd.f32 %v17110_v23, %v6996_v61  ;;  %v6999_v51 = vadd.f32 %v11704_v18, %v6300_v28  ;;  %v7380_v50 = vld [vmem:[%s19371_s7 + $0x88] sm:$0xff] }
 0x6d3   :  { %v6943_v37 = vpop.f32.mrf.mxu0  ;;  %v7173_v11 = vld [vmem:[#allocation4 + $0x4f] ss:$2 sm:$0x3f]  ;;  %v17193_v32 = vld [vmem:[#allocation4 + $0x4e] ss:$2 sm:$0x3f]  ;;  %7741 = vmatpush2.msra.mxu0 %v7380_v50 }
 0x6d4   :  { %7111 = vst.msk [vmem:[#allocation4 + $0xb0] sm:$0xff] %vm1695_vm10, %v7036_v60  ;;  %v7035_v24 = vmax.f32 %v7019_v30, 0.0  ;;  %v7022_v10 = vadd.f32 %v17110_v23, %v6999_v51  ;;  %v6998_v55 = vadd.f32 %v6943_v37, %v6299_v20  ;;  %7393 = vrot.lane.b32.xlu1 %v7173_v11, %s11895_s24  ;;  %v7488_v46 = vrot.slane %v17193_v32, 2  ;;  %7742 = vmatprep.subr.mxu0 %v19777_v15 }
 0x6d5   :  { %v17207_v63 = vld [vmem:[#allocation4 + $0x36] ss:$2 sm:$0x3f]  ;;  %v7424_v47 = vrot.slane %v17193_v32, 1  ;;  %v7456_v35 = vrot.slane %v7173_v11, 1  ;;  %7743 = vmatpush2.msra.mxu0 %v7379_v40 }
 0x6d6   :  { %7110 = vst.msk [vmem:[#allocation4 + $0x98] sm:$0xff] %vm1695_vm10, %v7035_v24  ;;  %v7038_v36 = vmax.f32 %v7022_v10, 0.0  ;;  %v7021_v42 = vadd.f32 %v17110_v23, %v6998_v55  ;;  %v7315_v13 = vrot.slane %v17207_v63, 2  ;;  %v10491_v16 = vcombine.low %v7487_v12, %v7488_v46  ;;  %v7171_v29 = vld [vmem:[#allocation4 + $0x37] ss:$2 sm:$0x3f]  ;;  %8010 = vmatprep.subr.mxu0 %v19777_v15 }
 0x6d7   :  { %v7177_v43 = vld [vmem:[#allocation4 + $0x7f] ss:$2 sm:$0x3f]  ;;  %v7283_v26 = vrot.slane %v7171_v29, 1  ;;  %v7251_v51 = vrot.slane %v17207_v63, 1 }
 0x6d8   :  { %7113 = vst.msk [vmem:[#allocation4 + $0xe0] sm:$0xff] %vm1695_vm10, %v7038_v36  ;;  %v7037_v7 = vmax.f32 %v7021_v42, 0.0  ;;  %7433 = vrot.lane.b32.xlu1 %v7424_v47, %s11898_s22  ;;  %7395 = vrot.lane.b32.xlu0 %v7177_v43, %s11895_s24  ;;  %v10503_v58 = vcombine.low %v7314_v44, %v7315_v13  ;;  %v17232_v3 = vld [vmem:[#allocation4 + $0x7e] ss:$2 sm:$0x3f]  ;;  %v7457_v30 = vrot.slane %v7177_v43, 1  ;;  %v5604_v42 = vadd.f32 %v17033_v9, %v4883_v57 }
 0x6d9   :  { %10498 = vmatprep.mubr.msk.f32.mxu1 %vm1695_vm10, %v10491_v16  ;;  %v11707_v53 = vpop.f32.mrf.mxu0  ;;  %v7425_v6 = vrot.slane %v17232_v3, 1  ;;  %v17247_v18 = vld [vmem:[#allocation4 + $0x66] ss:$2 sm:$0x3f]  ;;  %v7489_v60 = vrot.slane %v17232_v3, 2 }
 0x6da   :  { %7112 = vst.msk [vmem:[#allocation4 + $0xc8] sm:$0xff] %vm1695_vm10, %v7037_v7  ;;  %v7001_v8 = vadd.f32 %v11707_v53, %v6302_v31  ;;  %10510 = vmatprep.mubr.msk.f32.mxu0 %vm1695_vm10, %v10503_v58  ;;  %v7316_v20 = vrot.slane %v17247_v18, 2  ;;  %v7175_v14 = vld [vmem:[#allocation4 + $0x67] ss:$2 sm:$0x3f]  ;;  %v7252_v11 = vrot.slane %v17247_v18, 1 }
 0x6db   :  { %v6953_v21 = vpop.f32.mrf.mxu0  ;;  %v17264_v62 = vcombine.low %v7488_v46, %v7489_v60  ;;  %v7181_v2 = vld [vmem:[#allocation4 + $0xaf] ss:$2 sm:$0x3f]  ;;  %v7284_v37 = vrot.slane %v7175_v14, 1 }
 0x6dc   :  { %v7024_v0 = vadd.f32 %v17110_v23, %v7001_v8  ;;  %7465 = vrot.lane.b32.xlu1 %v7456_v35, %s11899_s5  ;;  %7292 = vrot.lane.b32.xlu0 %v7283_v26, %s11899_s5  ;;  %v7000_v61 = vadd.f32 %v6953_v21, %v6301_v41  ;;  %v17268_v19 = vcombine.low %v7315_v13, %v7316_v20  ;;  %v17273_v24 = vld [vmem:[#allocation4 + $0xae] ss:$2 sm:$0x3f]  ;;  %v7458_v55 = vrot.slane %v7181_v2, 1 }
 0x6dd   :  { %v7426_v10 = vrot.slane %v17273_v24, 1  ;;  %v17285_v36 = vld [vmem:[#allocation4 + $0x97] ss:$2 sm:$0x3f] }
 0x6de   :  { %v7040_v28 = vmax.f32 %v7024_v0, 0.0  ;;  %v7023_v4 = vadd.f32 %v17110_v23, %v7000_v61  ;;  %v17307_v0 = vld [vmem:[#allocation4 + $0x96] ss:$2 sm:$0x3f] }
 0x6df   :  { %v7253_v40 = vrot.slane %v17307_v0, 1 }
 0x6e0   :  { %7115 = vst.msk [vmem:[#allocation4 + $0x170] sm:$0xff] %vm1695_vm10, %v7040_v28  ;;  %v7039_v12 = vmax.f32 %v7023_v4, 0.0  ;;  %7220 = vrot.lane.b32.xlu1 %v7171_v29, %s11895_s24  ;;  %7435 = vrot.lane.b32.xlu0 %v7425_v6, %s11898_s22 }
 0x6e2   :  { %7114 = vst.msk [vmem:[#allocation4 + $0x158] sm:$0xff] %vm1695_vm10, %v7039_v12 }
 0x6e4   :  { %7260 = vrot.lane.b32.xlu1 %v7251_v51, %s11898_s22  ;;  %7467 = vrot.lane.b32.xlu0 %v7457_v30, %s11899_s5  ;;  %v7183_v51 = vld [vmem:[#allocation4 + $0xc7] ss:$2 sm:$0x3f] }
 0x6e5   :  { %v11666_v44 = vpop.f32.mrf.mxu1 }
 0x6e6   :  { %v6304_v47 = vadd.f32 %v11666_v44, %v5605_v49 }
 0x6e7   :  { %v6264_v46 = vpop.f32.mrf.mxu1  ;;  %v7195_v52 = vld [vmem:[#allocation4 + $0x16f] ss:$2 sm:$0x3f]  ;;  %v17290_v43 = vld [vmem:[#allocation4 + $0x16e] ss:$2 sm:$0x3f] }
 0x6e8   :  { %7222 = vrot.lane.b32.xlu0 %v7175_v14, %s11895_s24  ;;  %7397 = vrot.lane.b32.xlu1 %v7181_v2, %s11895_s24  ;;  %v6303_v17 = vadd.f32 %v6264_v46, %v5604_v42  ;;  %v7428_v9 = vrot.slane %v17290_v43, 1  ;;  %v7460_v5 = vrot.slane %v7195_v52, 1  ;;  %v7492_v12 = vrot.slane %v17290_v43, 2  ;;  %v7189_v14 = vld [vmem:[#allocation4 + $0x127] ss:$2 sm:$0x3f]  ;;  %v17325_v2 = vpop.permute.xlu0 %7391 }
 0x6e9   :  { %v17332_v44 = vld [vmem:[#allocation4 + $0x156] ss:$2 sm:$0x3f]  ;;  %v7286_v46 = vrot.slane %v7189_v14, 1  ;;  %v7285_v42 = vrot.slane %v17285_v36, 1 }
 0x6ea   :  { %v7255_v49 = vrot.slane %v17332_v44, 1 }
 0x6ec   :  { %7294 = vrot.lane.b32.xlu0 %v7284_v37, %s11899_s5  ;;  %7262 = vrot.lane.b32.xlu1 %v7252_v11, %s11898_s22  ;;  %v17336_v22 = vpop.permute.xlu0 %7431 }
 0x6f0   :  { %7437 = vrot.lane.b32.xlu1 %v7426_v10, %s11898_s22  ;;  %v7783_v10 = vrot.slane %v7183_v51, 1 }
 0x6f4   :  { %7469 = vrot.lane.b32.xlu1 %v7458_v55, %s11899_s5 }
 0x6f8   :  { %7224 = vrot.lane.b32.xlu1 %v17285_v36, %s11895_s24 }
 0x6f9   :  { %v11710_v13 = vpop.f32.mrf.mxu0 }
 0x6fa   :  { %v7003_v1 = vadd.f32 %v11710_v13, %v6304_v47  ;;  %v17342_v47 = vpop.permute.xlu0 %7463 }
 0x6fb   :  { %v6963_v34 = vpop.f32.mrf.mxu0 }
 0x6fc   :  { %v7026_v25 = vadd.f32 %v17110_v23, %v7003_v1  ;;  %7401 = vrot.lane.b32.xlu1 %v7195_v52, %s11895_s24  ;;  %v7002_v38 = vadd.f32 %v6963_v34, %v6303_v17  ;;  %v17346_v1 = vld [vmem:[#allocation4 + $0xc6] ss:$2 sm:$0x3f] }
 0x6fd   :  { %v7775_v34 = vrot.slane %v17346_v1, 1 }
 0x6fe   :  { %v7042_v56 = vmax.f32 %v7026_v25, 0.0  ;;  %v7025_v16 = vadd.f32 %v17110_v23, %v7002_v38  ;;  %v11669_v31 = vpop.f32.mrf.mxu1  ;;  %v17355_v36 = vpop.permute.xlu0 %7399 }
 0x6ff   :  { %v6306_v41 = vadd.f32 %v11669_v31, %v17051_v27  ;;  %v17358_v31 = vld [vmem:[#allocation4 + $0x126] ss:$2 sm:$0x3f] }
 0x700   :  { %7117 = vst.msk [vmem:[#allocation4 + $0x1a0] sm:$0xff] %vm1695_vm10, %v7042_v56  ;;  %v7041_v29 = vmax.f32 %v7025_v16, 0.0  ;;  %7441 = vrot.lane.b32.xlu1 %v7428_v9, %s11898_s22  ;;  %v6274_v53 = vpop.f32.mrf.mxu1 }
 0x701   :  { %v6305_v8 = vadd.f32 %v6274_v53, %v17064_v48 }
 0x702   :  { %7116 = vst.msk [vmem:[#allocation4 + $0x188] sm:$0xff] %vm1695_vm10, %v7041_v29 }
 0x704   :  { %7473 = vrot.lane.b32.xlu1 %v7460_v5, %s11899_s5 }
 0x707   :  { %v7199_v7 = vld [vmem:[#allocation4 + $0x19f] ss:$2 sm:$0x3f]  ;;  %v17300_v58 = vld [vmem:[#allocation4 + $0x19e] ss:$2 sm:$0x3f] }
 0x708   :  { %7403 = vrot.lane.b32.xlu0 %v7199_v7, %s11895_s24  ;;  %v7429_v39 = vrot.slane %v17300_v58, 1  ;;  %v7461_v26 = vrot.slane %v7199_v7, 1  ;;  %v7493_v4 = vrot.slane %v17300_v58, 2 }
 0x709   :  { %v17344_v17 = vld [vmem:[#allocation4 + $0x186] ss:$2 sm:$0x3f]  ;;  %v7197_v38 = vld [vmem:[#allocation4 + $0x187] ss:$2 sm:$0x3f] }
 0x70a   :  { %v17321_v30 = vcombine.low %v7492_v12, %v7493_v4  ;;  %v7256_v52 = vrot.slane %v17344_v17, 1  ;;  %v7288_v5 = vrot.slane %v7197_v38, 1 }
 0x70c   :  { %7443 = vrot.lane.b32.xlu0 %v7429_v39, %s11898_s22  ;;  %v7193_v39 = vld [vmem:[#allocation4 + $0x157] ss:$2 sm:$0x3f] }
 0x70d   :  { %v11713_v35 = vpop.f32.mrf.mxu0 }
 0x70e   :  { %v7005_v21 = vadd.f32 %v11713_v35, %v6306_v41 }
 0x70f   :  { %v6973_v50 = vpop.f32.mrf.mxu0 }
 0x710   :  { %v7028_v61 = vadd.f32 %v17110_v23, %v7005_v21  ;;  %v7004_v28 = vadd.f32 %v6973_v50, %v6305_v8  ;;  %7475 = vrot.lane.b32.xlu0 %v7461_v26, %s11899_s5  ;;  %v17365_v21 = vpop.permute.xlu0 %7439 }
 0x712   :  { %v7044_v6 = vmax.f32 %v7028_v61, 0.0  ;;  %v7027_v27 = vadd.f32 %v17110_v23, %v7004_v28  ;;  %v7287_v28 = vrot.slane %v7193_v39, 1 }
 0x714   :  { %7119 = vst.msk [vmem:[#allocation4 + $0x1d0] sm:$0xff] %vm1695_vm10, %v7044_v6  ;;  %v7043_v48 = vmax.f32 %v7027_v27, 0.0  ;;  %7264 = vrot.lane.b32.xlu0 %v7253_v40, %s11898_s22  ;;  %v17372_v61 = vpop.permute.xlu0 %7471 }
 0x716   :  { %7118 = vst.msk [vmem:[#allocation4 + $0x1b8] sm:$0xff] %vm1695_vm10, %v7043_v48  ;;  %v7291_v48 = vpop.permute.xlu1 %7290 }
 0x718   :  { %7767 = vrot.lane.b32.xlu0 %v7183_v51, %s11895_s24  ;;  %v7219_v27 = vpop.permute.xlu0 %7218 }
 0x71b   :  { %v7203_v37 = vld [vmem:[#allocation4 + $0x1cf] ss:$2 sm:$0x3f]  ;;  %v17327_v11 = vld [vmem:[#allocation4 + $0x1ce] ss:$2 sm:$0x3f] }
 0x71c   :  { %7226 = vrot.lane.b32.xlu0 %v7189_v14, %s11895_s24  ;;  %7405 = vrot.lane.b32.xlu1 %v7203_v37, %s11895_s24  ;;  %v7430_v55 = vrot.slane %v17327_v11, 1  ;;  %v7462_v57 = vrot.slane %v7203_v37, 1  ;;  %v7185_v14 = vld [vmem:[#allocation4 + $0xdf] ss:$2 sm:$0x3f]  ;;  %v7259_v37 = vpop.permute.xlu0 %7258 }
 0x71d   :  { %v7201_v53 = vld [vmem:[#allocation4 + $0x1b7] ss:$2 sm:$0x3f]  ;;  %v17378_v40 = vld [vmem:[#allocation4 + $0x1b6] ss:$2 sm:$0x3f] }
 0x71e   :  { %v11672_v13 = vpop.f32.mrf.mxu1  ;;  %v7257_v51 = vrot.slane %v17378_v40, 1 }
 0x71f   :  { %v6308_v56 = vadd.f32 %v11672_v13, %v17080_v33  ;;  %v7254_v33 = vrot.slane %v17358_v31, 1 }
 0x720   :  { %7785 = vrot.lane.b32.xlu0 %v7783_v10, %s11899_s5  ;;  %7445 = vrot.lane.b32.xlu1 %v7430_v55, %s11898_s22  ;;  %v6284_v25 = vpop.f32.mrf.mxu1  ;;  %v7950_v10 = vrot.slane %v7185_v14, 1 }
 0x721   :  { %v6307_v9 = vadd.f32 %v6284_v25, %v17094_v45  ;;  %v7289_v45 = vrot.slane %v7201_v53, 1 }
 0x724   :  { %7268 = vrot.lane.b32.xlu0 %v7255_v49, %s11898_s22  ;;  %7477 = vrot.lane.b32.xlu1 %v7462_v57, %s11899_s5  ;;  %v7495_v57 = vsel %vm1695_vm10, %v16870_v59, %v17325_v2 }
 0x725   :  { %v7503_v13 = vsel %vm4007_vm13, %v7495_v57, %v17336_v22 }
 0x726   :  { %v7511_v59 = vsel %vm7338_vm1, %v7503_v13, %v17342_v47 }
 0x728   :  { %7298 = vrot.lane.b32.xlu0 %v7286_v46, %s11899_s5  ;;  %7296 = vrot.lane.b32.xlu1 %v7285_v42, %s11899_s5  ;;  %v17388_v46 = vld [vmem:[#allocation4 + $0xf6] ss:$2 sm:$0x3f] }
 0x729   :  { %v8109_v42 = vrot.slane %v17388_v46, 1 }
 0x72c   :  { %7270 = vrot.lane.b32.xlu0 %v7256_v52, %s11898_s22  ;;  %7777 = vrot.lane.b32.xlu1 %v7775_v34, %s11898_s22 }
 0x72d   :  { %v11716_v16 = vpop.f32.mrf.mxu0 }
 0x72e   :  { %v7007_v29 = vadd.f32 %v11716_v16, %v6308_v56  ;;  %v7490_v56 = vrot.slane %v17273_v24, 2 }
 0x72f   :  { %v6983_v7 = vpop.f32.mrf.mxu0 }
 0x730   :  { %v7030_v41 = vadd.f32 %v17110_v23, %v7007_v29  ;;  %v7006_v35 = vadd.f32 %v6983_v7, %v6307_v9  ;;  %7302 = vrot.lane.b32.xlu0 %v7288_v5, %s11899_s5  ;;  %7228 = vrot.lane.b32.xlu1 %v7193_v39, %s11895_s24  ;;  %v7322_v39 = vsel %vm1695_vm10, %v16908_v54, %v7219_v27 }
 0x732   :  { %v7046_v8 = vmax.f32 %v7030_v41, 0.0  ;;  %v7029_v26 = vadd.f32 %v17110_v23, %v7006_v35  ;;  %v7187_v41 = vld [vmem:[#allocation4 + $0xf7] ss:$2 sm:$0x3f] }
 0x734   :  { %7121 = vst.msk [vmem:[#allocation4 + $0x200] sm:$0xff] %vm1695_vm10, %v7046_v8  ;;  %v7045_v50 = vmax.f32 %v7029_v26, 0.0  ;;  %7266 = vrot.lane.b32.xlu1 %v7254_v33, %s11898_s22  ;;  %7304 = vrot.lane.b32.xlu0 %v7289_v45, %s11899_s5  ;;  %v7330_v8 = vsel %vm4007_vm13, %v7322_v39, %v7259_v37  ;;  %v17423_v26 = vld [vmem:[#allocation4 + $0x216] ss:$2 sm:$0x3f] }
 0x735   :  { %v7817_v45 = vld [vmem:[%s19371_s7 + $0x1b0] sm:$0xff] }
 0x736   :  { %7120 = vst.msk [vmem:[#allocation4 + $0x1e8] sm:$0xff] %vm1695_vm10, %v7045_v50  ;;  %v8117_v50 = vrot.slane %v7187_v41, 1 }
 0x738   :  { %7230 = vrot.lane.b32.xlu1 %v7197_v38, %s11895_s24  ;;  %v17395_v38 = vld [vmem:[#allocation4 + $0xde] ss:$2 sm:$0x3f] }
 0x739   :  { %v7942_v29 = vrot.slane %v17395_v38, 1 }
 0x73b   :  { %v7207_v7 = vld [vmem:[#allocation4 + $0x1ff] ss:$2 sm:$0x3f] }
 0x73c   :  { %7300 = vrot.lane.b32.xlu1 %v7287_v28, %s11899_s5  ;;  %v7951_v35 = vrot.slane %v7207_v7, 1 }
 0x73d   :  { %v17375_v23 = vld [vmem:[#allocation4 + $0x1e6] ss:$2 sm:$0x3f]  ;;  %v7205_v49 = vld [vmem:[#allocation4 + $0x1e7] ss:$2 sm:$0x3f] }
 0x73e   :  { %v7776_v6 = vrot.slane %v17375_v23, 1  ;;  %v7784_v52 = vrot.slane %v7205_v49, 1 }
 0x740   :  { %7232 = vrot.lane.b32.xlu1 %v7201_v53, %s11895_s24  ;;  %7779 = vrot.lane.b32.xlu0 %v7776_v6, %s11898_s22  ;;  %v10493_v53 = vcombine.low %v7489_v60, %v7490_v56  ;;  %v8110_v60 = vrot.slane %v17423_v26, 1  ;;  %v7339_v6 = vsel %vm7338_vm1, %v7330_v8, %v7291_v48  ;;  %v17446_v48 = vld [vmem:[#allocation4 + $0x1fe] ss:$2 sm:$0x3f] }
 0x744   :  { %7272 = vrot.lane.b32.xlu1 %v7257_v51, %s11898_s22  ;;  %7934 = vrot.lane.b32.xlu0 %v7185_v14, %s11895_s24 }
 0x746   :  { %v7394_v55 = vpop.permute.xlu1 %7393 }
 0x747   :  { %v7496_v2 = vsel %vm1695_vm10, %v17193_v32, %v7394_v55  ;;  %v7818_v32 = vld [vmem:[%s19371_s7 + $0x1b8] sm:$0xff]  ;;  %v7816_v55 = vld [vmem:[%s19371_s7 + $0x1a8] sm:$0xff] }
 0x748   :  { %7769 = vrot.lane.b32.xlu1 %v7205_v49, %s11895_s24  ;;  %7952 = vrot.lane.b32.xlu0 %v7950_v10, %s11899_s5  ;;  %v7317_v10 = vrot.slane %v17307_v0, 2 }
 0x74a   :  { %v7396_v34 = vpop.permute.xlu0 %7395  ;;  %v7434_v25 = vpop.permute.xlu1 %7433 }
 0x74b   :  { %v7504_v22 = vsel %vm4007_vm13, %v7496_v2, %v7434_v25  ;;  %v7497_v28 = vsel %vm1695_vm10, %v17232_v3, %v7396_v34  ;;  %v17464_v34 = vcombine.low %v7316_v20, %v7317_v10  ;;  %v7943_v25 = vrot.slane %v17446_v48, 1  ;;  %v7814_v2 = vld [vmem:[%s19371_s7 + $0x198] sm:$0xff]  ;;  %v7984_v20 = vld [vmem:[%s19371_s7 + $0x250] sm:$0xff] }
 0x74c   :  { %7787 = vrot.lane.b32.xlu1 %v7784_v52, %s11899_s5  ;;  %8111 = vrot.lane.b32.xlu0 %v8109_v42, %s11898_s22  ;;  %v7815_v42 = vld [vmem:[%s19371_s7 + $0x1a0] sm:$0xff] }
 0x74e   :  { %v7293_v16 = vpop.permute.xlu0 %7292  ;;  %v7466_v9 = vpop.permute.xlu1 %7465 }
 0x74f   :  { %v17407_v5 = vsel %vm7338_vm1, %v7504_v22, %v7466_v9  ;;  %v7209_v22 = vld [vmem:[#allocation4 + $0x217] ss:$2 sm:$0x3f] }
 0x750   :  { %v10490_v47 = vcombine.low %v7511_v59, %v17407_v5  ;;  %7944 = vrot.lane.b32.xlu1 %v7942_v29, %s11898_s22  ;;  %7936 = vrot.lane.b32.xlu0 %v7207_v7, %s11895_s24  ;;  %v7985_v59 = vld [vmem:[%s19371_s7 + $0x258] sm:$0xff]  ;;  %v7812_v29 = vld [vmem:[%s19371_s7 + $0x188] sm:$0xff]  ;;  %v8118_v39 = vrot.slane %v7209_v22, 1 }
 0x751   :  { %v7983_v7 = vld [vmem:[%s19371_s7 + $0x248] sm:$0xff] }
 0x752   :  { %v7436_v33 = vpop.permute.xlu0 %7435  ;;  %7640 = vmatmul.mubr.f32.vlgmr.msra.gmra.mxu1 %v10490_v47  ;;  %v7221_v54 = vpop.permute.xlu1 %7220  ;;  %v7811_v47 = vld [vmem:[%s19371_s7 + $0x180] sm:$0xff] }
 0x753   :  { %10499 = vmatprep.mubr.msk.f32.mxu1 %vm1695_vm10, %v10493_v53  ;;  %7844 = vmatpush1.msra.mxu1 %v7818_v32  ;;  %v7505_v27 = vsel %vm4007_vm13, %v7497_v28, %v7436_v33  ;;  %v7323_v51 = vsel %vm1695_vm10, %v17207_v63, %v7221_v54  ;;  %v7982_v53 = vld [vmem:[%s19371_s7 + $0x240] sm:$0xff]  ;;  %v7980_v28 = vld [vmem:[%s19371_s7 + $0x230] sm:$0xff] }
 0x754   :  { %8101 = vrot.lane.b32.xlu1 %v7187_v41, %s11895_s24  ;;  %7954 = vrot.lane.b32.xlu0 %v7951_v35, %s11899_s5  ;;  %v7810_v41 = vld [vmem:[%s19371_s7 + $0x178] sm:$0xff] }
 0x755   :  { %7845 = vmatprep.subr.mxu1 %v19777_v15  ;;  %v7981_v35 = vld [vmem:[%s19371_s7 + $0x238] sm:$0xff] }
 0x756   :  { %v7468_v14 = vpop.permute.xlu0 %7467  ;;  %v7261_v37 = vpop.permute.xlu1 %7260  ;;  %7846 = vmatpush1.msra.mxu1 %v7817_v45  ;;  %v11836_v54 = vld [vmem:[#allocation4 + $0x13e] ss:$2 sm:$0x3f]  ;;  %v7809_v45 = vld [vmem:[%s19371_s7 + $0x170] sm:$0xff] }
 0x757   :  { %v17443_v3 = vsel %vm7338_vm1, %v7505_v27, %v7468_v14  ;;  %v7331_v57 = vsel %vm4007_vm13, %v7323_v51, %v7261_v37  ;;  %7847 = vmatprep.subr.mxu1 %v19777_v15  ;;  %v7491_v8 = vrot.slane %v11836_v54, 2  ;;  %v7808_v51 = vld [vmem:[%s19371_s7 + $0x168] sm:$0xff] }
 0x758   :  { %v10526_v63 = vcombine.low %v17407_v5, %v17443_v3  ;;  %v17452_v49 = vsel %vm7338_vm1, %v7331_v57, %v7293_v16  ;;  %8119 = vrot.lane.b32.xlu1 %v8117_v50, %s11899_s5  ;;  %8113 = vrot.lane.b32.xlu0 %v8110_v60, %s11898_s22  ;;  %v7813_v16 = vld [vmem:[%s19371_s7 + $0x190] sm:$0xff]  ;;  %v7979_v37 = vld [vmem:[%s19371_s7 + $0x228] sm:$0xff] }
 0x759   :  { %v10502_v13 = vcombine.low %v7339_v6, %v17452_v49  ;;  %7848 = vmatpush1.msra.mxu1 %v7816_v55  ;;  %v10495_v14 = vcombine.low %v7491_v8, %v7492_v12  ;;  %v7807_v57 = vld [vmem:[%s19371_s7 + $0x160] sm:$0xff]  ;;  %v8154_v5 = vld [vmem:[%s19371_s7 + $0x308] sm:$0xff] }
 0x75a   :  { %v7398_v52 = vpop.permute.xlu1 %7397  ;;  %7849 = vmatprep.subr.mxu1 %v19777_v15  ;;  %v7978_v12 = vld [vmem:[%s19371_s7 + $0x220] sm:$0xff] }
 0x75b   :  { %7745 = vmatmul.mubr.f32.vlgmr.msra.gmra.mxu0 %v10502_v13  ;;  %7850 = vmatpush1.msra.mxu1 %v7815_v42  ;;  %v7498_v33 = vsel %vm1695_vm10, %v17273_v24, %v7398_v52  ;;  %v7806_v42 = vld [vmem:[%s19371_s7 + $0x158] sm:$0xff] }
 0x75c   :  { %10511 = vmatprep.mubr.msk.f32.mxu0 %vm1695_vm10, %v17464_v34  ;;  %7946 = vrot.lane.b32.xlu1 %v7943_v25, %s11898_s22  ;;  %v7977_v13 = vld [vmem:[%s19371_s7 + $0x218] sm:$0xff]  ;;  %v7805_v25 = vld [vmem:[%s19371_s7 + $0x150] sm:$0xff] }
 0x75d   :  { %7851 = vmatprep.subr.mxu1 %v19777_v15  ;;  %8011 = vmatpush1.msra.mxu0 %v7985_v59  ;;  %v7976_v59 = vld [vmem:[%s19371_s7 + $0x210] sm:$0xff] }
 0x75e   :  { %v17484_v9 = vpop.permute.xlu1 %7262  ;;  %7852 = vmatpush1.msra.mxu1 %v7814_v2  ;;  %8012 = vmatprep.subr.mxu0 %v19777_v15  ;;  %v17565_v2 = vpop.permute.xlu0 %7222 }
 0x75f   :  { %7853 = vmatprep.subr.mxu1 %v19777_v15  ;;  %8013 = vmatpush1.msra.mxu0 %v7984_v20  ;;  %v7804_v20 = vld [vmem:[%s19371_s7 + $0x148] sm:$0xff] }
 0x760   :  { %8103 = vrot.lane.b32.xlu1 %v7209_v22, %s11895_s24  ;;  %7854 = vmatpush1.msra.mxu1 %v7813_v16  ;;  %v7499_v22 = vsel %vm1695_vm10, %v11836_v54, %v17355_v36  ;;  %v7975_v16 = vld [vmem:[%s19371_s7 + $0x208] sm:$0xff]  ;;  %v7974_v36 = vld [vmem:[%s19371_s7 + $0x200] sm:$0xff] }
 0x761   :  { %7855 = vmatprep.subr.mxu1 %v19777_v15  ;;  %8014 = vmatprep.subr.mxu0 %v19777_v15 }
 0x762   :  { %v7438_v32 = vpop.permute.xlu1 %7437  ;;  %7856 = vmatpush1.msra.mxu1 %v7812_v29  ;;  %8015 = vmatpush1.msra.mxu0 %v7983_v7  ;;  %v7803_v7 = vld [vmem:[%s19371_s7 + $0x140] sm:$0xff] }
 0x763   :  { %7857 = vmatprep.subr.mxu1 %v19777_v15  ;;  %8016 = vmatprep.subr.mxu0 %v19777_v15  ;;  %v7506_v50 = vsel %vm4007_vm13, %v7498_v33, %v7438_v32 }
 0x764   :  { %8121 = vrot.lane.b32.xlu1 %v8118_v39, %s11899_s5  ;;  %7858 = vmatpush1.msra.mxu1 %v7811_v47  ;;  %v7507_v39 = vsel %vm4007_vm13, %v7499_v22, %v17365_v21  ;;  %v7822_v47 = vld [vmem:[%s19371_s7 + $0x1d8] sm:$0xff]  ;;  %v17598_v21 = vpop.permute.xlu0 %7294 }
 0x765   :  { %7859 = vmatprep.subr.mxu1 %v19777_v15  ;;  %8017 = vmatpush1.msra.mxu0 %v7982_v53  ;;  %v7494_v53 = vrot.slane %v17327_v11, 2  ;;  %v7515_v54 = vsel %vm7338_vm1, %v7507_v39, %v17372_v61 }
 0x766   :  { %v7470_v60 = vpop.permute.xlu1 %7469  ;;  %7860 = vmatpush1.msra.mxu1 %v7810_v41  ;;  %8018 = vmatprep.subr.mxu0 %v19777_v15  ;;  %v7973_v41 = vld [vmem:[%s19371_s7 + $0x1f8] sm:$0xff] }
 0x767   :  { %v17524_v6 = vsel %vm7338_vm1, %v7506_v50, %v7470_v60  ;;  %7861 = vmatprep.subr.mxu1 %v19777_v15  ;;  %8019 = vmatpush1.msra.mxu0 %v7981_v35  ;;  %v7820_v50 = vld [vmem:[%s19371_s7 + $0x1c8] sm:$0xff]  ;;  %v10497_v61 = vcombine.low %v7493_v4, %v7494_v53  ;;  %v7972_v60 = vld [vmem:[%s19371_s7 + $0x1f0] sm:$0xff] }
 0x768   :  { %v10492_v27 = vcombine.low %v17443_v3, %v17524_v6  ;;  %7862 = vmatpush1.msra.mxu1 %v7809_v45  ;;  %8020 = vmatprep.subr.mxu0 %v19777_v15  ;;  %v7971_v4 = vld [vmem:[%s19371_s7 + $0x1e8] sm:$0xff] }
 0x769   :  { %7863 = vmatprep.subr.mxu1 %v19777_v15  ;;  %8021 = vmatpush1.msra.mxu0 %v7980_v28 }
 0x76a   :  { %7645 = vmatmul.mubr.f32.gmra.mxu1 %v10492_v27  ;;  %v17539_v55 = vpop.permute.xlu1 %7224  ;;  %8022 = vmatprep.subr.mxu0 %v19777_v15  ;;  %v7819_v27 = vld [vmem:[%s19371_s7 + $0x1c0] sm:$0xff] }
 0x76b   :  { %10500 = vmatprep.mubr.msk.f32.mxu1 %vm1695_vm10, %v10495_v14  ;;  %7864 = vmatpush1.msra.mxu1 %v7808_v51  ;;  %v7970_v51 = vld [vmem:[%s19371_s7 + $0x1e0] sm:$0xff] }
 0x76c   :  { %7865 = vmatprep.subr.mxu1 %v19777_v15  ;;  %8023 = vmatpush1.msra.mxu0 %v7979_v37  ;;  %v7989_v37 = vld [vmem:[%s19371_s7 + $0x278] sm:$0xff] }
 0x76d   :  { %7866 = vmatpush1.msra.mxu1 %v7807_v57  ;;  %8024 = vmatprep.subr.mxu0 %v19777_v15  ;;  %v7988_v57 = vld [vmem:[%s19371_s7 + $0x270] sm:$0xff] }
 0x76e   :  { %v7402_v52 = vpop.permute.xlu1 %7401  ;;  %7867 = vmatprep.subr.mxu1 %v19777_v15  ;;  %8025 = vmatpush1.msra.mxu0 %v7978_v12 }
 0x76f   :  { %7868 = vmatpush1.msra.mxu1 %v7806_v42  ;;  %8026 = vmatprep.subr.mxu0 %v19777_v15  ;;  %v7500_v32 = vsel %vm1695_vm10, %v17290_v43, %v7402_v52  ;;  %v7821_v43 = vld [vmem:[%s19371_s7 + $0x1d0] sm:$0xff]  ;;  %v7987_v42 = vld [vmem:[%s19371_s7 + $0x268] sm:$0xff] }
 0x770   :  { %7869 = vmatprep.subr.mxu1 %v19777_v15  ;;  %8027 = vmatpush1.msra.mxu0 %v7977_v13  ;;  %v7986_v13 = vld [vmem:[%s19371_s7 + $0x260] sm:$0xff] }
 0x771   :  { %7870 = vmatpush1.msra.mxu1 %v7805_v25  ;;  %8028 = vmatprep.subr.mxu0 %v19777_v15 }
 0x772   :  { %v7442_v29 = vpop.permute.xlu1 %7441  ;;  %7871 = vmatprep.subr.mxu1 %v19777_v15  ;;  %8029 = vmatpush1.msra.mxu0 %v7976_v59 }
 0x773   :  { %7872 = vmatpush1.msra.mxu1 %v7804_v20  ;;  %8030 = vmatprep.subr.mxu0 %v19777_v15  ;;  %v7508_v35 = vsel %vm4007_vm13, %v7500_v32, %v7442_v29  ;;  %v7324_v29 = vsel %vm1695_vm10, %v17247_v18, %v17565_v2  ;;  %v7791_v2 = vrot.slane %v17346_v1, 2 }
 0x774   :  { %7873 = vmatprep.subr.mxu1 %v19777_v15  ;;  %8031 = vmatpush1.msra.mxu0 %v7975_v16  ;;  %v7332_v39 = vsel %vm4007_vm13, %v7324_v29, %v17484_v9  ;;  %v7325_v9 = vsel %vm1695_vm10, %v17307_v0, %v17539_v55 }
 0x775   :  { %7874 = vmatpush1.msra.mxu1 %v7803_v7  ;;  %8032 = vmatprep.subr.mxu0 %v19777_v15 }
 0x776   :  { %v7474_v33 = vpop.permute.xlu1 %7473  ;;  %7899 = vmatprep.subr.mxu1 %v19777_v15  ;;  %8033 = vmatpush1.msra.mxu0 %v7974_v36 }
 0x777   :  { %v17608_v8 = vsel %vm7338_vm1, %v7508_v35, %v7474_v33  ;;  %7900 = vmatpush2.msra.mxu1 %v7822_v47  ;;  %8034 = vmatprep.subr.mxu0 %v19777_v15 }
 0x778   :  { %v10494_v45 = vcombine.low %v7515_v54, %v17608_v8  ;;  %7901 = vmatprep.subr.mxu1 %v19777_v15  ;;  %8035 = vmatpush1.msra.mxu0 %v7973_v41  ;;  %v7318_v54 = vrot.slane %v17358_v31, 2 }
 0x779   :  { %7902 = vmatpush2.msra.mxu1 %v7821_v43  ;;  %8036 = vmatprep.subr.mxu0 %v19777_v15  ;;  %v7341_v43 = vsel %vm7338_vm1, %v7332_v39, %v17598_v21 }
 0x77a   :  { %7650 = vmatmul.mubr.f32.gmra.mxu1 %v10494_v45  ;;  %v7404_v28 = vpop.permute.xlu0 %7403  ;;  %7903 = vmatprep.subr.mxu1 %v19777_v15  ;;  %v7319_v45 = vrot.slane %v17332_v44, 2  ;;  %v10514_v55 = vcombine.low %v17452_v49, %v7341_v43 }
 0x77b   :  { %10501 = vmatprep.mubr.msk.f32.mxu1 %vm1695_vm10, %v10497_v61  ;;  %7904 = vmatpush2.msra.mxu1 %v7820_v50  ;;  %v7501_v7 = vsel %vm1695_vm10, %v17300_v58, %v7404_v28 }
 0x77c   :  { %7905 = vmatprep.subr.mxu1 %v19777_v15  ;;  %8037 = vmatpush1.msra.mxu0 %v7972_v60  ;;  %v10507_v21 = vcombine.low %v7318_v54, %v7319_v45  ;;  %v8145_v54 = vld [vmem:[%s19371_s7 + $0x2c0] sm:$0xff] }
 0x77d   :  { %7906 = vmatpush2.msra.mxu1 %v7819_v27  ;;  %8038 = vmatprep.subr.mxu0 %v19777_v15 }
 0x77e   :  { %v7444_v14 = vpop.permute.xlu0 %7443  ;;  %8167 = vmatprep.subr.mxu1 %v19777_v15  ;;  %8039 = vmatpush1.msra.mxu0 %v7971_v4  ;;  %v10517_v4 = vcombine.low %v7317_v10, %v7791_v2  ;;  %v8151_v10 = vld [vmem:[%s19371_s7 + $0x2f0] sm:$0xff] }
 0x77f   :  { %8040 = vmatprep.subr.mxu0 %v19777_v15  ;;  %v7509_v47 = vsel %vm4007_vm13, %v7501_v7, %v7444_v14  ;;  %v7320_v14 = vrot.slane %v17344_v17, 2  ;;  %v8147_v7 = vld [vmem:[%s19371_s7 + $0x2d0] sm:$0xff] }
 0x780   :  { %8041 = vmatpush1.msra.mxu0 %v7970_v51  ;;  %v8152_v51 = vld [vmem:[%s19371_s7 + $0x2f8] sm:$0xff] }
 0x781   :  { %8066 = vmatprep.subr.mxu0 %v19777_v15 }
 0x782   :  { %v7476_v12 = vpop.permute.xlu0 %7475  ;;  %8067 = vmatpush2.msra.mxu0 %v7989_v37 }
 0x783   :  { %8068 = vmatprep.subr.mxu0 %v19777_v15  ;;  %v17671_v33 = vsel %vm7338_vm1, %v7509_v47, %v7476_v12  ;;  %v8150_v12 = vld [vmem:[%s19371_s7 + $0x2e8] sm:$0xff] }
 0x784   :  { %8069 = vmatpush2.msra.mxu0 %v7988_v57  ;;  %v8146_v47 = vld [vmem:[%s19371_s7 + $0x2c8] sm:$0xff] }
 0x785   :  { %8070 = vmatprep.subr.mxu0 %v19777_v15 }
 0x786   :  { %v7265_v52 = vpop.permute.xlu0 %7264  ;;  %8071 = vmatpush2.msra.mxu0 %v7987_v42 }
 0x787   :  { %8072 = vmatprep.subr.mxu0 %v19777_v15  ;;  %v7333_v50 = vsel %vm4007_vm13, %v7325_v9, %v7265_v52  ;;  %v10519_v52 = vcombine.low %v7319_v45, %v7320_v14 }
 0x788   :  { %8073 = vmatpush2.msra.mxu0 %v7986_v13 }
 0x78a   :  { %v7768_v25 = vpop.permute.xlu0 %7767 }
 0x78e   :  { %v17655_v59 = vpop.permute.xlu0 %7226  ;;  %v7406_v20 = vpop.permute.xlu1 %7405 }
 0x78f   :  { %v7502_v36 = vsel %vm1695_vm10, %v17327_v11, %v7406_v20  ;;  %v8148_v20 = vld [vmem:[%s19371_s7 + $0x2d8] sm:$0xff] }
 0x792   :  { %v7786_v22 = vpop.permute.xlu0 %7785  ;;  %v7446_v16 = vpop.permute.xlu1 %7445 }
 0x793   :  { %v7510_v32 = vsel %vm4007_vm13, %v7502_v36, %v7446_v16 }
 0x796   :  { %v17668_v41 = vpop.permute.xlu0 %7268  ;;  %v7478_v35 = vpop.permute.xlu1 %7477 }
 0x797   :  { %v17674_v18 = vsel %vm7338_vm1, %v7510_v32, %v7478_v35  ;;  %v17754_v32 = vld [vmem:[#allocation5 + $0x96] sm:$0xff] }
 0x798   :  { %v10496_v58 = vcombine.low %v17671_v33, %v17674_v18 }
 0x79a   :  { %7655 = vmatmul.mubr.f32.gmra.mxu1 %v10496_v58  ;;  %v7297_v61 = vpop.permute.xlu1 %7296  ;;  %v17690_v28 = vpop.permute.xlu0 %7298  ;;  %v7326_v58 = vsel %vm1695_vm10, %v17358_v31, %v17655_v59  ;;  %v8144_v31 = vld [vmem:[%s19371_s7 + $0x2b8] sm:$0xff] }
 0x79b   :  { %v7342_v60 = vsel %vm7338_vm1, %v7333_v50, %v7297_v61  ;;  %10522 = vmatprep.mubr.msk.f32.mxu1 %vm1695_vm10, %v17268_v19  ;;  %v7793_v19 = vsel %vm1695_vm10, %v17346_v1, %v7768_v25  ;;  %v8149_v25 = vld [vmem:[%s19371_s7 + $0x2e0] sm:$0xff] }
 0x79c   :  { %v17693_v27 = vcombine.low %v7341_v43, %v7342_v60 }
 0x79e   :  { %7750 = vmatmul.mubr.f32.gmra.mxu0 %v17693_v27  ;;  %7908 = vmatmul.mubr.f32.vlgmr.msra.gmra.mxu1 %v10514_v55  ;;  %v7778_v49 = vpop.permute.xlu1 %7777  ;;  %v7271_v42 = vpop.permute.xlu0 %7270  ;;  %v7321_v55 = vrot.slane %v17378_v40, 2 }
 0x79f   :  { %v7795_v0 = vsel %vm4007_vm13, %v7793_v19, %v7778_v49  ;;  %10512 = vmatprep.mubr.msk.f32.mxu0 %vm1695_vm10, %v10507_v21  ;;  %10523 = vmatprep.mubr.msk.f32.mxu1 %vm1695_vm10, %v10517_v4  ;;  %v7792_v21 = vrot.slane %v17375_v23, 2  ;;  %v8143_v49 = vld [vmem:[%s19371_s7 + $0x2b0] sm:$0xff] }
 0x7a0   :  { %v17721_v37 = vsel %vm7338_vm1, %v7795_v0, %v7786_v22  ;;  %8168 = vmatpush1.msra.mxu1 %v8152_v51  ;;  %v17739_v22 = vld [vmem:[#allocation5 + $0x16] sm:$0xff] }
 0x7a1   :  { %v10516_v57 = vcombine.low %v7342_v60, %v17721_v37  ;;  %8169 = vmatprep.subr.mxu1 %v19777_v15  ;;  %v19413_v29 = vrot.slane %v17739_v22, 3  ;;  %v8380_v39 = vrot.slane %v17739_v22, 1 }
 0x7a2   :  { %8170 = vmatpush1.msra.mxu1 %v8151_v10  ;;  %v7229_v13 = vpop.permute.xlu1 %7228  ;;  %v7303_v36 = vpop.permute.xlu0 %7302  ;;  %v19410_v10 = vrot.slane %v17754_v32, 1 }
 0x7a3   :  { %8171 = vmatprep.subr.mxu1 %v19777_v15  ;;  %7913 = vmatmul.mubr.f32.gmra.mxu1 %v10516_v57  ;;  %v7327_v9 = vsel %vm1695_vm10, %v17332_v44, %v7229_v13  ;;  %v19409_v44 = vrot.slane %v17754_v32, 3  ;;  %v8142_v13 = vld [vmem:[%s19371_s7 + $0x2a8] sm:$0xff] }
 0x7a4   :  { %8172 = vmatpush1.msra.mxu1 %v8150_v12  ;;  %10524 = vmatprep.mubr.msk.f32.mxu1 %vm1695_vm10, %v10519_v52  ;;  %v7335_v61 = vsel %vm4007_vm13, %v7327_v9, %v17668_v41  ;;  %v17796_v12 = vcombine.low %v7320_v14, %v7321_v55  ;;  %v7958_v9 = vrot.slane %v17395_v38, 2 }
 0x7a5   :  { %8173 = vmatprep.subr.mxu1 %v19777_v15  ;;  %8437 = vrot.lane.b32.xlu1 %v19413_v29, %s11898_s22 }
 0x7a6   :  { %8174 = vmatpush1.msra.mxu1 %v8149_v25  ;;  %v7267_v16 = vpop.permute.xlu1 %7266  ;;  %v7305_v59 = vpop.permute.xlu0 %7304 }
 0x7a7   :  { %8175 = vmatprep.subr.mxu1 %v19777_v15  ;;  %v7334_v45 = vsel %vm4007_vm13, %v7326_v58, %v7267_v16  ;;  %v17819_v16 = vld [vmem:[#allocation5 + $0x66] sm:$0xff] }
 0x7a8   :  { %8176 = vmatpush1.msra.mxu1 %v8148_v20  ;;  %v7343_v4 = vsel %vm7338_vm1, %v7334_v45, %v17690_v28  ;;  %v8140_v20 = vld [vmem:[%s19371_s7 + $0x298] sm:$0xff]  ;;  %19791 = vst [vmem:[#allocation33_spill] sm:$0xff] %v17819_v16  ;;  %v8138_v58 = vld [vmem:[%s19371_s7 + $0x288] sm:$0xff] }
 0x7a9   :  { %8177 = vmatprep.subr.mxu1 %v19777_v15  ;;  %8389 = vrot.lane.b32.xlu1 %v8380_v39, %s11898_s22 }
 0x7aa   :  { %8178 = vmatpush1.msra.mxu1 %v8147_v7  ;;  %v7231_v35 = vpop.permute.xlu1 %7230 }
 0x7ab   :  { %8179 = vmatprep.subr.mxu1 %v19777_v15  ;;  %v7328_v43 = vsel %vm1695_vm10, %v17344_v17, %v7231_v35  ;;  %v8141_v17 = vld [vmem:[%s19371_s7 + $0x2a0] sm:$0xff] }
 0x7ac   :  { %v7336_v50 = vsel %vm4007_vm13, %v7328_v43, %v7271_v42  ;;  %8180 = vmatpush1.msra.mxu1 %v8146_v47  ;;  %v10521_v42 = vcombine.low %v7321_v55, %v7792_v21  ;;  %v8361_v43 = vld [vmem:[#allocation5 + $0xe6] sm:$0xff] }
 0x7ad   :  { %8181 = vmatprep.subr.mxu1 %v19777_v15  ;;  %v7345_v51 = vsel %vm7338_vm1, %v7336_v50, %v7303_v36  ;;  %8445 = vrot.lane.b32.xlu1 %v19409_v44, %s11898_s22  ;;  %v8137_v50 = vld [vmem:[%s19371_s7 + $0x280] sm:$0xff] }
 0x7ae   :  { %8182 = vmatpush1.msra.mxu1 %v8145_v54  ;;  %v7301_v60 = vpop.permute.xlu1 %7300 }
 0x7af   :  { %8183 = vmatprep.subr.mxu1 %v19777_v15  ;;  %v7344_v19 = vsel %vm7338_vm1, %v7335_v61, %v7301_v60  ;;  %v8156_v61 = vld [vmem:[%s19371_s7 + $0x318] sm:$0xff]  ;;  %v10529_v60 = vcombine.low %v7490_v56, %v7958_v9  ;;  %v8854_v9 = vrot.slane %v17819_v16, 3 }
 0x7b0   :  { %v10506_v0 = vcombine.low %v7343_v4, %v7344_v19  ;;  %v10518_v41 = vcombine.low %v7344_v19, %v7345_v51  ;;  %8184 = vmatpush1.msra.mxu1 %v8144_v31  ;;  %v8155_v4 = vld [vmem:[%s19371_s7 + $0x310] sm:$0xff]  ;;  %v8153_v19 = vld [vmem:[%s19371_s7 + $0x300] sm:$0xff] }
 0x7b1   :  { %8185 = vmatprep.subr.mxu1 %v19777_v15  ;;  %8397 = vrot.lane.b32.xlu1 %v19410_v10, %s11898_s22 }
 0x7b2   :  { %8186 = vmatpush1.msra.mxu1 %v8143_v49  ;;  %v7780_v28 = vpop.permute.xlu0 %7779  ;;  %7755 = vmatmul.mubr.f32.gmra.mxu0 %v10506_v0  ;;  %v7233_v57 = vpop.permute.xlu1 %7232 }
 0x7b3   :  { %7918 = vmatmul.mubr.f32.gmra.mxu1 %v10518_v41  ;;  %8187 = vmatprep.subr.mxu1 %v19777_v15  ;;  %v7329_v14 = vsel %vm1695_vm10, %v17378_v40, %v7233_v57  ;;  %v8139_v40 = vld [vmem:[%s19371_s7 + $0x290] sm:$0xff]  ;;  %v7959_v41 = vrot.slane %v17446_v48, 2 }
 0x7b4   :  { %10513 = vmatprep.mubr.msk.f32.mxu0 %vm1695_vm10, %v17796_v12  ;;  %10525 = vmatprep.mubr.msk.f32.mxu1 %vm1695_vm10, %v10521_v42  ;;  %v10530_v42 = vcombine.low %v17608_v8, %v17671_v33 }
 0x7b5   :  { %8188 = vmatpush1.msra.mxu1 %v8142_v13  ;;  %8721 = vrot.lane.b32.xlu1 %v17819_v16, %s11898_s22 }
 0x7b6   :  { %8189 = vmatprep.subr.mxu1 %v19777_v15  ;;  %v7935_v52 = vpop.permute.xlu0 %7934  ;;  %v7273_v25 = vpop.permute.xlu1 %7272 }
 0x7b7   :  { %8190 = vmatpush1.msra.mxu1 %v8141_v17  ;;  %v7337_v7 = vsel %vm4007_vm13, %v7329_v14, %v7273_v25  ;;  %v7960_v24 = vsel %vm1695_vm10, %v17395_v38, %v7935_v52 }
 0x7b8   :  { %8191 = vmatprep.subr.mxu1 %v19777_v15  ;;  %v7346_v36 = vsel %vm7338_vm1, %v7337_v7, %v7305_v59 }
 0x7b9   :  { %v17827_v47 = vcombine.low %v7345_v51, %v7346_v36  ;;  %8192 = vmatpush1.msra.mxu1 %v8140_v20  ;;  %8729 = vrot.lane.b32.xlu1 %v8361_v43, %s11898_s22 }
 0x7ba   :  { %8193 = vmatprep.subr.mxu1 %v19777_v15  ;;  %v7770_v35 = vpop.permute.xlu1 %7769  ;;  %v7953_v54 = vpop.permute.xlu0 %7952 }
 0x7bb   :  { %8194 = vmatpush1.msra.mxu1 %v8139_v40  ;;  %v7794_v45 = vsel %vm1695_vm10, %v17375_v23, %v7770_v35  ;;  %7760 = vmatmul.mubr.f32.gmra.mxu0 %v17827_v47  ;;  %v19412_v35 = vrot.slane %v17754_v32, 2 }
 0x7bc   :  { %8195 = vmatprep.subr.mxu1 %v19777_v15  ;;  %10534 = vmatprep.mubr.msk.f32.mxu0 %vm1695_vm10, %v17264_v62  ;;  %v7796_v31 = vsel %vm4007_vm13, %v7794_v45, %v7780_v28  ;;  %v19407_v45 = vrot.slane %v17819_v16, 1 }
 0x7bd   :  { %8196 = vmatpush1.msra.mxu1 %v8138_v58  ;;  %v8571_v58 = vrot.slane %v17739_v22, 4  ;;  %8865 = vrot.lane.b32.xlu1 %v8854_v9, %s11898_s22 }
 0x7be   :  { %8197 = vmatprep.subr.mxu1 %v19777_v15  ;;  %v7788_v59 = vpop.permute.xlu1 %7787  ;;  %v8112_v51 = vpop.permute.xlu0 %8111 }
 0x7bf   :  { %8198 = vmatpush1.msra.mxu1 %v8137_v50  ;;  %v7798_v62 = vsel %vm7338_vm1, %v7796_v31, %v7788_v59  ;;  %8075 = vmatmul.mubr.f32.vlgmr.msra.gmra.mxu0 %v10526_v63  ;;  %v8125_v63 = vrot.slane %v17388_v46, 2  ;;  %v19411_v31 = vrot.slane %v17819_v16, 2  ;;  %v17949_v59 = vld [vmem:[#allocation5 + $0x76] sm:$0xff] }
 0x7c0   :  { %8223 = vmatprep.subr.mxu1 %v19777_v15  ;;  %v10520_v55 = vcombine.low %v7346_v36, %v7798_v62  ;;  %10535 = vmatprep.mubr.msk.f32.mxu0 %vm1695_vm10, %v10529_v60  ;;  %v17924_v36 = vld [vmem:[#allocation5 + $0x86] sm:$0xff] }
 0x7c1   :  { %8224 = vmatpush2.msra.mxu1 %v8156_v61  ;;  %v10539_v57 = vcombine.low %v7791_v2, %v8125_v63  ;;  %v8431_v40 = vrot.slane %v17924_v36, 3  ;;  %8817 = vrot.lane.b32.xlu1 %v19407_v45, %s11898_s22  ;;  %v8950_v61 = vrot.slane %v17949_v59, 2  ;;  %v9233_v63 = vld [vmem:[%s19373_s9 + $0xf0] sm:$0xff] }
 0x7c2   :  { %8225 = vmatprep.subr.mxu1 %v19777_v15  ;;  %7923 = vmatmul.mubr.f32.gmra.mxu1 %v10520_v55  ;;  %v7945_v56 = vpop.permute.xlu1 %7944  ;;  %v7937_v28 = vpop.permute.xlu0 %7936 }
 0x7c3   :  { %8226 = vmatpush2.msra.mxu1 %v8155_v4  ;;  %v7962_v3 = vsel %vm4007_vm13, %v7960_v24, %v7945_v56  ;;  %10542 = vmatprep.mubr.msk.f32.mxu1 %vm1695_vm10, %v17464_v34 }
 0x7c4   :  { %8227 = vmatprep.subr.mxu1 %v19777_v15  ;;  %v7964_v38 = vsel %vm7338_vm1, %v7962_v3, %v7953_v54  ;;  %v8575_v54 = vrot.slane %v17754_v32, 4  ;;  %v9218_v3 = vld [vmem:[%s19373_s9 + $0x78] sm:$0xff] }
 0x7c5   :  { %v10528_v49 = vcombine.low %v17524_v6, %v7964_v38  ;;  %8228 = vmatpush2.msra.mxu1 %v8154_v5  ;;  %8961 = vrot.lane.b32.xlu1 %v8950_v61, %s11898_s22  ;;  %v9234_v5 = vld [vmem:[%s19373_s9 + $0xf8] sm:$0xff]  ;;  %v9217_v38 = vld [vmem:[%s19373_s9 + $0x70] sm:$0xff] }
 0x7c6   :  { %8229 = vmatprep.subr.mxu1 %v19777_v15  ;;  %v8102_v0 = vpop.permute.xlu1 %8101  ;;  %v7955_v2 = vpop.permute.xlu0 %7954  ;;  %10918 = vmatprep.subr.mxu0 %v9234_v5  ;;  %v9221_v61 = vld [vmem:[%s19373_s9 + $0x90] sm:$0xff]  ;;  %v9220_v5 = vld [vmem:[%s19373_s9 + $0x88] sm:$0xff] }
 0x7c7   :  { %8230 = vmatpush2.msra.mxu1 %v8153_v19  ;;  %v8127_v34 = vsel %vm1695_vm10, %v17388_v46, %v8102_v0  ;;  %8080 = vmatmul.mubr.f32.gmra.mxu0 %v10528_v49  ;;  %v10533_v46 = vcombine.low %v7494_v53, %v7959_v41  ;;  %v9232_v19 = vld [vmem:[%s19373_s9 + $0xe8] sm:$0xff]  ;;  %v9231_v0 = vld [vmem:[%s19373_s9 + $0xe0] sm:$0xff] }
 0x7c8   :  { %8232 = vmatmul.mubr.f32.vlgmr.msra.gmra.mxu1 %v17693_v27  ;;  %10536 = vmatprep.mubr.msk.f32.mxu0 %vm1695_vm10, %v17321_v30  ;;  %v8129_v6 = vsel %vm4007_vm13, %v8127_v34, %v8112_v51  ;;  %v8126_v30 = vrot.slane %v17423_v26, 2  ;;  %v7961_v27 = vsel %vm1695_vm10, %v17446_v48, %v7937_v28  ;;  %v9216_v49 = vld [vmem:[%s19373_s9 + $0x68] sm:$0xff]  ;;  %v9215_v41 = vld [vmem:[%s19373_s9 + $0x60] sm:$0xff]  ;;  %v9230_v28 = vld [vmem:[%s19373_s9 + $0xd8] sm:$0xff] }
 0x7c9   :  { %10543 = vmatprep.mubr.msk.f32.mxu1 %vm1695_vm10, %v10539_v57  ;;  %10919 = vmatpush3.msra.mxu0 %v9218_v3  ;;  %v9214_v34 = vld [vmem:[%s19373_s9 + $0x58] sm:$0xff]  ;;  %v9229_v57 = vld [vmem:[%s19373_s9 + $0xd0] sm:$0xff] }
 0x7ca   :  { %v8120_v13 = vpop.permute.xlu1 %8119  ;;  %v8114_v14 = vpop.permute.xlu0 %8113  ;;  %10920 = vmatprep.subr.mxu0 %v9233_v63  ;;  %v9204_v63 = vld [vmem:[%s19373_s9 + $0x8] sm:$0xff] }
 0x7cb   :  { %v8131_v17 = vsel %vm7338_vm1, %v8129_v6, %v8120_v13  ;;  %8085 = vmatmul.mubr.f32.gmra.mxu0 %v10530_v42  ;;  %v9213_v6 = vld [vmem:[%s19373_s9 + $0x50] sm:$0xff]  ;;  %v9228_v42 = vld [vmem:[%s19373_s9 + $0xc8] sm:$0xff] }
 0x7cc   :  { %v10538_v1 = vcombine.low %v17721_v37, %v8131_v17  ;;  %10537 = vmatprep.mubr.msk.f32.mxu0 %vm1695_vm10, %v10533_v46  ;;  %v10541_v37 = vcombine.low %v7792_v21, %v8126_v30  ;;  %10921 = vmatpush3.msra.mxu0 %v9217_v38  ;;  %v9212_v13 = vld [vmem:[%s19373_s9 + $0x48] sm:$0xff]  ;;  %v9227_v46 = vld [vmem:[%s19373_s9 + $0xc0] sm:$0xff] }
 0x7cd   :  { %10922 = vmatprep.subr.mxu0 %v9232_v19  ;;  %v9219_v38 = vld [vmem:[%s19373_s9 + $0x80] sm:$0xff] }
 0x7ce   :  { %8237 = vmatmul.mubr.f32.gmra.mxu1 %v10538_v1  ;;  %v7947_v8 = vpop.permute.xlu1 %7946  ;;  %10923 = vmatpush3.msra.mxu0 %v9216_v49  ;;  %v9203_v19 = vld [vmem:[%s19373_s9] sm:$0xff]  ;;  %v9266_v49 = vld [vmem:[%s19373_s9 + $0x1f8] sm:$0xff] }
 0x7cf   :  { %v7963_v33 = vsel %vm4007_vm13, %v7961_v27, %v7947_v8  ;;  %10544 = vmatprep.mubr.msk.f32.mxu1 %vm1695_vm10, %v17796_v12  ;;  %10924 = vmatprep.subr.mxu0 %v9231_v0  ;;  %v9226_v27 = vld [vmem:[%s19373_s9 + $0xb8] sm:$0xff] }
 0x7d0   :  { %v7965_v11 = vsel %vm7338_vm1, %v7963_v33, %v7955_v2  ;;  %10925 = vmatpush3.msra.mxu0 %v9215_v41  ;;  %v9211_v2 = vld [vmem:[%s19373_s9 + $0x40] sm:$0xff]  ;;  %v9250_v0 = vld [vmem:[%s19373_s9 + $0x178] sm:$0xff]  ;;  %10962 = vmatprep.subr.mxu1 %v9266_v49 }
 0x7d1   :  { %v10532_v53 = vcombine.low %v17674_v18, %v7965_v11  ;;  %v17912_v18 = vld [vmem:[#allocation5 + $0x6] sm:$0xff]  ;;  %10926 = vmatprep.subr.mxu0 %v9230_v28  ;;  %10963 = vmatpush3.msra.mxu1 %v9250_v0 }
 0x7d2   :  { %8242 = vmatmul.mubr.f32.gmra.mxu1 %v17827_v47  ;;  %v8104_v52 = vpop.permute.xlu1 %8103  ;;  %v8427_v23 = vrot.slane %v17912_v18, 3  ;;  %v8379_v21 = vrot.slane %v17912_v18, 1  ;;  %v8383_v47 = vrot.slane %v17924_v36, 1  ;;  %10927 = vmatpush3.msra.mxu0 %v9214_v34  ;;  %v8411_v30 = vrot.slane %v17912_v18, 2  ;;  %v9265_v34 = vld [vmem:[%s19373_s9 + $0x1f0] sm:$0xff] }
 0x7d3   :  { %v8128_v48 = vsel %vm1695_vm10, %v17423_v26, %v8104_v52  ;;  %8090 = vmatmul.mubr.f32.gmra.mxu0 %v10532_v53  ;;  %10545 = vmatprep.mubr.msk.f32.mxu1 %vm1695_vm10, %v10541_v37  ;;  %v8523_v26 = vrot.slane %v17739_v22, 2  ;;  %v9210_v53 = vld [vmem:[%s19373_s9 + $0x38] sm:$0xff]  ;;  %v9225_v37 = vld [vmem:[%s19373_s9 + $0xb0] sm:$0xff]  ;;  %v8459_v44 = vrot.slane %v17912_v18, 4 }
 0x7d4   :  { %v8130_v25 = vsel %vm4007_vm13, %v8128_v48, %v8114_v14  ;;  %8435 = vrot.lane.b32.xlu0 %v8427_v23, %s11898_s22  ;;  %10928 = vmatprep.subr.mxu0 %v9229_v57  ;;  %v9209_v48 = vld [vmem:[%s19373_s9 + $0x30] sm:$0xff]  ;;  %v9223_v23 = vld [vmem:[%s19373_s9 + $0xa0] sm:$0xff] }
 0x7d5   :  { %10929 = vmatpush3.msra.mxu0 %v9213_v6  ;;  %v9249_v57 = vld [vmem:[%s19373_s9 + $0x170] sm:$0xff]  ;;  %10964 = vmatprep.subr.mxu1 %v9265_v34 }
 0x7d6   :  { %v8122_v12 = vpop.permute.xlu1 %8121  ;;  %10930 = vmatprep.subr.mxu0 %v9228_v42  ;;  %10965 = vmatpush3.msra.mxu1 %v9249_v57  ;;  %v9254_v57 = vld [vmem:[%s19373_s9 + $0x198] sm:$0xff] }
 0x7d7   :  { %v8132_v20 = vsel %vm7338_vm1, %v8130_v25, %v8122_v12  ;;  %10931 = vmatpush3.msra.mxu0 %v9212_v13  ;;  %v9224_v25 = vld [vmem:[%s19373_s9 + $0xa8] sm:$0xff] }
 0x7d8   :  { %v10540_v7 = vcombine.low %v7798_v62, %v8132_v20  ;;  %8387 = vrot.lane.b32.xlu0 %v8379_v21, %s11898_s22  ;;  %10932 = vmatprep.subr.mxu0 %v9227_v46  ;;  %v9264_v13 = vld [vmem:[%s19373_s9 + $0x1e8] sm:$0xff] }
 0x7d9   :  { %10933 = vmatpush3.msra.mxu0 %v9211_v2  ;;  %v9248_v46 = vld [vmem:[%s19373_s9 + $0x168] sm:$0xff]  ;;  %10966 = vmatprep.subr.mxu1 %v9264_v13  ;;  %v9262_v2 = vld [vmem:[%s19373_s9 + $0x1d8] sm:$0xff] }
 0x7da   :  { %8247 = vmatmul.mubr.f32.gmra.mxu1 %v10540_v7  ;;  %10934 = vmatprep.subr.mxu0 %v9226_v27  ;;  %v9208_v7 = vld [vmem:[%s19373_s9 + $0x28] sm:$0xff] }
 0x7db   :  { %10935 = vmatpush3.msra.mxu0 %v9210_v53  ;;  %10967 = vmatpush3.msra.mxu1 %v9248_v46 }
 0x7dc   :  { %8531 = vrot.lane.b32.xlu0 %v8523_v26, %s11898_s22  ;;  %10936 = vmatprep.subr.mxu0 %v9225_v37  ;;  %v9260_v37 = vld [vmem:[%s19373_s9 + $0x1c8] sm:$0xff] }
 0x7dd   :  { %10937 = vmatpush3.msra.mxu0 %v9209_v48  ;;  %v9259_v48 = vld [vmem:[%s19373_s9 + $0x1c0] sm:$0xff] }
 0x7de   :  { %10938 = vmatprep.subr.mxu0 %v9224_v25  ;;  %v9243_v25 = vld [vmem:[%s19373_s9 + $0x140] sm:$0xff] }
 0x7df   :  { %10939 = vmatpush3.msra.mxu0 %v9208_v7 }
 0x7e0   :  { %8483 = vrot.lane.b32.xlu0 %v17739_v22, %s11898_s22  ;;  %10940 = vmatprep.subr.mxu0 %v9223_v23  ;;  %v9258_v23 = vld [vmem:[%s19373_s9 + $0x1b8] sm:$0xff] }
 0x7e4   :  { %8443 = vrot.lane.b32.xlu0 %v8431_v40, %s11898_s22  ;;  %v9207_v40 = vld [vmem:[%s19373_s9 + $0x20] sm:$0xff] }
 0x7e5   :  { %10941 = vmatpush3.msra.mxu0 %v9207_v40  ;;  %v9257_v40 = vld [vmem:[%s19373_s9 + $0x1b0] sm:$0xff] }
 0x7e8   :  { %8395 = vrot.lane.b32.xlu0 %v8383_v47, %s11898_s22  ;;  %v9222_v47 = vld [vmem:[%s19373_s9 + $0x98] sm:$0xff] }
 0x7e9   :  { %10942 = vmatprep.subr.mxu0 %v9222_v47  ;;  %v9241_v47 = vld [vmem:[%s19373_s9 + $0x130] sm:$0xff] }
 0x7ec   :  { %8539 = vrot.lane.b32.xlu0 %v19412_v35, %s11898_s22 }
 0x7f0   :  { %8491 = vrot.lane.b32.xlu0 %v17754_v32, %s11898_s22 }
 0x7f4   :  { %8579 = vrot.lane.b32.xlu0 %v8571_v58, %s11898_s22 }
 0x7f8   :  { %8587 = vrot.lane.b32.xlu0 %v8575_v54, %s11898_s22 }
 0x7fc   :  { %8959 = vrot.lane.b32.xlu0 %v19411_v31, %s11898_s22 }
 0x800   :  { %8911 = vrot.lane.b32.xlu0 %v17819_v16, %s11898_s22 }
 0x812   :  { %v7641_v43 = vpop.f32.mrf.mxu1 }
 0x814   :  { %v7643_v50 = vpop.f32.mrf.mxu1 }
 0x815   :  { %v9206_v50 = vld [vmem:[%s19373_s9 + $0x18] sm:$0xff] }
 0x816   :  { %10943 = vmatpush3.msra.mxu0 %v9206_v50  ;;  %v9256_v50 = vld [vmem:[%s19373_s9 + $0x1a8] sm:$0xff] }
 0x817   :  { %v8438_v17 = vpop.permute.xlu1 %8437  ;;  %10944 = vmatprep.subr.mxu0 %v9221_v61  ;;  %v9240_v61 = vld [vmem:[%s19373_s9 + $0x128] sm:$0xff] }
 0x818   :  { %v8748_v1 = vsel %vm4007_vm13, %v8523_v26, %v8438_v17  ;;  %v9263_v17 = vld [vmem:[%s19373_s9 + $0x1e0] sm:$0xff] }
 0x819   :  { %10968 = vmatprep.subr.mxu1 %v9263_v17 }
 0x81b   :  { %v7746_v60 = vpop.f32.mrf.mxu0  ;;  %v8390_v9 = vpop.permute.xlu1 %8389 }
 0x81c   :  { %v17956_v62 = vadd.f32 %v7746_v60, %v7641_v43  ;;  %v8740_v60 = vsel %vm4007_vm13, %v17739_v22, %v8390_v9 }
 0x81d   :  { %v7748_v55 = vpop.f32.mrf.mxu0 }
 0x82a   :  { %v17992_v4 = vpop.f32.mrf.mxu1 }
 0x82c   :  { %v7648_v51 = vpop.f32.mrf.mxu1 }
 0x83a   :  { %v17994_v24 = vpop.f32.mrf.mxu1 }
 0x83c   :  { %v7653_v56 = vpop.f32.mrf.mxu1 }
 0x83d   :  { %v9205_v56 = vld [vmem:[%s19373_s9 + $0x10] sm:$0xff] }
 0x83e   :  { %10945 = vmatpush3.msra.mxu0 %v9205_v56  ;;  %v18194_v56 = vld [vmem:[%s19372_s8] ss:$0 sm:$0xff] }
 0x83f   :  { %10946 = vmatprep.subr.mxu0 %v9220_v5 }
 0x840   :  { %10947 = vmatpush3.msra.mxu0 %v9204_v63 }
 0x841   :  { %10948 = vmatprep.subr.mxu0 %v9219_v38 }
 0x842   :  { %10949 = vmatpush3.msra.mxu0 %v9203_v19 }
 0x846   :  { %v8436_v33 = vpop.permute.xlu0 %8435 }
 0x847   :  { %v8747_v11 = vsel %vm4007_vm13, %v8411_v30, %v8436_v33  ;;  %v9246_v30 = vld [vmem:[%s19373_s9 + $0x158] sm:$0xff]  ;;  %v9261_v33 = vld [vmem:[%s19373_s9 + $0x1d0] sm:$0xff] }
 0x848   :  { %v10557_v52 = vcombine.low %v8747_v11, %v8748_v1  ;;  %v9247_v1 = vld [vmem:[%s19373_s9 + $0x160] sm:$0xff]  ;;  %v9245_v11 = vld [vmem:[%s19373_s9 + $0x150] sm:$0xff] }
 0x849   :  { %10969 = vmatpush3.msra.mxu1 %v9247_v1  ;;  %v9252_v1 = vld [vmem:[%s19373_s9 + $0x188] sm:$0xff] }
 0x84a   :  { %9582 = vmatprep.mubr.f32.mxu0 %v10557_v52  ;;  %v8388_v54 = vpop.permute.xlu0 %8387  ;;  %10970 = vmatprep.subr.mxu1 %v9262_v2  ;;  %v9236_v2 = vld [vmem:[%s19373_s9 + $0x108] sm:$0xff] }
 0x84b   :  { %v8739_v55 = vsel %vm4007_vm13, %v17912_v18, %v8388_v54  ;;  %10971 = vmatpush3.msra.mxu1 %v9246_v30 }
 0x84c   :  { %v10556_v3 = vcombine.low %v8739_v55, %v8740_v60  ;;  %10972 = vmatprep.subr.mxu1 %v9261_v33  ;;  %v9251_v33 = vld [vmem:[%s19373_s9 + $0x180] sm:$0xff] }
 0x84d   :  { %10973 = vmatpush3.msra.mxu1 %v9245_v11 }
 0x84e   :  { %9583 = vmatmul.mubr.f32.vlgmr.msra.gmra.mxu0 %v10556_v3  ;;  %10974 = vmatprep.subr.mxu1 %v9260_v37 }
 0x85a   :  { %v18051_v8 = vpop.f32.mrf.mxu1 }
 0x85c   :  { %v7658_v14 = vpop.f32.mrf.mxu1 }
 0x85d   :  { %v9244_v14 = vld [vmem:[%s19373_s9 + $0x148] sm:$0xff] }
 0x85e   :  { %v18066_v12 = vpop.f32.mrf.mxu0  ;;  %v18068_v20 = vpop.f32.mrf.mxu1  ;;  %10975 = vmatpush3.msra.mxu1 %v9244_v14 }
 0x85f   :  { %10976 = vmatprep.subr.mxu1 %v9259_v48  ;;  %v7928_v54 = vadd.f32 %v18068_v20, %v17956_v62  ;;  %v9239_v62 = vld [vmem:[%s19373_s9 + $0x120] sm:$0xff]  ;;  %v7752_v5 = vadd.f32 %v18066_v12, %v17992_v4  ;;  %v9238_v4 = vld [vmem:[%s19373_s9 + $0x118] sm:$0xff]  ;;  %v9253_v12 = vld [vmem:[%s19373_s9 + $0x190] sm:$0xff] }
 0x860   :  { %v7753_v21 = vpop.f32.mrf.mxu0  ;;  %v7911_v26 = vpop.f32.mrf.mxu1  ;;  %10977 = vmatpush3.msra.mxu1 %v9243_v25 }
 0x861   :  { %v9242_v21 = vld [vmem:[%s19373_s9 + $0x138] sm:$0xff]  ;;  %10978 = vmatprep.subr.mxu1 %v9258_v23 }
 0x862   :  { %10979 = vmatpush3.msra.mxu1 %v9242_v21 }
 0x863   :  { %v18082_v43 = vpop.f32.mrf.mxu1  ;;  %10980 = vmatprep.subr.mxu1 %v9257_v40 }
 0x864   :  { %10981 = vmatpush3.msra.mxu1 %v9241_v47  ;;  %v7929_v19 = vadd.f32 %v18082_v43, %v7752_v5 }
 0x865   :  { %v7916_v51 = vpop.f32.mrf.mxu1  ;;  %10982 = vmatprep.subr.mxu1 %v9256_v50 }
 0x866   :  { %10983 = vmatpush3.msra.mxu1 %v9240_v61  ;;  %v9255_v51 = vld [vmem:[%s19373_s9 + $0x1a0] sm:$0xff] }
 0x867   :  { %10984 = vmatprep.subr.mxu1 %v9255_v51 }
 0x868   :  { %10985 = vmatpush3.msra.mxu1 %v9239_v62 }
 0x869   :  { %10986 = vmatprep.subr.mxu1 %v9254_v57 }
 0x86a   :  { %10987 = vmatpush3.msra.mxu1 %v9238_v4 }
 0x86b   :  { %10988 = vmatprep.subr.mxu1 %v9253_v12 }
 0x872   :  { %v18115_v41 = vpop.f32.mrf.mxu0 }
 0x873   :  { %v18117_v28 = vpop.f32.mrf.mxu1  ;;  %v7757_v49 = vadd.f32 %v18115_v41, %v17994_v24  ;;  %v9237_v24 = vld [vmem:[%s19373_s9 + $0x110] sm:$0xff] }
 0x874   :  { %v7758_v6 = vpop.f32.mrf.mxu0  ;;  %10989 = vmatpush3.msra.mxu1 %v9237_v24  ;;  %v9298_v24 = vld [vmem:[%s19373_s9 + $0x2f8] sm:$0xff] }
 0x875   :  { %v7921_v42 = vpop.f32.mrf.mxu1  ;;  %v7930_v13 = vadd.f32 %v18117_v28, %v7757_v49  ;;  %10990 = vmatprep.subr.mxu1 %v9252_v1  ;;  %v9235_v28 = vld [vmem:[%s19373_s9 + $0x100] sm:$0xff]  ;;  %11006 = vmatprep.subr.mxu0 %v9298_v24  ;;  %v18362_v1 = vpop.permute.xlu0 %8531 }
 0x876   :  { %10991 = vmatpush3.msra.mxu1 %v9236_v2  ;;  %v9295_v2 = vld [vmem:[%s19373_s9 + $0x2e0] sm:$0xff]  ;;  %v8763_v18 = vsel %vm4007_vm13, %v8380_v39, %v18362_v1  ;;  %v9314_v39 = vld [vmem:[%s19373_s9 + $0x378] sm:$0xff]  ;;  %v9313_v1 = vld [vmem:[%s19373_s9 + $0x370] sm:$0xff] }
 0x877   :  { %10992 = vmatprep.subr.mxu1 %v9251_v33  ;;  %v9294_v33 = vld [vmem:[%s19373_s9 + $0x2d8] sm:$0xff]  ;;  %v9271_v24 = vld [vmem:[%s19373_s9 + $0x220] sm:$0xff] }
 0x878   :  { %10993 = vmatpush3.msra.mxu1 %v9235_v28  ;;  %v9278_v28 = vld [vmem:[%s19373_s9 + $0x258] sm:$0xff] }
 0x87b   :  { %v18143_v27 = vpop.f32.mrf.mxu0 }
 0x87d   :  { %v7763_v53 = vpop.f32.mrf.mxu0 }
 0x87f   :  { %v8076_v52 = vpop.f32.mrf.mxu0 }
 0x880   :  { %v8095_v60 = vadd.f32 %v8076_v52, %v7928_v54 }
 0x881   :  { %v8078_v7 = vpop.f32.mrf.mxu0 }
 0x882   :  { %v18169_v26 = vpop.f32.mrf.mxu1  ;;  %v7762_v7 = vadd.f32 %v18143_v27, %v18051_v8 }
 0x884   :  { %v7926_v9 = vpop.f32.mrf.mxu1 }
 0x885   :  { %v7931_v9 = vadd.f32 %v18169_v26, %v7762_v7  ;;  %v9291_v7 = vld [vmem:[%s19373_s9 + $0x2c0] sm:$0xff] }
 0x887   :  { %v8081_v55 = vpop.f32.mrf.mxu0 }
 0x888   :  { %v8233_v20 = vpop.f32.mrf.mxu1  ;;  %v8096_v41 = vadd.f32 %v8081_v55, %v7929_v19 }
 0x889   :  { %v8252_v3 = vadd.f32 %v8233_v20, %v8095_v60  ;;  %v8083_v63 = vpop.f32.mrf.mxu0 }
 0x88a   :  { %v8235_v38 = vpop.f32.mrf.mxu1 }
 0x88b   :  { %v8263_v0 = vadd.f32 %v18194_v56, %v8252_v3  ;;  %v8086_v34 = vpop.f32.mrf.mxu0 }
 0x88c   :  { %v8097_v11 = vadd.f32 %v8086_v34, %v7930_v13  ;;  %v9296_v13 = vld [vmem:[%s19373_s9 + $0x2e8] sm:$0xff] }
 0x88d   :  { %v8267_v43 = vmax.f32 %v8263_v0, 0.0  ;;  %v8088_v6 = vpop.f32.mrf.mxu0 }
 0x88e   :  { %v8238_v42 = vpop.f32.mrf.mxu1  ;;  %v9297_v6 = vld [vmem:[%s19373_s9 + $0x2f0] sm:$0xff] }
 0x88f   :  { %v8275_v46 = vcombine.high %v8267_v43, %v8267_v43  ;;  %8320 = vst.msk [vmem:[#allocation5 + $0x28] sm:$0xf] %vm8319_vm4, %v8267_v43  ;;  %v8253_v17 = vadd.f32 %v8238_v42, %v8096_v41  ;;  %v9282_v43 = vld [vmem:[%s19373_s9 + $0x278] sm:$0xff]  ;;  %v9281_v42 = vld [vmem:[%s19373_s9 + $0x270] sm:$0xff] }
 0x890   :  { %v8240_v30 = vpop.f32.mrf.mxu1  ;;  %11007 = vmatpush3.msra.mxu0 %v9282_v43 }
 0x891   :  { %8321 = vst.msk [vmem:[#allocation5 + $0x38] sm:$0xf] %vm8319_vm4, %v8275_v46  ;;  %v8264_v53 = vadd.f32 %v18194_v56, %v8253_v17  ;;  %11008 = vmatprep.subr.mxu0 %v9297_v6  ;;  %v9280_v46 = vld [vmem:[%s19373_s9 + $0x268] sm:$0xff]  ;;  %v9279_v30 = vld [vmem:[%s19373_s9 + $0x260] sm:$0xff]  ;;  %v9286_v6 = vld [vmem:[%s19373_s9 + $0x298] sm:$0xff] }
 0x892   :  { %v8243_v37 = vpop.f32.mrf.mxu1  ;;  %11009 = vmatpush3.msra.mxu0 %v9281_v42  ;;  %v9270_v42 = vld [vmem:[%s19373_s9 + $0x218] sm:$0xff] }
 0x893   :  { %v8268_v14 = vmax.f32 %v8264_v53, 0.0  ;;  %v8254_v52 = vadd.f32 %v8243_v37, %v8097_v11  ;;  %v8091_v48 = vpop.f32.mrf.mxu0  ;;  %11010 = vmatprep.subr.mxu0 %v9296_v13  ;;  %v9293_v53 = vld [vmem:[%s19373_s9 + $0x2d0] sm:$0xff] }
 0x894   :  { %v8245_v25 = vpop.f32.mrf.mxu1  ;;  %v8098_v27 = vadd.f32 %v8091_v48, %v7931_v9  ;;  %11011 = vmatpush3.msra.mxu0 %v9280_v46  ;;  %v9277_v37 = vld [vmem:[%s19373_s9 + $0x250] sm:$0xff]  ;;  %v9276_v48 = vld [vmem:[%s19373_s9 + $0x248] sm:$0xff] }
 0x895   :  { %v8276_v23 = vcombine.high %v8268_v14, %v8268_v14  ;;  %8322 = vst.msk [vmem:[#allocation5 + $0x48] sm:$0xf] %vm8319_vm4, %v8268_v14  ;;  %v8265_v21 = vadd.f32 %v18194_v56, %v8254_v52  ;;  %v8093_v40 = vpop.f32.mrf.mxu0  ;;  %11012 = vmatprep.subr.mxu0 %v9295_v2  ;;  %v9292_v52 = vld [vmem:[%s19373_s9 + $0x2c8] sm:$0xff]  ;;  %v18397_v25 = vpop.permute.xlu0 %8483  ;;  %v9285_v2 = vld [vmem:[%s19373_s9 + $0x290] sm:$0xff] }
 0x896   :  { %v18234_v47 = vld [vmem:[#allocation5 + $0x26] sm:$0xff]  ;;  %11013 = vmatpush3.msra.mxu0 %v9279_v30  ;;  %v9274_v40 = vld [vmem:[%s19373_s9 + $0x238] sm:$0xff]  ;;  %v8755_v15 = vsel %vm4007_vm13, %v8459_v44, %v18397_v25  ;;  %v9329_v44 = vld [vmem:[%s19373_s9 + $0x3f0] sm:$0xff] }
 0x897   :  { %8323 = vst.msk [vmem:[#allocation5 + $0x58] sm:$0xf] %vm8319_vm4, %v8276_v23  ;;  %v8269_v54 = vmax.f32 %v8265_v21, 0.0  ;;  %8485 = vrot.lane.b32.xlu1 %v18234_v47, %s11898_s22  ;;  %v18241_v50 = vrot.slane %v18234_v47, 3  ;;  %v18247_v61 = vrot.slane %v18234_v47, 2  ;;  %v18253_v55 = vrot.slane %v18234_v47, 1  ;;  %11014 = vmatprep.subr.mxu0 %v9294_v33 }
 0x898   :  { %v18259_v20 = vrot.slane %v18234_v47, 4  ;;  %v18261_v5 = vld [vmem:[#allocation5 + $0x36] sm:$0xff]  ;;  %11015 = vmatpush3.msra.mxu0 %v9278_v28  ;;  %v9275_v23 = vld [vmem:[%s19373_s9 + $0x240] sm:$0xff]  ;;  %v18476_v28 = vpop.permute.xlu1 %8445 }
 0x899   :  { %v8277_v8 = vcombine.high %v8269_v54, %v8269_v54  ;;  %8324 = vst.msk [vmem:[#allocation5 + $0xa8] sm:$0xf] %vm8319_vm4, %v8269_v54  ;;  %8439 = vrot.lane.b32.xlu0 %v18241_v50, %s11898_s22  ;;  %v18277_v38 = vrot.slane %v18261_v5, 1  ;;  %v18292_v49 = vrot.slane %v18261_v5, 2  ;;  %v18299_v0 = vrot.slane %v18261_v5, 4  ;;  %11016 = vmatprep.subr.mxu0 %v9293_v53  ;;  %v9290_v21 = vld [vmem:[%s19373_s9 + $0x2b8] sm:$0xff] }
 0x89a   :  { %v8248_v26 = vpop.f32.mrf.mxu1  ;;  %11017 = vmatpush3.msra.mxu0 %v9277_v37  ;;  %v9289_v54 = vld [vmem:[%s19373_s9 + $0x2b0] sm:$0xff]  ;;  %v9284_v53 = vld [vmem:[%s19373_s9 + $0x288] sm:$0xff] }
 0x89b   :  { %8325 = vst.msk [vmem:[#allocation5 + $0xb8] sm:$0xf] %vm8319_vm4, %v8277_v8  ;;  %8533 = vrot.lane.b32.xlu1 %v18247_v61, %s11898_s22  ;;  %v8255_v60 = vadd.f32 %v8248_v26, %v8098_v27  ;;  %11018 = vmatprep.subr.mxu0 %v9292_v52  ;;  %v9330_v8 = vld [vmem:[%s19373_s9 + $0x3f8] sm:$0xff]  ;;  %v9273_v27 = vld [vmem:[%s19373_s9 + $0x230] sm:$0xff]  ;;  %v9268_v37 = vld [vmem:[%s19373_s9 + $0x208] sm:$0xff] }
 0x89c   :  { %v8250_v51 = vpop.f32.mrf.mxu1  ;;  %v18283_v19 = vld [vmem:[#allocation5 + $0x46] sm:$0xff]  ;;  %11019 = vmatpush3.msra.mxu0 %v9276_v48  ;;  %11050 = vmatprep.subr.mxu1 %v9330_v8  ;;  %v9269_v33 = vld [vmem:[%s19373_s9 + $0x210] sm:$0xff] }
 0x89d   :  { %v8266_v62 = vadd.f32 %v18194_v56, %v8255_v60  ;;  %8391 = vrot.lane.b32.xlu0 %v18253_v55, %s11898_s22  ;;  %v18269_v56 = vrot.slane %v18261_v5, 3  ;;  %v18308_v34 = vrot.slane %v18283_v19, 2  ;;  %v19408_v57 = vrot.slane %v18283_v19, 4  ;;  %11020 = vmatprep.subr.mxu0 %v9291_v7  ;;  %v18431_v60 = vpop.permute.xlu0 %8443  ;;  %v9288_v51 = vld [vmem:[%s19373_s9 + $0x2a8] sm:$0xff]  ;;  %v9283_v52 = vld [vmem:[%s19373_s9 + $0x280] sm:$0xff] }
 0x89e   :  { %v18321_v4 = vrot.slane %v18283_v19, 3  ;;  %v18326_v12 = vrot.slane %v18283_v19, 1  ;;  %v18338_v41 = vld [vmem:[#allocation5 + $0x56] sm:$0xff]  ;;  %11021 = vmatpush3.msra.mxu0 %v9275_v23  ;;  %v9267_v48 = vld [vmem:[%s19373_s9 + $0x200] sm:$0xff]  ;;  %v18501_v23 = vpop.permute.xlu1 %8397 }
 0x89f   :  { %v8270_v3 = vmax.f32 %v8266_v62, 0.0  ;;  %8581 = vrot.lane.b32.xlu1 %v18259_v20, %s11898_s22  ;;  %v18379_v11 = vrot.slane %v18338_v41, 1  ;;  %v8853_v14 = vrot.slane %v18338_v41, 3  ;;  %v18415_v9 = vrot.slane %v18338_v41, 2  ;;  %11022 = vmatprep.subr.mxu0 %v9290_v21  ;;  %v9272_v62 = vld [vmem:[%s19373_s9 + $0x228] sm:$0xff] }
 0x8a0   :  { %v18358_v17 = vld [vmem:[#allocation5 + $0xa6] sm:$0xff]  ;;  %11023 = vmatpush3.msra.mxu0 %v9274_v40 }
 0x8a1   :  { %v8278_v63 = vcombine.high %v8270_v3, %v8270_v3  ;;  %8326 = vst.msk [vmem:[#allocation5 + $0xc8] sm:$0xf] %vm8319_vm4, %v8270_v3  ;;  %8487 = vrot.lane.b32.xlu0 %v18261_v5, %s11898_s22  ;;  %v18429_v26 = vrot.slane %v18358_v17, 3  ;;  %11024 = vmatprep.subr.mxu0 %v9289_v54  ;;  %v18442_v3 = vrot.slane %v18358_v17, 2  ;;  %v18453_v43 = vrot.slane %v18358_v17, 1  ;;  %v18466_v46 = vpop.permute.xlu0 %8395 }
 0x8a2   :  { %11025 = vmatpush3.msra.mxu0 %v9273_v27  ;;  %v18464_v13 = vrot.slane %v18358_v17, 4  ;;  %v18471_v30 = vld [vmem:[#allocation5 + $0xb6] sm:$0xff]  ;;  %v18516_v8 = vpop.permute.xlu1 %8721 }
 0x8a3   :  { %8327 = vst.msk [vmem:[#allocation5 + $0xd8] sm:$0xf] %vm8319_vm4, %v8278_v63  ;;  %8441 = vrot.lane.b32.xlu1 %v18269_v56, %s11898_s22  ;;  %v9287_v63 = vld [vmem:[%s19373_s9 + $0x2a0] sm:$0xff]  ;;  %11026 = vmatprep.subr.mxu0 %v9288_v51  ;;  %v18506_v21 = vrot.slane %v18471_v30, 1  ;;  %v18527_v51 = vrot.slane %v18471_v30, 2 }
 0x8a4   :  { %11027 = vmatpush3.msra.mxu0 %v9272_v62 }
 0x8a5   :  { %8619 = vrot.lane.b32.xlu0 %v18253_v55, %s11898_s22  ;;  %11028 = vmatprep.subr.mxu0 %v9287_v63  ;;  %v18499_v7 = vpop.permute.xlu0 %8539  ;;  %v18534_v63 = vrot.slane %v18471_v30, 4 }
 0x8a6   :  { %11029 = vmatpush3.msra.mxu0 %v9271_v24  ;;  %v18522_v27 = vpop.permute.xlu1 %8729 }
 0x8a7   :  { %8393 = vrot.lane.b32.xlu1 %v18277_v38, %s11898_s22  ;;  %11030 = vmatprep.subr.mxu0 %v9286_v6 }
 0x8a8   :  { %11031 = vmatpush3.msra.mxu0 %v9270_v42  ;;  %v18514_v54 = vld [vmem:[#allocation5 + $0xc6] sm:$0xff]  ;;  %v9362_v42 = vld [vmem:[%s19373_s9 + $0x4f8] sm:$0xff] }
 0x8a9   :  { %8715 = vrot.lane.b32.xlu0 %v18261_v5, %s11898_s22  ;;  %11032 = vmatprep.subr.mxu0 %v9285_v2  ;;  %v18512_v40 = vpop.permute.xlu0 %8491  ;;  %v18550_v2 = vrot.slane %v18514_v54, 2  ;;  %v18573_v45 = vrot.slane %v18514_v54, 1  ;;  %v19416_v29 = vrot.slane %v18514_v54, 4 }
 0x8aa   :  { %11033 = vmatpush3.msra.mxu0 %v9269_v33  ;;  %v18536_v24 = vpop.permute.xlu1 %8865  ;;  %v18582_v31 = vld [vmem:[#allocation5 + $0xd6] sm:$0xff] }
 0x8ab   :  { %8489 = vrot.lane.b32.xlu1 %v18283_v19, %s11898_s22  ;;  %11034 = vmatprep.subr.mxu0 %v9284_v53  ;;  %19793 = vst [vmem:[#allocation56_spill] sm:$0xff] %v18550_v2 }
 0x8ac   :  { %11035 = vmatpush3.msra.mxu0 %v9268_v37 }
 0x8ad   :  { %8667 = vrot.lane.b32.xlu0 %v18241_v50, %s11898_s22  ;;  %11036 = vmatprep.subr.mxu0 %v9283_v52  ;;  %v8580_v62 = vpop.permute.xlu0 %8579  ;;  %v18564_v52 = vld [vmem:[#allocation5 + $0xe6] sm:$0xff] }
 0x8ae   :  { %11037 = vmatpush3.msra.mxu0 %v9267_v48  ;;  %v18552_v33 = vpop.permute.xlu1 %8817  ;;  %19796 = vst [vmem:[#allocation17_spill] sm:$0xff] %v18564_v52  ;;  %v8858_v48 = vrot.slane %v18564_v52, 3 }
 0x8af   :  { %8621 = vrot.lane.b32.xlu1 %v18277_v38, %s11898_s22  ;;  %11094 = vmatprep.subr.mxu0 %v9362_v42 }
 0x8b1   :  { %8535 = vrot.lane.b32.xlu0 %v18292_v49, %s11898_s22  ;;  %v18540_v6 = vpop.permute.xlu0 %8587 }
 0x8b2   :  { %v18562_v37 = vpop.permute.xlu1 %8961 }
 0x8b3   :  { %8717 = vrot.lane.b32.xlu1 %v18283_v19, %s11898_s22  ;;  %19795 = vst [vmem:[#allocation14_spill] sm:$0xff] %v18562_v37 }
 0x8b5   :  { %8583 = vrot.lane.b32.xlu0 %v18299_v0, %s11898_s22  ;;  %v18556_v53 = vpop.permute.xlu0 %8959 }
 0x8b6   :  { %19794 = vst [vmem:[#allocation73_spill] sm:$0xff] %v18556_v53 }
 0x8b7   :  { %8669 = vrot.lane.b32.xlu1 %v18269_v56, %s11898_s22 }
 0x8b9   :  { %8859 = vrot.lane.b32.xlu0 %v18269_v56, %s11898_s22  ;;  %v18569_v42 = vpop.permute.xlu0 %8911 }
 0x8ba   :  { %19797 = vst [vmem:[#allocation61_spill] sm:$0xff] %v18569_v42 }
 0x8bb   :  { %8537 = vrot.lane.b32.xlu1 %v18308_v34, %s11898_s22 }
 0x8bd   :  { %8811 = vrot.lane.b32.xlu0 %v18277_v38, %s11898_s22 }
 0x8bf   :  { %8585 = vrot.lane.b32.xlu1 %v19408_v57, %s11898_s22  ;;  %v19414_v57 = vrot.slane %v18564_v52, 1 }
 0x8c1   :  { %8907 = vrot.lane.b32.xlu0 %v18283_v19, %s11898_s22 }
 0x8c3   :  { %8861 = vrot.lane.b32.xlu1 %v18321_v4, %s11898_s22 }
 0x8c5   :  { %8623 = vrot.lane.b32.xlu0 %v18326_v12, %s11898_s22 }
 0x8c7   :  { %8813 = vrot.lane.b32.xlu1 %v18326_v12, %s11898_s22 }
 0x8c9   :  { %8719 = vrot.lane.b32.xlu0 %v18338_v41, %s11898_s22 }
 0x8cb   :  { %8909 = vrot.lane.b32.xlu1 %v18338_v41, %s11898_s22 }
 0x8cd   :  { %8671 = vrot.lane.b32.xlu0 %v18321_v4, %s11898_s22 }
 0x8cf   :  { %8493 = vrot.lane.b32.xlu1 %v18358_v17, %s11898_s22 }
 0x8d1   :  { %8955 = vrot.lane.b32.xlu0 %v18308_v34, %s11898_s22 }
 0x8d3   :  { %8625 = vrot.lane.b32.xlu1 %v18379_v11, %s11898_s22 }
 0x8d5   :  { %8863 = vrot.lane.b32.xlu0 %v8853_v14, %s11898_s22 }
 0x8d7   :  { %8673 = vrot.lane.b32.xlu1 %v8853_v14, %s11898_s22  ;;  %v18489_v14 = vrot.slane %v18471_v30, 3 }
 0x8d9   :  { %8815 = vrot.lane.b32.xlu0 %v18379_v11, %s11898_s22  ;;  %19792 = vst [vmem:[#allocation72_spill] sm:$0xff] %v18489_v14 }
 0x8db   :  { %8957 = vrot.lane.b32.xlu1 %v18415_v9, %s11898_s22 }
 0x8dd   :  { %8447 = vrot.lane.b32.xlu0 %v18429_v26, %s11898_s22 }
 0x8df   :  { %8541 = vrot.lane.b32.xlu1 %v18442_v3, %s11898_s22 }
 0x8e1   :  { %8399 = vrot.lane.b32.xlu0 %v18453_v43, %s11898_s22 }
 0x8e3   :  { %8589 = vrot.lane.b32.xlu1 %v18464_v13, %s11898_s22 }
 0x8e5   :  { %8495 = vrot.lane.b32.xlu0 %v18471_v30, %s11898_s22 }
 0x8e7   :  { %8449 = vrot.lane.b32.xlu1 %v18489_v14, %s11898_s22 }
 0x8e9   :  { %8627 = vrot.lane.b32.xlu0 %v18453_v43, %s11898_s22 }
 0x8eb   :  { %8401 = vrot.lane.b32.xlu1 %v18506_v21, %s11898_s22 }
 0x8ed   :  { %8723 = vrot.lane.b32.xlu0 %v18471_v30, %s11898_s22 }
 0x8ef   :  { %8497 = vrot.lane.b32.xlu1 %v18514_v54, %s11898_s22 }
 0x8f1   :  { %8675 = vrot.lane.b32.xlu0 %v18429_v26, %s11898_s22 }
 0x8f3   :  { %8629 = vrot.lane.b32.xlu1 %v18506_v21, %s11898_s22 }
 0x8f5   :  { %8543 = vrot.lane.b32.xlu0 %v18527_v51, %s11898_s22 }
 0x8f7   :  { %8725 = vrot.lane.b32.xlu1 %v18514_v54, %s11898_s22 }
 0x8f9   :  { %8591 = vrot.lane.b32.xlu0 %v18534_v63, %s11898_s22 }
 0x8fb   :  { %8677 = vrot.lane.b32.xlu1 %v18489_v14, %s11898_s22 }
 0x8fd   :  { %8867 = vrot.lane.b32.xlu0 %v18489_v14, %s11898_s22 }
 0x8ff   :  { %8545 = vrot.lane.b32.xlu1 %v18550_v2, %s11898_s22 }
 0x901   :  { %8819 = vrot.lane.b32.xlu0 %v18506_v21, %s11898_s22 }
 0x903   :  { %8913 = vrot.lane.b32.xlu1 %v17949_v59, %s11898_s22 }
 0x905   :  { %8915 = vrot.lane.b32.xlu0 %v18514_v54, %s11898_s22 }
 0x907   :  { %8873 = vrot.lane.b32.xlu1 %v8858_v48, %s11898_s22 }
 0x909   :  { %8631 = vrot.lane.b32.xlu0 %v18573_v45, %s11898_s22  ;;  %v8486_v59 = vpop.permute.xlu1 %8485 }
 0x90a   :  { %v8756_v48 = vsel %vm4007_vm13, %v8571_v58, %v8486_v59  ;;  %v18602_v58 = vrot.slane %v18514_v54, 3 }
 0x90b   :  { %v8440_v10 = vpop.permute.xlu0 %8439  ;;  %8825 = vrot.lane.b32.xlu1 %v19414_v57, %s11898_s22  ;;  %v10558_v59 = vcombine.low %v8755_v15, %v8756_v48 }
 0x90d   :  { %8727 = vrot.lane.b32.xlu0 %v18582_v31, %s11898_s22  ;;  %v8534_v35 = vpop.permute.xlu1 %8533 }
 0x90e   :  { %v8764_v57 = vsel %vm4007_vm13, %v18253_v55, %v8534_v35  ;;  %v19798_v55 = vrot.slane %v17739_v22, 3  ;;  %v9328_v22 = vld [vmem:[%s19373_s9 + $0x3e8] sm:$0xff] }
 0x90f   :  { %v10559_v42 = vcombine.low %v8763_v18, %v8764_v57  ;;  %v8392_v37 = vpop.permute.xlu0 %8391  ;;  %8593 = vrot.lane.b32.xlu1 %v19416_v29, %s11898_s22  ;;  %v19417_v18 = vrot.slane %v18564_v52, 2 }
 0x910   :  { %v18615_v57 = vsel %vm4007_vm13, %v19798_v55, %v8580_v62  ;;  %v8415_v62 = vrot.slane %v17924_v36, 2  ;;  %v8741_v29 = vsel %vm4007_vm13, %v18234_v47, %v8392_v37 }
 0x911   :  { %8679 = vrot.lane.b32.xlu0 %v18602_v58, %s11898_s22  ;;  %9667 = vmatprep.mubr.f32.mxu1 %v10559_v42  ;;  %v8582_v35 = vpop.permute.xlu1 %8581 }
 0x912   :  { %v18619_v15 = vsel %vm4007_vm13, %v18241_v50, %v8582_v35  ;;  %9668 = vmatmul.mubr.f32.vlgmr.msra.gmra.mxu1 %v10558_v59  ;;  %v9312_v50 = vld [vmem:[%s19373_s9 + $0x368] sm:$0xff]  ;;  %v9327_v59 = vld [vmem:[%s19373_s9 + $0x3e0] sm:$0xff] }
 0x913   :  { %v18626_v42 = vpop.permute.xlu0 %8487  ;;  %8869 = vrot.lane.b32.xlu1 %v18602_v58, %s11898_s22  ;;  %11051 = vmatpush3.msra.mxu1 %v9314_v39  ;;  %v8749_v39 = vsel %vm4007_vm13, %v18247_v61, %v8440_v10  ;;  %v9326_v10 = vld [vmem:[%s19373_s9 + $0x3d8] sm:$0xff] }
 0x914   :  { %11052 = vmatprep.subr.mxu1 %v9329_v44 }
 0x915   :  { %8963 = vrot.lane.b32.xlu0 %v18550_v2, %s11898_s22  ;;  %v8442_v48 = vpop.permute.xlu1 %8441  ;;  %11053 = vmatpush3.msra.mxu1 %v9313_v1  ;;  %v9311_v1 = vld [vmem:[%s19373_s9 + $0x360] sm:$0xff]  ;;  %v19806_v2 = vrot.slane %v17819_v16, 2 }
 0x916   :  { %v8750_v35 = vsel %vm4007_vm13, %v18292_v49, %v8442_v48  ;;  %11054 = vmatprep.subr.mxu1 %v9328_v22  ;;  %v19799_v48 = vrot.slane %v17754_v32, 2  ;;  %v11840_v16 = vld [vmem:[#allocation5 + $0x86] sm:$0xff] }
 0x917   :  { %v10569_v44 = vcombine.low %v8749_v39, %v8750_v35  ;;  %v18647_v55 = vpop.permute.xlu0 %8619  ;;  %8821 = vrot.lane.b32.xlu1 %v18573_v45, %s11898_s22  ;;  %11055 = vmatpush3.msra.mxu1 %v9312_v50  ;;  %v8751_v39 = vsel %vm4007_vm13, %v8415_v62, %v18431_v60  ;;  %v9310_v35 = vld [vmem:[%s19373_s9 + $0x358] sm:$0xff]  ;;  %v8463_v53 = vrot.slane %v11840_v16, 4 }
 0x918   :  { %11056 = vmatprep.subr.mxu1 %v9327_v59  ;;  %v8752_v22 = vsel %vm4007_vm13, %v19799_v48, %v18476_v28  ;;  %v18667_v59 = vrot.slane %v18582_v31, 1  ;;  %v9325_v48 = vld [vmem:[%s19373_s9 + $0x3d0] sm:$0xff] }
 0x919   :  { %8967 = vrot.lane.b32.xlu0 %v19417_v18, %s11898_s22  ;;  %9587 = vmatprep.mubr.f32.mxu0 %v10569_v44  ;;  %v8394_v50 = vpop.permute.xlu1 %8393  ;;  %v8857_v44 = vrot.slane %v18582_v31, 3  ;;  %v18682_v18 = vld [vmem:[#allocation5 + $0x96] sm:$0xff]  ;;  %v8759_v16 = vsel %vm4007_vm13, %v8463_v53, %v18512_v40 }
 0x91a   :  { %19800 = vst [vmem:[#allocation46_spill] sm:$0xff] %v18667_v59  ;;  %v8742_v28 = vsel %vm4007_vm13, %v18261_v5, %v8394_v50  ;;  %11057 = vmatpush3.msra.mxu1 %v9311_v1  ;;  %v8744_v37 = vsel %vm4007_vm13, %v18682_v18, %v18501_v23  ;;  %v10581_v50 = vcombine.low %v8751_v39, %v8752_v22  ;;  %v9309_v1 = vld [vmem:[%s19373_s9 + $0x350] sm:$0xff] }
 0x91b   :  { %v10568_v60 = vcombine.low %v8741_v29, %v8742_v28  ;;  %v8716_v62 = vpop.permute.xlu0 %8715  ;;  %8633 = vrot.lane.b32.xlu1 %v18667_v59, %s11898_s22  ;;  %11058 = vmatprep.subr.mxu1 %v9326_v10  ;;  %v8743_v29 = vsel %vm4007_vm13, %v17924_v36, %v18466_v46  ;;  %v9324_v28 = vld [vmem:[%s19373_s9 + $0x3c8] sm:$0xff]  ;;  %v9323_v46 = vld [vmem:[%s19373_s9 + $0x3c0] sm:$0xff] }
 0x91c   :  { %11059 = vmatpush3.msra.mxu1 %v9310_v35  ;;  %v10580_v23 = vcombine.low %v8743_v29, %v8744_v37  ;;  %v9308_v36 = vld [vmem:[%s19373_s9 + $0x348] sm:$0xff]  ;;  %v9307_v35 = vld [vmem:[%s19373_s9 + $0x340] sm:$0xff]  ;;  %v18719_v37 = vld [vmem:[#allocation5 + $0xf6] sm:$0xff] }
 0x91d   :  { %8871 = vrot.lane.b32.xlu0 %v8857_v44, %s11898_s22  ;;  %9588 = vmatmul.mubr.f32.gmra.mxu0 %v10568_v60  ;;  %v8490_v10 = vpop.permute.xlu1 %8489  ;;  %v9322_v60 = vld [vmem:[%s19373_s9 + $0x3b8] sm:$0xff]  ;;  %19801 = vst [vmem:[#allocation99_spill] sm:$0xff] %v18719_v37 }
 0x91e   :  { %9592 = vmatprep.mubr.f32.mxu0 %v10581_v50  ;;  %11060 = vmatprep.subr.mxu1 %v9325_v48  ;;  %v9306_v48 = vld [vmem:[%s19373_s9 + $0x338] sm:$0xff]  ;;  %v9321_v50 = vld [vmem:[%s19373_s9 + $0x3b0] sm:$0xff] }
 0x91f   :  { %v8668_v22 = vpop.permute.xlu0 %8667  ;;  %8681 = vrot.lane.b32.xlu1 %v8857_v44, %s11898_s22  ;;  %11061 = vmatpush3.msra.mxu1 %v9309_v1  ;;  %v18725_v1 = vrot.slane %v18582_v31, 2 }
 0x920   :  { %11062 = vmatprep.subr.mxu1 %v9324_v28  ;;  %v9305_v28 = vld [vmem:[%s19373_s9 + $0x330] sm:$0xff] }
 0x921   :  { %8823 = vrot.lane.b32.xlu0 %v18667_v59, %s11898_s22  ;;  %9593 = vmatmul.mubr.f32.gmra.mxu0 %v10580_v23  ;;  %v18706_v39 = vpop.permute.xlu1 %8621  ;;  %19802 = vst [vmem:[#allocation58_spill] sm:$0xff] %v18725_v1  ;;  %v18734_v23 = vsel %vm4007_vm13, %v18259_v20, %v8716_v62  ;;  %v8954_v62 = vrot.slane %v18719_v37, 2  ;;  %v18761_v59 = vsel %vm4007_vm13, %v18247_v61, %v8668_v22  ;;  %v9302_v61 = vld [vmem:[%s19373_s9 + $0x318] sm:$0xff] }
 0x922   :  { %11063 = vmatpush3.msra.mxu1 %v9308_v36  ;;  %v8758_v22 = vsel %vm4007_vm13, %v18299_v0, %v8490_v10  ;;  %v8780_v40 = vsel %vm4007_vm13, %v18261_v5, %v18706_v39 }
 0x923   :  { %v8536_v44 = vpop.permute.xlu0 %8535  ;;  %8917 = vrot.lane.b32.xlu1 %v18582_v31, %s11898_s22  ;;  %11064 = vmatprep.subr.mxu1 %v9323_v46  ;;  %v9320_v46 = vld [vmem:[%s19373_s9 + $0x3a8] sm:$0xff] }
 0x924   :  { %11065 = vmatpush3.msra.mxu1 %v9307_v35  ;;  %v9303_v35 = vld [vmem:[%s19373_s9 + $0x320] sm:$0xff] }
 0x925   :  { %v8718_v29 = vpop.permute.xlu1 %8717  ;;  %8919 = vrot.lane.b32.xlu0 %v18564_v52, %s11898_s22  ;;  %11066 = vmatprep.subr.mxu1 %v9322_v60 }
 0x926   :  { %v18738_v36 = vsel %vm4007_vm13, %v18299_v0, %v8718_v29  ;;  %11067 = vmatpush3.msra.mxu1 %v9306_v48  ;;  %v9304_v29 = vld [vmem:[%s19373_s9 + $0x328] sm:$0xff]  ;;  %v9319_v48 = vld [vmem:[%s19373_s9 + $0x3a0] sm:$0xff]  ;;  %v8757_v0 = vsel %vm4007_vm13, %v18259_v20, %v18626_v42 }
 0x927   :  { %v18745_v60 = vpop.permute.xlu0 %8583  ;;  %8965 = vrot.lane.b32.xlu1 %v18725_v1, %s11898_s22  ;;  %11068 = vmatprep.subr.mxu1 %v9321_v50  ;;  %v10570_v1 = vcombine.low %v8757_v0, %v8758_v22  ;;  %v9315_v20 = vld [vmem:[%s19373_s9 + $0x380] sm:$0xff] }
 0x928   :  { %11069 = vmatpush3.msra.mxu1 %v9305_v28  ;;  %v9318_v28 = vld [vmem:[%s19373_s9 + $0x398] sm:$0xff]  ;;  %v9299_v42 = vld [vmem:[%s19373_s9 + $0x300] sm:$0xff] }
 0x929   :  { %v8670_v25 = vpop.permute.xlu1 %8669  ;;  %11070 = vmatprep.subr.mxu1 %v9320_v46  ;;  %v9301_v46 = vld [vmem:[%s19373_s9 + $0x310] sm:$0xff] }
 0x92a   :  { %v18765_v50 = vsel %vm4007_vm13, %v18292_v49, %v8670_v25  ;;  %11071 = vmatpush3.msra.mxu1 %v9304_v29  ;;  %v9317_v25 = vld [vmem:[%s19373_s9 + $0x390] sm:$0xff] }
 0x92b   :  { %v8860_v52 = vpop.permute.xlu0 %8859  ;;  %8969 = vrot.lane.b32.xlu1 %v8954_v62, %s11898_s22  ;;  %11072 = vmatprep.subr.mxu1 %v9319_v48  ;;  %v8765_v62 = vsel %vm4007_vm13, %v18277_v38, %v8536_v44  ;;  %v9300_v38 = vld [vmem:[%s19373_s9 + $0x308] sm:$0xff] }
 0x92c   :  { %11073 = vmatpush3.msra.mxu1 %v9303_v35  ;;  %v9316_v35 = vld [vmem:[%s19373_s9 + $0x388] sm:$0xff] }
 0x92d   :  { %v8538_v29 = vpop.permute.xlu1 %8537  ;;  %11074 = vmatprep.subr.mxu1 %v9318_v28 }
 0x92e   :  { %v8766_v48 = vsel %vm4007_vm13, %v18326_v12, %v8538_v29  ;;  %11075 = vmatpush3.msra.mxu1 %v9302_v61 }
 0x92f   :  { %v10571_v10 = vcombine.low %v8765_v62, %v8766_v48  ;;  %v8812_v28 = vpop.permute.xlu0 %8811  ;;  %8921 = vrot.lane.b32.xlu1 %v18719_v37, %s11898_s22  ;;  %11076 = vmatprep.subr.mxu1 %v9317_v25  ;;  %v8995_v25 = vsel %vm4007_vm13, %v18292_v49, %v8860_v52 }
 0x930   :  { %11077 = vmatpush3.msra.mxu1 %v9301_v46  ;;  %v9394_v46 = vld [vmem:[%s19373_s9 + $0x5f8] sm:$0xff] }
 0x931   :  { %9672 = vmatprep.mubr.f32.mxu1 %v10571_v10  ;;  %v18799_v44 = vpop.permute.xlu1 %8585  ;;  %11078 = vmatprep.subr.mxu1 %v9316_v35  ;;  %v8987_v35 = vsel %vm4007_vm13, %v18261_v5, %v8812_v28 }
 0x932   :  { %9673 = vmatmul.mubr.f32.gmra.mxu1 %v10570_v1  ;;  %v9052_v1 = vrot.slane %v8995_v25, 1  ;;  %v9051_v52 = vrot.slane %v8987_v35, 1  ;;  %v8892_v25 = vrot.slane %v18338_v41, 7 }
 0x933   :  { %v8908_v61 = vpop.permute.xlu0 %8907  ;;  %11079 = vmatpush3.msra.mxu1 %v9300_v38  ;;  %v8891_v38 = vrot.slane %v18283_v19, 7 }
 0x934   :  { %11080 = vmatprep.subr.mxu1 %v9315_v20 }
 0x935   :  { %v8862_v22 = vpop.permute.xlu1 %8861  ;;  %11081 = vmatpush3.msra.mxu1 %v9299_v42 }
 0x936   :  { %v8996_v29 = vsel %vm4007_vm13, %v18308_v34, %v8862_v22  ;;  %11138 = vmatprep.subr.mxu1 %v9394_v46  ;;  %v9003_v46 = vsel %vm4007_vm13, %v8891_v38, %v8908_v61  ;;  %v8998_v61 = vsel %vm4007_vm13, %v19806_v2, %v18536_v24 }
 0x937   :  { %v9057_v62 = vrot.slane %v8996_v29, 1  ;;  %v18814_v48 = vpop.permute.xlu0 %8623 }
 0x938   :  { %v8781_v39 = vsel %vm4007_vm13, %v18283_v19, %v18814_v48 }
 0x939   :  { %v8814_v0 = vpop.permute.xlu1 %8813  ;;  %v18818_v10 = vcombine.low %v9052_v1, %v9057_v62  ;;  %v9053_v1 = vrot.slane %v9003_v46, 1 }
 0x93a   :  { %v8988_v49 = vsel %vm4007_vm13, %v18283_v19, %v8814_v0 }
 0x93b   :  { %19803 = vst [vmem:[#allocation18_spill] sm:$0xff] %v18818_v10  ;;  %v9056_v20 = vrot.slane %v8988_v49, 1  ;;  %v18823_v42 = vpop.permute.xlu0 %8719 }
 0x93d   :  { %v18827_v22 = vcombine.low %v9051_v52, %v9056_v20  ;;  %v8910_v29 = vpop.permute.xlu1 %8909  ;;  %v9067_v20 = vrot.slane %v8998_v61, 1  ;;  %v8464_v61 = vrot.slane %v18682_v18, 4  ;;  %v19808_v18 = vrot.slane %v17754_v32, 1 }
 0x93e   :  { %v9004_v28 = vsel %vm4007_vm13, %v8892_v25, %v8910_v29  ;;  %v18842_v29 = vld [vmem:[#allocation5 + $0x66] sm:$0xff] }
 0x93f   :  { %19804 = vst [vmem:[#allocation35_spill] sm:$0xff] %v18827_v22  ;;  %v9058_v62 = vrot.slane %v9004_v28, 1  ;;  %v18830_v37 = vpop.permute.xlu0 %8671  ;;  %v8990_v28 = vsel %vm4007_vm13, %v18842_v29, %v18552_v33 }
 0x941   :  { %v18832_v10 = vcombine.low %v9053_v1, %v9058_v62  ;;  %v8494_v0 = vpop.permute.xlu1 %8493 }
 0x943   :  { %19805 = vst [vmem:[#allocation62_spill] sm:$0xff] %v18832_v10  ;;  %v8956_v35 = vpop.permute.xlu0 %8955 }
 0x944   :  { %v9011_v24 = vsel %vm4007_vm13, %v18326_v12, %v8956_v35  ;;  %v8760_v12 = vsel %vm4007_vm13, %v8464_v61, %v8494_v0 }
 0x945   :  { %v8626_v49 = vpop.permute.xlu1 %8625  ;;  %v9054_v33 = vrot.slane %v9011_v24, 1 }
 0x947   :  { %v8864_v38 = vpop.permute.xlu0 %8863 }
 0x948   :  { %v8997_v52 = vsel %vm4007_vm13, %v18415_v9, %v8864_v38  ;;  %v9066_v38 = vrot.slane %v8990_v28, 1  ;;  %v8767_v28 = vsel %vm4007_vm13, %v19808_v18, %v18499_v7  ;;  %v8782_v18 = vsel %vm4007_vm13, %v18338_v41, %v8626_v49  ;;  %v9361_v49 = vld [vmem:[%s19373_s9 + $0x4f0] sm:$0xff] }
 0x949   :  { %v9062_v25 = vrot.slane %v8997_v52, 1  ;;  %v18840_v46 = vpop.permute.xlu1 %8673 }
 0x94b   :  { %v8816_v1 = vpop.permute.xlu0 %8815  ;;  %v18847_v62 = vcombine.low %v9062_v25, %v9067_v20 }
 0x94c   :  { %v8989_v2 = vsel %vm4007_vm13, %v18338_v41, %v8816_v1 }
 0x94d   :  { %19807 = vst [vmem:[#allocation30_spill] sm:$0xff] %v18847_v62  ;;  %v9061_v52 = vrot.slane %v8989_v2, 1  ;;  %v8958_v10 = vpop.permute.xlu1 %8957 }
 0x94e   :  { %v9012_v22 = vsel %vm4007_vm13, %v18379_v11, %v8958_v10 }
 0x94f   :  { %v18856_v14 = vcombine.low %v9061_v52, %v9066_v38  ;;  %v9059_v20 = vrot.slane %v9012_v22, 1  ;;  %v8448_v25 = vpop.permute.xlu0 %8447  ;;  %v10582_v22 = vcombine.low %v8759_v16, %v8760_v12  ;;  %v19809_v16 = vcombine.low %v18615_v57, %v18619_v15  ;;  %v9360_v57 = vld [vmem:[%s19373_s9 + $0x4e8] sm:$0xff] }
 0x950   :  { %v8753_v38 = vsel %vm4007_vm13, %v18442_v3, %v8448_v25 }
 0x951   :  { %v8542_v35 = vpop.permute.xlu1 %8541  ;;  %v18859_v62 = vcombine.low %v9054_v33, %v9059_v20  ;;  %v8779_v20 = vsel %vm4007_vm13, %v18234_v47, %v18647_v55  ;;  %v9346_v47 = vld [vmem:[%s19373_s9 + $0x478] sm:$0xff]  ;;  %v8774_v55 = vsel %vm4007_vm13, %v18321_v4, %v18799_v44 }
 0x952   :  { %v8768_v11 = vsel %vm4007_vm13, %v18453_v43, %v8542_v35  ;;  %v10561_v35 = vcombine.low %v8779_v20, %v8780_v40  ;;  %v9342_v40 = vld [vmem:[%s19373_s9 + $0x458] sm:$0xff]  ;;  %v9340_v20 = vld [vmem:[%s19373_s9 + $0x448] sm:$0xff] }
 0x953   :  { %v10583_v10 = vcombine.low %v8767_v28, %v8768_v11  ;;  %v8400_v1 = vpop.permute.xlu0 %8399  ;;  %v10573_v11 = vcombine.low %v8781_v39, %v8782_v18  ;;  %v9339_v39 = vld [vmem:[%s19373_s9 + $0x440] sm:$0xff] }
 0x954   :  { %v8745_v52 = vsel %vm4007_vm13, %v18358_v17, %v8400_v1  ;;  %v8773_v1 = vsel %vm4007_vm13, %v18269_v56, %v18745_v60  ;;  %v9344_v56 = vld [vmem:[%s19373_s9 + $0x468] sm:$0xff] }
 0x955   :  { %9677 = vmatprep.mubr.f32.mxu1 %v10583_v10  ;;  %v8590_v24 = vpop.permute.xlu1 %8589  ;;  %v9345_v10 = vld [vmem:[%s19373_s9 + $0x470] sm:$0xff]  ;;  %v10572_v15 = vcombine.low %v8773_v1, %v8774_v55 }
 0x956   :  { %9678 = vmatmul.mubr.f32.gmra.mxu1 %v10582_v22  ;;  %v9353_v1 = vld [vmem:[%s19373_s9 + $0x4b0] sm:$0xff] }
 0x957   :  { %v18869_v0 = vpop.permute.xlu0 %8495 }
 0x959   :  { %v8450_v2 = vpop.permute.xlu1 %8449 }
 0x95a   :  { %v8754_v7 = vsel %vm4007_vm13, %v18527_v51, %v8450_v2 }
 0x95b   :  { %v10593_v61 = vcombine.low %v8753_v38, %v8754_v7  ;;  %v8628_v43 = vpop.permute.xlu0 %8627  ;;  %v9343_v38 = vld [vmem:[%s19373_s9 + $0x460] sm:$0xff]  ;;  %v19810_v7 = vrot.slane %v17754_v32, 3  ;;  %v9357_v32 = vld [vmem:[%s19373_s9 + $0x4d0] sm:$0xff] }
 0x95c   :  { %v8783_v4 = vsel %vm4007_vm13, %v18358_v17, %v8628_v43  ;;  %v8776_v17 = vsel %vm4007_vm13, %v18429_v26, %v8590_v24  ;;  %v9358_v26 = vld [vmem:[%s19373_s9 + $0x4d8] sm:$0xff] }
 0x95d   :  { %9597 = vmatprep.mubr.f32.mxu0 %v10593_v61  ;;  %v8402_v53 = vpop.permute.xlu1 %8401  ;;  %v8775_v61 = vsel %vm4007_vm13, %v19810_v7, %v18540_v6  ;;  %v8789_v7 = vsel %vm4007_vm13, %v18308_v34, %v18830_v37  ;;  %v9376_v34 = vld [vmem:[%s19373_s9 + $0x568] sm:$0xff] }
 0x95e   :  { %v8746_v33 = vsel %vm4007_vm13, %v18471_v30, %v8402_v53  ;;  %v10584_v24 = vcombine.low %v8775_v61, %v8776_v17  ;;  %v9341_v53 = vld [vmem:[%s19373_s9 + $0x450] sm:$0xff]  ;;  %v8790_v17 = vsel %vm4007_vm13, %v18415_v9, %v18840_v46  ;;  %v9335_v46 = vld [vmem:[%s19373_s9 + $0x420] sm:$0xff] }
 0x95f   :  { %v10592_v25 = vcombine.low %v8745_v52, %v8746_v33  ;;  %v18885_v12 = vpop.permute.xlu0 %8723  ;;  %v9356_v52 = vld [vmem:[%s19373_s9 + $0x4c8] sm:$0xff]  ;;  %v9377_v9 = vld [vmem:[%s19373_s9 + $0x570] sm:$0xff] }
 0x961   :  { %9598 = vmatmul.mubr.f32.gmra.mxu0 %v10592_v25  ;;  %v8498_v5 = vpop.permute.xlu1 %8497  ;;  %v9355_v25 = vld [vmem:[%s19373_s9 + $0x4c0] sm:$0xff] }
 0x962   :  { %9752 = vmatprep.mubr.f32.mxu0 %v10561_v35  ;;  %v8762_v35 = vsel %vm4007_vm13, %v18534_v63, %v8498_v5  ;;  %v8761_v5 = vsel %vm4007_vm13, %v18464_v13, %v18869_v0  ;;  %v9337_v0 = vld [vmem:[%s19373_s9 + $0x430] sm:$0xff] }
 0x963   :  { %v18892_v28 = vpop.permute.xlu0 %8675 }
 0x965   :  { %9753 = vmatmul.mubr.f32.vlgmr.msra.gmra.mxu0 %v19809_v16  ;;  %v8630_v48 = vpop.permute.xlu1 %8629 }
 0x966   :  { %v8784_v44 = vsel %vm4007_vm13, %v18471_v30, %v8630_v48  ;;  %9757 = vmatprep.mubr.f32.mxu0 %v10573_v11  ;;  %11095 = vmatpush3.msra.mxu0 %v9346_v47  ;;  %v9359_v30 = vld [vmem:[%s19373_s9 + $0x4e0] sm:$0xff]  ;;  %v9354_v11 = vld [vmem:[%s19373_s9 + $0x4b8] sm:$0xff]  ;;  %v8694_v48 = vrot.slane %v18338_v41, 4  ;;  %v9352_v41 = vld [vmem:[%s19373_s9 + $0x4a8] sm:$0xff] }
 0x967   :  { %v10585_v22 = vcombine.low %v8783_v4, %v8784_v44  ;;  %v8544_v2 = vpop.permute.xlu0 %8543  ;;  %11096 = vmatprep.subr.mxu0 %v9361_v49  ;;  %v19811_v44 = vrot.slane %v18283_v19, 4 }
 0x968   :  { %11097 = vmatpush3.msra.mxu0 %v9345_v10  ;;  %v8769_v47 = vsel %vm4007_vm13, %v18506_v21, %v8544_v2  ;;  %v9338_v21 = vld [vmem:[%s19373_s9 + $0x438] sm:$0xff]  ;;  %v10594_v10 = vcombine.low %v8761_v5, %v8762_v35  ;;  %v9336_v2 = vld [vmem:[%s19373_s9 + $0x428] sm:$0xff]  ;;  %v8798_v19 = vsel %vm4007_vm13, %v8694_v48, %v18516_v8  ;;  %v9351_v8 = vld [vmem:[%s19373_s9 + $0x4a0] sm:$0xff]  ;;  %v19814_v35 = vrot.slane %v18514_v54, 4 }
 0x969   :  { %9758 = vmatmul.mubr.f32.gmra.mxu0 %v10572_v15  ;;  %v18927_v60 = vpop.permute.xlu1 %8725  ;;  %11098 = vmatprep.subr.mxu0 %v9360_v57  ;;  %v8797_v57 = vsel %vm4007_vm13, %v19811_v44, %v18823_v42  ;;  %v9378_v42 = vld [vmem:[%s19373_s9 + $0x578] sm:$0xff]  ;;  %v9372_v48 = vld [vmem:[%s19373_s9 + $0x548] sm:$0xff]  ;;  %v9347_v44 = vld [vmem:[%s19373_s9 + $0x480] sm:$0xff] }
 0x96a   :  { %9762 = vmatprep.mubr.f32.mxu0 %v10585_v22  ;;  %11099 = vmatpush3.msra.mxu0 %v9344_v56  ;;  %v19812_v22 = vcombine.low %v18734_v23, %v18738_v36  ;;  %v10575_v56 = vcombine.low %v8797_v57, %v8798_v19  ;;  %v9393_v36 = vld [vmem:[%s19373_s9 + $0x5f0] sm:$0xff]  ;;  %v9371_v57 = vld [vmem:[%s19373_s9 + $0x540] sm:$0xff]  ;;  %v19129_v19 = vld [vmem:[%s19373_s9 + $0x638] sm:$0xff] }
 0x96b   :  { %v18939_v43 = vpop.permute.xlu0 %8591  ;;  %11100 = vmatprep.subr.mxu0 %v9359_v30  ;;  %v8800_v30 = vsel %vm4007_vm13, %v18534_v63, %v18927_v60  ;;  %v9392_v63 = vld [vmem:[%s19373_s9 + $0x5e8] sm:$0xff]  ;;  %v8799_v60 = vsel %vm4007_vm13, %v18464_v13, %v18885_v12  ;;  %v9350_v13 = vld [vmem:[%s19373_s9 + $0x498] sm:$0xff]  ;;  %v9375_v12 = vld [vmem:[%s19373_s9 + $0x560] sm:$0xff] }
 0x96c   :  { %11101 = vmatpush3.msra.mxu0 %v9343_v38  ;;  %v19813_v38 = vcombine.low %v18761_v59, %v18765_v50  ;;  %v8698_v59 = vrot.slane %v18582_v31, 4  ;;  %v10574_v50 = vcombine.low %v8789_v7, %v8790_v17  ;;  %v10587_v37 = vcombine.low %v8799_v60, %v8800_v30  ;;  %v9385_v17 = vld [vmem:[%s19373_s9 + $0x5b0] sm:$0xff]  ;;  %v9384_v30 = vld [vmem:[%s19373_s9 + $0x5a8] sm:$0xff] }
 0x96d   :  { %9763 = vmatmul.mubr.f32.gmra.mxu0 %v10584_v24  ;;  %v18947_v6 = vpop.permute.xlu1 %8677  ;;  %11102 = vmatprep.subr.mxu0 %v9358_v26 }
 0x96e   :  { %11103 = vmatpush3.msra.mxu0 %v9342_v40  ;;  %v8792_v26 = vsel %vm4007_vm13, %v18527_v51, %v18947_v6  ;;  %v9391_v40 = vld [vmem:[%s19373_s9 + $0x5e0] sm:$0xff]  ;;  %v8791_v6 = vsel %vm4007_vm13, %v18442_v3, %v18892_v28  ;;  %v9374_v3 = vld [vmem:[%s19373_s9 + $0x558] sm:$0xff] }
 0x96f   :  { %v18955_v33 = vpop.permute.xlu0 %8867  ;;  %11104 = vmatprep.subr.mxu0 %v9357_v32  ;;  %v9334_v32 = vld [vmem:[%s19373_s9 + $0x418] sm:$0xff] }
 0x970   :  { %11105 = vmatpush3.msra.mxu0 %v9341_v53 }
 0x971   :  { %v8546_v18 = vpop.permute.xlu1 %8545  ;;  %11106 = vmatprep.subr.mxu0 %v9356_v52  ;;  %v9390_v52 = vld [vmem:[%s19373_s9 + $0x5d8] sm:$0xff] }
 0x972   :  { %v8770_v55 = vsel %vm4007_vm13, %v18573_v45, %v8546_v18  ;;  %11107 = vmatpush3.msra.mxu0 %v9340_v20  ;;  %v8802_v20 = vsel %vm4007_vm13, %v8698_v59, %v18522_v27  ;;  %v9349_v27 = vld [vmem:[%s19373_s9 + $0x490] sm:$0xff]  ;;  %v9383_v59 = vld [vmem:[%s19373_s9 + $0x5a0] sm:$0xff] }
 0x973   :  { %v10595_v49 = vcombine.low %v8769_v47, %v8770_v55  ;;  %v18978_v16 = vpop.permute.xlu0 %8819  ;;  %11108 = vmatprep.subr.mxu0 %v9355_v25  ;;  %v10586_v25 = vcombine.low %v8791_v6, %v8792_v26  ;;  %v9389_v47 = vld [vmem:[%s19373_s9 + $0x5d0] sm:$0xff] }
 0x974   :  { %11109 = vmatpush3.msra.mxu0 %v9339_v39  ;;  %v9373_v55 = vld [vmem:[%s19373_s9 + $0x550] sm:$0xff] }
 0x975   :  { %9682 = vmatprep.mubr.f32.mxu1 %v10595_v49  ;;  %v18987_v4 = vpop.permute.xlu1 %8913  ;;  %11110 = vmatprep.subr.mxu0 %v9354_v11  ;;  %v9333_v11 = vld [vmem:[%s19373_s9 + $0x410] sm:$0xff]  ;;  %v9388_v49 = vld [vmem:[%s19373_s9 + $0x5c8] sm:$0xff] }
 0x976   :  { %9683 = vmatmul.mubr.f32.gmra.mxu1 %v10594_v10  ;;  %11111 = vmatpush3.msra.mxu0 %v9338_v21  ;;  %v9348_v21 = vld [vmem:[%s19373_s9 + $0x488] sm:$0xff] }
 0x977   :  { %v18999_v15 = vpop.permute.xlu0 %8915  ;;  %9837 = vmatprep.mubr.f32.mxu1 %v19812_v22  ;;  %11112 = vmatprep.subr.mxu0 %v9353_v1  ;;  %v9332_v10 = vld [vmem:[%s19373_s9 + $0x408] sm:$0xff] }
 0x978   :  { %11113 = vmatpush3.msra.mxu0 %v9337_v0  ;;  %v9387_v0 = vld [vmem:[%s19373_s9 + $0x5c0] sm:$0xff] }
 0x979   :  { %v19015_v23 = vpop.permute.xlu1 %8873  ;;  %11114 = vmatprep.subr.mxu0 %v9352_v41  ;;  %v9331_v41 = vld [vmem:[%s19373_s9 + $0x400] sm:$0xff] }
 0x97a   :  { %9838 = vmatmul.mubr.f32.vlgmr.msra.gmra.mxu1 %v19813_v38  ;;  %11115 = vmatpush3.msra.mxu0 %v9336_v2  ;;  %v9386_v2 = vld [vmem:[%s19373_s9 + $0x5b8] sm:$0xff] }
 0x97b   :  { %11139 = vmatpush3.msra.mxu1 %v9378_v42  ;;  %v19038_v61 = vpop.permute.xlu0 %8631  ;;  %9842 = vmatprep.mubr.f32.mxu1 %v10575_v56  ;;  %v9370_v42 = vld [vmem:[%s19373_s9 + $0x538] sm:$0xff] }
 0x97c   :  { %11140 = vmatprep.subr.mxu1 %v9393_v36  ;;  %11116 = vmatprep.subr.mxu0 %v9351_v8  ;;  %v9369_v36 = vld [vmem:[%s19373_s9 + $0x530] sm:$0xff] }
 0x97d   :  { %11141 = vmatpush3.msra.mxu1 %v9377_v9  ;;  %v19053_v24 = vpop.permute.xlu1 %8825  ;;  %11117 = vmatpush3.msra.mxu0 %v9335_v46  ;;  %v19148_v38 = vld [vmem:[#allocation5 + $0x76] sm:$0xff]  ;;  %v9368_v46 = vld [vmem:[%s19373_s9 + $0x528] sm:$0xff] }
 0x97e   :  { %11142 = vmatprep.subr.mxu1 %v9392_v63  ;;  %9843 = vmatmul.mubr.f32.gmra.mxu1 %v10574_v50  ;;  %v8934_v9 = vrot.slane %v19148_v38, 1  ;;  %v8785_v50 = vsel %vm4007_vm13, %v18514_v54, %v19038_v61  ;;  %v9382_v61 = vld [vmem:[%s19373_s9 + $0x598] sm:$0xff] }
 0x97f   :  { %11143 = vmatpush3.msra.mxu1 %v9376_v34  ;;  %v8728_v53 = vpop.permute.xlu0 %8727  ;;  %9847 = vmatprep.mubr.f32.mxu1 %v10587_v37  ;;  %v9367_v34 = vld [vmem:[%s19373_s9 + $0x520] sm:$0xff] }
 0x980   :  { %v8801_v18 = vsel %vm4007_vm13, %v19814_v35, %v8728_v53  ;;  %11144 = vmatprep.subr.mxu1 %v9391_v40  ;;  %11118 = vmatprep.subr.mxu0 %v9350_v13  ;;  %v19815_v37 = vld [vmem:[#allocation72_spill] sm:$0xff]  ;;  %v19816_v13 = vld [vmem:[#allocation73_spill] sm:$0xff]  ;;  %v19819_v53 = vld [vmem:[#allocation14_spill] sm:$0xff] }
 0x981   :  { %v10599_v28 = vcombine.low %v8801_v18, %v8802_v20  ;;  %11145 = vmatpush3.msra.mxu1 %v9375_v12  ;;  %v8594_v39 = vpop.permute.xlu1 %8593  ;;  %11119 = vmatpush3.msra.mxu0 %v9334_v32  ;;  %v8777_v26 = vsel %vm4007_vm13, %v19815_v37, %v18939_v43  ;;  %v19817_v12 = vld [vmem:[#allocation33_spill] sm:$0xff]  ;;  %v9366_v43 = vld [vmem:[%s19373_s9 + $0x518] sm:$0xff] }
 0x982   :  { %11146 = vmatprep.subr.mxu1 %v9390_v52  ;;  %9848 = vmatmul.mubr.f32.gmra.mxu1 %v10586_v25  ;;  %v8778_v7 = vsel %vm4007_vm13, %v18602_v58, %v8594_v39  ;;  %v8893_v58 = vrot.slane %v18842_v29, 7  ;;  %v19818_v32 = vrot.slane %v19817_v12, 1  ;;  %v9014_v52 = vsel %vm4007_vm13, %v8934_v9, %v19819_v53  ;;  %v9381_v18 = vld [vmem:[%s19373_s9 + $0x590] sm:$0xff] }
 0x983   :  { %11147 = vmatpush3.msra.mxu1 %v9374_v3  ;;  %v19093_v5 = vpop.permute.xlu0 %8679  ;;  %9852 = vmatprep.mubr.f32.mxu1 %v10599_v28  ;;  %v10596_v20 = vcombine.low %v8777_v26, %v8778_v7  ;;  %v8894_v3 = vrot.slane %v19148_v38, 7  ;;  %v19820_v28 = vld [vmem:[#allocation56_spill] sm:$0xff]  ;;  %v19824_v7 = vld [vmem:[#allocation35_spill] sm:$0xff]  ;;  %v19827_v37 = vld [vmem:[#allocation17_spill] sm:$0xff] }
 0x984   :  { %11148 = vmatprep.subr.mxu1 %v9389_v47  ;;  %11120 = vmatprep.subr.mxu0 %v9349_v27  ;;  %v9013_v6 = vsel %vm4007_vm13, %v19818_v32, %v19816_v13  ;;  %v8793_v39 = vsel %vm4007_vm13, %v19820_v28, %v19093_v5  ;;  %v19821_v47 = vld [vmem:[#allocation58_spill] sm:$0xff]  ;;  %v9380_v5 = vld [vmem:[%s19373_s9 + $0x588] sm:$0xff]  ;;  %v8897_v26 = vrot.slane %v19827_v37, 7 }
 0x985   :  { %11149 = vmatpush3.msra.mxu1 %v9373_v55  ;;  %v19107_v1 = vpop.permute.xlu1 %8869  ;;  %11121 = vmatpush3.msra.mxu0 %v9333_v11  ;;  %v9365_v55 = vld [vmem:[%s19373_s9 + $0x510] sm:$0xff]  ;;  %v9064_v11 = vrot.slane %v9013_v6, 1 }
 0x986   :  { %11150 = vmatprep.subr.mxu1 %v9388_v49  ;;  %11122 = vmatprep.subr.mxu0 %v9348_v21  ;;  %v9069_v49 = vrot.slane %v9014_v52, 1  ;;  %v19822_v21 = vld [vmem:[#allocation61_spill] sm:$0xff]  ;;  %v19830_v52 = vld [vmem:[#allocation62_spill] sm:$0xff] }
 0x987   :  { %11151 = vmatpush3.msra.mxu1 %v9372_v48  ;;  %v19121_v22 = vpop.permute.xlu0 %8963  ;;  %11123 = vmatpush3.msra.mxu0 %v9332_v10  ;;  %v9005_v48 = vsel %vm4007_vm13, %v8893_v58, %v19822_v21  ;;  %v19826_v58 = vld [vmem:[#allocation30_spill] sm:$0xff] }
 0x988   :  { %11152 = vmatprep.subr.mxu1 %v9387_v0  ;;  %11124 = vmatprep.subr.mxu0 %v9347_v44  ;;  %v19823_v0 = vld [vmem:[#allocation18_spill] sm:$0xff]  ;;  %v9000_v44 = vsel %vm4007_vm13, %v19820_v28, %v19107_v1  ;;  %v8896_v1 = vrot.slane %v18582_v31, 7 }
 0x989   :  { %11153 = vmatpush3.msra.mxu1 %v9371_v57  ;;  %v19134_v56 = vpop.permute.xlu1 %8821  ;;  %11125 = vmatpush3.msra.mxu0 %v9331_v41  ;;  %v9364_v57 = vld [vmem:[%s19373_s9 + $0x508] sm:$0xff]  ;;  %v8999_v41 = vsel %vm4007_vm13, %v18527_v51, %v18955_v33  ;;  %v9077_v9 = vrot.slane %v9000_v44, 1  ;;  %v9363_v51 = vld [vmem:[%s19373_s9 + $0x500] sm:$0xff]  ;;  %v9401_v33 = vld [vmem:[%s19373_s9 + $0x630] sm:$0xff] }
 0x98a   :  { %11154 = vmatprep.subr.mxu1 %v9386_v2  ;;  %11717 = vmatprep.subr.mxu0 %v19129_v19 }
 0x98b   :  { %11155 = vmatpush3.msra.mxu1 %v9370_v42  ;;  %v19143_v8 = vpop.permute.xlu0 %8967  ;;  %v9063_v42 = vrot.slane %v9005_v48, 1 }
 0x98c   :  { %11156 = vmatprep.subr.mxu1 %v9385_v17  ;;  %v9006_v17 = vsel %vm4007_vm13, %v8894_v3, %v18987_v4  ;;  %v10579_v4 = vcombine.low %v9064_v11, %v9069_v49 }
 0x98d   :  { %11157 = vmatpush3.msra.mxu1 %v9369_v36  ;;  %v8634_v63 = vpop.permute.xlu1 %8633  ;;  %v8895_v36 = vrot.slane %v18514_v54, 7  ;;  %v9068_v13 = vrot.slane %v9006_v17, 1  ;;  %v11844_v17 = vld [vmem:[#allocation5 + $0x56] sm:$0xff] }
 0x98e   :  { %11158 = vmatprep.subr.mxu1 %v9384_v30  ;;  %v8786_v60 = vsel %vm4007_vm13, %v18582_v31, %v8634_v63  ;;  %v9379_v30 = vld [vmem:[%s19373_s9 + $0x580] sm:$0xff] }
 0x98f   :  { %v10597_v40 = vcombine.low %v8785_v50, %v8786_v60  ;;  %11159 = vmatpush3.msra.mxu1 %v9368_v46  ;;  %v8872_v25 = vpop.permute.xlu0 %8871  ;;  %v19825_v63 = vld [vmem:[#allocation99_spill] sm:$0xff]  ;;  %v9072_v50 = vrot.slane %v8999_v41, 1  ;;  %v9015_v60 = vsel %vm4007_vm13, %v18573_v45, %v19121_v22  ;;  %v9007_v12 = vsel %vm4007_vm13, %v8895_v36, %v18999_v15  ;;  %v9400_v15 = vld [vmem:[%s19373_s9 + $0x628] sm:$0xff] }
 0x990   :  { %11160 = vmatprep.subr.mxu1 %v9383_v59  ;;  %v8938_v59 = vrot.slane %v19825_v63, 1  ;;  %v9001_v45 = vsel %vm4007_vm13, %v19821_v47, %v8872_v25  ;;  %v8898_v6 = vrot.slane %v19825_v63, 7  ;;  %v10549_v41 = vrot.slane %v18842_v29, 4 }
 0x991   :  { %11161 = vmatpush3.msra.mxu1 %v9367_v34  ;;  %9767 = vmatprep.mubr.f32.mxu0 %v10597_v40  ;;  %v8682_v35 = vpop.permute.xlu1 %8681  ;;  %v8992_v34 = vsel %vm4007_vm13, %v18514_v54, %v19134_v56  ;;  %v11842_v40 = vld [vmem:[#allocation5 + $0xb6] sm:$0xff]  ;;  %v9082_v3 = vrot.slane %v9001_v45, 1  ;;  %v10548_v36 = vrot.slane %v11844_v17, 4 }
 0x992   :  { %11162 = vmatprep.subr.mxu1 %v9382_v61  ;;  %v8794_v27 = vsel %vm4007_vm13, %v19821_v47, %v8682_v35  ;;  %9768 = vmatmul.mubr.f32.gmra.mxu0 %v10596_v20  ;;  %v8991_v61 = vsel %vm4007_vm13, %v11842_v40, %v18978_v16  ;;  %v19829_v16 = vld [vmem:[#allocation46_spill] sm:$0xff]  ;;  %v9076_v53 = vrot.slane %v8992_v34, 1  ;;  %v19831_v35 = vrot.slane %v19827_v37, 1 }
 0x993   :  { %v10598_v10 = vcombine.low %v8793_v39, %v8794_v27  ;;  %11163 = vmatpush3.msra.mxu1 %v9366_v43  ;;  %9922 = vmatprep.mubr.f32.mxu0 %v19823_v0  ;;  %v8824_v46 = vpop.permute.xlu0 %8823  ;;  %v9071_v25 = vrot.slane %v8991_v61, 1  ;;  %v9399_v39 = vld [vmem:[%s19373_s9 + $0x620] sm:$0xff]  ;;  %v10578_v47 = vcombine.low %v9063_v42, %v9068_v13  ;;  %v9073_v27 = vrot.slane %v9007_v12, 1  ;;  %v9397_v42 = vld [vmem:[%s19373_s9 + $0x610] sm:$0xff] }
 0x994   :  { %11164 = vmatprep.subr.mxu1 %v9381_v18  ;;  %v9017_v18 = vsel %vm4007_vm13, %v19831_v35, %v19143_v8  ;;  %v8993_v28 = vsel %vm4007_vm13, %v18582_v31, %v8824_v46  ;;  %v11843_v8 = vld [vmem:[#allocation5 + $0xe6] sm:$0xff]  ;;  %v11846_v34 = vld [vmem:[#allocation5 + $0xd6] sm:$0xff]  ;;  %v10554_v61 = vrot.slane %v19825_v63, 4 }
 0x995   :  { %11165 = vmatpush3.msra.mxu1 %v9365_v55  ;;  %v8918_v2 = vpop.permute.xlu1 %8917  ;;  %v8994_v48 = vsel %vm4007_vm13, %v11843_v8, %v19053_v24  ;;  %v10588_v0 = vcombine.low %v9071_v25, %v9076_v53  ;;  %v9081_v44 = vrot.slane %v8993_v28, 1  ;;  %v10553_v40 = vrot.slane %v11843_v8, 4  ;;  %v11847_v13 = vld [vmem:[#allocation5 + $0xc6] sm:$0xff]  ;;  %v10155_v63 = vld [vmem:[%s19375_s11 + $0x78] sm:$0xff]  ;;  %v10142_v25 = vld [vmem:[%s19375_s11 + $0x10] sm:$0xff] }
 0x996   :  { %9853 = vmatmul.mubr.f32.gmra.mxu1 %v10598_v10  ;;  %11166 = vmatprep.subr.mxu1 %v9380_v5  ;;  %v9008_v56 = vsel %vm4007_vm13, %v8896_v1, %v8918_v2  ;;  %v9084_v5 = vrot.slane %v9017_v18, 1  ;;  %v10550_v2 = vrot.slane %v19148_v38, 4  ;;  %v9086_v1 = vrot.slane %v8994_v48, 1  ;;  %v9396_v38 = vld [vmem:[%s19373_s9 + $0x608] sm:$0xff]  ;;  %v10147_v53 = vld [vmem:[%s19375_s11 + $0x38] sm:$0xff]  ;;  %v10140_v18 = vld [vmem:[%s19375_s11] sm:$0xff] }
 0x997   :  { %9923 = vmatmul.mubr.f32.vlgmr.msra.gmra.mxu0 %v19824_v7  ;;  %11167 = vmatpush3.msra.mxu1 %v9364_v57  ;;  %v8920_v43 = vpop.permute.xlu0 %8919  ;;  %v9078_v55 = vrot.slane %v9008_v56, 1  ;;  %v10551_v12 = vrot.slane %v11847_v13, 4  ;;  %v10153_v56 = vld [vmem:[%s19375_s11 + $0x68] sm:$0xff] }
 0x998   :  { %10007 = vmatprep.mubr.f32.mxu1 %v18859_v62  ;;  %9927 = vmatprep.mubr.f32.mxu0 %v19826_v58  ;;  %v19828_v62 = vrot.slane %v19827_v37, 2  ;;  %v9009_v10 = vsel %vm4007_vm13, %v8897_v26, %v8920_v43  ;;  %v10552_v58 = vrot.slane %v11846_v34, 4  ;;  %v9435_v37 = vcombine.low %v10549_v41, %v10550_v2  ;;  %v10143_v43 = vld [vmem:[%s19375_s11 + $0x18] sm:$0xff]  ;;  %v10141_v35 = vld [vmem:[%s19375_s11 + $0x8] sm:$0xff] }
 0x999   :  { %11168 = vmatprep.subr.mxu1 %v9379_v30  ;;  %11718 = vmatpush3.msra.mxu0 %v19129_v19  ;;  %v8966_v54 = vpop.permute.xlu1 %8965  ;;  %v9074_v19 = vrot.slane %v9015_v60, 1  ;;  %v10590_v30 = vcombine.low %v9073_v27, %v9078_v55  ;;  %v9395_v60 = vld [vmem:[%s19373_s9 + $0x600] sm:$0xff] }
 0x99a   :  { %v9002_v22 = vsel %vm4007_vm13, %v19828_v62, %v19015_v23  ;;  %11169 = vmatpush3.msra.mxu1 %v9363_v51  ;;  %11719 = vmatprep.subr.mxu0 %v9401_v33  ;;  %v9016_v32 = vsel %vm4007_vm13, %v19829_v16, %v8966_v54  ;;  %v10589_v23 = vcombine.low %v9072_v50, %v9077_v9  ;;  %v9083_v9 = vrot.slane %v9009_v10, 1  ;;  %v11845_v51 = vld [vmem:[#allocation5 + $0x46] sm:$0xff] }
 0x99b   :  { %10008 = vmatmul.mubr.f32.vlgmr.msra.gmra.mxu1 %v19830_v52  ;;  %11720 = vmatpush3.msra.mxu0 %v9401_v33  ;;  %v9079_v20 = vrot.slane %v9016_v32, 1  ;;  %v9087_v21 = vrot.slane %v9002_v22, 1  ;;  %v10547_v33 = vrot.slane %v11845_v51, 4  ;;  %v9448_v45 = vcombine.low %v10551_v12, %v10552_v58  ;;  %v10154_v22 = vld [vmem:[%s19375_s11 + $0x70] sm:$0xff]  ;;  %v10152_v16 = vld [vmem:[%s19375_s11 + $0x60] sm:$0xff]  ;;  %v10151_v32 = vld [vmem:[%s19375_s11 + $0x58] sm:$0xff] }
 0x99c   :  { %9928 = vmatmul.mubr.f32.gmra.mxu0 %v18856_v14  ;;  %10012 = vmatprep.mubr.f32.mxu1 %v10579_v4  ;;  %v9398_v14 = vld [vmem:[%s19373_s9 + $0x618] sm:$0xff]  ;;  %v10600_v4 = vcombine.low %v9081_v44, %v9086_v1  ;;  %v9461_v54 = vcombine.low %v10553_v40, %v10554_v61  ;;  %v19832_v62 = vmov 0.0   ;;  %v10146_v52 = vld [vmem:[%s19375_s11 + $0x30] sm:$0xff] }
 0x99d   :  { %11721 = vmatprep.subr.mxu0 %v9400_v15  ;;  %9932 = vmatprep.mubr.f32.mxu0 %v10589_v23  ;;  %v8970_v11 = vpop.permute.xlu1 %8969  ;;  %v10591_v49 = vcombine.low %v9074_v19, %v9079_v20  ;;  %v10601_v24 = vcombine.low %v9082_v3, %v9087_v21  ;;  %v9422_v50 = vcombine.low %v10547_v33, %v10548_v36  ;;  %v10148_v19 = vld [vmem:[%s19375_s11 + $0x40] sm:$0xff]  ;;  %v10145_v20 = vld [vmem:[%s19375_s11 + $0x28] sm:$0xff]  ;;  %v10950_v3 = vpop.f32.mrf.mxu0 }
 0x99e   :  { %11722 = vmatpush3.msra.mxu0 %v9400_v15  ;;  %v9018_v31 = vsel %vm4007_vm13, %v8938_v59, %v8970_v11  ;;  %v10150_v15 = vld [vmem:[%s19375_s11 + $0x50] sm:$0xff]  ;;  %v10144_v23 = vld [vmem:[%s19375_s11 + $0x20] sm:$0xff] }
 0x99f   :  { %11723 = vmatprep.subr.mxu0 %v9399_v39  ;;  %10013 = vmatmul.mubr.f32.gmra.mxu1 %v10578_v47  ;;  %v9089_v57 = vrot.slane %v9018_v31, 1  ;;  %v10951_v28 = vpop.f32.mrf.mxu0 }
 0x9a0   :  { %11724 = vmatpush3.msra.mxu0 %v9399_v39  ;;  %10017 = vmatprep.mubr.f32.mxu1 %v10591_v49 }
 0x9a1   :  { %9933 = vmatmul.mubr.f32.gmra.mxu0 %v10588_v0  ;;  %11725 = vmatprep.subr.mxu0 %v9398_v14  ;;  %v8922_v46 = vpop.permute.xlu1 %8921  ;;  %v10603_v7 = vcombine.low %v9084_v5, %v9089_v57 }
 0x9a2   :  { %9937 = vmatprep.mubr.f32.mxu0 %v10601_v24  ;;  %11726 = vmatpush3.msra.mxu0 %v9398_v14  ;;  %v9010_v29 = vsel %vm4007_vm13, %v8898_v6, %v8922_v46  ;;  %v10149_v6 = vld [vmem:[%s19375_s11 + $0x48] sm:$0xff] }
 0x9a3   :  { %11727 = vmatprep.subr.mxu0 %v9397_v42  ;;  %10018 = vmatmul.mubr.f32.gmra.mxu1 %v10590_v30  ;;  %v9088_v59 = vrot.slane %v9010_v29, 1 }
 0x9a4   :  { %11728 = vmatpush3.msra.mxu0 %v9397_v42  ;;  %10022 = vmatprep.mubr.f32.mxu1 %v10603_v7 }
 0x9a5   :  { %v10602_v26 = vcombine.low %v9083_v9, %v9088_v59  ;;  %9938 = vmatmul.mubr.f32.gmra.mxu0 %v10600_v4  ;;  %11729 = vmatprep.subr.mxu0 %v9396_v38  ;;  %v10952_v59 = vadd.f32 %v10951_v28, %v10950_v3 }
 0x9a6   :  { %11730 = vmatpush3.msra.mxu0 %v9396_v38  ;;  %11733 = vmatprep.mubr.msk.f32.mxu0 %vm4007_vm13, %v9422_v50 }
 0x9a7   :  { %11731 = vmatprep.subr.mxu0 %v9395_v60  ;;  %10023 = vmatmul.mubr.f32.gmra.mxu1 %v10602_v26 }
 0x9a8   :  { %11732 = vmatpush3.msra.mxu0 %v9395_v60  ;;  %v10555_v60 = vld [vmem:[%s19374_s10] ss:$0 sm:$0xff]  ;;  %s11901_s10 = smov [#allocation8]  }
 0x9a9   :  { %11734 = vmatmul.mubr.msk.f32.vlgmr.msra.gmra.mxu0 %vm4007_vm13, %v9435_v37  ;;  %11739 = vmatprep.subr.mxu0 %v19832_v62  ;;  %v9585_v12 = vadd.f32 %v10952_v59, %v10555_v60  ;;  %s10250_s21 = sshll.u32 %s11901_s10, 4  ;;  %s10251_s21 = int_to_ptr.vmem [resolvable:$true] %s10250_s21 }
 0x9aa   :  { %11736 = vmatprep.mubr.msk.f32.mxu0 %vm4007_vm13, %v9448_v45  ;;  %11740 = vmatpush3.msra.mxu0 %v10155_v63  ;;  %s11848_s7 = scalar_lea.vmem %s10251_s21, 32  ;;  %p11853_p1 = scmp.lt.s32.totalorder %s10251_s21, %s10251_s21 }
 0x9ab   :  { %11741 = vmatprep.subr.mxu0 %v19832_v62  ;;  %p11849_p0 = scmp.ne.s32.totalorder %s10251_s21, %s11848_s7  ;;  %p11854_p2 = scmp.lt.s32.totalorder %s11848_s7, %s11848_s7 }
 0x9ac   :  { %11742 = vmatpush3.msra.mxu0 %v10154_v22 }
 0x9ad   :  { %11737 = vmatmul.mubr.msk.f32.gmra.mxu0 %vm4007_vm13, %v9461_v54  ;;  %11743 = vmatprep.subr.mxu0 %v19832_v62  ;;  %p11855_p3 = por %p11854_p2, %p11853_p1 }
 0x9ae   :  { %11744 = vmatpush3.msra.mxu0 %v10153_v56  ;;  %11771 = vmatprep.mubr.msk.f32.mxu0 %vm11900_vm5, %v19832_v62 }
 0x9af   :  { %11745 = vmatprep.subr.mxu0 %v19832_v62  ;;  %p11856_p4 = pnand %p11855_p3, %p11849_p0 }
 0x9b0   :  { %11746 = vmatpush3.msra.mxu0 %v10152_v16 }
 0x9b1   :  { %11747 = vmatprep.subr.mxu0 %v19832_v62 }
 0x9b2   :  { %11748 = vmatpush3.msra.mxu0 %v10151_v32 }
 0x9b3   :  { %11749 = vmatprep.subr.mxu0 %v19832_v62 }
 0x9b4   :  { %11750 = vmatpush3.msra.mxu0 %v10150_v15 }
 0x9b5   :  { %11751 = vmatprep.subr.mxu0 %v19832_v62 }
 0x9b6   :  { %11752 = vmatpush3.msra.mxu0 %v10149_v6 }
 0x9b7   :  { %11753 = vmatprep.subr.mxu0 %v19832_v62 }
 0x9b8   :  { %11754 = vmatpush3.msra.mxu0 %v10148_v19 }
 0x9b9   :  { %11755 = vmatprep.subr.mxu0 %v19832_v62 }
 0x9ba   :  { %11756 = vmatpush3.msra.mxu0 %v10147_v53 }
 0x9bb   :  { %11757 = vmatprep.subr.mxu0 %v19832_v62 }
 0x9bc   :  { %11758 = vmatpush3.msra.mxu0 %v10146_v52 }
 0x9bd   :  { %11759 = vmatprep.subr.mxu0 %v19832_v62 }
 0x9be   :  { %11760 = vmatpush3.msra.mxu0 %v10145_v20 }
 0x9bf   :  { %11761 = vmatprep.subr.mxu0 %v19832_v62 }
 0x9c0   :  { %11762 = vmatpush3.msra.mxu0 %v10144_v23 }
 0x9c1   :  { %11763 = vmatprep.subr.mxu0 %v19832_v62 }
 0x9c2   :  { %11764 = vmatpush3.msra.mxu0 %v10143_v43 }
 0x9c3   :  { %11765 = vmatprep.subr.mxu0 %v19832_v62 }
 0x9c4   :  { %11766 = vmatpush3.msra.mxu0 %v10142_v25 }
 0x9c5   :  { %11767 = vmatprep.subr.mxu0 %v19832_v62 }
 0x9c6   :  { %11768 = vmatpush3.msra.mxu0 %v10141_v35 }
 0x9c7   :  { %11769 = vmatprep.subr.mxu0 %v19832_v62 }
 0x9c8   :  { %11770 = vmatpush3.msra.mxu0 %v10140_v18 }
 0x9d2   :  { %v10994_v39 = vpop.f32.mrf.mxu1 }
 0x9d4   :  { %v10995_v27 = vpop.f32.mrf.mxu1 }
 0x9d5   :  { %v10996_v58 = vadd.f32 %v10995_v27, %v10994_v39 }
 0x9d7   :  { %v9670_v32 = vadd.f32 %v10996_v58, %v9585_v12 }
 0x9dd   :  { %v10953_v47 = vpop.f32.mrf.mxu0 }
 0x9df   :  { %v10954_v55 = vpop.f32.mrf.mxu0 }
 0x9e0   :  { %v10955_v33 = vadd.f32 %v10954_v55, %v10953_v47 }
 0x9e1   :  { %v10956_v49 = vpop.f32.mrf.mxu0 }
 0x9e2   :  { %v9590_v26 = vadd.f32 %v10955_v33, %v10555_v60 }
 0x9e3   :  { %v10957_v8 = vpop.f32.mrf.mxu0 }
 0x9e4   :  { %v10958_v45 = vadd.f32 %v10957_v8, %v10956_v49 }
 0x9e6   :  { %v9595_v43 = vadd.f32 %v10958_v45, %v10555_v60 }
 0x9f2   :  { %v10997_v11 = vpop.f32.mrf.mxu1 }
 0x9f4   :  { %v10998_v21 = vpop.f32.mrf.mxu1 }
 0x9f5   :  { %v10999_v34 = vadd.f32 %v10998_v21, %v10997_v11 }
 0x9f7   :  { %v9675_v63 = vadd.f32 %v10999_v34, %v9590_v26 }
 0xa16   :  { %v11000_v48 = vpop.f32.mrf.mxu1 }
 0xa18   :  { %v11001_v14 = vpop.f32.mrf.mxu1 }
 0xa19   :  { %v11002_v15 = vadd.f32 %v11001_v14, %v11000_v48 }
 0xa1b   :  { %v9680_v27 = vadd.f32 %v11002_v15, %v9595_v43 }
 0xa21   :  { %v10959_v31 = vpop.f32.mrf.mxu0 }
 0xa23   :  { %v10960_v10 = vpop.f32.mrf.mxu0 }
 0xa24   :  { %v10961_v40 = vadd.f32 %v10960_v10, %v10959_v31 }
 0xa25   :  { %v11038_v5 = vpop.f32.mrf.mxu0 }
 0xa26   :  { %v9600_v53 = vadd.f32 %v10961_v40, %v10555_v60 }
 0xa27   :  { %v11039_v57 = vpop.f32.mrf.mxu0 }
 0xa28   :  { %v11040_v54 = vadd.f32 %v11039_v57, %v11038_v5 }
 0xa29   :  { %v11041_v2 = vpop.f32.mrf.mxu0 }
 0xa2a   :  { %v9755_v25 = vadd.f32 %v11040_v54, %v9670_v32 }
 0xa2b   :  { %v11042_v42 = vpop.f32.mrf.mxu0 }
 0xa2c   :  { %v11043_v61 = vadd.f32 %v11042_v42, %v11041_v2 }
 0xa2d   :  { %v11044_v36 = vpop.f32.mrf.mxu0 }
 0xa2e   :  { %v9760_v52 = vadd.f32 %v11043_v61, %v9675_v63 }
 0xa2f   :  { %v11045_v30 = vpop.f32.mrf.mxu0 }
 0xa30   :  { %v11046_v35 = vadd.f32 %v11045_v30, %v11044_v36 }
 0xa32   :  { %v9765_v10 = vadd.f32 %v11046_v35, %v9680_v27 }
 0xa36   :  { %v11003_v0 = vpop.f32.mrf.mxu1 }
 0xa38   :  { %v11004_v44 = vpop.f32.mrf.mxu1 }
 0xa39   :  { %v11005_v22 = vadd.f32 %v11004_v44, %v11003_v0 }
 0xa3a   :  { %v11082_v41 = vpop.f32.mrf.mxu1 }
 0xa3b   :  { %v9685_v39 = vadd.f32 %v11005_v22, %v9600_v53 }
 0xa3c   :  { %v11083_v24 = vpop.f32.mrf.mxu1 }
 0xa3d   :  { %v11084_v6 = vadd.f32 %v11083_v24, %v11082_v41 }
 0xa3e   :  { %v11085_v17 = vpop.f32.mrf.mxu1 }
 0xa3f   :  { %v9840_v55 = vadd.f32 %v11084_v6, %v9755_v25 }
 0xa40   :  { %v11086_v1 = vpop.f32.mrf.mxu1 }
 0xa41   :  { %v11087_v56 = vadd.f32 %v11086_v1, %v11085_v17 }
 0xa42   :  { %v11088_v9 = vpop.f32.mrf.mxu1 }
 0xa43   :  { %v9845_v47 = vadd.f32 %v11087_v56, %v9760_v52 }
 0xa44   :  { %v11089_v7 = vpop.f32.mrf.mxu1 }
 0xa45   :  { %v11090_v11 = vadd.f32 %v11089_v7, %v11088_v9 }
 0xa47   :  { %v9850_v2 = vadd.f32 %v11090_v11, %v9765_v10 }
 0xa52   :  { %v11047_v46 = vpop.f32.mrf.mxu0 }
 0xa54   :  { %v11048_v29 = vpop.f32.mrf.mxu0 }
 0xa55   :  { %v11049_v20 = vadd.f32 %v11048_v29, %v11047_v46 }
 0xa56   :  { %v11091_v38 = vpop.f32.mrf.mxu1 }
 0xa57   :  { %v11126_v51 = vpop.f32.mrf.mxu0  ;;  %v9770_v8 = vadd.f32 %v11049_v20, %v9685_v39 }
 0xa58   :  { %v11092_v4 = vpop.f32.mrf.mxu1 }
 0xa59   :  { %v11127_v50 = vpop.f32.mrf.mxu0  ;;  %v11093_v48 = vadd.f32 %v11092_v4, %v11091_v38 }
 0xa5a   :  { %v11128_v18 = vadd.f32 %v11127_v50, %v11126_v51 }
 0xa5b   :  { %v11170_v37 = vpop.f32.mrf.mxu1  ;;  %v9855_v17 = vadd.f32 %v11093_v48, %v9770_v8 }
 0xa5c   :  { %v11129_v13 = vpop.f32.mrf.mxu0  ;;  %v9925_v0 = vadd.f32 %v11128_v18, %v9840_v55 }
 0xa5d   :  { %v11171_v62 = vpop.f32.mrf.mxu1 }
 0xa5e   :  { %v11130_v16 = vpop.f32.mrf.mxu0  ;;  %v11172_v5 = vadd.f32 %v11171_v62, %v11170_v37 }
 0xa5f   :  { %v11173_v19 = vpop.f32.mrf.mxu1  ;;  %v11131_v23 = vadd.f32 %v11130_v16, %v11129_v13 }
 0xa60   :  { %v10010_v46 = vadd.f32 %v11172_v5, %v9925_v0 }
 0xa61   :  { %v11132_v3 = vpop.f32.mrf.mxu0  ;;  %v11174_v28 = vpop.f32.mrf.mxu1  ;;  %v9930_v31 = vadd.f32 %v11131_v23, %v9845_v47 }
 0xa62   :  { %v11175_v14 = vadd.f32 %v11174_v28, %v11173_v19 }
 0xa63   :  { %v11133_v49 = vpop.f32.mrf.mxu0  ;;  %v11176_v21 = vpop.f32.mrf.mxu1 }
 0xa64   :  { %v11134_v44 = vadd.f32 %v11133_v49, %v11132_v3  ;;  %v10015_v1 = vadd.f32 %v11175_v14, %v9930_v31 }
 0xa65   :  { %v11135_v57 = vpop.f32.mrf.mxu0  ;;  %v11177_v41 = vpop.f32.mrf.mxu1 }
 0xa66   :  { %v9935_v30 = vadd.f32 %v11134_v44, %v9850_v2  ;;  %v11178_v29 = vadd.f32 %v11177_v41, %v11176_v21 }
 0xa67   :  { %v11136_v24 = vpop.f32.mrf.mxu0  ;;  %v11179_v42 = vpop.f32.mrf.mxu1 }
 0xa68   :  { %v11137_v36 = vadd.f32 %v11136_v24, %v11135_v57  ;;  %v10020_v26 = vadd.f32 %v11178_v29, %v9935_v30 }
 0xa69   :  { %v11735_v9 = vpop.f32.mrf.mxu0  ;;  %v11180_v7 = vpop.f32.mrf.mxu1 }
 0xa6a   :  { %v9940_v38 = vadd.f32 %v11137_v36, %v9855_v17  ;;  %v10100_v51 = vadd.f32 %v11735_v9, %v10015_v1  ;;  %v11181_v33 = vadd.f32 %v11180_v7, %v11179_v42 }
 0xa6b   :  { %v10094_v4 = vpop.f32.mrf.mxu0 }
 0xa6c   :  { %v10095_v59 = vadd.f32 %v10094_v4, %v10010_v46  ;;  %v10025_v50 = vadd.f32 %v11181_v33, %v9940_v38  ;;  %v10114_v34 = vmax.f32 %v10100_v51, 0.0 }
 0xa6d   :  { %v11738_v60 = vpop.f32.mrf.mxu0 }
 0xa6e   :  { %v10113_v58 = vmax.f32 %v10095_v59, 0.0  ;;  %v10110_v37 = vadd.f32 %v11738_v60, %v10025_v50 }
 0xa6f   :  { %v10104_v40 = vpop.f32.mrf.mxu0 }
 0xa70   :  { %v10117_v61 = vadd.f32 %v10114_v34, %v10113_v58  ;;  %v10116_v13 = vmax.f32 %v10110_v37, 0.0  ;;  %v10105_v12 = vadd.f32 %v10104_v40, %v10020_v26 }
 0xa72   :  { %v10118_v45 = vrot.slane %v10117_v61, 4  ;;  %v10115_v54 = vmax.f32 %v10105_v12, 0.0 }
 0xa74   :  { %v10119_v62 = vadd.f32 %v10118_v45, %v10117_v61  ;;  %v10124_v63 = vadd.f32 %v10116_v13, %v10115_v54 }
 0xa76   :  { %v10120_v22 = vrot.slane %v10119_v62, 2  ;;  %v10125_v56 = vrot.slane %v10124_v63, 4 }
 0xa78   :  { %v10121_v16 = vadd.f32 %v10120_v22, %v10119_v62  ;;  %v10126_v32 = vadd.f32 %v10125_v56, %v10124_v63 }
 0xa7a   :  { %v10122_v15 = vrot.slane %v10121_v16, 1  ;;  %v10127_v6 = vrot.slane %v10126_v32, 2 }
 0xa7c   :  { %v10128_v19 = vadd.f32 %v10127_v6, %v10126_v32  ;;  %v10123_v53 = vadd.f32 %v10122_v15, %v10121_v16 }
 0xa7e   :  { %v10129_v52 = vrot.slane %v10128_v19, 1  ;;  %v10132_v23 = vmul.f32 0.0625, %v10123_v53 }
 0xa80   :  { %v10130_v20 = vadd.f32 %v10129_v52, %v10128_v19 }
 0xa82   :  { %v10133_v43 = vmul.f32 0.0625, %v10130_v20 }
 0xa84   :  { %v10137_v25 = vsel %vm10136_vm6, %v10133_v43, %v10132_v23 }
 0xa85   :  { %11772 = vmatmul.mubr.f32.vlgmr.msra.gmra.mxu0 %v10137_v25  ;;  %10139 = vst [vmem:[#allocation8] sm:$0x3] %v10137_v25 }
 0xa86   :  { %11859 = shalt.err (!%p11856_p4)
}
 0xa87   :  { %10253 = dma.vmem_to_hbm [thread:$0]  %s10251_s21, 32, %s19378_s14, [#allocation9]   ;;  %v10608_v35 = vld [vmem:[%s19376_s12] ss:$0 sm:$0xff] }
 0xa88   :  { %s11902_s25 = smov [#allocation6]  }
 0xa89   :  { %s10240_s26 = sshll.u32 %s11902_s25, 4  ;;  %s10241_s26 = int_to_ptr.vmem [resolvable:$true] %s10240_s26 }
 0xa8a   :  { %s11868_s27 = scalar_lea.vmem %s10241_s26, 32  ;;  %p11873_p6 = scmp.lt.s32.totalorder %s10241_s26, %s10241_s26 }
 0xa8b   :  { %p11869_p5 = scmp.ne.s32.totalorder %s10241_s26, %s11868_s27  ;;  %p11874_p7 = scmp.lt.s32.totalorder %s11868_s27, %s11868_s27 }
 0xa8d   :  { %p11875_p8 = por %p11874_p7, %p11873_p6 }
 0xa8f   :  { %p11876_p9 = pnand %p11875_p8, %p11869_p5 }
 0xb45   :  { %v10229_v18 = vpop.f32.mrf.mxu0 }
 0xb46   :  { %v10230_v3 = vadd.f32 %v10608_v35, %v10229_v18 }
 0xb47   :  { %v11773_v28 = vpop.f32.mrf.mxu0 }
 0xb48   :  { %10233 = vst [vmem:[#allocation6] sm:$0x3] %v10230_v3 }
 0xb49   :  { %11879 = shalt.err (!%p11876_p9)
}
 0xb4a   :  { %10243 = dma.vmem_to_hbm [thread:$0]  %s10241_s26, 32, %s19377_s13, [#allocation7]  }
 0xb4b   :  { %11888 = dma.done.wait [#allocation7], 32  }
 0xb4c   :  { %11889 = vsyncadd [#allocation7], 4294967264 }
 0xb4d   :  { %11890 = dma.done.wait [#allocation9], 32  }
 0xb4e   :  { %11891 = vsyncadd [#allocation9], 4294967264 }
 0xb4f   :  { %10260 = vsyncpa [#allocation7], 1 }
 0xb50   :  { %10261 = vsyncpa [#allocation9], 1 }

</bundles_post_ra>
